<compile_context>
chip_gen: v5e
topology: v5e:2x2
jax: 0.10.0
libtpu: 0.0.40
codegen_flags: <defaults>
</compile_context>

<pallas_src>
import functools

import jax
import jax.numpy as jnp
from jax.experimental import pallas as pl
from jax.experimental.pallas import tpu as pltpu


def _qinco_decode_kernel(codes_ref, cb_ref, wcatT_ref, bcat_ref, wupT_ref,
                         wdownT_ref, mean_ref, std_ref, out_ref, *,
                         M, L, K, D, compute_dtype):
    """Grid = (B_tiles,). One invocation computes the full M-step decode for one batch tile;
    all weights/codebooks have constant block indices, so Pallas keeps them VMEM-resident."""
    tb = out_ref.shape[0]
    lane_iota = jax.lax.broadcasted_iota(jnp.int32, (tb, K), 1)   # hoisted out of the M loop

    xhat = jnp.zeros((tb, D), jnp.float32)
    for m in range(M):                                            # static unroll over steps
        # --- codeword gather: one-hot(codes) @ codebook_m on the MXU (exact) ---
        onehot = (codes_ref[:, m:m + 1] == lane_iota).astype(jnp.float32)      # (tb, K)
        cw = jnp.dot(onehot, cb_ref[m], preferred_element_type=jnp.float32)    # (tb, D)

        if m == 0:
            # codebook-only step: QINCoStep.forward is identity on the codeword
            xhat = xhat + cw
            continue

        # --- QConcat: z = zqs + Linear(concat([zqs, xhat])) ; single fused K=2*De dot ---
        cc = jnp.concatenate([cw, xhat], axis=-1).astype(compute_dtype)        # (tb, 2*De)
        z = cw + jnp.dot(cc, wcatT_ref[m],
                         preferred_element_type=jnp.float32) + bcat_ref[m]

        # --- L residual FFN blocks: x + down_proj(relu(up_proj(x))) ---
        for l in range(L):
            h = jnp.maximum(
                jnp.dot(z.astype(compute_dtype), wupT_ref[m, l],
                        preferred_element_type=jnp.float32), 0.0)
            z = z + jnp.dot(h.astype(compute_dtype), wdownT_ref[m, l],
                            preferred_element_type=jnp.float32)

        # residual around the whole step, then accumulate into xhat
        xhat = xhat + cw + z

    # final de-normalization: xhat * data_std + data_mean
    out_ref[...] = xhat * std_ref[0] + mean_ref[...]


def qinco_decode(codes_MB, codebooks_MKD, WcatT, bcat, WupT, WdownT,
                 data_mean, data_std, *, tb=256, compute_dtype=jnp.bfloat16):
    """codes_MB: (M,B) int32; codebooks: (M,K,D); WcatT: (M, De+D, De) pre-transposed;
    bcat: (M, De); WupT: (M,L,De,Dh); WdownT: (M,L,Dh,De)."""
    M, B = codes_MB.shape
    _, K, D = codebooks_MKD.shape
    _, L, De, Dh = WupT.shape
    assert De == D, "de=None in cfg -> in_proj/out_proj are Identity (De == D)"
    assert tb % 8 == 0

    # Pad batch up to a multiple of tb (padded rows use code 0, sliced off afterwards).
    B_pad = pl.cdiv(B, tb) * tb
    codes_BM = codes_MB.T.astype(jnp.int32)                      # (B, M): tb rows / M lanes
    if B_pad != B:
        codes_BM = jnp.pad(codes_BM, ((0, B_pad - B), (0, 0)))

    cb = codebooks_MKD.astype(jnp.float32)                       # gather kept exact in f32
    wcat_c = WcatT.astype(compute_dtype)                         # matmul weights in compute dtype
    wup_c = WupT.astype(compute_dtype)
    wdn_c = WdownT.astype(compute_dtype)
    bcat3 = bcat.reshape(M, 1, De).astype(jnp.float32)
    mean2 = data_mean.reshape(1, D).astype(jnp.float32)
    std1 = jnp.asarray([data_std], dtype=jnp.float32)

    kernel = functools.partial(_qinco_decode_kernel, M=M, L=L, K=K, D=D,
                               compute_dtype=compute_dtype)

    out = pl.pallas_call(
        kernel,
        out_shape=jax.ShapeDtypeStruct((B_pad, D), jnp.float32),
        grid_spec=pltpu.PrefetchScalarGridSpec(
            num_scalar_prefetch=0,
            grid=(B_pad // tb,),
            in_specs=[
                pl.BlockSpec((tb, M), lambda b: (b, 0)),                  # codes (per batch tile)
                pl.BlockSpec((M, K, D), lambda b: (0, 0, 0)),             # codebooks  (resident)
                pl.BlockSpec((M, De + D, De), lambda b: (0, 0, 0)),       # WcatT      (resident)
                pl.BlockSpec((M, 1, De), lambda b: (0, 0, 0)),            # bcat       (resident)
                pl.BlockSpec((M, L, De, Dh), lambda b: (0, 0, 0, 0)),     # WupT       (resident)
                pl.BlockSpec((M, L, Dh, De), lambda b: (0, 0, 0, 0)),     # WdownT     (resident)
                pl.BlockSpec((1, D), lambda b: (0, 0)),                   # data_mean
                pl.BlockSpec(memory_space=pltpu.MemorySpace.SMEM),        # data_std (scalar)
            ],
            out_specs=pl.BlockSpec((tb, D), lambda b: (b, 0)),
        ),
        # NOTE: for production sizes (large tb / large M*K*D), raise vmem_limit_bytes here and
        # re-derive tb per generation (v7x has 64 MiB VMEM vs 128 MiB on v5e/v6e).
        compiler_params=pltpu.CompilerParams(
            dimension_semantics=("parallel",)),
    )(codes_BM, cb, wcat_c, bcat3, wup_c, wdn_c, mean2, std1)

    return out[:B]


def qinco_decode_ref(codes_MB, codebooks_MKD, WcatT, bcat, WupT, WdownT,
                     data_mean, data_std):
    """Pure-JAX f32 reference mirroring the PyTorch decode semantics."""
    M, B = codes_MB.shape
    D = codebooks_MKD.shape[-1]
    L = WupT.shape[1]
    xhat = jnp.zeros((B, D), jnp.float32)
    for m in range(M):
        cw = codebooks_MKD[m][codes_MB[m]]
        if m == 0:
            delta = cw
        else:
            cc = jnp.concatenate([cw, xhat], axis=-1)
            z = cw + cc @ WcatT[m] + bcat[m]
            for l in range(L):
                h = jnp.maximum(z @ WupT[m, l], 0.0)
                z = z + h @ WdownT[m, l]
            delta = cw + z
        xhat = xhat + delta
    return xhat * data_std + data_mean


if __name__ == "__main__":
    # Small but lane-dense config consistent with QINCo.__init__: M steps, codebook size K,
    # dim D, embed dim De (= D since cfg.de=None), hidden dim Dh, L residual FFN blocks.
    M, K, D, De, Dh, L = 4, 256, 128, 128, 256, 2
    B, TB = 512, 256

    key = jax.random.PRNGKey(0)
    ks = jax.random.split(key, 8)

    codebooks = jax.random.normal(ks[0], (M, K, D), jnp.float32) * 0.1
    WcatT = jax.random.normal(ks[1], (M, De + D, De), jnp.float32) * 0.02
    bcat = jax.random.normal(ks[2], (M, De), jnp.float32) * 0.01
    WupT = jax.random.normal(ks[3], (M, L, De, Dh), jnp.float32) * (2.0 / De) ** 0.5
    WdownT = jax.random.normal(ks[4], (M, L, Dh, De), jnp.float32) * 0.02
    data_mean = jax.random.normal(ks[5], (D,), jnp.float32) * 0.1
    data_std = 1.5
    codes_MB = jax.random.randint(ks[6], (M, B), 0, K, dtype=jnp.int32)

    ref = qinco_decode_ref(codes_MB, codebooks, WcatT, bcat, WupT, WdownT,
                           data_mean, data_std)
    ref = jax.block_until_ready(ref)

    # f32 matmul path: tight semantic check against the reference.
    out_f32 = qinco_decode(codes_MB, codebooks, WcatT, bcat, WupT, WdownT,
                           data_mean, data_std, tb=TB, compute_dtype=jnp.float32)
    out_f32 = jax.block_until_ready(out_f32)
    assert out_f32.shape == (B, D) and out_f32.dtype == jnp.float32
    if not bool(jnp.allclose(out_f32, ref, atol=2e-2, rtol=2e-2)):
        raise AssertionError(
            f"f32 mismatch vs reference, max abs err = "
            f"{float(jnp.max(jnp.abs(out_f32 - ref)))}")

    # bf16 matmul path (v6e/v7x default): looser tolerance for the reduced-precision MXU dots.
    out_bf16 = qinco_decode(codes_MB, codebooks, WcatT, bcat, WupT, WdownT,
                            data_mean, data_std, tb=TB, compute_dtype=jnp.bfloat16)
    out_bf16 = jax.block_until_ready(out_bf16)
    assert out_bf16.shape == (B, D) and out_bf16.dtype == jnp.float32
    if not bool(jnp.allclose(out_bf16, ref, atol=5e-2, rtol=5e-2)):
        raise AssertionError(
            f"bf16 mismatch vs reference, max abs err = "
            f"{float(jnp.max(jnp.abs(out_bf16 - ref)))}")

    print("KERNEL_OK")
</pallas_src>

<mosaic_0001>
module attributes {stable_mosaic.version = 11 : i64} {
  func.func @_qinco_decode_kernel(%arg0: i32, %arg1: memref<256x4xi32, #tpu.memory_space<vmem>>, %arg2: memref<4x256x128xf32, #tpu.memory_space<vmem>>, %arg3: memref<4x256x128xf32, #tpu.memory_space<vmem>>, %arg4: memref<4x1x128xf32, #tpu.memory_space<vmem>>, %arg5: memref<4x2x128x256xf32, #tpu.memory_space<vmem>>, %arg6: memref<4x2x256x128xf32, #tpu.memory_space<vmem>>, %arg7: memref<1x128xf32, #tpu.memory_space<vmem>>, %arg8: memref<1xf32, #tpu.memory_space<smem>>, %arg9: memref<256x128xf32, #tpu.memory_space<vmem>>) attributes {dimension_semantics = [#tpu.dimension_semantics<parallel>], iteration_bounds = array<i64: 2>, scalar_prefetch = 0 : i64, scratch_operands = 0 : i64, tpu.core_type = #tpu.core_type<tc>, window_params = [{transform_indices = @transform_0, window_bounds = array<i64: 256, 4>}, {pipeline_mode = #tpu.pipeline_mode<synchronous>, transform_indices = @transform_1, window_bounds = array<i64: 4, 256, 128>}, {pipeline_mode = #tpu.pipeline_mode<synchronous>, transform_indices = @transform_2, window_bounds = array<i64: 4, 256, 128>}, {pipeline_mode = #tpu.pipeline_mode<synchronous>, transform_indices = @transform_3, window_bounds = array<i64: 4, 1, 128>}, {pipeline_mode = #tpu.pipeline_mode<synchronous>, transform_indices = @transform_4, window_bounds = array<i64: 4, 2, 128, 256>}, {pipeline_mode = #tpu.pipeline_mode<synchronous>, transform_indices = @transform_5, window_bounds = array<i64: 4, 2, 256, 128>}, {pipeline_mode = #tpu.pipeline_mode<synchronous>, transform_indices = @transform_6, window_bounds = array<i64: 1, 128>}, {transform_indices = @transform_7, window_bounds = array<i64: 1>}, {transform_indices = @transform_8, window_bounds = array<i64: 256, 128>}]} {
    %0 = tpu.iota {dimensions = array<i32: 1>} : vector<256x256xi32>
    %cst = arith.constant 0.000000e+00 : f32
    %1 = vector.broadcast %cst : f32 to vector<256x128xf32>
    %c0 = arith.constant 0 : index
    %c0_0 = arith.constant 0 : index
    %2 = vector.load %arg1[%c0, %c0_0] : memref<256x4xi32, #tpu.memory_space<vmem>>, vector<256x1xi32>
    %3 = vector.broadcast %2 : vector<256x1xi32> to vector<256x256xi32>
    %4 = arith.cmpi eq, %3, %0 : vector<256x256xi32>
    %5 = arith.extui %4 : vector<256x256xi1> to vector<256x256xi32>
    %6 = arith.sitofp %5 : vector<256x256xi32> to vector<256x256xf32>
    %c0_1 = arith.constant 0 : index
    %c0_2 = arith.constant 0 : index
    %c0_3 = arith.constant 0 : index
    %7 = vector.load %arg2[%c0_1, %c0_2, %c0_3] : memref<4x256x128xf32, #tpu.memory_space<vmem>>, vector<1x256x128xf32>
    %8 = vector.shape_cast %7 : vector<1x256x128xf32> to vector<256x128xf32>
    %cst_4 = arith.constant dense<0.000000e+00> : vector<256x128xf32>
    %9 = tpu.matmul %6, %8, %cst_4 {dimension_numbers = #tpu.dot_dimension_numbers<[1], [0], [0], [1], [0, 0, 1, 1], [], []>} : vector<256x256xf32>, vector<256x128xf32>, vector<256x128xf32> -> vector<256x128xf32>
    %10 = arith.addf %1, %9 : vector<256x128xf32>
    %c0_5 = arith.constant 0 : index
    %c1 = arith.constant 1 : index
    %11 = vector.load %arg1[%c0_5, %c1] : memref<256x4xi32, #tpu.memory_space<vmem>>, vector<256x1xi32>
    %12 = vector.broadcast %11 : vector<256x1xi32> to vector<256x256xi32>
    %13 = arith.cmpi eq, %12, %0 : vector<256x256xi32>
    %14 = arith.extui %13 : vector<256x256xi1> to vector<256x256xi32>
    %15 = arith.sitofp %14 : vector<256x256xi32> to vector<256x256xf32>
    %c1_6 = arith.constant 1 : index
    %c0_7 = arith.constant 0 : index
    %c0_8 = arith.constant 0 : index
    %16 = vector.load %arg2[%c1_6, %c0_7, %c0_8] : memref<4x256x128xf32, #tpu.memory_space<vmem>>, vector<1x256x128xf32>
    %17 = vector.shape_cast %16 : vector<1x256x128xf32> to vector<256x128xf32>
    %cst_9 = arith.constant dense<0.000000e+00> : vector<256x128xf32>
    %18 = tpu.matmul %15, %17, %cst_9 {dimension_numbers = #tpu.dot_dimension_numbers<[1], [0], [0], [1], [0, 0, 1, 1], [], []>} : vector<256x256xf32>, vector<256x128xf32>, vector<256x128xf32> -> vector<256x128xf32>
    %19 = tpu.concatenate %18, %10 in 1 : vector<256x128xf32>, vector<256x128xf32> -> vector<256x256xf32>
    %c1_10 = arith.constant 1 : index
    %c0_11 = arith.constant 0 : index
    %c0_12 = arith.constant 0 : index
    %20 = vector.load %arg3[%c1_10, %c0_11, %c0_12] : memref<4x256x128xf32, #tpu.memory_space<vmem>>, vector<1x256x128xf32>
    %21 = vector.shape_cast %20 : vector<1x256x128xf32> to vector<256x128xf32>
    %cst_13 = arith.constant dense<0.000000e+00> : vector<256x128xf32>
    %22 = tpu.matmul %19, %21, %cst_13 {dimension_numbers = #tpu.dot_dimension_numbers<[1], [0], [0], [1], [0, 0, 1, 1], [], []>} : vector<256x256xf32>, vector<256x128xf32>, vector<256x128xf32> -> vector<256x128xf32>
    %23 = arith.addf %18, %22 : vector<256x128xf32>
    %c1_14 = arith.constant 1 : index
    %c0_15 = arith.constant 0 : index
    %c0_16 = arith.constant 0 : index
    %24 = vector.load %arg4[%c1_14, %c0_15, %c0_16] : memref<4x1x128xf32, #tpu.memory_space<vmem>>, vector<1x1x128xf32>
    %25 = vector.shape_cast %24 : vector<1x1x128xf32> to vector<1x128xf32>
    %26 = vector.broadcast %25 : vector<1x128xf32> to vector<256x128xf32>
    %27 = arith.addf %23, %26 : vector<256x128xf32>
    %c1_17 = arith.constant 1 : index
    %c0_18 = arith.constant 0 : index
    %c0_19 = arith.constant 0 : index
    %c0_20 = arith.constant 0 : index
    %28 = vector.load %arg5[%c1_17, %c0_18, %c0_19, %c0_20] : memref<4x2x128x256xf32, #tpu.memory_space<vmem>>, vector<1x1x128x256xf32>
    %29 = vector.shape_cast %28 : vector<1x1x128x256xf32> to vector<128x256xf32>
    %cst_21 = arith.constant dense<0.000000e+00> : vector<256x256xf32>
    %30 = tpu.matmul %27, %29, %cst_21 {dimension_numbers = #tpu.dot_dimension_numbers<[1], [0], [0], [1], [0, 0, 1, 1], [], []>} : vector<256x128xf32>, vector<128x256xf32>, vector<256x256xf32> -> vector<256x256xf32>
    %cst_22 = arith.constant 0.000000e+00 : f32
    %31 = vector.broadcast %cst_22 : f32 to vector<256x256xf32>
    %32 = arith.maximumf %30, %31 : vector<256x256xf32>
    %c1_23 = arith.constant 1 : index
    %c0_24 = arith.constant 0 : index
    %c0_25 = arith.constant 0 : index
    %c0_26 = arith.constant 0 : index
    %33 = vector.load %arg6[%c1_23, %c0_24, %c0_25, %c0_26] : memref<4x2x256x128xf32, #tpu.memory_space<vmem>>, vector<1x1x256x128xf32>
    %34 = vector.shape_cast %33 : vector<1x1x256x128xf32> to vector<256x128xf32>
    %cst_27 = arith.constant dense<0.000000e+00> : vector<256x128xf32>
    %35 = tpu.matmul %32, %34, %cst_27 {dimension_numbers = #tpu.dot_dimension_numbers<[1], [0], [0], [1], [0, 0, 1, 1], [], []>} : vector<256x256xf32>, vector<256x128xf32>, vector<256x128xf32> -> vector<256x128xf32>
    %36 = arith.addf %27, %35 : vector<256x128xf32>
    %c1_28 = arith.constant 1 : index
    %c1_29 = arith.constant 1 : index
    %c0_30 = arith.constant 0 : index
    %c0_31 = arith.constant 0 : index
    %37 = vector.load %arg5[%c1_28, %c1_29, %c0_30, %c0_31] : memref<4x2x128x256xf32, #tpu.memory_space<vmem>>, vector<1x1x128x256xf32>
    %38 = vector.shape_cast %37 : vector<1x1x128x256xf32> to vector<128x256xf32>
    %cst_32 = arith.constant dense<0.000000e+00> : vector<256x256xf32>
    %39 = tpu.matmul %36, %38, %cst_32 {dimension_numbers = #tpu.dot_dimension_numbers<[1], [0], [0], [1], [0, 0, 1, 1], [], []>} : vector<256x128xf32>, vector<128x256xf32>, vector<256x256xf32> -> vector<256x256xf32>
    %cst_33 = arith.constant 0.000000e+00 : f32
    %40 = vector.broadcast %cst_33 : f32 to vector<256x256xf32>
    %41 = arith.maximumf %39, %40 : vector<256x256xf32>
    %c1_34 = arith.constant 1 : index
    %c1_35 = arith.constant 1 : index
    %c0_36 = arith.constant 0 : index
    %c0_37 = arith.constant 0 : index
    %42 = vector.load %arg6[%c1_34, %c1_35, %c0_36, %c0_37] : memref<4x2x256x128xf32, #tpu.memory_space<vmem>>, vector<1x1x256x128xf32>
    %43 = vector.shape_cast %42 : vector<1x1x256x128xf32> to vector<256x128xf32>
    %cst_38 = arith.constant dense<0.000000e+00> : vector<256x128xf32>
    %44 = tpu.matmul %41, %43, %cst_38 {dimension_numbers = #tpu.dot_dimension_numbers<[1], [0], [0], [1], [0, 0, 1, 1], [], []>} : vector<256x256xf32>, vector<256x128xf32>, vector<256x128xf32> -> vector<256x128xf32>
    %45 = arith.addf %36, %44 : vector<256x128xf32>
    %46 = arith.addf %10, %18 : vector<256x128xf32>
    %47 = arith.addf %46, %45 : vector<256x128xf32>
    %c0_39 = arith.constant 0 : index
    %c2 = arith.constant 2 : index
    %48 = vector.load %arg1[%c0_39, %c2] : memref<256x4xi32, #tpu.memory_space<vmem>>, vector<256x1xi32>
    %49 = vector.broadcast %48 : vector<256x1xi32> to vector<256x256xi32>
    %50 = arith.cmpi eq, %49, %0 : vector<256x256xi32>
    %51 = arith.extui %50 : vector<256x256xi1> to vector<256x256xi32>
    %52 = arith.sitofp %51 : vector<256x256xi32> to vector<256x256xf32>
    %c2_40 = arith.constant 2 : index
    %c0_41 = arith.constant 0 : index
    %c0_42 = arith.constant 0 : index
    %53 = vector.load %arg2[%c2_40, %c0_41, %c0_42] : memref<4x256x128xf32, #tpu.memory_space<vmem>>, vector<1x256x128xf32>
    %54 = vector.shape_cast %53 : vector<1x256x128xf32> to vector<256x128xf32>
    %cst_43 = arith.constant dense<0.000000e+00> : vector<256x128xf32>
    %55 = tpu.matmul %52, %54, %cst_43 {dimension_numbers = #tpu.dot_dimension_numbers<[1], [0], [0], [1], [0, 0, 1, 1], [], []>} : vector<256x256xf32>, vector<256x128xf32>, vector<256x128xf32> -> vector<256x128xf32>
    %56 = tpu.concatenate %55, %47 in 1 : vector<256x128xf32>, vector<256x128xf32> -> vector<256x256xf32>
    %c2_44 = arith.constant 2 : index
    %c0_45 = arith.constant 0 : index
    %c0_46 = arith.constant 0 : index
    %57 = vector.load %arg3[%c2_44, %c0_45, %c0_46] : memref<4x256x128xf32, #tpu.memory_space<vmem>>, vector<1x256x128xf32>
    %58 = vector.shape_cast %57 : vector<1x256x128xf32> to vector<256x128xf32>
    %cst_47 = arith.constant dense<0.000000e+00> : vector<256x128xf32>
    %59 = tpu.matmul %56, %58, %cst_47 {dimension_numbers = #tpu.dot_dimension_numbers<[1], [0], [0], [1], [0, 0, 1, 1], [], []>} : vector<256x256xf32>, vector<256x128xf32>, vector<256x128xf32> -> vector<256x128xf32>
    %60 = arith.addf %55, %59 : vector<256x128xf32>
    %c2_48 = arith.constant 2 : index
    %c0_49 = arith.constant 0 : index
    %c0_50 = arith.constant 0 : index
    %61 = vector.load %arg4[%c2_48, %c0_49, %c0_50] : memref<4x1x128xf32, #tpu.memory_space<vmem>>, vector<1x1x128xf32>
    %62 = vector.shape_cast %61 : vector<1x1x128xf32> to vector<1x128xf32>
    %63 = vector.broadcast %62 : vector<1x128xf32> to vector<256x128xf32>
    %64 = arith.addf %60, %63 : vector<256x128xf32>
    %c2_51 = arith.constant 2 : index
    %c0_52 = arith.constant 0 : index
    %c0_53 = arith.constant 0 : index
    %c0_54 = arith.constant 0 : index
    %65 = vector.load %arg5[%c2_51, %c0_52, %c0_53, %c0_54] : memref<4x2x128x256xf32, #tpu.memory_space<vmem>>, vector<1x1x128x256xf32>
    %66 = vector.shape_cast %65 : vector<1x1x128x256xf32> to vector<128x256xf32>
    %cst_55 = arith.constant dense<0.000000e+00> : vector<256x256xf32>
    %67 = tpu.matmul %64, %66, %cst_55 {dimension_numbers = #tpu.dot_dimension_numbers<[1], [0], [0], [1], [0, 0, 1, 1], [], []>} : vector<256x128xf32>, vector<128x256xf32>, vector<256x256xf32> -> vector<256x256xf32>
    %cst_56 = arith.constant 0.000000e+00 : f32
    %68 = vector.broadcast %cst_56 : f32 to vector<256x256xf32>
    %69 = arith.maximumf %67, %68 : vector<256x256xf32>
    %c2_57 = arith.constant 2 : index
    %c0_58 = arith.constant 0 : index
    %c0_59 = arith.constant 0 : index
    %c0_60 = arith.constant 0 : index
    %70 = vector.load %arg6[%c2_57, %c0_58, %c0_59, %c0_60] : memref<4x2x256x128xf32, #tpu.memory_space<vmem>>, vector<1x1x256x128xf32>
    %71 = vector.shape_cast %70 : vector<1x1x256x128xf32> to vector<256x128xf32>
    %cst_61 = arith.constant dense<0.000000e+00> : vector<256x128xf32>
    %72 = tpu.matmul %69, %71, %cst_61 {dimension_numbers = #tpu.dot_dimension_numbers<[1], [0], [0], [1], [0, 0, 1, 1], [], []>} : vector<256x256xf32>, vector<256x128xf32>, vector<256x128xf32> -> vector<256x128xf32>
    %73 = arith.addf %64, %72 : vector<256x128xf32>
    %c2_62 = arith.constant 2 : index
    %c1_63 = arith.constant 1 : index
    %c0_64 = arith.constant 0 : index
    %c0_65 = arith.constant 0 : index
    %74 = vector.load %arg5[%c2_62, %c1_63, %c0_64, %c0_65] : memref<4x2x128x256xf32, #tpu.memory_space<vmem>>, vector<1x1x128x256xf32>
    %75 = vector.shape_cast %74 : vector<1x1x128x256xf32> to vector<128x256xf32>
    %cst_66 = arith.constant dense<0.000000e+00> : vector<256x256xf32>
    %76 = tpu.matmul %73, %75, %cst_66 {dimension_numbers = #tpu.dot_dimension_numbers<[1], [0], [0], [1], [0, 0, 1, 1], [], []>} : vector<256x128xf32>, vector<128x256xf32>, vector<256x256xf32> -> vector<256x256xf32>
    %cst_67 = arith.constant 0.000000e+00 : f32
    %77 = vector.broadcast %cst_67 : f32 to vector<256x256xf32>
    %78 = arith.maximumf %76, %77 : vector<256x256xf32>
    %c2_68 = arith.constant 2 : index
    %c1_69 = arith.constant 1 : index
    %c0_70 = arith.constant 0 : index
    %c0_71 = arith.constant 0 : index
    %79 = vector.load %arg6[%c2_68, %c1_69, %c0_70, %c0_71] : memref<4x2x256x128xf32, #tpu.memory_space<vmem>>, vector<1x1x256x128xf32>
    %80 = vector.shape_cast %79 : vector<1x1x256x128xf32> to vector<256x128xf32>
    %cst_72 = arith.constant dense<0.000000e+00> : vector<256x128xf32>
    %81 = tpu.matmul %78, %80, %cst_72 {dimension_numbers = #tpu.dot_dimension_numbers<[1], [0], [0], [1], [0, 0, 1, 1], [], []>} : vector<256x256xf32>, vector<256x128xf32>, vector<256x128xf32> -> vector<256x128xf32>
    %82 = arith.addf %73, %81 : vector<256x128xf32>
    %83 = arith.addf %47, %55 : vector<256x128xf32>
    %84 = arith.addf %83, %82 : vector<256x128xf32>
    %c0_73 = arith.constant 0 : index
    %c3 = arith.constant 3 : index
    %85 = vector.load %arg1[%c0_73, %c3] : memref<256x4xi32, #tpu.memory_space<vmem>>, vector<256x1xi32>
    %86 = vector.broadcast %85 : vector<256x1xi32> to vector<256x256xi32>
    %87 = arith.cmpi eq, %86, %0 : vector<256x256xi32>
    %88 = arith.extui %87 : vector<256x256xi1> to vector<256x256xi32>
    %89 = arith.sitofp %88 : vector<256x256xi32> to vector<256x256xf32>
    %c3_74 = arith.constant 3 : index
    %c0_75 = arith.constant 0 : index
    %c0_76 = arith.constant 0 : index
    %90 = vector.load %arg2[%c3_74, %c0_75, %c0_76] : memref<4x256x128xf32, #tpu.memory_space<vmem>>, vector<1x256x128xf32>
    %91 = vector.shape_cast %90 : vector<1x256x128xf32> to vector<256x128xf32>
    %cst_77 = arith.constant dense<0.000000e+00> : vector<256x128xf32>
    %92 = tpu.matmul %89, %91, %cst_77 {dimension_numbers = #tpu.dot_dimension_numbers<[1], [0], [0], [1], [0, 0, 1, 1], [], []>} : vector<256x256xf32>, vector<256x128xf32>, vector<256x128xf32> -> vector<256x128xf32>
    %93 = tpu.concatenate %92, %84 in 1 : vector<256x128xf32>, vector<256x128xf32> -> vector<256x256xf32>
    %c3_78 = arith.constant 3 : index
    %c0_79 = arith.constant 0 : index
    %c0_80 = arith.constant 0 : index
    %94 = vector.load %arg3[%c3_78, %c0_79, %c0_80] : memref<4x256x128xf32, #tpu.memory_space<vmem>>, vector<1x256x128xf32>
    %95 = vector.shape_cast %94 : vector<1x256x128xf32> to vector<256x128xf32>
    %cst_81 = arith.constant dense<0.000000e+00> : vector<256x128xf32>
    %96 = tpu.matmul %93, %95, %cst_81 {dimension_numbers = #tpu.dot_dimension_numbers<[1], [0], [0], [1], [0, 0, 1, 1], [], []>} : vector<256x256xf32>, vector<256x128xf32>, vector<256x128xf32> -> vector<256x128xf32>
    %97 = arith.addf %92, %96 : vector<256x128xf32>
    %c3_82 = arith.constant 3 : index
    %c0_83 = arith.constant 0 : index
    %c0_84 = arith.constant 0 : index
    %98 = vector.load %arg4[%c3_82, %c0_83, %c0_84] : memref<4x1x128xf32, #tpu.memory_space<vmem>>, vector<1x1x128xf32>
    %99 = vector.shape_cast %98 : vector<1x1x128xf32> to vector<1x128xf32>
    %100 = vector.broadcast %99 : vector<1x128xf32> to vector<256x128xf32>
    %101 = arith.addf %97, %100 : vector<256x128xf32>
    %c3_85 = arith.constant 3 : index
    %c0_86 = arith.constant 0 : index
    %c0_87 = arith.constant 0 : index
    %c0_88 = arith.constant 0 : index
    %102 = vector.load %arg5[%c3_85, %c0_86, %c0_87, %c0_88] : memref<4x2x128x256xf32, #tpu.memory_space<vmem>>, vector<1x1x128x256xf32>
    %103 = vector.shape_cast %102 : vector<1x1x128x256xf32> to vector<128x256xf32>
    %cst_89 = arith.constant dense<0.000000e+00> : vector<256x256xf32>
    %104 = tpu.matmul %101, %103, %cst_89 {dimension_numbers = #tpu.dot_dimension_numbers<[1], [0], [0], [1], [0, 0, 1, 1], [], []>} : vector<256x128xf32>, vector<128x256xf32>, vector<256x256xf32> -> vector<256x256xf32>
    %cst_90 = arith.constant 0.000000e+00 : f32
    %105 = vector.broadcast %cst_90 : f32 to vector<256x256xf32>
    %106 = arith.maximumf %104, %105 : vector<256x256xf32>
    %c3_91 = arith.constant 3 : index
    %c0_92 = arith.constant 0 : index
    %c0_93 = arith.constant 0 : index
    %c0_94 = arith.constant 0 : index
    %107 = vector.load %arg6[%c3_91, %c0_92, %c0_93, %c0_94] : memref<4x2x256x128xf32, #tpu.memory_space<vmem>>, vector<1x1x256x128xf32>
    %108 = vector.shape_cast %107 : vector<1x1x256x128xf32> to vector<256x128xf32>
    %cst_95 = arith.constant dense<0.000000e+00> : vector<256x128xf32>
    %109 = tpu.matmul %106, %108, %cst_95 {dimension_numbers = #tpu.dot_dimension_numbers<[1], [0], [0], [1], [0, 0, 1, 1], [], []>} : vector<256x256xf32>, vector<256x128xf32>, vector<256x128xf32> -> vector<256x128xf32>
    %110 = arith.addf %101, %109 : vector<256x128xf32>
    %c3_96 = arith.constant 3 : index
    %c1_97 = arith.constant 1 : index
    %c0_98 = arith.constant 0 : index
    %c0_99 = arith.constant 0 : index
    %111 = vector.load %arg5[%c3_96, %c1_97, %c0_98, %c0_99] : memref<4x2x128x256xf32, #tpu.memory_space<vmem>>, vector<1x1x128x256xf32>
    %112 = vector.shape_cast %111 : vector<1x1x128x256xf32> to vector<128x256xf32>
    %cst_100 = arith.constant dense<0.000000e+00> : vector<256x256xf32>
    %113 = tpu.matmul %110, %112, %cst_100 {dimension_numbers = #tpu.dot_dimension_numbers<[1], [0], [0], [1], [0, 0, 1, 1], [], []>} : vector<256x128xf32>, vector<128x256xf32>, vector<256x256xf32> -> vector<256x256xf32>
    %cst_101 = arith.constant 0.000000e+00 : f32
    %114 = vector.broadcast %cst_101 : f32 to vector<256x256xf32>
    %115 = arith.maximumf %113, %114 : vector<256x256xf32>
    %c3_102 = arith.constant 3 : index
    %c1_103 = arith.constant 1 : index
    %c0_104 = arith.constant 0 : index
    %c0_105 = arith.constant 0 : index
    %116 = vector.load %arg6[%c3_102, %c1_103, %c0_104, %c0_105] : memref<4x2x256x128xf32, #tpu.memory_space<vmem>>, vector<1x1x256x128xf32>
    %117 = vector.shape_cast %116 : vector<1x1x256x128xf32> to vector<256x128xf32>
    %cst_106 = arith.constant dense<0.000000e+00> : vector<256x128xf32>
    %118 = tpu.matmul %115, %117, %cst_106 {dimension_numbers = #tpu.dot_dimension_numbers<[1], [0], [0], [1], [0, 0, 1, 1], [], []>} : vector<256x256xf32>, vector<256x128xf32>, vector<256x128xf32> -> vector<256x128xf32>
    %119 = arith.addf %110, %118 : vector<256x128xf32>
    %120 = arith.addf %84, %92 : vector<256x128xf32>
    %121 = arith.addf %120, %119 : vector<256x128xf32>
    %c0_107 = arith.constant 0 : index
    %122 = memref.load %arg8[%c0_107] : memref<1xf32, #tpu.memory_space<smem>>
    %123 = vector.broadcast %122 : f32 to vector<256x128xf32>
    %124 = arith.mulf %121, %123 : vector<256x128xf32>
    %c0_108 = arith.constant 0 : index
    %c0_109 = arith.constant 0 : index
    %125 = vector.load %arg7[%c0_108, %c0_109] : memref<1x128xf32, #tpu.memory_space<vmem>>, vector<1x128xf32>
    %126 = vector.broadcast %125 : vector<1x128xf32> to vector<256x128xf32>
    %127 = arith.addf %124, %126 : vector<256x128xf32>
    %c0_110 = arith.constant 0 : index
    %c0_111 = arith.constant 0 : index
    %128 = vector.load %arg9[%c0_110, %c0_111] : memref<256x128xf32, #tpu.memory_space<vmem>>, vector<256x128xf32>
    tpu.vector_store %arg9[%c0_110, %c0_111], %127 {strides = array<i32>} : memref<256x128xf32, #tpu.memory_space<vmem>>, vector<256x128xf32>,
    return
  }
  func.func @transform_0(%arg0: i32) -> (i32, i32) {
    %c0_i32 = arith.constant 0 : i32
    %c0_i32_0 = arith.constant 0 : i32
    return %arg0, %c0_i32 : i32, i32
  }
  func.func @transform_1(%arg0: i32) -> (i32, i32, i32) {
    %c0_i32 = arith.constant 0 : i32
    %c0_i32_0 = arith.constant 0 : i32
    %c0_i32_1 = arith.constant 0 : i32
    %c0_i32_2 = arith.constant 0 : i32
    return %c0_i32, %c0_i32_0, %c0_i32_1 : i32, i32, i32
  }
  func.func @transform_2(%arg0: i32) -> (i32, i32, i32) {
    %c0_i32 = arith.constant 0 : i32
    %c0_i32_0 = arith.constant 0 : i32
    %c0_i32_1 = arith.constant 0 : i32
    %c0_i32_2 = arith.constant 0 : i32
    return %c0_i32, %c0_i32_0, %c0_i32_1 : i32, i32, i32
  }
  func.func @transform_3(%arg0: i32) -> (i32, i32, i32) {
    %c0_i32 = arith.constant 0 : i32
    %c0_i32_0 = arith.constant 0 : i32
    %c0_i32_1 = arith.constant 0 : i32
    %c0_i32_2 = arith.constant 0 : i32
    return %c0_i32, %c0_i32_0, %c0_i32_1 : i32, i32, i32
  }
  func.func @transform_4(%arg0: i32) -> (i32, i32, i32, i32) {
    %c0_i32 = arith.constant 0 : i32
    %c0_i32_0 = arith.constant 0 : i32
    %c0_i32_1 = arith.constant 0 : i32
    %c0_i32_2 = arith.constant 0 : i32
    %c0_i32_3 = arith.constant 0 : i32
    return %c0_i32, %c0_i32_0, %c0_i32_1, %c0_i32_2 : i32, i32, i32, i32
  }
  func.func @transform_5(%arg0: i32) -> (i32, i32, i32, i32) {
    %c0_i32 = arith.constant 0 : i32
    %c0_i32_0 = arith.constant 0 : i32
    %c0_i32_1 = arith.constant 0 : i32
    %c0_i32_2 = arith.constant 0 : i32
    %c0_i32_3 = arith.constant 0 : i32
    return %c0_i32, %c0_i32_0, %c0_i32_1, %c0_i32_2 : i32, i32, i32, i32
  }
  func.func @transform_6(%arg0: i32) -> (i32, i32) {
    %c0_i32 = arith.constant 0 : i32
    %c0_i32_0 = arith.constant 0 : i32
    %c0_i32_1 = arith.constant 0 : i32
    return %c0_i32, %c0_i32_0 : i32, i32
  }
  func.func @transform_7(%arg0: i32) -> i32 {
    %c0_i32 = arith.constant 0 : i32
    %c0_i32_0 = arith.constant 0 : i32
    return %c0_i32 : i32
  }
  func.func @transform_8(%arg0: i32) -> (i32, i32) {
    %c0_i32 = arith.constant 0 : i32
    %c0_i32_0 = arith.constant 0 : i32
    return %arg0, %c0_i32 : i32, i32
  }
}

</mosaic_0001>

<bundles_post_ra>
// kernel: tpu_custom_call.1
= control target key start
LH: loop header
LB: loop body
LE: loop exit
PB: predicated region body
PF: predicated region fallthrough
CT: control target
= control target key end

     0   :  { %s12105_s0 = inlined_call_operand.vmem [shape: s32[512,4], index: 0, kind: input, shape index: {}]   ;;  %s12106_s1 = inlined_call_operand.hbm [shape: f32[4,256,128], index: 1, kind: input, shape index: {}]   ;;  %s12107_s2 = inlined_call_operand.hbm [shape: f32[4,256,128], index: 2, kind: input, shape index: {}]   ;;  %s12108_s3 = inlined_call_operand.vmem [shape: f32[4,1,128], index: 3, kind: input, shape index: {}]   ;;  %s12109_s4 = inlined_call_operand.hbm [shape: f32[4,2,128,256], index: 4, kind: input, shape index: {}]   ;;  %s12110_s5 = inlined_call_operand.hbm [shape: f32[4,2,256,128], index: 5, kind: input, shape index: {}]   ;;  %s12111_s6 = inlined_call_operand.vmem [shape: f32[1,128], index: 6, kind: input, shape index: {}]   ;;  %s12112_s7 = inlined_call_operand.<no memory space> [shape: f32[1], index: 7, kind: input, shape index: {}]   ;;  %s12113_s8 = inlined_call_operand.hbm [shape: f32[512,128], index: 8, kind: output, shape index: {}]  }
   0x1   :  { %12311 = sst [smem:[#allocation103_spill]] %s12106_s1 }
   0x2   :  { %12312 = sst [smem:[#allocation104_spill]] %s12107_s2 }
   0x3   :  { %13 = sst [smem:[#allocation2]] %s12112_s7 }
   0x4   :  { %14 = vsyncpa [#allocation4], 0 }
   0x5   :  { %15 = vsyncpa [#allocation7], 0 }
   0x6   :  { %16 = vsyncpa [#allocation10], 0 }
   0x7   :  { %17 = vsyncpa [#allocation5], 0 }
   0x8   :  { %19 = vsyncpa [#allocation5 + $0x1], 0  ;;  %s8696_s29 = smov 0   ;;  %s8698_s30 = smov 0  }
   0x9   :  { %s8700_s9 = smov 0   ;;  %s8702_s10 = smov 0  }
   0xa LB: > { %12313 = sst [smem:[#allocation16_spill]] %s8627_s9  ;;  %s8717_s7 = sadd.s32 4294967295, %s8631_s10   ;;  %s8631_s10 = sphi %s8702_s10, %s12740_s10   ;;  %s8627_s9 = sphi %s8700_s9, %s12739_s9   ;;  %s8623_s30 = sphi %s8698_s30, %s12738_s30   ;;  %s8619_s29 = sphi %s8696_s29, %s12737_s29  }
   0xb   : > { %s7678_s11 = sadd.s32 4294967294, %s8631_s10   ;;  %s8721_s12 = sadd.s32 1, %s8631_s10  }
   0xc   : > { %s205_s13 = sadd.s32 1, %s8627_s9  ;;  %s202_s14 = ssub.s32 %s8631_s10, %s8721_s12 }
   0xd   : > { %p215_p0 = scmp.ne.s32.totalorder %s8627_s9, %s8623_s30  ;;  %p203_p1 = scmp.eq.s32.totalorder %s202_s14, 0 }
   0xe   : > { %p216_p2 = scmp.eq.s32.totalorder %s8717_s7, 1  ;;  %p221_p3 = scmp.ne.s32.totalorder %s8623_s30, %s8619_s29 }
   0xf   : > { %p222_p4 = scmp.eq.s32.totalorder %s7678_s11, 1  ;;  %p7679_p7 = scmp.ge.s32.totalorder %s8631_s10, 1 }
  0x10   : > { %s8732_s15 = scalar_select %p203_p1, %s8627_s9, %s205_s13  }
  0x11   : > { %p8734_p5 = por %p216_p2, %p215_p0  ;;  %p8738_p6 = por %p222_p4, %p221_p3 }
  0x12   : > { %12314 = sst [smem:[#allocation17_spill]] %s8732_s15  ;;  %p229_p8 = scmp.lt.s32.totalorder %s8631_s10, 3 }
  0x13   : > { %p8281_p9 = scmp.eq.s32.totalorder %s8717_s7, 0  ;;  %s12318_s2 = sld [smem:[#allocation104_spill]] }
  0x14   : > { %p8745_p10 = pnand %p7679_p7, %p229_p8  ;;  %s12319_s1 = sld [smem:[#allocation103_spill]] }
  0x15   : > { %s8633_s26 = smov [#allocation6]   ;;  %s8634_s28 = smov 128  }
  0x16   : > { %p8264_p11 = pneg %p8745_p10  ;;  %s256_s27 = sshll.u32 %s8633_s26, 4  ;;  %s257_s27 = int_to_ptr.vmem [resolvable:$true] %s256_s27 }
  0x17   : > { %s8635_s11 = smov 8   ;;  %s8636_s13 = smov [#allocation3]  }
  0x18   : > { %p8759_p12 = pnand %p8281_p9, %p8264_p11  ;;  %s242_s14 = sshll.u32 %s8636_s13, 4  ;;  %s243_s14 = int_to_ptr.vmem [resolvable:$true] %s242_s14 }
  0x19   : > { %s254_s21 = sshll.u32 %s12318_s2, 4  ;;  %s271_s22 = sshll.u32 %s12109_s4, 4  ;;  %s255_s21 = int_to_ptr.hbm [resolvable:$true] %s254_s21  ;;  %s272_s22 = int_to_ptr.hbm [resolvable:$true] %s271_s22 }
  0x1a   : > { %s240_s24 = sshll.u32 %s12319_s1, 4  ;;  %s8637_s23 = smov [#allocation8]   ;;  %s241_s24 = int_to_ptr.hbm [resolvable:$true] %s240_s24 }
  0x1b   : > { %8270 = dma.hbm_to_vmem [thread:$0]  (!%p8759_p12), %s255_s21, 16384, %s257_s27, [#allocation7], %s8634_s28, %s8634_s28, %s8635_s11  }
  0x1c   : > { %8267 = dma.hbm_to_vmem [thread:$0]  (!%p8759_p12), %s241_s24, 16384, %s243_s14, [#allocation4], %s8634_s28, %s8634_s28, %s8635_s11  }
  0x1d   : > { %s273_s26 = sshll.u32 %s8637_s23, 4  ;;  %s285_s15 = sshll.u32 %s12110_s5, 4  ;;  %s274_s26 = int_to_ptr.vmem [resolvable:$true] %s273_s26  ;;  %s286_s15 = int_to_ptr.hbm [resolvable:$true] %s285_s15 }
  0x1e   : > { %s8638_s9 = smov 256   ;;  %s8639_s21 = smov 16  }
  0x1f   : > { %8273 = dma.hbm_to_vmem [thread:$0]  (!%p8759_p12), %s272_s22, 32768, %s274_s26, [#allocation7], %s8638_s9, %s8638_s9, %s8639_s21  }
  0x20   : > { %s8640_s27 = smov [#allocation9]   ;;  %318 = sbr.rel (%p8745_p10) target bundleno = 2927 (0xb6f), region = 52 }
  0x21   : > { %s287_s13 = sshll.u32 %s8640_s27, 4  ;;  %s288_s13 = int_to_ptr.vmem [resolvable:$true] %s287_s13 }
  0x22   : > { %8276 = dma.hbm_to_vmem [thread:$0]  (!%p8759_p12), %s286_s15, 32768, %s288_s13, [#allocation10], %s8634_s28, %s8634_s28, %s8635_s11  }
  0x25   : > { %8602 = dma.done.wait (%p8281_p9), [#allocation4], 16384  }
  0x26   : > { %8604 = vsyncadd (%p8281_p9), [#allocation4], 4294950912 }
  0x27   : > { %8606 = dma.done.wait (%p8281_p9), [#allocation7], 49152  }
  0x28   : > { %8608 = vsyncadd (%p8281_p9), [#allocation7], 4294918144 }
  0x29   : > { %8610 = dma.done.wait (%p8281_p9), [#allocation10], 32768  }
  0x2a   : > { %8612 = vsyncadd (%p8281_p9), [#allocation10], 4294934528  ;;  %s7691_s1 = sshll.u32 %s8717_s7, 5  ;;  %v8641_v0 = vmov 0   ;;  %v8642_v18 = vmov 1   ;;  %v713_v19 = vld [vmem:[#allocation3 + $0x78] sm:$0xff] }
  0x2b   : > { %8338 = vset.pattern.permute.xlu1 %v8641_v0  ;;  %8337 = vset.pattern.permute.xlu0 %v8641_v0  ;;  %p369_p13 = scmp.lt.s32.totalorder %s7691_s1, 63  ;;  %v729_v20 = vld [vmem:[#allocation3 + $0xf8] sm:$0xff]  ;;  %v712_v21 = vld [vmem:[#allocation3 + $0x70] sm:$0xff]  ;;  %v711_v23 = vld [vmem:[#allocation3 + $0x68] sm:$0xff]  ;;  %s7457_s21 = sld [smem:[#allocation2]] }
  0x2c   : > { %8339 = vset.pattern.permute.xlu2 %v8641_v0  ;;  %8214 = vmatpush.msra.mxu2 %v713_v19  ;;  %v728_v22 = vld [vmem:[#allocation3 + $0xf0] sm:$0xff]  ;;  %v727_v25 = vld [vmem:[#allocation3 + $0xe8] sm:$0xff]  ;;  %v710_v27 = vld [vmem:[#allocation3 + $0x60] sm:$0xff]  ;;  %s365_s27 = sand.u32 1, %s8623_s30   ;;  %s8213_s15 = sshll.u32 %s8717_s7, 8 }
  0x2d   : > { %s12742_s1 = smov (!%p369_p13, %s7691_s1), 63  ;;  %8230 = vmatpush.msra.mxu3 %v729_v20  ;;  %730 = vmatpush.msra.mxu0 %v713_v19  ;;  %v726_v28 = vld [vmem:[#allocation3 + $0xe0] sm:$0xff]  ;;  %v709_v29 = vld [vmem:[#allocation3 + $0x58] sm:$0xff]  ;;  %v708_v31 = vld [vmem:[#allocation3 + $0x50] sm:$0xff]  ;;  %s7690_s13 = sshll.u32 %s365_s27, 8 }
  0x2e   : > { %s7692_s2 = sshll.u32 %s12742_s1, 3  ;;  %843 = vmatpush.msra.mxu1 %v729_v20  ;;  %8215 = vmatpush.msra.mxu2 %v712_v21  ;;  %v725_v30 = vld [vmem:[#allocation3 + $0xd8] sm:$0xff]  ;;  %v724_v33 = vld [vmem:[#allocation3 + $0xd0] sm:$0xff]  ;;  %v707_v34 = vld [vmem:[#allocation3 + $0x48] sm:$0xff]  ;;  %s11884_s9 = scalar_lea.vmem [#allocation11], %s7690_s13 }
  0x2f   : > { %s8798_s18 = scalar_lea.vmem %s12105_s0, %s7692_s2  ;;  %8231 = vmatpush.msra.mxu3 %v728_v22  ;;  %731 = vmatpush.msra.mxu0 %v712_v21  ;;  %v723_v35 = vld [vmem:[#allocation3 + $0xc8] sm:$0xff]  ;;  %v706_v36 = vld [vmem:[#allocation3 + $0x40] sm:$0xff]  ;;  %v705_v38 = vld [vmem:[#allocation3 + $0x38] sm:$0xff]  ;;  %s7571_s25 = scalar_lea.hbm %s12113_s8, %s8213_s15 }
  0x30   : > { %v8801_v1 = vld [vmem:[%s8798_s18 + $0x90] sm:$0xff]  ;;  %v8804_v2 = vld [vmem:[%s8798_s18 + $0x80] sm:$0xff]  ;;  %v8813_v4 = vld [vmem:[%s8798_s18 + $0x98] sm:$0xff]  ;;  %844 = vmatpush.msra.mxu1 %v728_v22  ;;  %8216 = vmatpush.msra.mxu2 %v711_v23  ;;  %s7572_s7 = sshll.u32 %s11884_s9, 4  ;;  %s7574_s28 = sshll.u32 %s7571_s25, 4  ;;  %s7573_s7 = int_to_ptr.vmem [resolvable:$true] %s7572_s7  ;;  %s7575_s28 = int_to_ptr.hbm [resolvable:$true] %s7574_s28 }
  0x31   : > { %465 = vperm.xlu1 %8338, %v8801_v1   ;;  %459 = vperm.xlu0 %8337, %v8804_v2   ;;  %v8809_v3 = vld [vmem:[%s8798_s18 + $0xa0] sm:$0xff]  ;;  %v8816_v5 = vld [vmem:[%s8798_s18 + $0x88] sm:$0xff]  ;;  %v8825_v7 = vld [vmem:[%s8798_s18 + $0xb8] sm:$0xff]  ;;  %s7560_s11 = scalar_lea.sflag [#allocation5], %s365_s27  ;;  %s8571_s14 = sshra.s32 %s7575_s28, 4  ;;  %s8572_s14 = int_to_ptr.hbm [resolvable:$true] %s8571_s14 }
  0x32   : > { %471 = vperm.xlu2 %8339, %v8809_v3   ;;  %v8819_v6 = vld [vmem:[%s8798_s18 + $0xa8] sm:$0xff]  ;;  %v8828_v8 = vld [vmem:[%s8798_s18 + $0xb0] sm:$0xff]  ;;  %v8831_v9 = vld [vmem:[%s8798_s18 + $0xc0] sm:$0xff]  ;;  %8232 = vmatpush.msra.mxu3 %v727_v25  ;;  %s8573_s19 = scalar_lea.hbm %s8572_s14, 256  ;;  %s8577_s23 = scalar_lea.hbm %s12113_s8, 512 }
  0x33   : > { %v8837_v10 = vld [vmem:[%s8798_s18 + $0xd0] sm:$0xff]  ;;  %v8840_v11 = vld [vmem:[%s8798_s18 + $0xc8] sm:$0xff]  ;;  %v8843_v12 = vld [vmem:[%s8798_s18 + $0xd8] sm:$0xff]  ;;  %732 = vmatpush.msra.mxu0 %v711_v23  ;;  %845 = vmatpush.msra.mxu1 %v727_v25  ;;  %v375_v23 = vlaneseq  ;;  %p8574_p0 = scmp.ne.s32.totalorder %s8572_s14, %s8573_s19  ;;  %p8578_p3 = scmp.lt.s32.totalorder %s8572_s14, %s12113_s8 }
  0x34   : > { %v8849_v13 = vld [vmem:[%s8798_s18 + $0xe8] sm:$0xff]  ;;  %v8852_v14 = vld [vmem:[%s8798_s18 + $0xe0] sm:$0xff]  ;;  %v8855_v15 = vld [vmem:[%s8798_s18 + $0xf0] sm:$0xff]  ;;  %8217 = vmatpush.msra.mxu2 %v710_v27  ;;  %8233 = vmatpush.msra.mxu3 %v726_v28  ;;  %p8579_p4 = scmp.lt.s32.totalorder %s8577_s23, %s8573_s19 }
  0x35   : > { %v8861_v16 = vld [vmem:[%s8798_s18 + $0xf8] sm:$0xff]  ;;  %v378_v17 = vld [vmem:[%s8798_s18] sm:$0xff]  ;;  %v379_v24 = vld [vmem:[%s8798_s18 + $0x8] sm:$0xff]  ;;  %733 = vmatpush.msra.mxu0 %v710_v27  ;;  %846 = vmatpush.msra.mxu1 %v726_v28  ;;  %v8895_v25 = vand.u32 127, %v375_v23  ;;  %p8575_p1 = pnand %p8574_p0, %p8734_p5 }
  0x36   : > { %v380_v26 = vld [vmem:[%s8798_s18 + $0x10] sm:$0xff]  ;;  %v381_v32 = vld [vmem:[%s8798_s18 + $0x18] sm:$0xff]  ;;  %8218 = vmatpush.msra.mxu2 %v709_v29  ;;  %8234 = vmatpush.msra.mxu3 %v725_v30  ;;  %v722_v37 = vld [vmem:[#allocation3 + $0xc0] sm:$0xff]  ;;  %p8580_p7 = por %p8579_p4, %p8578_p3 }
  0x37   : > { %734 = vmatpush.msra.mxu0 %v709_v29  ;;  %847 = vmatpush.msra.mxu1 %v725_v30  ;;  %v721_v39 = vld [vmem:[#allocation3 + $0xb8] sm:$0xff]  ;;  %v382_v40 = vld [vmem:[%s8798_s18 + $0x20] sm:$0xff]  ;;  %v704_v41 = vld [vmem:[#allocation3 + $0x30] sm:$0xff]  ;;  %v8900_v29 = vadd.s32 128, %v8895_v25  ;;  %p8576_p2 = pneg %p8575_p1 }
  0x38   : > { %8219 = vmatpush.msra.mxu2 %v708_v31  ;;  %8235 = vmatpush.msra.mxu3 %v724_v33  ;;  %v384_v42 = vld [vmem:[%s8798_s18 + $0x30] sm:$0xff]  ;;  %v703_v44 = vld [vmem:[#allocation3 + $0x28] sm:$0xff]  ;;  %v702_v46 = vld [vmem:[#allocation3 + $0x20] sm:$0xff] }
  0x39   : > { %468 = vperm.xlu1 %8338, %v8813_v4   ;;  %462 = vperm.xlu0 %8337, %v8816_v5   ;;  %v720_v43 = vld [vmem:[#allocation3 + $0xb0] sm:$0xff]  ;;  %v719_v45 = vld [vmem:[#allocation3 + $0xa8] sm:$0xff]  ;;  %v718_v47 = vld [vmem:[#allocation3 + $0xa0] sm:$0xff]  ;;  %12321 = vst [vmem:[#allocation18_spill] sm:$0xff] %v8900_v29  ;;  %p8581_p8 = pnand %p8580_p7, %p8576_p2 }
  0x3a   : > { %474 = vperm.xlu2 %8339, %v8819_v6   ;;  %8220 = vmatpush.msra.mxu2 %v707_v34  ;;  %v701_v48 = vld [vmem:[#allocation3 + $0x18] sm:$0xff]  ;;  %v383_v49 = vld [vmem:[%s8798_s18 + $0x28] sm:$0xff]  ;;  %v386_v50 = vld [vmem:[%s8798_s18 + $0x40] sm:$0xff] }
  0x3b   : > { %735 = vmatpush.msra.mxu0 %v708_v31  ;;  %8236 = vmatpush.msra.mxu3 %v723_v35  ;;  %v717_v51 = vld [vmem:[#allocation3 + $0x98] sm:$0xff]  ;;  %v700_v52 = vld [vmem:[#allocation3 + $0x10] sm:$0xff]  ;;  %v699_v54 = vld [vmem:[#allocation3 + $0x8] sm:$0xff] }
  0x3c   : > { %848 = vmatpush.msra.mxu1 %v724_v33  ;;  %8221 = vmatpush.msra.mxu2 %v706_v36  ;;  %v716_v53 = vld [vmem:[#allocation3 + $0x90] sm:$0xff]  ;;  %v715_v55 = vld [vmem:[#allocation3 + $0x88] sm:$0xff]  ;;  %v698_v56 = vld [vmem:[#allocation3] sm:$0xff] }
  0x3d   : > { %736 = vmatpush.msra.mxu0 %v707_v34  ;;  %8237 = vmatpush.msra.mxu3 %v722_v37  ;;  %v714_v57 = vld [vmem:[#allocation3 + $0x80] sm:$0xff]  ;;  %v1260_v58 = vld [vmem:[#allocation3 + $0x178] sm:$0xff]  ;;  %v1259_v62 = vld [vmem:[#allocation3 + $0x170] sm:$0xff]  ;;  %v12116_v34 = vmov 1.0  }
  0x3e   : > { %849 = vmatpush.msra.mxu1 %v723_v35  ;;  %8222 = vmatpush.msra.mxu2 %v705_v38  ;;  %v1276_v59 = vld [vmem:[#allocation3 + $0x1f8] sm:$0xff]  ;;  %v1275_v63 = vld [vmem:[#allocation3 + $0x1f0] sm:$0xff]  ;;  %v387_v19 = vld [vmem:[%s8798_s18 + $0x48] sm:$0xff] }
  0x3f   : > { %737 = vmatpush.msra.mxu0 %v706_v36  ;;  %8238 = vmatpush.msra.mxu3 %v721_v39  ;;  %v385_v60 = vld [vmem:[%s8798_s18 + $0x38] sm:$0xff]  ;;  %v1258_v21 = vld [vmem:[#allocation3 + $0x168] sm:$0xff]  ;;  %v1257_v27 = vld [vmem:[#allocation3 + $0x160] sm:$0xff] }
  0x40   : > { %850 = vmatpush.msra.mxu1 %v722_v37  ;;  %8223 = vmatpush.msra.mxu2 %v704_v41  ;;  %v1274_v22 = vld [vmem:[#allocation3 + $0x1e8] sm:$0xff]  ;;  %v1273_v28 = vld [vmem:[#allocation3 + $0x1e0] sm:$0xff]  ;;  %v1256_v35 = vld [vmem:[#allocation3 + $0x158] sm:$0xff] }
  0x41   : > { %480 = vperm.xlu1 %8338, %v8825_v7   ;;  %477 = vperm.xlu0 %8337, %v8828_v8   ;;  %v391_v30 = vld [vmem:[%s8798_s18 + $0x68] sm:$0xff]  ;;  %v1272_v36 = vld [vmem:[#allocation3 + $0x1d8] sm:$0xff]  ;;  %v390_v37 = vld [vmem:[%s8798_s18 + $0x60] sm:$0xff] }
  0x42   : > { %483 = vperm.xlu2 %8339, %v8831_v9   ;;  %8239 = vmatpush.msra.mxu3 %v720_v43 }
  0x43   : > { %8224 = vmatpush.msra.mxu2 %v703_v44  ;;  %738 = vmatpush.msra.mxu0 %v705_v38 }
  0x44   : > { %8240 = vmatpush.msra.mxu3 %v719_v45  ;;  %851 = vmatpush.msra.mxu1 %v721_v39 }
  0x45   : > { %8225 = vmatpush.msra.mxu2 %v702_v46  ;;  %739 = vmatpush.msra.mxu0 %v704_v41  ;;  %v1255_v41 = vld [vmem:[#allocation3 + $0x150] sm:$0xff] }
  0x46   : > { %8241 = vmatpush.msra.mxu3 %v718_v47  ;;  %852 = vmatpush.msra.mxu1 %v720_v43 }
  0x47   : > { %8226 = vmatpush.msra.mxu2 %v701_v48  ;;  %740 = vmatpush.msra.mxu0 %v703_v44 }
  0x48   : > { %8242 = vmatpush.msra.mxu3 %v717_v51  ;;  %853 = vmatpush.msra.mxu1 %v719_v45 }
  0x49   : > { %489 = vperm.xlu1 %8338, %v8837_v10   ;;  %486 = vperm.xlu0 %8337, %v8840_v11  }
  0x4a   : > { %492 = vperm.xlu2 %8339, %v8843_v12   ;;  %8227 = vmatpush.msra.mxu2 %v700_v52 }
  0x4b   : > { %8243 = vmatpush.msra.mxu3 %v716_v53  ;;  %741 = vmatpush.msra.mxu0 %v702_v46  ;;  %v1270_v46 = vld [vmem:[#allocation3 + $0x1c8] sm:$0xff] }
  0x4c   : > { %8228 = vmatpush.msra.mxu2 %v699_v54  ;;  %854 = vmatpush.msra.mxu1 %v718_v47 }
  0x4d   : > { %8244 = vmatpush.msra.mxu3 %v715_v55  ;;  %742 = vmatpush.msra.mxu0 %v701_v48  ;;  %v1253_v48 = vld [vmem:[#allocation3 + $0x140] sm:$0xff] }
  0x4e   : > { %855 = vmatpush.msra.mxu1 %v717_v51  ;;  %8229 = vmatpush.msra.mxu2 %v698_v56  ;;  %v1252_v51 = vld [vmem:[#allocation3 + $0x138] sm:$0xff] }
  0x4f   : > { %8245 = vmatpush.msra.mxu3 %v714_v57  ;;  %743 = vmatpush.msra.mxu0 %v700_v52  ;;  %v1268_v52 = vld [vmem:[#allocation3 + $0x1b8] sm:$0xff] }
  0x50   : > { %1277 = vmatpush.msrb.mxu2 %v1260_v58  ;;  %856 = vmatpush.msra.mxu1 %v716_v53  ;;  %v393_v53 = vld [vmem:[%s8798_s18 + $0x78] sm:$0xff]  ;;  %v1250_v58 = vld [vmem:[#allocation3 + $0x128] sm:$0xff] }
  0x51   : > { %498 = vperm.xlu1 %8338, %v8849_v13   ;;  %495 = vperm.xlu0 %8337, %v8852_v14  }
  0x52   : > { %501 = vperm.xlu2 %8339, %v8855_v15   ;;  %1390 = vmatpush.msrb.mxu3 %v1276_v59  ;;  %v1266_v59 = vld [vmem:[#allocation3 + $0x1a8] sm:$0xff] }
  0x53   : > { %744 = vmatpush.msra.mxu0 %v699_v54  ;;  %857 = vmatpush.msra.mxu1 %v715_v55  ;;  %v1251_v54 = vld [vmem:[#allocation3 + $0x130] sm:$0xff] }
  0x54   : > { %1278 = vmatpush.msrb.mxu2 %v1259_v62  ;;  %1391 = vmatpush.msrb.mxu3 %v1275_v63  ;;  %v1267_v55 = vld [vmem:[#allocation3 + $0x1b0] sm:$0xff]  ;;  %v1264_v62 = vld [vmem:[#allocation3 + $0x198] sm:$0xff] }
  0x55   : > { %745 = vmatpush.msra.mxu0 %v698_v56  ;;  %858 = vmatpush.msra.mxu1 %v714_v57  ;;  %v1247_v63 = vld [vmem:[#allocation3 + $0x110] sm:$0xff] }
  0x56   : > { %1279 = vmatpush.msrb.mxu2 %v1258_v21  ;;  %1392 = vmatpush.msrb.mxu3 %v1274_v22  ;;  %v1245_v21 = vld [vmem:[#allocation3 + $0x100] sm:$0xff] }
  0x57   : > { %v1261_v22 = vld [vmem:[#allocation3 + $0x180] sm:$0xff] }
  0x58   : > { %1280 = vmatpush.msrb.mxu2 %v1257_v27  ;;  %1393 = vmatpush.msrb.mxu3 %v1273_v28  ;;  %v1519_v27 = vld [vmem:[#allocation6 + $0x178] sm:$0xff] }
  0x59   : > { %8340 = vset.pattern.permute.xlu1 %v8642_v18  ;;  %504 = vperm.xlu0 %8337, %v8861_v16   ;;  %v1535_v28 = vld [vmem:[#allocation6 + $0x1f8] sm:$0xff] }
  0x5a   : > { %957 = vperm.xlu1 %8340, %v378_v17   ;;  %411 = vperm.xlu2 %8339, %v378_v17   ;;  %v389_v17 = vld [vmem:[%s8798_s18 + $0x58] sm:$0xff] }
  0x5b   : > { %1281 = vmatpush.msrb.mxu2 %v1256_v35  ;;  %1394 = vmatpush.msrb.mxu3 %v1272_v36  ;;  %v1534_v35 = vld [vmem:[#allocation6 + $0x1f0] sm:$0xff] }
  0x5c   : > { %1536 = vmatpush.msrb.mxu0 %v1519_v27  ;;  %1649 = vmatpush.msrb.mxu1 %v1535_v28  ;;  %v1518_v36 = vld [vmem:[#allocation6 + $0x170] sm:$0xff] }
  0x5d   : > { %1282 = vmatpush.msrb.mxu2 %v1255_v41  ;;  %v1531_v41 = vld [vmem:[#allocation6 + $0x1d8] sm:$0xff] }
  0x5e   : > { %1650 = vmatpush.msrb.mxu1 %v1534_v35  ;;  %1537 = vmatpush.msrb.mxu0 %v1518_v36  ;;  %v1854_v36 = vld [vmem:[#allocation8 + $0x2b0] sm:$0xff] }
  0x61   : > { %8341 = vset.pattern.permute.xlu0 %v8642_v18 }
  0x62   : > { %8342 = vset.pattern.permute.xlu1 %v8641_v0  ;;  %960 = vperm.xlu0 %8341, %v379_v24  }
  0x63   : > { %414 = vperm.xlu1 %8342, %v379_v24   ;;  %8343 = vset.pattern.permute.xlu2 %v8642_v18  ;;  %v388_v24 = vld [vmem:[%s8798_s18 + $0x50] sm:$0xff] }
  0x64   : > { %963 = vperm.xlu2 %8343, %v380_v26  }
  0x6a   : > { %8344 = vset.pattern.permute.xlu0 %v8641_v0 }
  0x6b   : > { %417 = vperm.xlu1 %8342, %v380_v26   ;;  %420 = vperm.xlu0 %8344, %v381_v32  }
  0x6c   : > { %966 = vperm.xlu2 %8343, %v381_v32  }
  0x73   : > { %8345 = vset.pattern.permute.xlu1 %v8642_v18  ;;  %8347 = vset.pattern.permute.xlu0 %v8642_v18 }
  0x74   : > { %969 = vperm.xlu1 %8345, %v382_v40   ;;  %975 = vperm.xlu0 %8347, %v384_v42  }
  0x75   : > { %8346 = vset.pattern.permute.xlu2 %v8641_v0 }
  0x76   : > { %423 = vperm.xlu2 %8346, %v382_v40  }
  0x7c   : > { %972 = vperm.xlu1 %8345, %v383_v49   ;;  %8350 = vset.pattern.permute.xlu0 %v8641_v0 }
  0x7d   : > { %435 = vperm.xlu0 %8350, %v386_v50  }
  0x7e   : > { %426 = vperm.xlu2 %8346, %v383_v49   ;;  %v1269_v49 = vld [vmem:[#allocation3 + $0x1c0] sm:$0xff] }
  0x84   : > { %8348 = vset.pattern.permute.xlu1 %v8641_v0 }
  0x85   : > { %429 = vperm.xlu1 %8348, %v384_v42   ;;  %8353 = vset.pattern.permute.xlu0 %v8642_v18  ;;  %v1271_v42 = vld [vmem:[#allocation3 + $0x1d0] sm:$0xff] }
  0x86   : > { %8349 = vset.pattern.permute.xlu2 %v8642_v18  ;;  %990 = vperm.xlu0 %8353, %v389_v17  }
  0x87   : > { %978 = vperm.xlu2 %8349, %v385_v60   ;;  %1395 = vmatpush.msrb.mxu3 %v1271_v42  ;;  %v1530_v42 = vld [vmem:[#allocation6 + $0x1d0] sm:$0xff] }
  0x89   : > { %1396 = vmatpush.msrb.mxu3 %v1270_v46  ;;  %v1860_v46 = vld [vmem:[#allocation8 + $0x2e0] sm:$0xff] }
  0x8b   : > { %1397 = vmatpush.msrb.mxu3 %v1269_v49  ;;  %v1516_v49 = vld [vmem:[#allocation6 + $0x160] sm:$0xff] }
  0x8c   : > { %v8885_v61 = vpop.permute.xlu2 %471 }
  0x8d   : > { %432 = vperm.xlu1 %8348, %v385_v60   ;;  %vm546_vm10 = vcmp.eq.s32.totalorder %v8885_v61, %v8895_v25  ;;  %vm547_vm11 = vcmp.eq.s32.totalorder %v8885_v61, %v8900_v29  ;;  %1398 = vmatpush.msrb.mxu3 %v1268_v52  ;;  %v1249_v60 = vld [vmem:[#allocation3 + $0x120] sm:$0xff]  ;;  %v1523_v52 = vld [vmem:[#allocation6 + $0x198] sm:$0xff] }
  0x8e   : > { %8356 = vset.pattern.permute.xlu0 %v8641_v0  ;;  %v1265_v61 = vld [vmem:[#allocation3 + $0x1a0] sm:$0xff] }
  0x8f   : > { %981 = vperm.xlu2 %8349, %v386_v50   ;;  %450 = vperm.xlu0 %8356, %v391_v30  }
  0x90   : > { %1399 = vmatpush.msrb.mxu3 %v1267_v55 }
  0x92   : > { %1400 = vmatpush.msrb.mxu3 %v1266_v59 }
  0x94   : > { %v8889_v20 = vpop.permute.xlu2 %474  ;;  %1401 = vmatpush.msrb.mxu3 %v1265_v61 }
  0x95   : > { %8351 = vset.pattern.permute.xlu1 %v8642_v18  ;;  %vm548_vm12 = vcmp.eq.s32.totalorder %v8889_v20, %v8895_v25  ;;  %vm549_vm13 = vcmp.eq.s32.totalorder %v8889_v20, %v8900_v29  ;;  %v1262_v20 = vld [vmem:[#allocation3 + $0x188] sm:$0xff] }
  0x96   : > { %984 = vperm.xlu1 %8351, %v387_v19   ;;  %1402 = vmatpush.msrb.mxu3 %v1264_v62 }
  0x97   : > { %8352 = vset.pattern.permute.xlu2 %v8641_v0  ;;  %8359 = vset.pattern.permute.xlu0 %v8642_v18 }
  0x98   : > { %438 = vperm.xlu2 %8352, %v387_v19   ;;  %1005 = vperm.xlu0 %8359, %v8804_v2   ;;  %v1254_v2 = vld [vmem:[#allocation3 + $0x148] sm:$0xff] }
  0x99   : > { %1283 = vmatpush.msrb.mxu2 %v1254_v2 }
  0x9b   : > { %1284 = vmatpush.msrb.mxu2 %v1253_v48  ;;  %v1526_v48 = vld [vmem:[#allocation6 + $0x1b0] sm:$0xff] }
  0x9c   : > { %v8897_v26 = vpop.permute.xlu2 %483 }
  0x9d   : > { %1285 = vmatpush.msrb.mxu2 %v1252_v51 }
  0x9e   : > { %987 = vperm.xlu1 %8351, %v388_v24  }
  0x9f   : > { %1286 = vmatpush.msrb.mxu2 %v1251_v54 }
  0xa0   : > { %441 = vperm.xlu2 %8352, %v388_v24   ;;  %1020 = vperm.xlu0 %8359, %v8819_v6  }
  0xa1   : > { %1287 = vmatpush.msrb.mxu2 %v1250_v58  ;;  %v1521_v58 = vld [vmem:[#allocation6 + $0x188] sm:$0xff] }
  0xa3   : > { %v466_v31 = vpop.permute.xlu1 %465  ;;  %v460_v32 = vpop.permute.xlu0 %459  ;;  %1288 = vmatpush.msrb.mxu2 %v1249_v60  ;;  %v1859_v60 = vld [vmem:[#allocation8 + $0x2d8] sm:$0xff] }
  0xa4   : > { %vm538_vm0 = vcmp.eq.s32.totalorder %v460_v32, %v8895_v25  ;;  %vm539_vm1 = vcmp.eq.s32.totalorder %v460_v32, %v8900_v29  ;;  %v8905_v33 = vpop.permute.xlu2 %492  ;;  %vm542_vm4 = vcmp.eq.s32.totalorder %v466_v31, %v8895_v25  ;;  %vm543_vm5 = vcmp.eq.s32.totalorder %v466_v31, %v8900_v29  ;;  %v1862_v32 = vld [vmem:[#allocation8 + $0x2f0] sm:$0xff] }
  0xa5   : > { %7773 = vmatmul.msk.f32.vlgmr.msra.gmra.mxu2 %vm538_vm0, %v12116_v34  ;;  %7805 = vmatmul.msk.f32.vlgmr.msra.gmra.mxu3 %vm539_vm1, %v12116_v34 }
  0xa6   : > { %8354 = vset.pattern.permute.xlu1 %v8641_v0 }
  0xa7   : > { %444 = vperm.xlu1 %8354, %v389_v17   ;;  %v1263_v17 = vld [vmem:[#allocation3 + $0x190] sm:$0xff] }
  0xa8   : > { %8355 = vset.pattern.permute.xlu2 %v8642_v18  ;;  %1029 = vperm.xlu0 %8359, %v8831_v9  }
  0xa9   : > { %993 = vperm.xlu2 %8355, %v390_v37   ;;  %1403 = vmatpush.msrb.mxu3 %v1263_v17 }
  0xab   : > { %v469_v38 = vpop.permute.xlu1 %468  ;;  %v463_v39 = vpop.permute.xlu0 %462  ;;  %1404 = vmatpush.msrb.mxu3 %v1262_v20  ;;  %v1513_v20 = vld [vmem:[#allocation6 + $0x148] sm:$0xff] }
  0xac   : > { %vm540_vm2 = vcmp.eq.s32.totalorder %v463_v39, %v8895_v25  ;;  %vm541_vm3 = vcmp.eq.s32.totalorder %v463_v39, %v8900_v29  ;;  %v8915_v40 = vpop.permute.xlu2 %501  ;;  %vm544_vm8 = vcmp.eq.s32.totalorder %v469_v38, %v8895_v25  ;;  %vm545_vm9 = vcmp.eq.s32.totalorder %v469_v38, %v8900_v29  ;;  %v1532_v39 = vld [vmem:[#allocation6 + $0x1e0] sm:$0xff] }
  0xad   : > { %7774 = vmatmul.msk.f32.gmra.mxu2 %vm540_vm2, %v12116_v34  ;;  %7806 = vmatmul.msk.f32.gmra.mxu3 %vm541_vm3, %v12116_v34 }
  0xae   : > { %1405 = vmatpush.msrb.mxu3 %v1261_v22 }
  0xaf   : > { %447 = vperm.xlu1 %8354, %v390_v37   ;;  %v1533_v37 = vld [vmem:[#allocation6 + $0x1e8] sm:$0xff] }
  0xb0   : > { %1038 = vperm.xlu0 %8359, %v8843_v12   ;;  %1651 = vmatpush.msrb.mxu1 %v1533_v37  ;;  %v1855_v37 = vld [vmem:[#allocation8 + $0x2b8] sm:$0xff] }
  0xb1   : > { %996 = vperm.xlu2 %8355, %v391_v30  }
  0xb2   : > { %1652 = vmatpush.msrb.mxu1 %v1532_v39 }
  0xb3   : > { %v8922_v43 = vpop.permute.xlu1 %480  ;;  %v478_v44 = vpop.permute.xlu0 %477 }
  0xb4   : > { %v412_v45 = vpop.permute.xlu2 %411  ;;  %vm550_vm14 = vcmp.eq.s32.totalorder %v478_v44, %v8895_v25  ;;  %vm551_vm15 = vcmp.eq.s32.totalorder %v478_v44, %v8900_v29  ;;  %vm552_vm2 = vcmp.eq.s32.totalorder %v8922_v43, %v8895_v25  ;;  %vm553_vm3 = vcmp.eq.s32.totalorder %v8922_v43, %v8900_v29  ;;  %1653 = vmatpush.msrb.mxu1 %v1531_v41  ;;  %v1517_v43 = vld [vmem:[#allocation6 + $0x168] sm:$0xff] }
  0xb5   : > { %7775 = vmatmul.msk.f32.gmra.mxu2 %vm542_vm4, %v12116_v34  ;;  %7807 = vmatmul.msk.f32.gmra.mxu3 %vm543_vm5, %v12116_v34  ;;  %vm506_vm6 = vcmp.eq.s32.totalorder %v412_v45, %v8895_v25  ;;  %vm507_vm7 = vcmp.eq.s32.totalorder %v412_v45, %v8900_v29  ;;  %v1529_v44 = vld [vmem:[#allocation6 + $0x1c8] sm:$0xff]  ;;  %v1528_v45 = vld [vmem:[#allocation6 + $0x1c0] sm:$0xff] }
  0xb6   : > { %7757 = vmatmul.msk.f32.vlgmr.msra.gmra.mxu0 %vm506_vm6, %v12116_v34  ;;  %7789 = vmatmul.msk.f32.vlgmr.msra.gmra.mxu1 %vm507_vm7, %v12116_v34  ;;  %vm554_vm6 = vcmp.eq.s32.totalorder %v8897_v26, %v8895_v25  ;;  %vm555_vm7 = vcmp.eq.s32.totalorder %v8897_v26, %v8900_v29 }
  0xb7   : > { %8357 = vset.pattern.permute.xlu1 %v8642_v18  ;;  %1654 = vmatpush.msrb.mxu1 %v1530_v42  ;;  %v1510_v42 = vld [vmem:[#allocation6 + $0x130] sm:$0xff] }
  0xb8   : > { %1047 = vperm.xlu0 %8359, %v8855_v15   ;;  %1538 = vmatpush.msrb.mxu0 %v1517_v43 }
  0xb9   : > { %8358 = vset.pattern.permute.xlu2 %v8641_v0  ;;  %v392_v0 = vld [vmem:[%s8798_s18 + $0x70] sm:$0xff]  ;;  %1655 = vmatpush.msrb.mxu1 %v1529_v44 }
  0xba   : > { %453 = vperm.xlu2 %8358, %v392_v0   ;;  %999 = vperm.xlu1 %8357, %v392_v0  }
  0xbb   : > { %v8933_v6 = vpop.permute.xlu1 %489  ;;  %v8935_v47 = vpop.permute.xlu0 %486  ;;  %1656 = vmatpush.msrb.mxu1 %v1528_v45  ;;  %1539 = vmatpush.msrb.mxu0 %v1516_v49  ;;  %v1852_v49 = vld [vmem:[#allocation8 + $0x2a0] sm:$0xff] }
  0xbd   : > { %7776 = vmatmul.msk.f32.gmra.mxu2 %vm544_vm8, %v12116_v34  ;;  %7808 = vmatmul.msk.f32.gmra.mxu3 %vm545_vm9, %v12116_v34 }
  0xbe   : > { %v8969_v57 = vpop.permute.xlu2 %963 }
  0xc2   : > { %456 = vperm.xlu2 %8358, %v393_v53   ;;  %1002 = vperm.xlu1 %8357, %v393_v53  }
  0xc3   : > { %v8947_v50 = vpop.permute.xlu1 %498  ;;  %v8950_v9 = vpop.permute.xlu0 %495 }
  0xc5   : > { %7777 = vmatmul.msk.f32.gmra.mxu2 %vm546_vm10, %v12116_v34  ;;  %7809 = vmatmul.msk.f32.gmra.mxu3 %vm547_vm11, %v12116_v34  ;;  %vm556_vm10 = vcmp.eq.s32.totalorder %v8935_v47, %v8895_v25  ;;  %vm557_vm11 = vcmp.eq.s32.totalorder %v8935_v47, %v8900_v29  ;;  %v1527_v47 = vld [vmem:[#allocation6 + $0x1b8] sm:$0xff] }
  0xc6   : > { %1657 = vmatpush.msrb.mxu1 %v1527_v47 }
  0xc8   : > { %1658 = vmatpush.msrb.mxu1 %v1526_v48 }
  0xca   : > { %1008 = vperm.xlu1 %8357, %v8816_v5   ;;  %8360 = vset.pattern.permute.xlu2 %v8642_v18  ;;  %v8989_v18 = vpop.permute.xlu2 %966 }
  0xcb   : > { %v8964_v56 = vpop.permute.xlu0 %504  ;;  %1011 = vperm.xlu2 %8360, %v8801_v1  }
  0xcc   : > { %v8959_v12 = vpop.permute.xlu1 %957 }
  0xcd   : > { %7778 = vmatmul.msk.f32.gmra.mxu2 %vm548_vm12, %v12116_v34  ;;  %7810 = vmatmul.msk.f32.gmra.mxu3 %vm549_vm13, %v12116_v34 }
  0xd2   : > { %1014 = vperm.xlu1 %8357, %v8813_v4   ;;  %v1248_v4 = vld [vmem:[#allocation3 + $0x118] sm:$0xff] }
  0xd3   : > { %1017 = vperm.xlu2 %8360, %v8809_v3   ;;  %1289 = vmatpush.msrb.mxu2 %v1248_v4 }
  0xd4   : > { %v8979_v1 = vpop.permute.xlu0 %960 }
  0xd5   : > { %7779 = vmatmul.msk.f32.gmra.mxu2 %vm550_vm14, %v12116_v34  ;;  %7811 = vmatmul.msk.f32.gmra.mxu3 %vm551_vm15, %v12116_v34  ;;  %v415_v15 = vpop.permute.xlu1 %414  ;;  %vm558_vm14 = vcmp.eq.s32.totalorder %v8933_v6, %v8895_v25  ;;  %vm559_vm15 = vcmp.eq.s32.totalorder %v8933_v6, %v8900_v29  ;;  %v1861_v6 = vld [vmem:[#allocation8 + $0x2e8] sm:$0xff] }
  0xd6   : > { %vm508_vm0 = vcmp.eq.s32.totalorder %v415_v15, %v8895_v25  ;;  %vm509_vm1 = vcmp.eq.s32.totalorder %v415_v15, %v8900_v29  ;;  %1290 = vmatpush.msrb.mxu2 %v1247_v63  ;;  %v1515_v15 = vld [vmem:[#allocation6 + $0x158] sm:$0xff] }
  0xd7   : > { %7758 = vmatmul.msk.f32.gmra.mxu0 %vm508_vm0, %v12116_v34  ;;  %7790 = vmatmul.msk.f32.gmra.mxu1 %vm509_vm1, %v12116_v34 }
  0xd8   : > { %1540 = vmatpush.msrb.mxu0 %v1515_v15 }
  0xda   : > { %1023 = vperm.xlu1 %8357, %v8828_v8  }
  0xdb   : > { %1026 = vperm.xlu2 %8360, %v8825_v7   ;;  %v424_v7 = vpop.permute.xlu2 %423 }
  0xdc   : > { %vm514_vm12 = vcmp.eq.s32.totalorder %v424_v7, %v8895_v25  ;;  %vm515_vm13 = vcmp.eq.s32.totalorder %v424_v7, %v8900_v29  ;;  %v1514_v7 = vld [vmem:[#allocation6 + $0x150] sm:$0xff] }
  0xdd   : > { %7780 = vmatmul.msk.f32.gmra.mxu2 %vm552_vm2, %v12116_v34  ;;  %7812 = vmatmul.msk.f32.gmra.mxu3 %vm553_vm3, %v12116_v34  ;;  %v418_v5 = vpop.permute.xlu1 %417  ;;  %v421_v3 = vpop.permute.xlu0 %420  ;;  %vm560_vm2 = vcmp.eq.s32.totalorder %v8905_v33, %v8895_v25  ;;  %vm561_vm3 = vcmp.eq.s32.totalorder %v8905_v33, %v8900_v29  ;;  %v1863_v33 = vld [vmem:[#allocation8 + $0x2f8] sm:$0xff] }
  0xde   : > { %vm510_vm4 = vcmp.eq.s32.totalorder %v418_v5, %v8895_v25  ;;  %vm511_vm5 = vcmp.eq.s32.totalorder %v418_v5, %v8900_v29  ;;  %vm512_vm8 = vcmp.eq.s32.totalorder %v421_v3, %v8895_v25  ;;  %vm513_vm9 = vcmp.eq.s32.totalorder %v421_v3, %v8900_v29  ;;  %1977 = vmatpush.msra.mxu3 %v1863_v33  ;;  %v1520_v5 = vld [vmem:[#allocation6 + $0x180] sm:$0xff] }
  0xdf   : > { %7759 = vmatmul.msk.f32.gmra.mxu0 %vm510_vm4, %v12116_v34  ;;  %7791 = vmatmul.msk.f32.gmra.mxu1 %vm511_vm5, %v12116_v34 }
  0xe0   : > { %1978 = vmatpush.msra.mxu3 %v1861_v6  ;;  %1541 = vmatpush.msrb.mxu0 %v1514_v7  ;;  %v1509_v6 = vld [vmem:[#allocation6 + $0x128] sm:$0xff] }
  0xe2   : > { %1032 = vperm.xlu1 %8357, %v8840_v11   ;;  %v1246_v11 = vld [vmem:[#allocation3 + $0x108] sm:$0xff]  ;;  %1979 = vmatpush.msra.mxu3 %v1859_v60 }
  0xe3   : > { %1035 = vperm.xlu2 %8360, %v8837_v10   ;;  %v427_v10 = vpop.permute.xlu2 %426  ;;  %1291 = vmatpush.msrb.mxu2 %v1246_v11 }
  0xe4   : > { %vm516_vm0 = vcmp.eq.s32.totalorder %v427_v10, %v8895_v25  ;;  %vm517_vm1 = vcmp.eq.s32.totalorder %v427_v10, %v8900_v29  ;;  %1542 = vmatpush.msrb.mxu0 %v1513_v20 }
  0xe5   : > { %7781 = vmatmul.msk.f32.gmra.mxu2 %vm554_vm6, %v12116_v34  ;;  %7813 = vmatmul.msk.f32.gmra.mxu3 %vm555_vm7, %v12116_v34  ;;  %vm562_vm6 = vcmp.eq.s32.totalorder %v8950_v9, %v8895_v25  ;;  %vm563_vm7 = vcmp.eq.s32.totalorder %v8950_v9, %v8900_v29  ;;  %v1524_v9 = vld [vmem:[#allocation6 + $0x1a0] sm:$0xff] }
  0xe6   : > { %v9005_v8 = vpop.permute.xlu1 %969  ;;  %1292 = vmatpush.msrb.mxu2 %v1245_v21 }
  0xe7   : > { %7760 = vmatmul.msk.f32.gmra.mxu0 %vm512_vm8, %v12116_v34  ;;  %7792 = vmatmul.msk.f32.gmra.mxu1 %vm513_vm9, %v12116_v34 }
  0xe8   : > { %1864 = vmatpush.msra.mxu2 %v1862_v32  ;;  %v1511_v32 = vld [vmem:[#allocation6 + $0x138] sm:$0xff] }
  0xea   : > { %1041 = vperm.xlu1 %8357, %v8852_v14   ;;  %1865 = vmatpush.msra.mxu2 %v1860_v46 }
  0xeb   : > { %1044 = vperm.xlu2 %8360, %v8849_v13   ;;  %v9036_v14 = vpop.permute.xlu2 %978 }
  0xed   : > { %7782 = vmatmul.msk.f32.gmra.mxu2 %vm556_vm10, %v12116_v34  ;;  %7814 = vmatmul.msk.f32.gmra.mxu3 %vm557_vm11, %v12116_v34  ;;  %vm564_vm10 = vcmp.eq.s32.totalorder %v8947_v50, %v8895_v25  ;;  %vm565_vm11 = vcmp.eq.s32.totalorder %v8947_v50, %v8900_v29  ;;  %v1525_v50 = vld [vmem:[#allocation6 + $0x1a8] sm:$0xff] }
  0xee   : > { %v9019_v19 = vpop.permute.xlu1 %972  ;;  %1659 = vmatpush.msrb.mxu1 %v1525_v50  ;;  %v1853_v50 = vld [vmem:[#allocation8 + $0x2a8] sm:$0xff] }
  0xef   : > { %7761 = vmatmul.msk.f32.gmra.mxu0 %vm514_vm12, %v12116_v34  ;;  %7793 = vmatmul.msk.f32.gmra.mxu1 %vm515_vm13, %v12116_v34 }
  0xf0   : > { %1660 = vmatpush.msrb.mxu1 %v1524_v9 }
  0xf2   : > { %1050 = vperm.xlu1 %8357, %v8861_v16   ;;  %v9048_v16 = vpop.permute.xlu0 %975  ;;  %1661 = vmatpush.msrb.mxu1 %v1523_v52 }
  0xf3   : > { %v9058_v24 = vpop.permute.xlu2 %981 }
  0xf5   : > { %7783 = vmatmul.msk.f32.gmra.mxu2 %vm558_vm14, %v12116_v34  ;;  %7815 = vmatmul.msk.f32.gmra.mxu3 %vm559_vm15, %v12116_v34  ;;  %vm566_vm14 = vcmp.eq.s32.totalorder %v8915_v40, %v8895_v25  ;;  %vm567_vm15 = vcmp.eq.s32.totalorder %v8915_v40, %v8900_v29 }
  0xf7   : > { %7762 = vmatmul.msk.f32.gmra.mxu0 %vm516_vm0, %v12116_v34  ;;  %7794 = vmatmul.msk.f32.gmra.mxu1 %vm517_vm1, %v12116_v34  ;;  %v430_v13 = vpop.permute.xlu1 %429 }
  0xf8   : > { %vm518_vm4 = vcmp.eq.s32.totalorder %v430_v13, %v8895_v25  ;;  %vm519_vm5 = vcmp.eq.s32.totalorder %v430_v13, %v8900_v29  ;;  %v1857_v13 = vld [vmem:[#allocation8 + $0x2c8] sm:$0xff] }
  0xf9   : > { %1980 = vmatpush.msra.mxu3 %v1857_v13 }
  0xfa   : > { %v436_v26 = vpop.permute.xlu0 %435 }
  0xfb   : > { %vm522_vm12 = vcmp.eq.s32.totalorder %v436_v26, %v8895_v25  ;;  %vm523_vm13 = vcmp.eq.s32.totalorder %v436_v26, %v8900_v29  ;;  %v439_v31 = vpop.permute.xlu2 %438  ;;  %v1512_v26 = vld [vmem:[#allocation6 + $0x140] sm:$0xff]  ;;  %1981 = vmatpush.msra.mxu3 %v1855_v37 }
  0xfc   : > { %vm524_vm0 = vcmp.eq.s32.totalorder %v439_v31, %v8895_v25  ;;  %vm525_vm1 = vcmp.eq.s32.totalorder %v439_v31, %v8900_v29  ;;  %1543 = vmatpush.msrb.mxu0 %v1512_v26 }
  0xfd   : > { %7784 = vmatmul.msk.f32.gmra.mxu2 %vm560_vm2, %v12116_v34  ;;  %7816 = vmatmul.msk.f32.gmra.mxu3 %vm561_vm3, %v12116_v34  ;;  %vm568_vm2 = vcmp.eq.s32.totalorder %v8964_v56, %v8895_v25  ;;  %vm569_vm3 = vcmp.eq.s32.totalorder %v8964_v56, %v8900_v29  ;;  %v1522_v56 = vld [vmem:[#allocation6 + $0x190] sm:$0xff] }
  0xfe   : > { %1662 = vmatpush.msrb.mxu1 %v1522_v56  ;;  %1544 = vmatpush.msrb.mxu0 %v1511_v32  ;;  %v1849_v32 = vld [vmem:[#allocation8 + $0x288] sm:$0xff] }
  0xff   : > { %7763 = vmatmul.msk.f32.gmra.mxu0 %vm518_vm4, %v12116_v34  ;;  %7795 = vmatmul.msk.f32.gmra.mxu1 %vm519_vm5, %v12116_v34  ;;  %v433_v23 = vpop.permute.xlu1 %432 }
 0x100   : > { %vm520_vm8 = vcmp.eq.s32.totalorder %v433_v23, %v8895_v25  ;;  %vm521_vm9 = vcmp.eq.s32.totalorder %v433_v23, %v8900_v29  ;;  %1663 = vmatpush.msrb.mxu1 %v1521_v58  ;;  %1545 = vmatpush.msrb.mxu0 %v1510_v42 }
 0x101   : > { %1982 = vmatpush.msra.mxu3 %v1853_v50 }
 0x102   : > { %v9108_v51 = vpop.permute.xlu0 %990  ;;  %1664 = vmatpush.msrb.mxu1 %v1520_v5  ;;  %1546 = vmatpush.msrb.mxu0 %v1509_v6  ;;  %v1846_v6 = vld [vmem:[#allocation8 + $0x270] sm:$0xff] }
 0x103   : > { %v442_v40 = vpop.permute.xlu2 %441 }
 0x104   : > { %vm526_vm4 = vcmp.eq.s32.totalorder %v442_v40, %v8895_v25  ;;  %vm527_vm5 = vcmp.eq.s32.totalorder %v442_v40, %v8900_v29 }
 0x105   : > { %7785 = vmatmul.msk.f32.gmra.mxu2 %vm562_vm6, %v12116_v34  ;;  %7817 = vmatmul.msk.f32.gmra.mxu3 %vm563_vm7, %v12116_v34  ;;  %vm1052_vm6 = vcmp.eq.s32.totalorder %v8959_v12, %v8895_v25  ;;  %vm1053_vm7 = vcmp.eq.s32.totalorder %v8959_v12, %v8900_v29 }
 0x107   : > { %7764 = vmatmul.msk.f32.gmra.mxu0 %vm520_vm8, %v12116_v34  ;;  %7796 = vmatmul.msk.f32.gmra.mxu1 %vm521_vm9, %v12116_v34 }
 0x108   : > { %v9062_v30 = vpop.permute.xlu1 %984 }
 0x10a   : > { %v451_v62 = vpop.permute.xlu0 %450 }
 0x10b   : > { %v9100_v0 = vpop.permute.xlu2 %993 }
 0x10d   : > { %7786 = vmatmul.msk.f32.gmra.mxu2 %vm564_vm10, %v12116_v34  ;;  %7818 = vmatmul.msk.f32.gmra.mxu3 %vm565_vm11, %v12116_v34  ;;  %vm1054_vm10 = vcmp.eq.s32.totalorder %v8979_v1, %v8895_v25  ;;  %vm1055_vm11 = vcmp.eq.s32.totalorder %v8979_v1, %v8900_v29  ;;  %v1858_v1 = vld [vmem:[#allocation8 + $0x2d0] sm:$0xff] }
 0x10e   : > { %1866 = vmatpush.msra.mxu2 %v1858_v1  ;;  %v1507_v1 = vld [vmem:[#allocation6 + $0x118] sm:$0xff] }
 0x10f   : > { %7765 = vmatmul.msk.f32.gmra.mxu0 %vm522_vm12, %v12116_v34  ;;  %7797 = vmatmul.msk.f32.gmra.mxu1 %vm523_vm13, %v12116_v34 }
 0x110   : > { %v9082_v38 = vpop.permute.xlu1 %987 }
 0x113   : > { %v9120_v59 = vpop.permute.xlu2 %996 }
 0x115   : > { %7787 = vmatmul.msk.f32.gmra.mxu2 %vm566_vm14, %v12116_v34  ;;  %7819 = vmatmul.msk.f32.gmra.mxu3 %vm567_vm15, %v12116_v34  ;;  %vm1056_vm14 = vcmp.eq.s32.totalorder %v8969_v57, %v8895_v25  ;;  %vm1057_vm15 = vcmp.eq.s32.totalorder %v8969_v57, %v8900_v29  ;;  %v1856_v57 = vld [vmem:[#allocation8 + $0x2c0] sm:$0xff] }
 0x116   : > { %1867 = vmatpush.msra.mxu2 %v1856_v57 }
 0x117   : > { %7766 = vmatmul.msk.f32.gmra.mxu0 %vm524_vm0, %v12116_v34  ;;  %7798 = vmatmul.msk.f32.gmra.mxu1 %vm525_vm1, %v12116_v34  ;;  %vm532_vm0 = vcmp.eq.s32.totalorder %v451_v62, %v8895_v25  ;;  %vm533_vm1 = vcmp.eq.s32.totalorder %v451_v62, %v8900_v29  ;;  %v1851_v62 = vld [vmem:[#allocation8 + $0x298] sm:$0xff] }
 0x118   : > { %1868 = vmatpush.msra.mxu2 %v1854_v36  ;;  %1983 = vmatpush.msra.mxu3 %v1851_v62 }
 0x119   : > { %v445_v2 = vpop.permute.xlu1 %444 }
 0x11a   : > { %vm528_vm8 = vcmp.eq.s32.totalorder %v445_v2, %v8895_v25  ;;  %vm529_vm9 = vcmp.eq.s32.totalorder %v445_v2, %v8900_v29  ;;  %1869 = vmatpush.msra.mxu2 %v1852_v49  ;;  %1984 = vmatpush.msra.mxu3 %v1849_v32 }
 0x11b   : > { %v454_v63 = vpop.permute.xlu2 %453 }
 0x11d   : > { %7788 = vmatmul.msk.f32.gmra.mxu2 %vm568_vm2, %v12116_v34  ;;  %7820 = vmatmul.msk.f32.gmra.mxu3 %vm569_vm3, %v12116_v34  ;;  %vm1058_vm2 = vcmp.eq.s32.totalorder %v8989_v18, %v8895_v25  ;;  %vm1059_vm3 = vcmp.eq.s32.totalorder %v8989_v18, %v8900_v29 }
 0x11f   : > { %7767 = vmatmul.msk.f32.gmra.mxu0 %vm526_vm4, %v12116_v34  ;;  %7799 = vmatmul.msk.f32.gmra.mxu1 %vm527_vm5, %v12116_v34  ;;  %vm534_vm4 = vcmp.eq.s32.totalorder %v454_v63, %v8895_v25  ;;  %vm535_vm5 = vcmp.eq.s32.totalorder %v454_v63, %v8900_v29 }
 0x121   : > { %v448_v55 = vpop.permute.xlu1 %447 }
 0x122   : > { %vm530_vm12 = vcmp.eq.s32.totalorder %v448_v55, %v8895_v25  ;;  %vm531_vm13 = vcmp.eq.s32.totalorder %v448_v55, %v8900_v29 }
 0x123   : > { %v457_v18 = vpop.permute.xlu2 %456 }
 0x125   : > { %7885 = vmatmul.msk.f32.vlgmr.msrb.gmra.mxu2 %vm1052_vm6, %v12116_v34  ;;  %7917 = vmatmul.msk.f32.vlgmr.msrb.gmra.mxu3 %vm1053_vm7, %v12116_v34  ;;  %vm1060_vm6 = vcmp.eq.s32.totalorder %v9005_v8, %v8895_v25  ;;  %vm1061_vm7 = vcmp.eq.s32.totalorder %v9005_v8, %v8900_v29 }
 0x127   : > { %7768 = vmatmul.msk.f32.gmra.mxu0 %vm528_vm8, %v12116_v34  ;;  %7800 = vmatmul.msk.f32.gmra.mxu1 %vm529_vm9, %v12116_v34  ;;  %vm536_vm8 = vcmp.eq.s32.totalorder %v457_v18, %v8895_v25  ;;  %vm537_vm9 = vcmp.eq.s32.totalorder %v457_v18, %v8900_v29  ;;  %v1505_v18 = vld [vmem:[#allocation6 + $0x108] sm:$0xff] }
 0x128   : > { %v795_v53 = vpop.f32.mrf.mxu2  ;;  %v908_v12 = vpop.f32.mrf.mxu3 }
 0x129   : > { %v9110_v54 = vadd.f32 %v908_v12, %v795_v53 }
 0x12b   : > { %12322 = vst [vmem:[#allocation19_spill] sm:$0xff] %v9110_v54 }
 0x12c   : > { %v1000_v50 = vpop.permute.xlu1 %999 }
 0x12d   : > { %7886 = vmatmul.msk.f32.gmra.mxu2 %vm1054_vm10, %v12116_v34  ;;  %7918 = vmatmul.msk.f32.gmra.mxu3 %vm1055_vm11, %v12116_v34  ;;  %vm1062_vm10 = vcmp.eq.s32.totalorder %v9019_v19, %v8895_v25  ;;  %vm1063_vm11 = vcmp.eq.s32.totalorder %v9019_v19, %v8900_v29 }
 0x12f   : > { %7769 = vmatmul.msk.f32.gmra.mxu0 %vm530_vm12, %v12116_v34  ;;  %7801 = vmatmul.msk.f32.gmra.mxu1 %vm531_vm13, %v12116_v34  ;;  %vm1064_vm12 = vcmp.eq.s32.totalorder %v9048_v16, %v8895_v25  ;;  %vm1065_vm13 = vcmp.eq.s32.totalorder %v9048_v16, %v8900_v29 }
 0x130   : > { %v798_v61 = vpop.f32.mrf.mxu2  ;;  %v911_v3 = vpop.f32.mrf.mxu3 }
 0x131   : > { %v9124_v4 = vadd.f32 %v911_v3, %v798_v61  ;;  %v1850_v3 = vld [vmem:[#allocation8 + $0x290] sm:$0xff] }
 0x132   : > { %1870 = vmatpush.msra.mxu2 %v1850_v3 }
 0x133   : > { %12323 = vst [vmem:[#allocation20_spill] sm:$0xff] %v9124_v4  ;;  %v747_v33 = vpop.f32.mrf.mxu0  ;;  %v860_v8 = vpop.f32.mrf.mxu1 }
 0x134   : > { %v9166_v35 = vadd.f32 %v860_v8, %v747_v33 }
 0x135   : > { %7887 = vmatmul.msk.f32.gmra.mxu2 %vm1056_vm14, %v12116_v34  ;;  %7919 = vmatmul.msk.f32.gmra.mxu3 %vm1057_vm15, %v12116_v34  ;;  %vm1066_vm14 = vcmp.eq.s32.totalorder %v9036_v14, %v8895_v25  ;;  %vm1067_vm15 = vcmp.eq.s32.totalorder %v9036_v14, %v8900_v29  ;;  %v1508_v14 = vld [vmem:[#allocation6 + $0x120] sm:$0xff] }
 0x136   : > { %1547 = vmatpush.msrb.mxu0 %v1508_v14 }
 0x137   : > { %7770 = vmatmul.msk.f32.gmra.mxu0 %vm532_vm0, %v12116_v34  ;;  %7802 = vmatmul.msk.f32.gmra.mxu1 %vm533_vm1, %v12116_v34  ;;  %vm1068_vm0 = vcmp.eq.s32.totalorder %v9058_v24, %v8895_v25  ;;  %vm1069_vm1 = vcmp.eq.s32.totalorder %v9058_v24, %v8900_v29 }
 0x138   : > { %v801_v17 = vpop.f32.mrf.mxu2  ;;  %v914_v10 = vpop.f32.mrf.mxu3  ;;  %1548 = vmatpush.msrb.mxu0 %v1507_v1 }
 0x139   : > { %v9136_v11 = vadd.f32 %v914_v10, %v801_v17 }
 0x13b   : > { %12324 = vst [vmem:[#allocation21_spill] sm:$0xff] %v9136_v11 }
 0x13d   : > { %7888 = vmatmul.msk.f32.gmra.mxu2 %vm1058_vm2, %v12116_v34  ;;  %7920 = vmatmul.msk.f32.gmra.mxu3 %vm1059_vm3, %v12116_v34  ;;  %vm1070_vm2 = vcmp.eq.s32.totalorder %v9062_v30, %v8895_v25  ;;  %vm1071_vm3 = vcmp.eq.s32.totalorder %v9062_v30, %v8900_v29  ;;  %v1506_v30 = vld [vmem:[#allocation6 + $0x110] sm:$0xff] }
 0x13e   : > { %1549 = vmatpush.msrb.mxu0 %v1506_v30 }
 0x13f   : > { %7771 = vmatmul.msk.f32.gmra.mxu0 %vm534_vm4, %v12116_v34  ;;  %7803 = vmatmul.msk.f32.gmra.mxu1 %vm535_vm5, %v12116_v34  ;;  %vm1072_vm4 = vcmp.eq.s32.totalorder %v9082_v38, %v8895_v25  ;;  %vm1073_vm5 = vcmp.eq.s32.totalorder %v9082_v38, %v8900_v29 }
 0x140   : > { %v804_v21 = vpop.f32.mrf.mxu2  ;;  %v917_v22 = vpop.f32.mrf.mxu3  ;;  %1550 = vmatpush.msrb.mxu0 %v1505_v18 }
 0x141   : > { %v9148_v23 = vadd.f32 %v917_v22, %v804_v21 }
 0x143   : > { %12325 = vst [vmem:[#allocation22_spill] sm:$0xff] %v9148_v23 }
 0x145   : > { %7889 = vmatmul.msk.f32.gmra.mxu2 %vm1060_vm6, %v12116_v34  ;;  %7921 = vmatmul.msk.f32.gmra.mxu3 %vm1061_vm7, %v12116_v34  ;;  %vm1074_vm6 = vcmp.eq.s32.totalorder %v9108_v51, %v8895_v25  ;;  %vm1075_vm7 = vcmp.eq.s32.totalorder %v9108_v51, %v8900_v29  ;;  %v1504_v51 = vld [vmem:[#allocation6 + $0x100] sm:$0xff] }
 0x146   : > { %1551 = vmatpush.msrb.mxu0 %v1504_v51 }
 0x147   : > { %7772 = vmatmul.msk.f32.gmra.mxu0 %vm536_vm8, %v12116_v34  ;;  %7804 = vmatmul.msk.f32.gmra.mxu1 %vm537_vm9, %v12116_v34  ;;  %vm1076_vm8 = vcmp.eq.s32.totalorder %v9100_v0, %v8895_v25  ;;  %vm1077_vm9 = vcmp.eq.s32.totalorder %v9100_v0, %v8900_v29 }
 0x148   : > { %v807_v27 = vpop.f32.mrf.mxu2  ;;  %v920_v28 = vpop.f32.mrf.mxu3 }
 0x149   : > { %v9160_v31 = vadd.f32 %v920_v28, %v807_v27  ;;  %v1848_v28 = vld [vmem:[#allocation8 + $0x280] sm:$0xff] }
 0x14a   : > { %1871 = vmatpush.msra.mxu2 %v1848_v28  ;;  %v2185_v28 = vld [vmem:[#allocation9 + $0x2f0] sm:$0xff] }
 0x14b   : > { %12326 = vst [vmem:[#allocation23_spill] sm:$0xff] %v9160_v31 }
 0x14c   : > { %1872 = vmatpush.msra.mxu2 %v1846_v6 }
 0x14d   : > { %7890 = vmatmul.msk.f32.gmra.mxu2 %vm1062_vm10, %v12116_v34  ;;  %7922 = vmatmul.msk.f32.gmra.mxu3 %vm1063_vm11, %v12116_v34  ;;  %vm1078_vm10 = vcmp.eq.s32.totalorder %v9120_v59, %v8895_v25  ;;  %vm1079_vm11 = vcmp.eq.s32.totalorder %v9120_v59, %v8900_v29 }
 0x14f   : > { %1665 = vmatmul.f32.vlgmr.msrb.gmra.mxu1 %v9166_v35 }
 0x150   : > { %v810_v39 = vpop.f32.mrf.mxu2  ;;  %v923_v41 = vpop.f32.mrf.mxu3 }
 0x151   : > { %v9171_v40 = vadd.f32 %v923_v41, %v810_v39 }
 0x153   : > { %12327 = vst [vmem:[#allocation24_spill] sm:$0xff] %v9171_v40 }
 0x154   : > { %v750_v19 = vpop.f32.mrf.mxu0  ;;  %v863_v43 = vpop.f32.mrf.mxu1 }
 0x155   : > { %7891 = vmatmul.msk.f32.gmra.mxu2 %vm1064_vm12, %v12116_v34  ;;  %7923 = vmatmul.msk.f32.gmra.mxu3 %vm1065_vm13, %v12116_v34  ;;  %v9179_v44 = vadd.f32 %v863_v43, %v750_v19  ;;  %vm1080_vm12 = vcmp.eq.s32.totalorder %v1000_v50, %v8895_v25  ;;  %vm1081_vm13 = vcmp.eq.s32.totalorder %v1000_v50, %v8900_v29 }
 0x157   : > { %1668 = vmatmul.f32.gmra.mxu1 %v9179_v44 }
 0x158   : > { %v813_v45 = vpop.f32.mrf.mxu2  ;;  %v926_v2 = vpop.f32.mrf.mxu3 }
 0x159   : > { %v9182_v46 = vadd.f32 %v926_v2, %v813_v45 }
 0x15b   : > { %12328 = vst [vmem:[#allocation25_spill] sm:$0xff] %v9182_v46 }
 0x15c   : > { %v753_v16 = vpop.f32.mrf.mxu0  ;;  %v866_v47 = vpop.f32.mrf.mxu1 }
 0x15d   : > { %7892 = vmatmul.msk.f32.gmra.mxu2 %vm1066_vm14, %v12116_v34  ;;  %7924 = vmatmul.msk.f32.gmra.mxu3 %vm1067_vm15, %v12116_v34  ;;  %v9190_v48 = vadd.f32 %v866_v47, %v753_v16  ;;  %v1847_v16 = vld [vmem:[#allocation8 + $0x278] sm:$0xff] }
 0x15e   : > { %1985 = vmatpush.msra.mxu3 %v1847_v16  ;;  %v1012_v16 = vpop.permute.xlu2 %1011 }
 0x15f   : > { %1671 = vmatmul.f32.gmra.mxu1 %v9190_v48 }
 0x160   : > { %v816_v9 = vpop.f32.mrf.mxu2  ;;  %v929_v52 = vpop.f32.mrf.mxu3 }
 0x161   : > { %v9193_v53 = vadd.f32 %v929_v52, %v816_v9 }
 0x163   : > { %12329 = vst [vmem:[#allocation26_spill] sm:$0xff] %v9193_v53 }
 0x164   : > { %v756_v12 = vpop.f32.mrf.mxu0  ;;  %v869_v55 = vpop.f32.mrf.mxu1 }
 0x165   : > { %7893 = vmatmul.msk.f32.gmra.mxu2 %vm1068_vm0, %v12116_v34  ;;  %7925 = vmatmul.msk.f32.gmra.mxu3 %vm1069_vm1, %v12116_v34  ;;  %v9201_v56 = vadd.f32 %v869_v55, %v756_v12  ;;  %v2170_v12 = vld [vmem:[#allocation9 + $0x278] sm:$0xff] }
 0x166   : > { %v2186_v55 = vld [vmem:[#allocation9 + $0x2f8] sm:$0xff]  ;;  %2187 = vmatpush.msra.mxu0 %v2170_v12  ;;  %v2184_v12 = vld [vmem:[#allocation9 + $0x2e8] sm:$0xff] }
 0x167   : > { %1674 = vmatmul.f32.gmra.mxu1 %v9201_v56 }
 0x168   : > { %v819_v15 = vpop.f32.mrf.mxu2  ;;  %v932_v58 = vpop.f32.mrf.mxu3  ;;  %2300 = vmatpush.msra.mxu1 %v2186_v55 }
 0x169   : > { %v9204_v5 = vadd.f32 %v932_v58, %v819_v15 }
 0x16a   : > { %2301 = vmatpush.msra.mxu1 %v2185_v28 }
 0x16b   : > { %12330 = vst [vmem:[#allocation27_spill] sm:$0xff] %v9204_v5 }
 0x16c   : > { %v759_v24 = vpop.f32.mrf.mxu0  ;;  %v872_v60 = vpop.f32.mrf.mxu1  ;;  %2302 = vmatpush.msra.mxu1 %v2184_v12  ;;  %v2166_v12 = vld [vmem:[#allocation9 + $0x258] sm:$0xff] }
 0x16d   : > { %7894 = vmatmul.msk.f32.gmra.mxu2 %vm1070_vm2, %v12116_v34  ;;  %7926 = vmatmul.msk.f32.gmra.mxu3 %vm1071_vm3, %v12116_v34  ;;  %v9212_v61 = vadd.f32 %v872_v60, %v759_v24  ;;  %v1003_v24 = vpop.permute.xlu1 %1002 }
 0x16e   : > { %vm1082_vm14 = vcmp.eq.s32.totalorder %v1003_v24, %v8895_v25  ;;  %vm1083_vm15 = vcmp.eq.s32.totalorder %v1003_v24, %v8900_v29 }
 0x16f   : > { %1677 = vmatmul.f32.gmra.mxu1 %v9212_v61 }
 0x170   : > { %v822_v7 = vpop.f32.mrf.mxu2  ;;  %v935_v63 = vpop.f32.mrf.mxu3 }
 0x171   : > { %v9215_v17 = vadd.f32 %v935_v63, %v822_v7  ;;  %v1844_v7 = vld [vmem:[#allocation8 + $0x260] sm:$0xff]  ;;  %v1845_v63 = vld [vmem:[#allocation8 + $0x268] sm:$0xff] }
 0x172   : > { %1873 = vmatpush.msra.mxu2 %v1844_v7  ;;  %1986 = vmatpush.msra.mxu3 %v1845_v63  ;;  %v1840_v63 = vld [vmem:[#allocation8 + $0x240] sm:$0xff] }
 0x173   : > { %12331 = vst [vmem:[#allocation28_spill] sm:$0xff] %v9215_v17 }
 0x174   : > { %v762_v10 = vpop.f32.mrf.mxu0  ;;  %v875_v20 = vpop.f32.mrf.mxu1 }
 0x175   : > { %7895 = vmatmul.msk.f32.gmra.mxu2 %vm1072_vm4, %v12116_v34  ;;  %7927 = vmatmul.msk.f32.gmra.mxu3 %vm1073_vm5, %v12116_v34  ;;  %v9223_v57 = vadd.f32 %v875_v20, %v762_v10  ;;  %v1006_v20 = vpop.permute.xlu0 %1005  ;;  %v1009_v51 = vpop.permute.xlu1 %1008  ;;  %vm1088_vm4 = vcmp.eq.s32.totalorder %v1012_v16, %v8895_v25  ;;  %vm1089_vm5 = vcmp.eq.s32.totalorder %v1012_v16, %v8900_v29 }
 0x176   : > { %vm1084_vm0 = vcmp.eq.s32.totalorder %v1006_v20, %v8895_v25  ;;  %vm1085_vm1 = vcmp.eq.s32.totalorder %v1006_v20, %v8900_v29  ;;  %vm1086_vm2 = vcmp.eq.s32.totalorder %v1009_v51, %v8895_v25  ;;  %vm1087_vm3 = vcmp.eq.s32.totalorder %v1009_v51, %v8900_v29  ;;  %v2183_v51 = vld [vmem:[#allocation9 + $0x2e0] sm:$0xff] }
 0x177   : > { %1680 = vmatmul.f32.gmra.mxu1 %v9223_v57 }
 0x178   : > { %v825_v13 = vpop.f32.mrf.mxu2  ;;  %v938_v21 = vpop.f32.mrf.mxu3  ;;  %2303 = vmatpush.msra.mxu1 %v2183_v51 }
 0x179   : > { %v9226_v22 = vadd.f32 %v938_v21, %v825_v13 }
 0x17b   : > { %12332 = vst [vmem:[#allocation29_spill] sm:$0xff] %v9226_v22 }
 0x17c   : > { %v765_v38 = vpop.f32.mrf.mxu0  ;;  %v878_v26 = vpop.f32.mrf.mxu1 }
 0x17d   : > { %7896 = vmatmul.msk.f32.gmra.mxu2 %vm1074_vm6, %v12116_v34  ;;  %7928 = vmatmul.msk.f32.gmra.mxu3 %vm1075_vm7, %v12116_v34  ;;  %v9234_v27 = vadd.f32 %v878_v26, %v765_v38  ;;  %v2169_v26 = vld [vmem:[#allocation9 + $0x270] sm:$0xff]  ;;  %v1015_v24 = vpop.permute.xlu1 %1014 }
 0x17e   : > { %2188 = vmatpush.msra.mxu0 %v2169_v26  ;;  %vm1090_vm6 = vcmp.eq.s32.totalorder %v1015_v24, %v8895_v25  ;;  %vm1091_vm7 = vcmp.eq.s32.totalorder %v1015_v24, %v8900_v29 }
 0x17f   : > { %1683 = vmatmul.f32.gmra.mxu1 %v9234_v27 }
 0x180   : > { %v828_v33 = vpop.f32.mrf.mxu2  ;;  %v941_v8 = vpop.f32.mrf.mxu3 }
 0x181   : > { %v9237_v36 = vadd.f32 %v941_v8, %v828_v33 }
 0x183   : > { %12333 = vst [vmem:[#allocation30_spill] sm:$0xff] %v9237_v36 }
 0x184   : > { %v768_v37 = vpop.f32.mrf.mxu0  ;;  %v881_v39 = vpop.f32.mrf.mxu1 }
 0x185   : > { %7897 = vmatmul.msk.f32.gmra.mxu2 %vm1076_vm8, %v12116_v34  ;;  %7929 = vmatmul.msk.f32.gmra.mxu3 %vm1077_vm9, %v12116_v34  ;;  %v9245_v41 = vadd.f32 %v881_v39, %v768_v37 }
 0x187   : > { %12334 = vst [vmem:[#allocation31_spill] sm:$0xff] %v9245_v41  ;;  %1686 = vmatmul.f32.gmra.mxu1 %v9245_v41 }
 0x188   : > { %v831_v42 = vpop.f32.mrf.mxu2  ;;  %v944_v19 = vpop.f32.mrf.mxu3 }
 0x189   : > { %v9248_v43 = vadd.f32 %v944_v19, %v831_v42  ;;  %v1842_v19 = vld [vmem:[#allocation8 + $0x250] sm:$0xff] }
 0x18a   : > { %1874 = vmatpush.msra.mxu2 %v1842_v19 }
 0x18b   : > { %12335 = vst [vmem:[#allocation32_spill] sm:$0xff] %v9248_v43 }
 0x18c   : > { %v771_v0 = vpop.f32.mrf.mxu0  ;;  %v884_v45 = vpop.f32.mrf.mxu1  ;;  %1875 = vmatpush.msra.mxu2 %v1840_v63  ;;  %v1836_v63 = vld [vmem:[#allocation8 + $0x220] sm:$0xff] }
 0x18d   : > { %v9254_v2 = vadd.f32 %v884_v45, %v771_v0  ;;  %7898 = vmatmul.msk.f32.gmra.mxu2 %vm1078_vm10, %v12116_v34  ;;  %7930 = vmatmul.msk.f32.gmra.mxu3 %vm1079_vm11, %v12116_v34  ;;  %v1843_v0 = vld [vmem:[#allocation8 + $0x258] sm:$0xff] }
 0x18e   : > { %1987 = vmatpush.msra.mxu3 %v1843_v0  ;;  %v1021_v0 = vpop.permute.xlu0 %1020 }
 0x18f   : > { %12336 = vst [vmem:[#allocation33_spill] sm:$0xff] %v9254_v2  ;;  %1689 = vmatmul.f32.gmra.mxu1 %v9254_v2  ;;  %vm1094_vm10 = vcmp.eq.s32.totalorder %v1021_v0, %v8895_v25  ;;  %vm1095_vm11 = vcmp.eq.s32.totalorder %v1021_v0, %v8900_v29 }
 0x190   : > { %v834_v47 = vpop.f32.mrf.mxu2  ;;  %v947_v49 = vpop.f32.mrf.mxu3 }
 0x191   : > { %v9259_v9 = vadd.f32 %v947_v49, %v834_v47 }
 0x193   : > { %12337 = vst [vmem:[#allocation34_spill] sm:$0xff] %v9259_v9 }
 0x194   : > { %v774_v59 = vpop.f32.mrf.mxu0  ;;  %v887_v52 = vpop.f32.mrf.mxu1 }
 0x195   : > { %v9263_v14 = vadd.f32 %v887_v52, %v774_v59  ;;  %7899 = vmatmul.msk.f32.gmra.mxu2 %vm1080_vm12, %v12116_v34  ;;  %7931 = vmatmul.msk.f32.gmra.mxu3 %vm1081_vm13, %v12116_v34  ;;  %v2168_v52 = vld [vmem:[#allocation9 + $0x268] sm:$0xff] }
 0x196   : > { %2189 = vmatpush.msra.mxu0 %v2168_v52  ;;  %v1024_v52 = vpop.permute.xlu1 %1023 }
 0x197   : > { %12338 = vst [vmem:[#allocation35_spill] sm:$0xff] %v9263_v14  ;;  %1692 = vmatmul.f32.gmra.mxu1 %v9263_v14  ;;  %vm1096_vm12 = vcmp.eq.s32.totalorder %v1024_v52, %v8895_v25  ;;  %vm1097_vm13 = vcmp.eq.s32.totalorder %v1024_v52, %v8900_v29  ;;  %v2463_v14 = vld [vmem:[#allocation8 + $0x388] sm:$0xff] }
 0x198   : > { %v837_v15 = vpop.f32.mrf.mxu2  ;;  %v950_v58 = vpop.f32.mrf.mxu3 }
 0x199   : > { %v9268_v1 = vadd.f32 %v950_v58, %v837_v15 }
 0x19b   : > { %12339 = vst [vmem:[#allocation36_spill] sm:$0xff] %v9268_v1 }
 0x19c   : > { %v777_v60 = vpop.f32.mrf.mxu0  ;;  %v890_v3 = vpop.f32.mrf.mxu1 }
 0x19d   : > { %v9272_v62 = vadd.f32 %v890_v3, %v777_v60  ;;  %7900 = vmatmul.msk.f32.gmra.mxu2 %vm1082_vm14, %v12116_v34  ;;  %7932 = vmatmul.msk.f32.gmra.mxu3 %vm1083_vm15, %v12116_v34 }
 0x19f   : > { %12340 = vst [vmem:[#allocation37_spill] sm:$0xff] %v9272_v62  ;;  %1695 = vmatmul.f32.gmra.mxu1 %v9272_v62 }
 0x1a0   : > { %v840_v30 = vpop.f32.mrf.mxu2  ;;  %v953_v10 = vpop.f32.mrf.mxu3 }
 0x1a1   : > { %v9277_v13 = vadd.f32 %v953_v10, %v840_v30  ;;  %v1841_v30 = vld [vmem:[#allocation8 + $0x248] sm:$0xff] }
 0x1a2   : > { %1988 = vmatpush.msra.mxu3 %v1841_v30  ;;  %v1837_v30 = vld [vmem:[#allocation8 + $0x228] sm:$0xff] }
 0x1a3   : > { %12341 = vst [vmem:[#allocation38_spill] sm:$0xff] %v9277_v13 }
 0x1a4   : > { %v780_v21 = vpop.f32.mrf.mxu0  ;;  %v893_v18 = vpop.f32.mrf.mxu1 }
 0x1a5   : > { %v9281_v38 = vadd.f32 %v893_v18, %v780_v21  ;;  %7901 = vmatmul.msk.f32.gmra.mxu2 %vm1084_vm0, %v12116_v34  ;;  %7933 = vmatmul.msk.f32.gmra.mxu3 %vm1085_vm1, %v12116_v34  ;;  %v1018_v18 = vpop.permute.xlu2 %1017 }
 0x1a6   : > { %vm1092_vm8 = vcmp.eq.s32.totalorder %v1018_v18, %v8895_v25  ;;  %vm1093_vm9 = vcmp.eq.s32.totalorder %v1018_v18, %v8900_v29 }
 0x1a7   : > { %12342 = vst [vmem:[#allocation39_spill] sm:$0xff] %v9281_v38  ;;  %1698 = vmatmul.f32.gmra.mxu1 %v9281_v38 }
 0x1a8   : > { %v1294_v32 = vpop.f32.mrf.mxu2  ;;  %v1407_v33 = vpop.f32.mrf.mxu3 }
 0x1a9   : > { %v9286_v8 = vadd.f32 %v1407_v33, %v1294_v32  ;;  %v2167_v33 = vld [vmem:[#allocation9 + $0x260] sm:$0xff] }
 0x1aa   : > { %2190 = vmatpush.msra.mxu0 %v2167_v33  ;;  %v2181_v33 = vld [vmem:[#allocation9 + $0x2d0] sm:$0xff] }
 0x1ab   : > { %1552 = vmatmul.f32.vlgmr.msrb.gmra.mxu0 %v9286_v8 }
 0x1ac   : > { %v783_v37 = vpop.f32.mrf.mxu0  ;;  %v896_v39 = vpop.f32.mrf.mxu1  ;;  %2191 = vmatpush.msra.mxu0 %v2166_v12 }
 0x1ad   : > { %v9291_v42 = vadd.f32 %v896_v39, %v783_v37  ;;  %7902 = vmatmul.msk.f32.gmra.mxu2 %vm1086_vm2, %v12116_v34  ;;  %7934 = vmatmul.msk.f32.gmra.mxu3 %vm1087_vm3, %v12116_v34 }
 0x1af   : > { %12343 = vst [vmem:[#allocation40_spill] sm:$0xff] %v9291_v42  ;;  %1701 = vmatmul.f32.gmra.mxu1 %v9291_v42 }
 0x1b0   : > { %v1297_v45 = vpop.f32.mrf.mxu2  ;;  %v1410_v6 = vpop.f32.mrf.mxu3 }
 0x1b1   : > { %v9296_v47 = vadd.f32 %v1410_v6, %v1297_v45  ;;  %v1838_v45 = vld [vmem:[#allocation8 + $0x230] sm:$0xff]  ;;  %v1839_v6 = vld [vmem:[#allocation8 + $0x238] sm:$0xff] }
 0x1b2   : > { %1876 = vmatpush.msra.mxu2 %v1838_v45  ;;  %1989 = vmatpush.msra.mxu3 %v1839_v6  ;;  %v1033_v45 = vpop.permute.xlu1 %1032  ;;  %v1834_v6 = vld [vmem:[#allocation8 + $0x210] sm:$0xff] }
 0x1b3   : > { %1555 = vmatmul.f32.gmra.mxu0 %v9296_v47  ;;  %vm1102_vm2 = vcmp.eq.s32.totalorder %v1033_v45, %v8895_v25  ;;  %vm1103_vm3 = vcmp.eq.s32.totalorder %v1033_v45, %v8900_v29 }
 0x1b4   : > { %v786_v49 = vpop.f32.mrf.mxu0  ;;  %v899_v50 = vpop.f32.mrf.mxu1  ;;  %1877 = vmatpush.msra.mxu2 %v1836_v63  ;;  %1990 = vmatpush.msra.mxu3 %v1837_v30 }
 0x1b5   : > { %v9301_v59 = vadd.f32 %v899_v50, %v786_v49  ;;  %7903 = vmatmul.msk.f32.gmra.mxu2 %vm1088_vm4, %v12116_v34  ;;  %7935 = vmatmul.msk.f32.gmra.mxu3 %vm1089_vm5, %v12116_v34 }
 0x1b6   : > { %1878 = vmatpush.msra.mxu2 %v1834_v6 }
 0x1b7   : > { %12344 = vst [vmem:[#allocation41_spill] sm:$0xff] %v9301_v59  ;;  %1704 = vmatmul.f32.gmra.mxu1 %v9301_v59 }
 0x1b8   : > { %v1300_v55 = vpop.f32.mrf.mxu2  ;;  %v1413_v15 = vpop.f32.mrf.mxu3 }
 0x1b9   : > { %v9306_v58 = vadd.f32 %v1413_v15, %v1300_v55  ;;  %v2182_v55 = vld [vmem:[#allocation9 + $0x2d8] sm:$0xff] }
 0x1ba   : > { %2304 = vmatpush.msra.mxu1 %v2182_v55  ;;  %v1042_v6 = vpop.permute.xlu1 %1041 }
 0x1bb   : > { %1558 = vmatmul.f32.gmra.mxu0 %v9306_v58 }
 0x1bc   : > { %v789_v60 = vpop.f32.mrf.mxu0  ;;  %v902_v3 = vpop.f32.mrf.mxu1  ;;  %2305 = vmatpush.msra.mxu1 %v2181_v33  ;;  %v1833_v33 = vld [vmem:[#allocation8 + $0x208] sm:$0xff] }
 0x1bd   : > { %v9311_v7 = vadd.f32 %v902_v3, %v789_v60  ;;  %7904 = vmatmul.msk.f32.gmra.mxu2 %vm1090_vm6, %v12116_v34  ;;  %7936 = vmatmul.msk.f32.gmra.mxu3 %vm1091_vm7, %v12116_v34  ;;  %v1027_v3 = vpop.permute.xlu2 %1026 }
 0x1be   : > { %vm1098_vm14 = vcmp.eq.s32.totalorder %v1027_v3, %v8895_v25  ;;  %vm1099_vm15 = vcmp.eq.s32.totalorder %v1027_v3, %v8900_v29  ;;  %v2180_v3 = vld [vmem:[#allocation9 + $0x2c8] sm:$0xff] }
 0x1bf   : > { %12345 = vst [vmem:[#allocation42_spill] sm:$0xff] %v9311_v7  ;;  %1707 = vmatmul.f32.gmra.mxu1 %v9311_v7  ;;  %v2467_v7 = vld [vmem:[#allocation8 + $0x3a8] sm:$0xff] }
 0x1c0   : > { %v1303_v10 = vpop.f32.mrf.mxu2  ;;  %v1416_v20 = vpop.f32.mrf.mxu3  ;;  %2306 = vmatpush.msra.mxu1 %v2180_v3 }
 0x1c1   : > { %v9316_v21 = vadd.f32 %v1416_v20, %v1303_v10 }
 0x1c3   : > { %1561 = vmatmul.f32.gmra.mxu0 %v9316_v21 }
 0x1c4   : > { %v792_v26 = vpop.f32.mrf.mxu0  ;;  %v905_v28 = vpop.f32.mrf.mxu1 }
 0x1c5   : > { %v9321_v32 = vadd.f32 %v905_v28, %v792_v26  ;;  %7905 = vmatmul.msk.f32.gmra.mxu2 %vm1092_vm8, %v12116_v34  ;;  %7937 = vmatmul.msk.f32.gmra.mxu3 %vm1093_vm9, %v12116_v34  ;;  %v1030_v26 = vpop.permute.xlu0 %1029  ;;  %v2165_v28 = vld [vmem:[#allocation9 + $0x250] sm:$0xff]  ;;  %v1036_v55 = vpop.permute.xlu2 %1035  ;;  %vm1108_vm8 = vcmp.eq.s32.totalorder %v1042_v6, %v8895_v25  ;;  %vm1109_vm9 = vcmp.eq.s32.totalorder %v1042_v6, %v8900_v29  ;;  %v2178_v6 = vld [vmem:[#allocation9 + $0x2b8] sm:$0xff] }
 0x1c6   : > { %vm1100_vm0 = vcmp.eq.s32.totalorder %v1030_v26, %v8895_v25  ;;  %vm1101_vm1 = vcmp.eq.s32.totalorder %v1030_v26, %v8900_v29  ;;  %2192 = vmatpush.msra.mxu0 %v2165_v28  ;;  %vm1104_vm4 = vcmp.eq.s32.totalorder %v1036_v55, %v8895_v25  ;;  %vm1105_vm5 = vcmp.eq.s32.totalorder %v1036_v55, %v8900_v29  ;;  %v1832_v28 = vld [vmem:[#allocation8 + $0x200] sm:$0xff] }
 0x1c7   : > { %12346 = vst [vmem:[#allocation43_spill] sm:$0xff] %v9321_v32  ;;  %1710 = vmatmul.f32.gmra.mxu1 %v9321_v32  ;;  %1879 = vmatpush.msra.mxu2 %v1832_v28  ;;  %v2466_v32 = vld [vmem:[#allocation8 + $0x3a0] sm:$0xff] }
 0x1c8   : > { %v1306_v37 = vpop.f32.mrf.mxu2  ;;  %v1419_v39 = vpop.f32.mrf.mxu3 }
 0x1c9   : > { %v9326_v19 = vadd.f32 %v1419_v39, %v1306_v37 }
 0x1cb   : > { %1564 = vmatmul.f32.gmra.mxu0 %v9326_v19 }
 0x1cc   : > { %v9358_v39 = vpop.f32.mrf.mxu1 }
 0x1cd   : > { %7906 = vmatmul.msk.f32.gmra.mxu2 %vm1094_vm10, %v12116_v34  ;;  %7938 = vmatmul.msk.f32.gmra.mxu3 %vm1095_vm11, %v12116_v34  ;;  %v1045_v3 = vpop.permute.xlu2 %1044 }
 0x1ce   : > { %vm1110_vm10 = vcmp.eq.s32.totalorder %v1045_v3, %v8895_v25  ;;  %vm1111_vm11 = vcmp.eq.s32.totalorder %v1045_v3, %v8900_v29  ;;  %v1051_v3 = vpop.permute.xlu1 %1050 }
 0x1cf   : > { %1713 = vmatmul.f32.gmra.mxu1 %v9110_v54 }
 0x1d0   : > { %v1309_v16 = vpop.f32.mrf.mxu2  ;;  %v1422_v49 = vpop.f32.mrf.mxu3 }
 0x1d1   : > { %v9334_v50 = vadd.f32 %v1422_v49, %v1309_v16  ;;  %v1835_v16 = vld [vmem:[#allocation8 + $0x218] sm:$0xff] }
 0x1d2   : > { %1991 = vmatpush.msra.mxu3 %v1835_v16  ;;  %v2163_v16 = vld [vmem:[#allocation9 + $0x240] sm:$0xff] }
 0x1d3   : > { %1567 = vmatmul.f32.gmra.mxu0 %v9334_v50 }
 0x1d4   : > { %1992 = vmatpush.msra.mxu3 %v1833_v33 }
 0x1d5   : > { %7907 = vmatmul.msk.f32.gmra.mxu2 %vm1096_vm12, %v12116_v34  ;;  %7939 = vmatmul.msk.f32.gmra.mxu3 %vm1097_vm13, %v12116_v34 }
 0x1d7   : > { %1716 = vmatmul.f32.gmra.mxu1 %v9124_v4 }
 0x1d8   : > { %v1312_v15 = vpop.f32.mrf.mxu2  ;;  %v1425_v24 = vpop.f32.mrf.mxu3 }
 0x1d9   : > { %v9342_v60 = vadd.f32 %v1425_v24, %v1312_v15  ;;  %v9370_v15 = vpop.f32.mrf.mxu1  ;;  %v2164_v24 = vld [vmem:[#allocation9 + $0x248] sm:$0xff] }
 0x1da   : > { %2193 = vmatpush.msra.mxu0 %v2164_v24 }
 0x1db   : > { %12347 = vst [vmem:[#allocation44_spill] sm:$0xff] %v9342_v60  ;;  %1570 = vmatmul.f32.gmra.mxu0 %v9342_v60 }
 0x1dc   : > { %2194 = vmatpush.msra.mxu0 %v2163_v16 }
 0x1dd   : > { %7908 = vmatmul.msk.f32.gmra.mxu2 %vm1098_vm14, %v12116_v34  ;;  %7940 = vmatmul.msk.f32.gmra.mxu3 %vm1099_vm15, %v12116_v34  ;;  %vm1114_vm14 = vcmp.eq.s32.totalorder %v1051_v3, %v8895_v25  ;;  %vm1115_vm15 = vcmp.eq.s32.totalorder %v1051_v3, %v8900_v29 }
 0x1df   : > { %1719 = vmatmul.f32.gmra.mxu1 %v9136_v11 }
 0x1e0   : > { %v1315_v10 = vpop.f32.mrf.mxu2  ;;  %v1428_v20 = vpop.f32.mrf.mxu3 }
 0x1e1   : > { %v9350_v18 = vadd.f32 %v1428_v20, %v1315_v10  ;;  %v1039_v20 = vpop.permute.xlu0 %1038  ;;  %v9383_v26 = vpop.f32.mrf.mxu1 }
 0x1e2   : > { %vm1106_vm6 = vcmp.eq.s32.totalorder %v1039_v20, %v8895_v25  ;;  %vm1107_vm7 = vcmp.eq.s32.totalorder %v1039_v20, %v8900_v29 }
 0x1e3   : > { %12348 = vst [vmem:[#allocation45_spill] sm:$0xff] %v9350_v18  ;;  %1573 = vmatmul.f32.gmra.mxu0 %v9350_v18 }
 0x1e5   : > { %7909 = vmatmul.msk.f32.gmra.mxu2 %vm1100_vm0, %v12116_v34  ;;  %7941 = vmatmul.msk.f32.gmra.mxu3 %vm1101_vm1, %v12116_v34 }
 0x1e7   : > { %1722 = vmatmul.f32.gmra.mxu1 %v9148_v23 }
 0x1e8   : > { %v1318_v51 = vpop.f32.mrf.mxu2  ;;  %v1431_v37 = vpop.f32.mrf.mxu3 }
 0x1e9   : > { %v9360_v0 = vadd.f32 %v1431_v37, %v1318_v51  ;;  %v1048_v28 = vpop.permute.xlu0 %1047 }
 0x1ea   : > { %vm1112_vm12 = vcmp.eq.s32.totalorder %v1048_v28, %v8895_v25  ;;  %vm1113_vm13 = vcmp.eq.s32.totalorder %v1048_v28, %v8900_v29 }
 0x1eb   : > { %12349 = vst [vmem:[#allocation46_spill] sm:$0xff] %v9360_v0  ;;  %1576 = vmatmul.f32.gmra.mxu0 %v9360_v0 }
 0x1ed   : > { %7910 = vmatmul.msk.f32.gmra.mxu2 %vm1102_vm2, %v12116_v34  ;;  %7942 = vmatmul.msk.f32.gmra.mxu3 %vm1103_vm3, %v12116_v34 }
 0x1ef   : > { %1725 = vmatmul.f32.gmra.mxu1 %v9160_v31 }
 0x1f0   : > { %v1321_v49 = vpop.f32.mrf.mxu2  ;;  %v1434_v52 = vpop.f32.mrf.mxu3 }
 0x1f1   : > { %v9368_v12 = vadd.f32 %v1434_v52, %v1321_v49  ;;  %v2179_v49 = vld [vmem:[#allocation9 + $0x2c0] sm:$0xff]  ;;  %v9395_v52 = vpop.f32.mrf.mxu1 }
 0x1f2   : > { %2307 = vmatpush.msra.mxu1 %v2179_v49 }
 0x1f3   : > { %12350 = vst [vmem:[#allocation47_spill] sm:$0xff] %v9368_v12  ;;  %1579 = vmatmul.f32.gmra.mxu0 %v9368_v12 }
 0x1f4   : > { %2308 = vmatpush.msra.mxu1 %v2178_v6 }
 0x1f5   : > { %7911 = vmatmul.msk.f32.gmra.mxu2 %vm1104_vm4, %v12116_v34  ;;  %7943 = vmatmul.msk.f32.gmra.mxu3 %vm1105_vm5, %v12116_v34 }
 0x1f7   : > { %1728 = vmatmul.f32.gmra.mxu1 %v9171_v40 }
 0x1f8   : > { %v1324_v63 = vpop.f32.mrf.mxu2  ;;  %v1437_v30 = vpop.f32.mrf.mxu3 }
 0x1f9   : > { %v9378_v10 = vadd.f32 %v1437_v30, %v1324_v63  ;;  %v9406_v33 = vpop.f32.mrf.mxu1 }
 0x1fb   : > { %12351 = vst [vmem:[#allocation48_spill] sm:$0xff] %v9378_v10  ;;  %1582 = vmatmul.f32.gmra.mxu0 %v9378_v10 }
 0x1fd   : > { %7912 = vmatmul.msk.f32.gmra.mxu2 %vm1106_vm6, %v12116_v34  ;;  %7944 = vmatmul.msk.f32.gmra.mxu3 %vm1107_vm7, %v12116_v34 }
 0x1ff   : > { %1731 = vmatmul.f32.gmra.mxu1 %v9182_v46 }
 0x200   : > { %v1327_v51 = vpop.f32.mrf.mxu2  ;;  %v1440_v37 = vpop.f32.mrf.mxu3 }
 0x201   : > { %v9388_v45 = vadd.f32 %v1440_v37, %v1327_v51  ;;  %v2162_v37 = vld [vmem:[#allocation9 + $0x238] sm:$0xff] }
 0x202   : > { %2195 = vmatpush.msra.mxu0 %v2162_v37 }
 0x203   : > { %12352 = vst [vmem:[#allocation49_spill] sm:$0xff] %v9388_v45  ;;  %1585 = vmatmul.f32.gmra.mxu0 %v9388_v45 }
 0x205   : > { %7913 = vmatmul.msk.f32.gmra.mxu2 %vm1108_vm8, %v12116_v34  ;;  %7945 = vmatmul.msk.f32.gmra.mxu3 %vm1109_vm9, %v12116_v34 }
 0x207   : > { %1734 = vmatmul.f32.gmra.mxu1 %v9193_v53 }
 0x208   : > { %v1330_v55 = vpop.f32.mrf.mxu2  ;;  %v1443_v24 = vpop.f32.mrf.mxu3 }
 0x209   : > { %v9398_v63 = vadd.f32 %v1443_v24, %v1330_v55  ;;  %v2476_v55 = vld [vmem:[#allocation8 + $0x3f0] sm:$0xff]  ;;  %v2477_v24 = vld [vmem:[#allocation8 + $0x3f8] sm:$0xff] }
 0x20a   : > { %2478 = vmatpush.msrb.mxu2 %v2476_v55  ;;  %2591 = vmatpush.msrb.mxu3 %v2477_v24 }
 0x20b   : > { %12353 = vst [vmem:[#allocation50_spill] sm:$0xff] %v9398_v63  ;;  %1588 = vmatmul.f32.gmra.mxu0 %v9398_v63 }
 0x20d   : > { %7914 = vmatmul.msk.f32.gmra.mxu2 %vm1110_vm10, %v12116_v34  ;;  %7946 = vmatmul.msk.f32.gmra.mxu3 %vm1111_vm11, %v12116_v34 }
 0x20f   : > { %1737 = vmatmul.f32.gmra.mxu1 %v9204_v5 }
 0x210   : > { %v1333_v30 = vpop.f32.mrf.mxu2  ;;  %v1446_v20 = vpop.f32.mrf.mxu3 }
 0x211   : > { %v9408_v51 = vadd.f32 %v1446_v20, %v1333_v30  ;;  %v9418_v20 = vpop.f32.mrf.mxu1 }
 0x213   : > { %12354 = vst [vmem:[#allocation51_spill] sm:$0xff] %v9408_v51  ;;  %1591 = vmatmul.f32.gmra.mxu0 %v9408_v51 }
 0x215   : > { %7915 = vmatmul.msk.f32.gmra.mxu2 %vm1112_vm12, %v12116_v34  ;;  %7947 = vmatmul.msk.f32.gmra.mxu3 %vm1113_vm13, %v12116_v34 }
 0x217   : > { %1740 = vmatmul.f32.gmra.mxu1 %v9215_v17  ;;  %v2474_v17 = vld [vmem:[#allocation8 + $0x3e0] sm:$0xff] }
 0x218   : > { %v1336_v16 = vpop.f32.mrf.mxu2  ;;  %v1449_v49 = vpop.f32.mrf.mxu3  ;;  %2479 = vmatpush.msrb.mxu2 %v2474_v17 }
 0x219   : > { %v9416_v30 = vadd.f32 %v1449_v49, %v1336_v16  ;;  %v2161_v16 = vld [vmem:[#allocation9 + $0x230] sm:$0xff]  ;;  %v9429_v55 = vpop.f32.mrf.mxu1 }
 0x21a   : > { %v2177_v49 = vld [vmem:[#allocation9 + $0x2b0] sm:$0xff]  ;;  %2196 = vmatpush.msra.mxu0 %v2161_v16 }
 0x21b   : > { %12355 = vst [vmem:[#allocation52_spill] sm:$0xff] %v9416_v30  ;;  %1594 = vmatmul.f32.gmra.mxu0 %v9416_v30  ;;  %2309 = vmatpush.msra.mxu1 %v2177_v49 }
 0x21d   : > { %7916 = vmatmul.msk.f32.gmra.mxu2 %vm1114_vm14, %v12116_v34  ;;  %7948 = vmatmul.msk.f32.gmra.mxu3 %vm1115_vm15, %v12116_v34  ;;  %v2475_v34 = vld [vmem:[#allocation8 + $0x3e8] sm:$0xff] }
 0x21e   : > { %2592 = vmatpush.msrb.mxu3 %v2475_v34 }
 0x21f   : > { %1743 = vmatmul.f32.gmra.mxu1 %v9226_v22 }
 0x220   : > { %v1339_v28 = vpop.f32.mrf.mxu2  ;;  %v1452_v37 = vpop.f32.mrf.mxu3 }
 0x221   : > { %v9426_v6 = vadd.f32 %v1452_v37, %v1339_v28  ;;  %v9438_v37 = vld [vmem:[%s12108_s3 + $0x1] ss:$0 sm:$0xff] }
 0x223   : > { %12356 = vst [vmem:[#allocation53_spill] sm:$0xff] %v9426_v6  ;;  %1597 = vmatmul.f32.gmra.mxu0 %v9426_v6 }
 0x227   : > { %1746 = vmatmul.f32.gmra.mxu1 %v9237_v36  ;;  %v9445_v36 = vpop.f32.mrf.mxu1 }
 0x228   : > { %v1342_v24 = vpop.f32.mrf.mxu2  ;;  %v1455_v3 = vpop.f32.mrf.mxu3 }
 0x229   : > { %v9432_v5 = vadd.f32 %v1455_v3, %v1342_v24  ;;  %v1553_v22 = vpop.f32.mrf.mxu0 }
 0x22a   : > { %v1667_v28 = vadd.f32 %v9358_v39, %v1553_v22 }
 0x22b   : > { %12357 = vst [vmem:[#allocation54_spill] sm:$0xff] %v9432_v5  ;;  %1600 = vmatmul.f32.gmra.mxu0 %v9432_v5 }
 0x22c   : > { %v1762_v16 = vadd.f32 %v1667_v28, %v9286_v8  ;;  %v2160_v28 = vld [vmem:[#allocation9 + $0x228] sm:$0xff] }
 0x22d   : > { %2197 = vmatpush.msra.mxu0 %v2160_v28 }
 0x22e   : > { %v9443_v49 = vadd.f32 %v9438_v37, %v1762_v16  ;;  %v2176_v16 = vld [vmem:[#allocation9 + $0x2a8] sm:$0xff] }
 0x22f   : > { %1749 = vmatmul.f32.gmra.mxu1 %v9248_v43  ;;  %v9461_v53 = vpop.f32.mrf.mxu1 }
 0x230   : > { %1880 = vmatmul.f32.vlgmr.msra.gmra.mxu2 %v9443_v49  ;;  %1993 = vmatmul.f32.vlgmr.msra.gmra.mxu3 %v9443_v49  ;;  %v1345_v34 = vpop.f32.mrf.mxu2  ;;  %v1458_v17 = vpop.f32.mrf.mxu3 }
 0x231   : > { %v9450_v22 = vadd.f32 %v1458_v17, %v1345_v34  ;;  %v1556_v39 = vpop.f32.mrf.mxu0  ;;  %2310 = vmatpush.msra.mxu1 %v2176_v16 }
 0x232   : > { %v1670_v24 = vadd.f32 %v9370_v15, %v1556_v39  ;;  %v2472_v15 = vld [vmem:[#allocation8 + $0x3d0] sm:$0xff]  ;;  %v2473_v39 = vld [vmem:[#allocation8 + $0x3d8] sm:$0xff] }
 0x233   : > { %12358 = vst [vmem:[#allocation55_spill] sm:$0xff] %v9450_v22  ;;  %1603 = vmatmul.f32.gmra.mxu0 %v9450_v22  ;;  %2480 = vmatpush.msrb.mxu2 %v2472_v15 }
 0x234   : > { %v1763_v3 = vadd.f32 %v1670_v24, %v9296_v47  ;;  %2593 = vmatpush.msrb.mxu3 %v2473_v39 }
 0x236   : > { %v9456_v43 = vadd.f32 %v9438_v37, %v1763_v3 }
 0x237   : > { %1752 = vmatmul.f32.gmra.mxu1 %v9259_v9 }
 0x238   : > { %1883 = vmatmul.f32.gmra.mxu2 %v9456_v43  ;;  %1996 = vmatmul.f32.gmra.mxu3 %v9456_v43  ;;  %v1348_v34 = vpop.f32.mrf.mxu2  ;;  %v1461_v17 = vpop.f32.mrf.mxu3 }
 0x239   : > { %v9463_v24 = vadd.f32 %v1461_v17, %v1348_v34  ;;  %v1559_v46 = vpop.f32.mrf.mxu0 }
 0x23a   : > { %v1673_v3 = vadd.f32 %v9383_v26, %v1559_v46  ;;  %v9477_v26 = vpop.f32.mrf.mxu1 }
 0x23b   : > { %12359 = vst [vmem:[#allocation56_spill] sm:$0xff] %v9463_v24  ;;  %1606 = vmatmul.f32.gmra.mxu0 %v9463_v24 }
 0x23c   : > { %v1764_v28 = vadd.f32 %v1673_v3, %v9306_v58  ;;  %v2159_v3 = vld [vmem:[#allocation9 + $0x220] sm:$0xff] }
 0x23d   : > { %2198 = vmatpush.msra.mxu0 %v2159_v3 }
 0x23e   : > { %v9469_v16 = vadd.f32 %v9438_v37, %v1764_v28  ;;  %v2175_v28 = vld [vmem:[#allocation9 + $0x2a0] sm:$0xff] }
 0x23f   : > { %1755 = vmatmul.f32.gmra.mxu1 %v9268_v1 }
 0x240   : > { %1886 = vmatmul.f32.gmra.mxu2 %v9469_v16  ;;  %1999 = vmatmul.f32.gmra.mxu3 %v9469_v16  ;;  %v1351_v34 = vpop.f32.mrf.mxu2  ;;  %v1464_v17 = vpop.f32.mrf.mxu3 }
 0x241   : > { %v9474_v9 = vadd.f32 %v1464_v17, %v1351_v34  ;;  %v1562_v15 = vpop.f32.mrf.mxu0  ;;  %2311 = vmatpush.msra.mxu1 %v2175_v28  ;;  %v2470_v17 = vld [vmem:[#allocation8 + $0x3c0] sm:$0xff] }
 0x242   : > { %v1676_v46 = vadd.f32 %v9395_v52, %v1562_v15  ;;  %v2471_v15 = vld [vmem:[#allocation8 + $0x3c8] sm:$0xff]  ;;  %2481 = vmatpush.msrb.mxu2 %v2470_v17  ;;  %v9492_v28 = vpop.f32.mrf.mxu1 }
 0x243   : > { %12360 = vst [vmem:[#allocation57_spill] sm:$0xff] %v9474_v9  ;;  %1609 = vmatmul.f32.gmra.mxu0 %v9474_v9  ;;  %2594 = vmatpush.msrb.mxu3 %v2471_v15 }
 0x244   : > { %v1765_v39 = vadd.f32 %v1676_v46, %v9316_v21 }
 0x246   : > { %v9482_v1 = vadd.f32 %v9438_v37, %v1765_v39 }
 0x247   : > { %1758 = vmatmul.f32.gmra.mxu1 %v9277_v13 }
 0x248   : > { %1889 = vmatmul.f32.gmra.mxu2 %v9482_v1  ;;  %2002 = vmatmul.f32.gmra.mxu3 %v9482_v1  ;;  %v1354_v52 = vpop.f32.mrf.mxu2  ;;  %v1467_v34 = vpop.f32.mrf.mxu3 }
 0x249   : > { %v9487_v40 = vadd.f32 %v1467_v34, %v1354_v52  ;;  %v1565_v46 = vpop.f32.mrf.mxu0 }
 0x24a   : > { %v1679_v3 = vadd.f32 %v9406_v33, %v1565_v46  ;;  %v2158_v46 = vld [vmem:[#allocation9 + $0x218] sm:$0xff]  ;;  %v9507_v23 = vpop.f32.mrf.mxu1 }
 0x24b   : > { %12361 = vst [vmem:[#allocation58_spill] sm:$0xff] %v9487_v40  ;;  %1612 = vmatmul.f32.gmra.mxu0 %v9487_v40 }
 0x24c   : > { %v1766_v39 = vadd.f32 %v1679_v3, %v9326_v19  ;;  %v2174_v3 = vld [vmem:[#allocation9 + $0x298] sm:$0xff]  ;;  %2199 = vmatpush.msra.mxu0 %v2158_v46 }
 0x24d   : > { %2312 = vmatpush.msra.mxu1 %v2174_v3 }
 0x24e   : > { %v9495_v13 = vadd.f32 %v9438_v37, %v1766_v39 }
 0x250   : > { %1892 = vmatmul.f32.gmra.mxu2 %v9495_v13  ;;  %2005 = vmatmul.f32.gmra.mxu3 %v9495_v13  ;;  %v1357_v52 = vpop.f32.mrf.mxu2  ;;  %v1470_v34 = vpop.f32.mrf.mxu3 }
 0x251   : > { %v9499_v31 = vadd.f32 %v1470_v34, %v1357_v52  ;;  %v1568_v17 = vpop.f32.mrf.mxu0 }
 0x252   : > { %v1682_v33 = vadd.f32 %v9418_v20, %v1568_v17  ;;  %v2468_v20 = vld [vmem:[#allocation8 + $0x3b0] sm:$0xff]  ;;  %v2469_v17 = vld [vmem:[#allocation8 + $0x3b8] sm:$0xff] }
 0x253   : > { %12362 = vst [vmem:[#allocation59_spill] sm:$0xff] %v9499_v31  ;;  %1615 = vmatmul.f32.gmra.mxu0 %v9499_v31  ;;  %2482 = vmatpush.msrb.mxu2 %v2468_v20 }
 0x254   : > { %v1767_v15 = vadd.f32 %v1682_v33, %v9334_v50  ;;  %2595 = vmatpush.msrb.mxu3 %v2469_v17 }
 0x255   : > { %2483 = vmatpush.msrb.mxu2 %v2466_v32 }
 0x256   : > { %v9505_v39 = vadd.f32 %v9438_v37, %v1767_v15  ;;  %2596 = vmatpush.msrb.mxu3 %v2467_v7 }
 0x258   : > { %1895 = vmatmul.f32.gmra.mxu2 %v9505_v39  ;;  %2008 = vmatmul.f32.gmra.mxu3 %v9505_v39  ;;  %v1360_v52 = vpop.f32.mrf.mxu2  ;;  %v1473_v34 = vpop.f32.mrf.mxu3 }
 0x259   : > { %v9511_v11 = vadd.f32 %v1473_v34, %v1360_v52  ;;  %v1571_v33 = vpop.f32.mrf.mxu0  ;;  %v9521_v52 = vpop.f32.mrf.mxu1 }
 0x25a   : > { %v1685_v46 = vadd.f32 %v9429_v55, %v1571_v33  ;;  %v2157_v33 = vld [vmem:[#allocation9 + $0x210] sm:$0xff] }
 0x25b   : > { %12363 = vst [vmem:[#allocation60_spill] sm:$0xff] %v9511_v11  ;;  %1618 = vmatmul.f32.gmra.mxu0 %v9511_v11 }
 0x25c   : > { %v1768_v15 = vadd.f32 %v1685_v46, %v9342_v60  ;;  %v2173_v46 = vld [vmem:[#allocation9 + $0x290] sm:$0xff]  ;;  %2200 = vmatpush.msra.mxu0 %v2157_v33 }
 0x25d   : > { %2313 = vmatpush.msra.mxu1 %v2173_v46 }
 0x25e   : > { %v9517_v3 = vadd.f32 %v9438_v37, %v1768_v15 }
 0x260   : > { %1898 = vmatmul.f32.gmra.mxu2 %v9517_v3  ;;  %2011 = vmatmul.f32.gmra.mxu3 %v9517_v3  ;;  %v1363_v4 = vpop.f32.mrf.mxu2  ;;  %v1476_v54 = vpop.f32.mrf.mxu3 }
 0x261   : > { %v9523_v34 = vadd.f32 %v1476_v54, %v1363_v4  ;;  %v1574_v20 = vpop.f32.mrf.mxu0  ;;  %v9536_v33 = vpop.f32.mrf.mxu1 }
 0x262   : > { %v1688_v55 = vadd.f32 %v9445_v36, %v1574_v20 }
 0x263   : > { %12364 = vst [vmem:[#allocation61_spill] sm:$0xff] %v9523_v34  ;;  %1621 = vmatmul.f32.gmra.mxu0 %v9523_v34 }
 0x264   : > { %v1769_v17 = vadd.f32 %v1688_v55, %v9350_v18  ;;  %v2800_v18 = vld [vmem:[#allocation9 + $0x3f8] sm:$0xff] }
 0x266   : > { %v9529_v15 = vadd.f32 %v9438_v37, %v1769_v17 }
 0x268   : > { %1901 = vmatmul.f32.gmra.mxu2 %v9529_v15  ;;  %2014 = vmatmul.f32.gmra.mxu3 %v9529_v15  ;;  %v1366_v54 = vpop.f32.mrf.mxu2  ;;  %v1479_v4 = vpop.f32.mrf.mxu3 }
 0x269   : > { %v9533_v36 = vadd.f32 %v1479_v4, %v1366_v54  ;;  %v1577_v20 = vpop.f32.mrf.mxu0  ;;  %v9550_v42 = vpop.f32.mrf.mxu1 }
 0x26a   : > { %v1691_v55 = vadd.f32 %v9461_v53, %v1577_v20  ;;  %v2156_v20 = vld [vmem:[#allocation9 + $0x208] sm:$0xff] }
 0x26b   : > { %12365 = vst [vmem:[#allocation62_spill] sm:$0xff] %v9533_v36  ;;  %1624 = vmatmul.f32.gmra.mxu0 %v9533_v36 }
 0x26c   : > { %v1770_v17 = vadd.f32 %v1691_v55, %v9360_v0  ;;  %v2172_v55 = vld [vmem:[#allocation9 + $0x288] sm:$0xff]  ;;  %2201 = vmatpush.msra.mxu0 %v2156_v20  ;;  %v2460_v0 = vld [vmem:[#allocation8 + $0x370] sm:$0xff] }
 0x26d   : > { %2314 = vmatpush.msra.mxu1 %v2172_v55 }
 0x26e   : > { %v9541_v46 = vadd.f32 %v9438_v37, %v1770_v17 }
 0x270   : > { %1904 = vmatmul.f32.gmra.mxu2 %v9541_v46  ;;  %2017 = vmatmul.f32.gmra.mxu3 %v9541_v46  ;;  %v1369_v54 = vpop.f32.mrf.mxu2  ;;  %v1482_v4 = vpop.f32.mrf.mxu3 }
 0x271   : > { %v9545_v59 = vadd.f32 %v1482_v4, %v1369_v54  ;;  %v1580_v7 = vpop.f32.mrf.mxu0  ;;  %v9565_v55 = vpop.f32.mrf.mxu1 }
 0x272   : > { %v1694_v53 = vadd.f32 %v9477_v26, %v1580_v7  ;;  %v2464_v26 = vld [vmem:[#allocation8 + $0x390] sm:$0xff]  ;;  %v2465_v7 = vld [vmem:[#allocation8 + $0x398] sm:$0xff] }
 0x273   : > { %12366 = vst [vmem:[#allocation63_spill] sm:$0xff] %v9545_v59  ;;  %1627 = vmatmul.f32.gmra.mxu0 %v9545_v59  ;;  %2484 = vmatpush.msrb.mxu2 %v2464_v26 }
 0x274   : > { %v1771_v32 = vadd.f32 %v1694_v53, %v9368_v12  ;;  %2597 = vmatpush.msrb.mxu3 %v2465_v7  ;;  %v2155_v7 = vld [vmem:[#allocation9 + $0x200] sm:$0xff] }
 0x275   : > { %2202 = vmatpush.msra.mxu0 %v2155_v7 }
 0x276   : > { %v9553_v17 = vadd.f32 %v9438_v37, %v1771_v32  ;;  %2598 = vmatpush.msrb.mxu3 %v2463_v14 }
 0x278   : > { %1907 = vmatmul.f32.gmra.mxu2 %v9553_v17  ;;  %2020 = vmatmul.f32.gmra.mxu3 %v9553_v17  ;;  %v1372_v54 = vpop.f32.mrf.mxu2  ;;  %v1485_v4 = vpop.f32.mrf.mxu3 }
 0x279   : > { %v9557_v38 = vadd.f32 %v1485_v4, %v1372_v54  ;;  %v1583_v53 = vpop.f32.mrf.mxu0 }
 0x27a   : > { %v1697_v62 = vadd.f32 %v9492_v28, %v1583_v53  ;;  %v2171_v53 = vld [vmem:[#allocation9 + $0x280] sm:$0xff] }
 0x27b   : > { %12367 = vst [vmem:[#allocation64_spill] sm:$0xff] %v9557_v38  ;;  %1630 = vmatmul.f32.gmra.mxu0 %v9557_v38  ;;  %2315 = vmatpush.msra.mxu1 %v2171_v53 }
 0x27c   : > { %v1772_v32 = vadd.f32 %v1697_v62, %v9378_v10  ;;  %v2462_v10 = vld [vmem:[#allocation8 + $0x380] sm:$0xff] }
 0x27d   : > { %2485 = vmatpush.msrb.mxu2 %v2462_v10  ;;  %2914 = vmatpush.msrb.mxu1 %v2800_v18  ;;  %v2458_v18 = vld [vmem:[#allocation8 + $0x360] sm:$0xff] }
 0x27e   : > { %v9563_v20 = vadd.f32 %v9438_v37, %v1772_v32 }
 0x27f   : > { %2486 = vmatpush.msrb.mxu2 %v2460_v0 }
 0x280   : > { %1910 = vmatmul.f32.gmra.mxu2 %v9563_v20  ;;  %2023 = vmatmul.f32.gmra.mxu3 %v9563_v20  ;;  %v1375_v54 = vpop.f32.mrf.mxu2  ;;  %v1488_v4 = vpop.f32.mrf.mxu3 }
 0x281   : > { %v9569_v12 = vadd.f32 %v1488_v4, %v1375_v54  ;;  %v1586_v26 = vpop.f32.mrf.mxu0  ;;  %2487 = vmatpush.msrb.mxu2 %v2458_v18 }
 0x282   : > { %v1700_v28 = vadd.f32 %v9507_v23, %v1586_v26 }
 0x283   : > { %12368 = vst [vmem:[#allocation65_spill] sm:$0xff] %v9569_v12  ;;  %1633 = vmatmul.f32.gmra.mxu0 %v9569_v12 }
 0x284   : > { %v1773_v62 = vadd.f32 %v1700_v28, %v9388_v45  ;;  %v1714_v28 = vpop.f32.mrf.mxu1 }
 0x286   : > { %v9575_v32 = vadd.f32 %v9438_v37, %v1773_v62 }
 0x288   : > { %1913 = vmatmul.f32.gmra.mxu2 %v9575_v32  ;;  %2026 = vmatmul.f32.gmra.mxu3 %v9575_v32  ;;  %v1378_v54 = vpop.f32.mrf.mxu2  ;;  %v1491_v4 = vpop.f32.mrf.mxu3 }
 0x289   : > { %v9579_v23 = vadd.f32 %v1491_v4, %v1378_v54  ;;  %v1589_v26 = vpop.f32.mrf.mxu0 }
 0x28a   : > { %v1703_v7 = vadd.f32 %v9521_v52, %v1589_v26 }
 0x28b   : > { %12369 = vst [vmem:[#allocation66_spill] sm:$0xff] %v9579_v23  ;;  %1636 = vmatmul.f32.gmra.mxu0 %v9579_v23 }
 0x28c   : > { %v1774_v62 = vadd.f32 %v1703_v7, %v9398_v63  ;;  %v1717_v52 = vpop.f32.mrf.mxu1 }
 0x28e   : > { %v9585_v53 = vadd.f32 %v9438_v37, %v1774_v62 }
 0x290   : > { %1916 = vmatmul.f32.gmra.mxu2 %v9585_v53  ;;  %2029 = vmatmul.f32.gmra.mxu3 %v9585_v53  ;;  %v1381_v45 = vpop.f32.mrf.mxu2  ;;  %v1494_v54 = vpop.f32.mrf.mxu3 }
 0x291   : > { %v9589_v4 = vadd.f32 %v1494_v54, %v1381_v45  ;;  %v1592_v10 = vpop.f32.mrf.mxu0  ;;  %v2461_v45 = vld [vmem:[#allocation8 + $0x378] sm:$0xff] }
 0x292   : > { %v1706_v14 = vadd.f32 %v9536_v33, %v1592_v10  ;;  %2599 = vmatpush.msrb.mxu3 %v2461_v45 }
 0x293   : > { %12370 = vst [vmem:[#allocation67_spill] sm:$0xff] %v9589_v4  ;;  %1639 = vmatmul.f32.gmra.mxu0 %v9589_v4 }
 0x294   : > { %v1775_v26 = vadd.f32 %v1706_v14, %v9408_v51  ;;  %v1720_v14 = vpop.f32.mrf.mxu1  ;;  %v2784_v51 = vld [vmem:[#allocation9 + $0x378] sm:$0xff] }
 0x295   : > { %2801 = vmatpush.msrb.mxu0 %v2784_v51 }
 0x296   : > { %v9595_v7 = vadd.f32 %v9438_v37, %v1775_v26 }
 0x298   : > { %1919 = vmatmul.f32.gmra.mxu2 %v9595_v7  ;;  %2032 = vmatmul.f32.gmra.mxu3 %v9595_v7  ;;  %v1384_v62 = vpop.f32.mrf.mxu2  ;;  %v1497_v63 = vpop.f32.mrf.mxu3 }
 0x299   : > { %v9599_v54 = vadd.f32 %v1497_v63, %v1384_v62  ;;  %v1595_v2 = vpop.f32.mrf.mxu0 }
 0x29a   : > { %v1709_v33 = vadd.f32 %v9550_v42, %v1595_v2 }
 0x29b   : > { %12371 = vst [vmem:[#allocation68_spill] sm:$0xff] %v9599_v54  ;;  %1642 = vmatmul.f32.gmra.mxu0 %v9599_v54 }
 0x29c   : > { %v1776_v10 = vadd.f32 %v1709_v33, %v9416_v30  ;;  %v1723_v51 = vpop.f32.mrf.mxu1 }
 0x29e   : > { %v9605_v26 = vadd.f32 %v9438_v37, %v1776_v10  ;;  %v2459_v10 = vld [vmem:[#allocation8 + $0x368] sm:$0xff] }
 0x29f   : > { %2600 = vmatpush.msrb.mxu3 %v2459_v10 }
 0x2a0   : > { %1922 = vmatmul.f32.gmra.mxu2 %v9605_v26  ;;  %2035 = vmatmul.f32.gmra.mxu3 %v9605_v26  ;;  %v1387_v0 = vpop.f32.mrf.mxu2  ;;  %v1500_v63 = vpop.f32.mrf.mxu3 }
 0x2a1   : > { %v9609_v62 = vadd.f32 %v1500_v63, %v1387_v0  ;;  %v1598_v2 = vpop.f32.mrf.mxu0 }
 0x2a2   : > { %v1712_v42 = vadd.f32 %v9565_v55, %v1598_v2  ;;  %v2783_v2 = vld [vmem:[#allocation9 + $0x370] sm:$0xff] }
 0x2a3   : > { %12372 = vst [vmem:[#allocation69_spill] sm:$0xff] %v9609_v62  ;;  %1645 = vmatmul.f32.gmra.mxu0 %v9609_v62 }
 0x2a4   : > { %v1777_v45 = vadd.f32 %v1712_v42, %v9426_v6  ;;  %v2799_v42 = vld [vmem:[#allocation9 + $0x3f0] sm:$0xff]  ;;  %2802 = vmatpush.msrb.mxu0 %v2783_v2  ;;  %v1726_v6 = vpop.f32.mrf.mxu1  ;;  %v2457_v2 = vld [vmem:[#allocation8 + $0x358] sm:$0xff] }
 0x2a5   : > { %2915 = vmatpush.msrb.mxu1 %v2799_v42  ;;  %2601 = vmatpush.msrb.mxu3 %v2457_v2 }
 0x2a6   : > { %v9615_v33 = vadd.f32 %v9438_v37, %v1777_v45 }
 0x2a8   : > { %1925 = vmatmul.f32.gmra.mxu2 %v9615_v33  ;;  %2038 = vmatmul.f32.gmra.mxu3 %v9615_v33 }
 0x2a9   : > { %v1601_v30 = vpop.f32.mrf.mxu0 }
 0x2aa   : > { %v1715_v0 = vadd.f32 %v1714_v28, %v1601_v30 }
 0x2ac   : > { %v1778_v55 = vadd.f32 %v1715_v0, %v9432_v5 }
 0x2ae   : > { %v9621_v63 = vadd.f32 %v9438_v37, %v1778_v55  ;;  %v2456_v55 = vld [vmem:[#allocation8 + $0x350] sm:$0xff] }
 0x2af   : > { %2488 = vmatpush.msrb.mxu2 %v2456_v55 }
 0x2b0   : > { %1928 = vmatmul.f32.gmra.mxu2 %v9621_v63  ;;  %2041 = vmatmul.f32.gmra.mxu3 %v9621_v63 }
 0x2b1   : > { %v1604_v45 = vpop.f32.mrf.mxu0 }
 0x2b2   : > { %v1718_v41 = vadd.f32 %v1717_v52, %v1604_v45 }
 0x2b3   : > { %v1881_v60 = vpop.f32.mrf.mxu2  ;;  %v1994_v18 = vpop.f32.mrf.mxu3 }
 0x2b4   : > { %v1779_v30 = vadd.f32 %v1718_v41, %v9450_v22  ;;  %v2090_v28 = vmax.f32 %v1881_v60, 0.0  ;;  %v2091_v10 = vmax.f32 %v1994_v18, 0.0  ;;  %v1729_v41 = vpop.f32.mrf.mxu1  ;;  %v2798_v22 = vld [vmem:[#allocation9 + $0x3e8] sm:$0xff] }
 0x2b5   : > { %2916 = vmatpush.msrb.mxu1 %v2798_v22  ;;  %v2454_v22 = vld [vmem:[#allocation8 + $0x340] sm:$0xff] }
 0x2b6   : > { %2203 = vmatmul.f32.vlgmr.msra.gmra.mxu0 %v2090_v28  ;;  %2316 = vmatmul.f32.vlgmr.msra.gmra.mxu1 %v2091_v10  ;;  %v9627_v0 = vadd.f32 %v9438_v37, %v1779_v30  ;;  %v2782_v10 = vld [vmem:[#allocation9 + $0x368] sm:$0xff] }
 0x2b7   : > { %2803 = vmatpush.msrb.mxu0 %v2782_v10  ;;  %2489 = vmatpush.msrb.mxu2 %v2454_v22 }
 0x2b8   : > { %1931 = vmatmul.f32.gmra.mxu2 %v9627_v0  ;;  %2044 = vmatmul.f32.gmra.mxu3 %v9627_v0 }
 0x2b9   : > { %v1607_v42 = vpop.f32.mrf.mxu0 }
 0x2ba   : > { %v1721_v52 = vadd.f32 %v1720_v14, %v1607_v42 }
 0x2bb   : > { %v1884_v45 = vpop.f32.mrf.mxu2  ;;  %v1997_v5 = vpop.f32.mrf.mxu3 }
 0x2bc   : > { %v1780_v60 = vadd.f32 %v1721_v52, %v9463_v24  ;;  %v2092_v18 = vmax.f32 %v1884_v45, 0.0  ;;  %v2093_v28 = vmax.f32 %v1997_v5, 0.0 }
 0x2be   : > { %2206 = vmatmul.f32.gmra.mxu0 %v2092_v18  ;;  %2319 = vmatmul.f32.gmra.mxu1 %v2093_v28  ;;  %v9633_v30 = vadd.f32 %v9438_v37, %v1780_v60  ;;  %v1732_v18 = vpop.f32.mrf.mxu1  ;;  %v2455_v28 = vld [vmem:[#allocation8 + $0x348] sm:$0xff] }
 0x2bf   : > { %2602 = vmatpush.msrb.mxu3 %v2455_v28 }
 0x2c0   : > { %1934 = vmatmul.f32.gmra.mxu2 %v9633_v30  ;;  %2047 = vmatmul.f32.gmra.mxu3 %v9633_v30 }
 0x2c1   : > { %v1610_v14 = vpop.f32.mrf.mxu0 }
 0x2c2   : > { %v1724_v55 = vadd.f32 %v1723_v51, %v1610_v14 }
 0x2c3   : > { %v1887_v2 = vpop.f32.mrf.mxu2  ;;  %v2000_v42 = vpop.f32.mrf.mxu3 }
 0x2c4   : > { %v1781_v52 = vadd.f32 %v1724_v55, %v9474_v9  ;;  %v2094_v5 = vmax.f32 %v1887_v2, 0.0  ;;  %v2095_v45 = vmax.f32 %v2000_v42, 0.0  ;;  %v2797_v9 = vld [vmem:[#allocation9 + $0x3e0] sm:$0xff] }
 0x2c5   : > { %2917 = vmatpush.msrb.mxu1 %v2797_v9  ;;  %v2452_v9 = vld [vmem:[#allocation8 + $0x330] sm:$0xff] }
 0x2c6   : > { %2209 = vmatmul.f32.gmra.mxu0 %v2094_v5  ;;  %2322 = vmatmul.f32.gmra.mxu1 %v2095_v45  ;;  %v9639_v60 = vadd.f32 %v9438_v37, %v1781_v52  ;;  %v2781_v45 = vld [vmem:[#allocation9 + $0x360] sm:$0xff]  ;;  %v1735_v24 = vpop.f32.mrf.mxu1 }
 0x2c7   : > { %2804 = vmatpush.msrb.mxu0 %v2781_v45  ;;  %2490 = vmatpush.msrb.mxu2 %v2452_v9 }
 0x2c8   : > { %1937 = vmatmul.f32.gmra.mxu2 %v9639_v60  ;;  %2050 = vmatmul.f32.gmra.mxu3 %v9639_v60 }
 0x2c9   : > { %v1613_v10 = vpop.f32.mrf.mxu0 }
 0x2ca   : > { %v1727_v51 = vadd.f32 %v1726_v6, %v1613_v10 }
 0x2cb   : > { %v1890_v14 = vpop.f32.mrf.mxu2  ;;  %v2003_v55 = vpop.f32.mrf.mxu3 }
 0x2cc   : > { %v1782_v2 = vadd.f32 %v1727_v51, %v9487_v40  ;;  %v2096_v42 = vmax.f32 %v1890_v14, 0.0  ;;  %v2097_v5 = vmax.f32 %v2003_v55, 0.0 }
 0x2ce   : > { %2212 = vmatmul.f32.gmra.mxu0 %v2096_v42  ;;  %2325 = vmatmul.f32.gmra.mxu1 %v2097_v5  ;;  %v9645_v52 = vadd.f32 %v9438_v37, %v1782_v2  ;;  %v2453_v42 = vld [vmem:[#allocation8 + $0x338] sm:$0xff] }
 0x2cf   : > { %2603 = vmatpush.msrb.mxu3 %v2453_v42 }
 0x2d0   : > { %1940 = vmatmul.f32.gmra.mxu2 %v9645_v52  ;;  %2053 = vmatmul.f32.gmra.mxu3 %v9645_v52 }
 0x2d1   : > { %v1616_v6 = vpop.f32.mrf.mxu0 }
 0x2d2   : > { %v1730_v22 = vadd.f32 %v1729_v41, %v1616_v6  ;;  %v1738_v41 = vpop.f32.mrf.mxu1 }
 0x2d3   : > { %v1893_v28 = vpop.f32.mrf.mxu2  ;;  %v2006_v10 = vpop.f32.mrf.mxu3 }
 0x2d4   : > { %v1783_v51 = vadd.f32 %v1730_v22, %v9499_v31  ;;  %v2098_v14 = vmax.f32 %v1893_v28, 0.0  ;;  %v2099_v55 = vmax.f32 %v2006_v10, 0.0  ;;  %v2796_v31 = vld [vmem:[#allocation9 + $0x3d8] sm:$0xff] }
 0x2d5   : > { %2918 = vmatpush.msrb.mxu1 %v2796_v31  ;;  %v2450_v31 = vld [vmem:[#allocation8 + $0x320] sm:$0xff] }
 0x2d6   : > { %2215 = vmatmul.f32.gmra.mxu0 %v2098_v14  ;;  %2328 = vmatmul.f32.gmra.mxu1 %v2099_v55  ;;  %v9651_v2 = vadd.f32 %v9438_v37, %v1783_v51  ;;  %v2780_v55 = vld [vmem:[#allocation9 + $0x358] sm:$0xff] }
 0x2d7   : > { %2805 = vmatpush.msrb.mxu0 %v2780_v55  ;;  %2491 = vmatpush.msrb.mxu2 %v2450_v31 }
 0x2d8   : > { %1943 = vmatmul.f32.gmra.mxu2 %v9651_v2  ;;  %2056 = vmatmul.f32.gmra.mxu3 %v9651_v2 }
 0x2d9   : > { %v1619_v5 = vpop.f32.mrf.mxu0 }
 0x2da   : > { %v1733_v45 = vadd.f32 %v1732_v18, %v1619_v5 }
 0x2db   : > { %v1896_v6 = vpop.f32.mrf.mxu2  ;;  %v2009_v22 = vpop.f32.mrf.mxu3 }
 0x2dc   : > { %v1784_v28 = vadd.f32 %v1733_v45, %v9511_v11  ;;  %v2100_v10 = vmax.f32 %v1896_v6, 0.0  ;;  %v2101_v14 = vmax.f32 %v2009_v22, 0.0  ;;  %v1741_v45 = vpop.f32.mrf.mxu1 }
 0x2de   : > { %2218 = vmatmul.f32.gmra.mxu0 %v2100_v10  ;;  %2331 = vmatmul.f32.gmra.mxu1 %v2101_v14  ;;  %v9657_v51 = vadd.f32 %v9438_v37, %v1784_v28  ;;  %v2451_v14 = vld [vmem:[#allocation8 + $0x328] sm:$0xff] }
 0x2df   : > { %2604 = vmatpush.msrb.mxu3 %v2451_v14 }
 0x2e0   : > { %1946 = vmatmul.f32.gmra.mxu2 %v9657_v51  ;;  %2059 = vmatmul.f32.gmra.mxu3 %v9657_v51 }
 0x2e1   : > { %v1622_v18 = vpop.f32.mrf.mxu0 }
 0x2e2   : > { %v1736_v9 = vadd.f32 %v1735_v24, %v1622_v18 }
 0x2e3   : > { %v1899_v42 = vpop.f32.mrf.mxu2  ;;  %v2012_v5 = vpop.f32.mrf.mxu3 }
 0x2e4   : > { %v1785_v6 = vadd.f32 %v1736_v9, %v9523_v34  ;;  %v2102_v22 = vmax.f32 %v1899_v42, 0.0  ;;  %v2103_v10 = vmax.f32 %v2012_v5, 0.0  ;;  %v2795_v34 = vld [vmem:[#allocation9 + $0x3d0] sm:$0xff] }
 0x2e5   : > { %2919 = vmatpush.msrb.mxu1 %v2795_v34  ;;  %v2448_v34 = vld [vmem:[#allocation8 + $0x310] sm:$0xff] }
 0x2e6   : > { %2221 = vmatmul.f32.gmra.mxu0 %v2102_v22  ;;  %2334 = vmatmul.f32.gmra.mxu1 %v2103_v10  ;;  %v9663_v28 = vadd.f32 %v9438_v37, %v1785_v6  ;;  %v1744_v22 = vpop.f32.mrf.mxu1  ;;  %v2779_v10 = vld [vmem:[#allocation9 + $0x350] sm:$0xff] }
 0x2e7   : > { %2806 = vmatpush.msrb.mxu0 %v2779_v10  ;;  %2492 = vmatpush.msrb.mxu2 %v2448_v34 }
 0x2e8   : > { %1949 = vmatmul.f32.gmra.mxu2 %v9663_v28  ;;  %2062 = vmatmul.f32.gmra.mxu3 %v9663_v28 }
 0x2e9   : > { %v1625_v55 = vpop.f32.mrf.mxu0 }
 0x2ea   : > { %v1739_v24 = vadd.f32 %v1738_v41, %v1625_v55 }
 0x2eb   : > { %v1902_v18 = vpop.f32.mrf.mxu2  ;;  %v2015_v11 = vpop.f32.mrf.mxu3 }
 0x2ec   : > { %v1786_v9 = vadd.f32 %v1739_v24, %v9533_v36  ;;  %v2104_v42 = vmax.f32 %v1902_v18, 0.0  ;;  %v2105_v5 = vmax.f32 %v2015_v11, 0.0 }
 0x2ee   : > { %2224 = vmatmul.f32.gmra.mxu0 %v2104_v42  ;;  %2337 = vmatmul.f32.gmra.mxu1 %v2105_v5  ;;  %v9669_v6 = vadd.f32 %v9438_v37, %v1786_v9  ;;  %v1747_v42 = vpop.f32.mrf.mxu1  ;;  %v2449_v5 = vld [vmem:[#allocation8 + $0x318] sm:$0xff] }
 0x2ef   : > { %2605 = vmatpush.msrb.mxu3 %v2449_v5 }
 0x2f0   : > { %1952 = vmatmul.f32.gmra.mxu2 %v9669_v6  ;;  %2065 = vmatmul.f32.gmra.mxu3 %v9669_v6 }
 0x2f1   : > { %v1628_v41 = vpop.f32.mrf.mxu0 }
 0x2f2   : > { %v1742_v31 = vadd.f32 %v1741_v45, %v1628_v41 }
 0x2f3   : > { %v1905_v14 = vpop.f32.mrf.mxu2  ;;  %v2018_v55 = vpop.f32.mrf.mxu3 }
 0x2f4   : > { %v1787_v11 = vadd.f32 %v1742_v31, %v9545_v59  ;;  %v2106_v24 = vmax.f32 %v1905_v14, 0.0  ;;  %v2107_v18 = vmax.f32 %v2018_v55, 0.0  ;;  %v2794_v59 = vld [vmem:[#allocation9 + $0x3c8] sm:$0xff] }
 0x2f5   : > { %2920 = vmatpush.msrb.mxu1 %v2794_v59  ;;  %v2446_v59 = vld [vmem:[#allocation8 + $0x300] sm:$0xff] }
 0x2f6   : > { %2227 = vmatmul.f32.gmra.mxu0 %v2106_v24  ;;  %2340 = vmatmul.f32.gmra.mxu1 %v2107_v18  ;;  %v9675_v9 = vadd.f32 %v9438_v37, %v1787_v11  ;;  %v2778_v18 = vld [vmem:[#allocation9 + $0x348] sm:$0xff]  ;;  %v1750_v34 = vpop.f32.mrf.mxu1 }
 0x2f7   : > { %2807 = vmatpush.msrb.mxu0 %v2778_v18  ;;  %2493 = vmatpush.msrb.mxu2 %v2446_v59 }
 0x2f8   : > { %1955 = vmatmul.f32.gmra.mxu2 %v9675_v9  ;;  %2068 = vmatmul.f32.gmra.mxu3 %v9675_v9 }
 0x2f9   : > { %v1631_v10 = vpop.f32.mrf.mxu0 }
 0x2fa   : > { %v1745_v45 = vadd.f32 %v1744_v22, %v1631_v10 }
 0x2fb   : > { %v1908_v41 = vpop.f32.mrf.mxu2  ;;  %v2021_v31 = vpop.f32.mrf.mxu3 }
 0x2fc   : > { %v1788_v14 = vadd.f32 %v1745_v45, %v9557_v38  ;;  %v2108_v55 = vmax.f32 %v1908_v41, 0.0  ;;  %v2109_v24 = vmax.f32 %v2021_v31, 0.0 }
 0x2fe   : > { %2230 = vmatmul.f32.gmra.mxu0 %v2108_v55  ;;  %2343 = vmatmul.f32.gmra.mxu1 %v2109_v24  ;;  %v9681_v11 = vadd.f32 %v9438_v37, %v1788_v14  ;;  %v2447_v24 = vld [vmem:[#allocation8 + $0x308] sm:$0xff] }
 0x2ff   : > { %2606 = vmatpush.msrb.mxu3 %v2447_v24 }
 0x300   : > { %1958 = vmatmul.f32.gmra.mxu2 %v9681_v11  ;;  %2071 = vmatmul.f32.gmra.mxu3 %v9681_v11 }
 0x301   : > { %v1634_v22 = vpop.f32.mrf.mxu0 }
 0x302   : > { %v1748_v5 = vadd.f32 %v1747_v42, %v1634_v22 }
 0x303   : > { %v1911_v10 = vpop.f32.mrf.mxu2  ;;  %v2024_v45 = vpop.f32.mrf.mxu3 }
 0x304   : > { %v1789_v41 = vadd.f32 %v1748_v5, %v9569_v12  ;;  %v2110_v31 = vmax.f32 %v1911_v10, 0.0  ;;  %v2111_v55 = vmax.f32 %v2024_v45, 0.0  ;;  %v2793_v12 = vld [vmem:[#allocation9 + $0x3c0] sm:$0xff] }
 0x305   : > { %2921 = vmatpush.msrb.mxu1 %v2793_v12 }
 0x306   : > { %2233 = vmatmul.f32.gmra.mxu0 %v2110_v31  ;;  %2346 = vmatmul.f32.gmra.mxu1 %v2111_v55  ;;  %v9687_v14 = vadd.f32 %v9438_v37, %v1789_v41  ;;  %v1753_v31 = vpop.f32.mrf.mxu1  ;;  %v2777_v55 = vld [vmem:[#allocation9 + $0x340] sm:$0xff] }
 0x307   : > { %2808 = vmatpush.msrb.mxu0 %v2777_v55  ;;  %v3443_v55 = vld [vmem:[#allocation3 + $0x2f8] sm:$0xff] }
 0x308   : > { %1961 = vmatmul.f32.gmra.mxu2 %v9687_v14  ;;  %2074 = vmatmul.f32.gmra.mxu3 %v9687_v14 }
 0x309   : > { %v1637_v18 = vpop.f32.mrf.mxu0  ;;  %3557 = vmatpush.msra.mxu3 %v3443_v55 }
 0x30a   : > { %v1751_v42 = vadd.f32 %v1750_v34, %v1637_v18 }
 0x30b   : > { %v1914_v22 = vpop.f32.mrf.mxu2  ;;  %v2027_v38 = vpop.f32.mrf.mxu3 }
 0x30c   : > { %v1790_v5 = vadd.f32 %v1751_v42, %v9579_v23  ;;  %v2112_v10 = vmax.f32 %v1914_v22, 0.0  ;;  %v2113_v45 = vmax.f32 %v2027_v38, 0.0 }
 0x30e   : > { %2236 = vmatmul.f32.gmra.mxu0 %v2112_v10  ;;  %2349 = vmatmul.f32.gmra.mxu1 %v2113_v45  ;;  %v9693_v41 = vadd.f32 %v9438_v37, %v1790_v5  ;;  %v1756_v10 = vpop.f32.mrf.mxu1  ;;  %v3427_v45 = vld [vmem:[#allocation3 + $0x278] sm:$0xff] }
 0x30f   : > { %3444 = vmatpush.msra.mxu2 %v3427_v45 }
 0x310   : > { %1964 = vmatmul.f32.gmra.mxu2 %v9693_v41  ;;  %2077 = vmatmul.f32.gmra.mxu3 %v9693_v41 }
 0x311   : > { %v1640_v34 = vpop.f32.mrf.mxu0 }
 0x312   : > { %v1754_v59 = vadd.f32 %v1753_v31, %v1640_v34 }
 0x313   : > { %v1917_v24 = vpop.f32.mrf.mxu2  ;;  %v2030_v18 = vpop.f32.mrf.mxu3 }
 0x314   : > { %v1791_v38 = vadd.f32 %v1754_v59, %v9589_v4  ;;  %v2114_v42 = vmax.f32 %v1917_v24, 0.0  ;;  %v2115_v22 = vmax.f32 %v2030_v18, 0.0  ;;  %v2792_v4 = vld [vmem:[#allocation9 + $0x3b8] sm:$0xff] }
 0x315   : > { %2922 = vmatpush.msrb.mxu1 %v2792_v4 }
 0x316   : > { %2239 = vmatmul.f32.gmra.mxu0 %v2114_v42  ;;  %2352 = vmatmul.f32.gmra.mxu1 %v2115_v22  ;;  %v9699_v5 = vadd.f32 %v9438_v37, %v1791_v38  ;;  %v2776_v22 = vld [vmem:[#allocation9 + $0x338] sm:$0xff] }
 0x317   : > { %2809 = vmatpush.msrb.mxu0 %v2776_v22 }
 0x318   : > { %1967 = vmatmul.f32.gmra.mxu2 %v9699_v5  ;;  %2080 = vmatmul.f32.gmra.mxu3 %v9699_v5 }
 0x319   : > { %v1643_v12 = vpop.f32.mrf.mxu0 }
 0x31a   : > { %v1757_v31 = vadd.f32 %v1756_v10, %v1643_v12  ;;  %v1759_v10 = vpop.f32.mrf.mxu1 }
 0x31b   : > { %v1920_v34 = vpop.f32.mrf.mxu2  ;;  %v2033_v59 = vpop.f32.mrf.mxu3 }
 0x31c   : > { %v1792_v24 = vadd.f32 %v1757_v31, %v9599_v54  ;;  %v2116_v18 = vmax.f32 %v1920_v34, 0.0  ;;  %v2117_v42 = vmax.f32 %v2033_v59, 0.0  ;;  %v3442_v54 = vld [vmem:[#allocation3 + $0x2f0] sm:$0xff] }
 0x31d   : > { %3558 = vmatpush.msra.mxu3 %v3442_v54 }
 0x31e   : > { %2242 = vmatmul.f32.gmra.mxu0 %v2116_v18  ;;  %2355 = vmatmul.f32.gmra.mxu1 %v2117_v42  ;;  %v9705_v38 = vadd.f32 %v9438_v37, %v1792_v24  ;;  %v3426_v42 = vld [vmem:[#allocation3 + $0x270] sm:$0xff] }
 0x31f   : > { %3445 = vmatpush.msra.mxu2 %v3426_v42  ;;  %v3425_v42 = vld [vmem:[#allocation3 + $0x268] sm:$0xff] }
 0x320   : > { %1970 = vmatmul.f32.gmra.mxu2 %v9705_v38  ;;  %2083 = vmatmul.f32.gmra.mxu3 %v9705_v38 }
 0x321   : > { %v1646_v12 = vpop.f32.mrf.mxu0  ;;  %3446 = vmatpush.msra.mxu2 %v3425_v42 }
 0x322   : > { %v1760_v45 = vadd.f32 %v1759_v10, %v1646_v12 }
 0x323   : > { %v1923_v55 = vpop.f32.mrf.mxu2  ;;  %v2036_v31 = vpop.f32.mrf.mxu3 }
 0x324   : > { %v1793_v34 = vadd.f32 %v1760_v45, %v9609_v62  ;;  %v2118_v59 = vmax.f32 %v1923_v55, 0.0  ;;  %v2119_v18 = vmax.f32 %v2036_v31, 0.0  ;;  %v2775_v45 = vld [vmem:[#allocation9 + $0x330] sm:$0xff] }
 0x325   : > { %v2791_v55 = vld [vmem:[#allocation9 + $0x3b0] sm:$0xff]  ;;  %2810 = vmatpush.msrb.mxu0 %v2775_v45 }
 0x326   : > { %2245 = vmatmul.f32.gmra.mxu0 %v2118_v59  ;;  %2358 = vmatmul.f32.gmra.mxu1 %v2119_v18  ;;  %v9711_v24 = vadd.f32 %v9438_v37, %v1793_v34 }
 0x327   : > { %2923 = vmatpush.msrb.mxu1 %v2791_v55 }
 0x328   : > { %1973 = vmatmul.f32.gmra.mxu2 %v9711_v24  ;;  %2086 = vmatmul.f32.gmra.mxu3 %v9711_v24 }
 0x32b   : > { %v1926_v4 = vpop.f32.mrf.mxu2  ;;  %v2039_v22 = vpop.f32.mrf.mxu3 }
 0x32c   : > { %v2120_v10 = vmax.f32 %v1926_v4, 0.0  ;;  %v2121_v12 = vmax.f32 %v2039_v22, 0.0  ;;  %v3441_v4 = vld [vmem:[#allocation3 + $0x2e8] sm:$0xff] }
 0x32d   : > { %3559 = vmatpush.msra.mxu3 %v3441_v4 }
 0x32e   : > { %2248 = vmatmul.f32.gmra.mxu0 %v2120_v10  ;;  %2361 = vmatmul.f32.gmra.mxu1 %v2121_v12 }
 0x333   : > { %v1929_v37 = vpop.f32.mrf.mxu2  ;;  %v2042_v31 = vpop.f32.mrf.mxu3 }
 0x334   : > { %v2122_v34 = vmax.f32 %v1929_v37, 0.0  ;;  %v2123_v59 = vmax.f32 %v2042_v31, 0.0  ;;  %v2204_v18 = vpop.f32.mrf.mxu0  ;;  %v2317_v62 = vpop.f32.mrf.mxu1  ;;  %v2790_v31 = vld [vmem:[#allocation9 + $0x3a8] sm:$0xff] }
 0x335   : > { %v2318_v23 = vadd.f32 %v2317_v62, %v2204_v18  ;;  %2924 = vmatpush.msrb.mxu1 %v2790_v31 }
 0x336   : > { %2251 = vmatmul.f32.gmra.mxu0 %v2122_v34  ;;  %2364 = vmatmul.f32.gmra.mxu1 %v2123_v59 }
 0x337   : > { %v9716_v54 = vadd.f32 %v2318_v23, %v9443_v49  ;;  %v2774_v23 = vld [vmem:[#allocation9 + $0x328] sm:$0xff] }
 0x338   : > { %2811 = vmatpush.msrb.mxu0 %v2774_v23 }
 0x339   : > { %2494 = vmatmul.f32.vlgmr.msrb.gmra.mxu2 %v9716_v54  ;;  %2607 = vmatmul.f32.vlgmr.msrb.gmra.mxu3 %v9716_v54 }
 0x33b   : > { %v1932_v22 = vpop.f32.mrf.mxu2  ;;  %v2045_v10 = vpop.f32.mrf.mxu3 }
 0x33c   : > { %v2124_v12 = vmax.f32 %v1932_v22, 0.0  ;;  %v2125_v45 = vmax.f32 %v2045_v10, 0.0  ;;  %v2207_v55 = vpop.f32.mrf.mxu0  ;;  %v2320_v37 = vpop.f32.mrf.mxu1 }
 0x33d   : > { %v2321_v62 = vadd.f32 %v2320_v37, %v2207_v55 }
 0x33e   : > { %2254 = vmatmul.f32.gmra.mxu0 %v2124_v12  ;;  %2367 = vmatmul.f32.gmra.mxu1 %v2125_v45  ;;  %v3424_v12 = vld [vmem:[#allocation3 + $0x260] sm:$0xff] }
 0x33f   : > { %v9721_v49 = vadd.f32 %v2321_v62, %v9456_v43  ;;  %v3440_v45 = vld [vmem:[#allocation3 + $0x2e0] sm:$0xff]  ;;  %3447 = vmatpush.msra.mxu2 %v3424_v12 }
 0x340   : > { %3560 = vmatpush.msra.mxu3 %v3440_v45 }
 0x341   : > { %2497 = vmatmul.f32.gmra.mxu2 %v9721_v49  ;;  %2610 = vmatmul.f32.gmra.mxu3 %v9721_v49 }
 0x343   : > { %v1935_v34 = vpop.f32.mrf.mxu2  ;;  %v2048_v59 = vpop.f32.mrf.mxu3 }
 0x344   : > { %v2126_v18 = vmax.f32 %v1935_v34, 0.0  ;;  %v2127_v42 = vmax.f32 %v2048_v59, 0.0  ;;  %v2210_v4 = vpop.f32.mrf.mxu0  ;;  %v2323_v22 = vpop.f32.mrf.mxu1 }
 0x345   : > { %v2324_v10 = vadd.f32 %v2323_v22, %v2210_v4 }
 0x346   : > { %2257 = vmatmul.f32.gmra.mxu0 %v2126_v18  ;;  %2370 = vmatmul.f32.gmra.mxu1 %v2127_v42  ;;  %v2773_v18 = vld [vmem:[#allocation9 + $0x320] sm:$0xff] }
 0x347   : > { %v9726_v43 = vadd.f32 %v2324_v10, %v9469_v16  ;;  %v2789_v42 = vld [vmem:[#allocation9 + $0x3a0] sm:$0xff]  ;;  %2812 = vmatpush.msrb.mxu0 %v2773_v18 }
 0x348   : > { %2925 = vmatpush.msrb.mxu1 %v2789_v42 }
 0x349   : > { %2500 = vmatmul.f32.gmra.mxu2 %v9726_v43  ;;  %2613 = vmatmul.f32.gmra.mxu3 %v9726_v43 }
 0x34b   : > { %v1938_v55 = vpop.f32.mrf.mxu2  ;;  %v2051_v37 = vpop.f32.mrf.mxu3 }
 0x34c   : > { %v2128_v62 = vmax.f32 %v1938_v55, 0.0  ;;  %v2129_v23 = vmax.f32 %v2051_v37, 0.0  ;;  %v2213_v31 = vpop.f32.mrf.mxu0  ;;  %v2326_v34 = vpop.f32.mrf.mxu1 }
 0x34d   : > { %v2327_v59 = vadd.f32 %v2326_v34, %v2213_v31 }
 0x34e   : > { %2260 = vmatmul.f32.gmra.mxu0 %v2128_v62  ;;  %2373 = vmatmul.f32.gmra.mxu1 %v2129_v23  ;;  %v3423_v62 = vld [vmem:[#allocation3 + $0x258] sm:$0xff] }
 0x34f   : > { %v9731_v16 = vadd.f32 %v2327_v59, %v9482_v1  ;;  %v3439_v23 = vld [vmem:[#allocation3 + $0x2d8] sm:$0xff]  ;;  %3448 = vmatpush.msra.mxu2 %v3423_v62  ;;  %v8371_v62 = vld [vmem:[%s8798_s18 + $0x8] sm:$0xff] }
 0x350   : > { %3561 = vmatpush.msra.mxu3 %v3439_v23  ;;  %v8372_v23 = vld [vmem:[%s8798_s18 + $0x10] sm:$0xff] }
 0x351   : > { %2503 = vmatmul.f32.gmra.mxu2 %v9731_v16  ;;  %2616 = vmatmul.f32.gmra.mxu3 %v9731_v16 }
 0x353   : > { %v1941_v4 = vpop.f32.mrf.mxu2  ;;  %v2054_v22 = vpop.f32.mrf.mxu3 }
 0x354   : > { %v2130_v10 = vmax.f32 %v1941_v4, 0.0  ;;  %v2131_v12 = vmax.f32 %v2054_v22, 0.0  ;;  %v2216_v45 = vpop.f32.mrf.mxu0  ;;  %v2329_v55 = vpop.f32.mrf.mxu1 }
 0x355   : > { %v2330_v37 = vadd.f32 %v2329_v55, %v2216_v45  ;;  %v8644_v45 = vmov 2  }
 0x356   : > { %2263 = vmatmul.f32.gmra.mxu0 %v2130_v10  ;;  %2376 = vmatmul.f32.gmra.mxu1 %v2131_v12  ;;  %v2772_v10 = vld [vmem:[#allocation9 + $0x318] sm:$0xff] }
 0x357   : > { %v9736_v1 = vadd.f32 %v2330_v37, %v9495_v13  ;;  %v2788_v12 = vld [vmem:[#allocation9 + $0x398] sm:$0xff]  ;;  %2813 = vmatpush.msrb.mxu0 %v2772_v10  ;;  %8362 = vset.pattern.permute.xlu0 %v8644_v45  ;;  %v3438_v10 = vld [vmem:[#allocation3 + $0x2d0] sm:$0xff] }
 0x358   : > { %2926 = vmatpush.msrb.mxu1 %v2788_v12  ;;  %8363 = vset.pattern.permute.xlu1 %v8644_v45 }
 0x359   : > { %2506 = vmatmul.f32.gmra.mxu2 %v9736_v1  ;;  %2619 = vmatmul.f32.gmra.mxu3 %v9736_v1 }
 0x35a   : > { %3127 = vperm.xlu0 %8362, %v8371_v62   ;;  %3130 = vperm.xlu1 %8363, %v8372_v23  }
 0x35b   : > { %v1944_v31 = vpop.f32.mrf.mxu2  ;;  %v2057_v34 = vpop.f32.mrf.mxu3  ;;  %8361 = vset.pattern.permute.xlu2 %v8644_v45  ;;  %3562 = vmatpush.msra.mxu3 %v3438_v10 }
 0x35c   : > { %v2132_v59 = vmax.f32 %v1944_v31, 0.0  ;;  %v2133_v18 = vmax.f32 %v2057_v34, 0.0  ;;  %v2219_v42 = vpop.f32.mrf.mxu0  ;;  %v2332_v4 = vpop.f32.mrf.mxu1 }
 0x35d   : > { %v2333_v22 = vadd.f32 %v2332_v4, %v2219_v42  ;;  %v8373_v42 = vld [vmem:[%s8798_s18] sm:$0xff] }
 0x35e   : > { %2266 = vmatmul.f32.gmra.mxu0 %v2132_v59  ;;  %2379 = vmatmul.f32.gmra.mxu1 %v2133_v18 }
 0x35f   : > { %v9741_v13 = vadd.f32 %v2333_v22, %v9505_v39  ;;  %3124 = vperm.xlu2 %8361, %v8373_v42   ;;  %v3422_v22 = vld [vmem:[#allocation3 + $0x250] sm:$0xff] }
 0x360   : > { %3449 = vmatpush.msra.mxu2 %v3422_v22  ;;  %v2787_v42 = vld [vmem:[#allocation9 + $0x390] sm:$0xff] }
 0x361   : > { %2509 = vmatmul.f32.gmra.mxu2 %v9741_v13  ;;  %2622 = vmatmul.f32.gmra.mxu3 %v9741_v13 }
 0x362   : > { %2927 = vmatpush.msrb.mxu1 %v2787_v42 }
 0x363   : > { %v1947_v55 = vpop.f32.mrf.mxu2  ;;  %v2060_v37 = vpop.f32.mrf.mxu3 }
 0x364   : > { %v2134_v39 = vmax.f32 %v1947_v55, 0.0  ;;  %v2135_v31 = vmax.f32 %v2060_v37, 0.0  ;;  %v2222_v34 = vpop.f32.mrf.mxu0  ;;  %v2335_v59 = vpop.f32.mrf.mxu1  ;;  %v8374_v55 = vld [vmem:[%s8798_s18 + $0x30] sm:$0xff]  ;;  %v8375_v37 = vld [vmem:[%s8798_s18 + $0x20] sm:$0xff] }
 0x365   : > { %v2336_v18 = vadd.f32 %v2335_v59, %v2222_v34  ;;  %3142 = vperm.xlu0 %8362, %v8374_v55   ;;  %3136 = vperm.xlu1 %8363, %v8375_v37   ;;  %v8376_v34 = vld [vmem:[%s8798_s18 + $0x18] sm:$0xff] }
 0x366   : > { %2269 = vmatmul.f32.gmra.mxu0 %v2134_v39  ;;  %2382 = vmatmul.f32.gmra.mxu1 %v2135_v31 }
 0x367   : > { %v9749_v4 = vadd.f32 %v2336_v18, %v9517_v3  ;;  %3133 = vperm.xlu2 %8361, %v8376_v34   ;;  %v2771_v18 = vld [vmem:[#allocation9 + $0x310] sm:$0xff]  ;;  %v3437_v34 = vld [vmem:[#allocation3 + $0x2c8] sm:$0xff] }
 0x368   : > { %2814 = vmatpush.msrb.mxu0 %v2771_v18  ;;  %3563 = vmatpush.msra.mxu3 %v3437_v34 }
 0x369   : > { %2512 = vmatmul.f32.gmra.mxu2 %v9749_v4  ;;  %2625 = vmatmul.f32.gmra.mxu3 %v9749_v4 }
 0x36b   : > { %v1950_v12 = vpop.f32.mrf.mxu2  ;;  %v2063_v45 = vpop.f32.mrf.mxu3 }
 0x36c   : > { %v2136_v62 = vmax.f32 %v1950_v12, 0.0  ;;  %v2137_v23 = vmax.f32 %v2063_v45, 0.0  ;;  %v2225_v39 = vpop.f32.mrf.mxu0  ;;  %v2338_v3 = vpop.f32.mrf.mxu1  ;;  %v8377_v12 = vld [vmem:[%s8798_s18 + $0x48] sm:$0xff]  ;;  %v8378_v45 = vld [vmem:[%s8798_s18 + $0x38] sm:$0xff] }
 0x36d   : > { %v2339_v31 = vadd.f32 %v2338_v3, %v2225_v39  ;;  %3151 = vperm.xlu0 %8362, %v8377_v12   ;;  %3145 = vperm.xlu1 %8363, %v8378_v45   ;;  %v8379_v39 = vld [vmem:[%s8798_s18 + $0x28] sm:$0xff] }
 0x36e   : > { %2272 = vmatmul.f32.gmra.mxu0 %v2136_v62  ;;  %2385 = vmatmul.f32.gmra.mxu1 %v2137_v23 }
 0x36f   : > { %v9757_v59 = vadd.f32 %v2339_v31, %v9529_v15  ;;  %3139 = vperm.xlu2 %8361, %v8379_v39   ;;  %v3421_v31 = vld [vmem:[#allocation3 + $0x248] sm:$0xff] }
 0x370   : > { %3450 = vmatpush.msra.mxu2 %v3421_v31  ;;  %v2786_v39 = vld [vmem:[#allocation9 + $0x388] sm:$0xff] }
 0x371   : > { %2515 = vmatmul.f32.gmra.mxu2 %v9757_v59  ;;  %2628 = vmatmul.f32.gmra.mxu3 %v9757_v59 }
 0x372   : > { %2928 = vmatpush.msrb.mxu1 %v2786_v39 }
 0x373   : > { %v1953_v22 = vpop.f32.mrf.mxu2  ;;  %v2066_v10 = vpop.f32.mrf.mxu3 }
 0x374   : > { %v2138_v55 = vmax.f32 %v1953_v22, 0.0  ;;  %v2139_v37 = vmax.f32 %v2066_v10, 0.0  ;;  %v2228_v62 = vpop.f32.mrf.mxu0  ;;  %v2341_v15 = vpop.f32.mrf.mxu1  ;;  %v8380_v22 = vld [vmem:[%s8798_s18 + $0x60] sm:$0xff]  ;;  %v8381_v10 = vld [vmem:[%s8798_s18 + $0x50] sm:$0xff] }
 0x375   : > { %v2342_v23 = vadd.f32 %v2341_v15, %v2228_v62  ;;  %3160 = vperm.xlu0 %8362, %v8380_v22   ;;  %3154 = vperm.xlu1 %8363, %v8381_v10   ;;  %v8382_v62 = vld [vmem:[%s8798_s18 + $0x40] sm:$0xff] }
 0x376   : > { %2275 = vmatmul.f32.gmra.mxu0 %v2138_v55  ;;  %2388 = vmatmul.f32.gmra.mxu1 %v2139_v37 }
 0x377   : > { %v9765_v3 = vadd.f32 %v2342_v23, %v9541_v46  ;;  %3148 = vperm.xlu2 %8361, %v8382_v62   ;;  %v2770_v23 = vld [vmem:[#allocation9 + $0x308] sm:$0xff]  ;;  %v3436_v62 = vld [vmem:[#allocation3 + $0x2c0] sm:$0xff] }
 0x378   : > { %2815 = vmatpush.msrb.mxu0 %v2770_v23  ;;  %3564 = vmatpush.msra.mxu3 %v3436_v62 }
 0x379   : > { %2518 = vmatmul.f32.gmra.mxu2 %v9765_v3  ;;  %2631 = vmatmul.f32.gmra.mxu3 %v9765_v3 }
 0x37b   : > { %v1956_v18 = vpop.f32.mrf.mxu2  ;;  %v2069_v42 = vpop.f32.mrf.mxu3 }
 0x37c   : > { %v2140_v12 = vmax.f32 %v1956_v18, 0.0  ;;  %v2141_v45 = vmax.f32 %v2069_v42, 0.0  ;;  %v2231_v55 = vpop.f32.mrf.mxu0  ;;  %v2344_v46 = vpop.f32.mrf.mxu1  ;;  %v8383_v18 = vld [vmem:[%s8798_s18 + $0x78] sm:$0xff]  ;;  %v8384_v42 = vld [vmem:[%s8798_s18 + $0x68] sm:$0xff] }
 0x37d   : > { %v2345_v37 = vadd.f32 %v2344_v46, %v2231_v55  ;;  %3169 = vperm.xlu0 %8362, %v8383_v18   ;;  %3163 = vperm.xlu1 %8363, %v8384_v42   ;;  %v8385_v55 = vld [vmem:[%s8798_s18 + $0x58] sm:$0xff] }
 0x37e   : > { %2278 = vmatmul.f32.gmra.mxu0 %v2140_v12  ;;  %2391 = vmatmul.f32.gmra.mxu1 %v2141_v45 }
 0x37f   : > { %v9773_v15 = vadd.f32 %v2345_v37, %v9553_v17  ;;  %3157 = vperm.xlu2 %8361, %v8385_v55   ;;  %v3420_v37 = vld [vmem:[#allocation3 + $0x240] sm:$0xff] }
 0x380   : > { %3451 = vmatpush.msra.mxu2 %v3420_v37  ;;  %v2785_v55 = vld [vmem:[#allocation9 + $0x380] sm:$0xff] }
 0x381   : > { %2521 = vmatmul.f32.gmra.mxu2 %v9773_v15  ;;  %2634 = vmatmul.f32.gmra.mxu3 %v9773_v15 }
 0x382   : > { %2929 = vmatpush.msrb.mxu1 %v2785_v55 }
 0x383   : > { %v1959_v31 = vpop.f32.mrf.mxu2  ;;  %v2072_v34 = vpop.f32.mrf.mxu3 }
 0x384   : > { %v2142_v22 = vmax.f32 %v1959_v31, 0.0  ;;  %v2143_v10 = vmax.f32 %v2072_v34, 0.0  ;;  %v2234_v12 = vpop.f32.mrf.mxu0  ;;  %v2347_v17 = vpop.f32.mrf.mxu1  ;;  %v8386_v31 = vld [vmem:[%s8798_s18 + $0x90] sm:$0xff]  ;;  %v8387_v34 = vld [vmem:[%s8798_s18 + $0x80] sm:$0xff] }
 0x385   : > { %v2348_v45 = vadd.f32 %v2347_v17, %v2234_v12  ;;  %3178 = vperm.xlu0 %8362, %v8386_v31   ;;  %3172 = vperm.xlu1 %8363, %v8387_v34   ;;  %v8388_v12 = vld [vmem:[%s8798_s18 + $0x70] sm:$0xff] }
 0x386   : > { %2281 = vmatmul.f32.gmra.mxu0 %v2142_v22  ;;  %2394 = vmatmul.f32.gmra.mxu1 %v2143_v10 }
 0x387   : > { %v9781_v46 = vadd.f32 %v2348_v45, %v9563_v20  ;;  %3166 = vperm.xlu2 %8361, %v8388_v12   ;;  %v2769_v45 = vld [vmem:[#allocation9 + $0x300] sm:$0xff]  ;;  %v3435_v12 = vld [vmem:[#allocation3 + $0x2b8] sm:$0xff] }
 0x388   : > { %2816 = vmatpush.msrb.mxu0 %v2769_v45  ;;  %3565 = vmatpush.msra.mxu3 %v3435_v12 }
 0x389   : > { %2524 = vmatmul.f32.gmra.mxu2 %v9781_v46  ;;  %2637 = vmatmul.f32.gmra.mxu3 %v9781_v46 }
 0x38b   : > { %v1962_v23 = vpop.f32.mrf.mxu2  ;;  %v2075_v39 = vpop.f32.mrf.mxu3 }
 0x38c   : > { %v2144_v18 = vmax.f32 %v1962_v23, 0.0  ;;  %v2145_v42 = vmax.f32 %v2075_v39, 0.0  ;;  %v2237_v22 = vpop.f32.mrf.mxu0  ;;  %v2350_v20 = vpop.f32.mrf.mxu1  ;;  %v8389_v23 = vld [vmem:[%s8798_s18 + $0xa8] sm:$0xff]  ;;  %v8390_v39 = vld [vmem:[%s8798_s18 + $0x98] sm:$0xff] }
 0x38d   : > { %v2351_v10 = vadd.f32 %v2350_v20, %v2237_v22  ;;  %3187 = vperm.xlu0 %8362, %v8389_v23   ;;  %3181 = vperm.xlu1 %8363, %v8390_v39   ;;  %v8391_v22 = vld [vmem:[%s8798_s18 + $0x88] sm:$0xff] }
 0x38e   : > { %2284 = vmatmul.f32.gmra.mxu0 %v2144_v18  ;;  %2397 = vmatmul.f32.gmra.mxu1 %v2145_v42 }
 0x38f   : > { %v9789_v17 = vadd.f32 %v2351_v10, %v9575_v32  ;;  %3175 = vperm.xlu2 %8361, %v8391_v22   ;;  %v3419_v10 = vld [vmem:[#allocation3 + $0x238] sm:$0xff] }
 0x390   : > { %3452 = vmatpush.msra.mxu2 %v3419_v10  ;;  %v3702_v22 = vld [vmem:[#allocation6 + $0x2f8] sm:$0xff] }
 0x391   : > { %2527 = vmatmul.f32.gmra.mxu2 %v9789_v17  ;;  %2640 = vmatmul.f32.gmra.mxu3 %v9789_v17 }
 0x392   : > { %3816 = vmatpush.msra.mxu1 %v3702_v22 }
 0x393   : > { %v1965_v37 = vpop.f32.mrf.mxu2  ;;  %v2078_v62 = vpop.f32.mrf.mxu3 }
 0x394   : > { %v2146_v31 = vmax.f32 %v1965_v37, 0.0  ;;  %v2147_v34 = vmax.f32 %v2078_v62, 0.0  ;;  %v2240_v18 = vpop.f32.mrf.mxu0  ;;  %v2353_v32 = vpop.f32.mrf.mxu1  ;;  %v8392_v37 = vld [vmem:[%s8798_s18 + $0xc0] sm:$0xff]  ;;  %v8393_v62 = vld [vmem:[%s8798_s18 + $0xb0] sm:$0xff] }
 0x395   : > { %v2354_v42 = vadd.f32 %v2353_v32, %v2240_v18  ;;  %3196 = vperm.xlu0 %8362, %v8392_v37   ;;  %3190 = vperm.xlu1 %8363, %v8393_v62   ;;  %v8394_v18 = vld [vmem:[%s8798_s18 + $0xa0] sm:$0xff] }
 0x396   : > { %2287 = vmatmul.f32.gmra.mxu0 %v2146_v31  ;;  %2400 = vmatmul.f32.gmra.mxu1 %v2147_v34 }
 0x397   : > { %v9797_v20 = vadd.f32 %v2354_v42, %v9585_v53  ;;  %3184 = vperm.xlu2 %8361, %v8394_v18   ;;  %v3686_v42 = vld [vmem:[#allocation6 + $0x278] sm:$0xff]  ;;  %v3434_v18 = vld [vmem:[#allocation3 + $0x2b0] sm:$0xff] }
 0x398   : > { %3703 = vmatpush.msra.mxu0 %v3686_v42  ;;  %3566 = vmatpush.msra.mxu3 %v3434_v18 }
 0x399   : > { %12373 = vst [vmem:[#allocation70_spill] sm:$0xff] %v9797_v20  ;;  %2530 = vmatmul.f32.gmra.mxu2 %v9797_v20  ;;  %2643 = vmatmul.f32.gmra.mxu3 %v9797_v20 }
 0x39b   : > { %v1968_v45 = vpop.f32.mrf.mxu2  ;;  %v2081_v55 = vpop.f32.mrf.mxu3 }
 0x39c   : > { %v2148_v23 = vmax.f32 %v1968_v45, 0.0  ;;  %v2149_v39 = vmax.f32 %v2081_v55, 0.0  ;;  %v2243_v31 = vpop.f32.mrf.mxu0  ;;  %v2356_v53 = vpop.f32.mrf.mxu1  ;;  %v8395_v45 = vld [vmem:[%s8798_s18 + $0xd8] sm:$0xff]  ;;  %v8396_v55 = vld [vmem:[%s8798_s18 + $0xc8] sm:$0xff] }
 0x39d   : > { %v2357_v34 = vadd.f32 %v2356_v53, %v2243_v31  ;;  %3205 = vperm.xlu0 %8362, %v8395_v45   ;;  %3199 = vperm.xlu1 %8363, %v8396_v55   ;;  %v8397_v31 = vld [vmem:[%s8798_s18 + $0xb8] sm:$0xff] }
 0x39e   : > { %2290 = vmatmul.f32.gmra.mxu0 %v2148_v23  ;;  %2403 = vmatmul.f32.gmra.mxu1 %v2149_v39 }
 0x39f   : > { %v9805_v32 = vadd.f32 %v2357_v34, %v9595_v7  ;;  %3193 = vperm.xlu2 %8361, %v8397_v31   ;;  %v3418_v34 = vld [vmem:[#allocation3 + $0x230] sm:$0xff] }
 0x3a0   : > { %3453 = vmatpush.msra.mxu2 %v3418_v34  ;;  %v3701_v31 = vld [vmem:[#allocation6 + $0x2f0] sm:$0xff]  ;;  %v8401_v34 = vld [vmem:[%s8798_s18 + $0xf8] sm:$0xff] }
 0x3a1   : > { %12374 = vst [vmem:[#allocation71_spill] sm:$0xff] %v9805_v32  ;;  %2533 = vmatmul.f32.gmra.mxu2 %v9805_v32  ;;  %2646 = vmatmul.f32.gmra.mxu3 %v9805_v32 }
 0x3a2   : > { %3817 = vmatpush.msra.mxu1 %v3701_v31 }
 0x3a3   : > { %v1971_v10 = vpop.f32.mrf.mxu2  ;;  %v2084_v12 = vpop.f32.mrf.mxu3 }
 0x3a4   : > { %v2150_v37 = vmax.f32 %v1971_v10, 0.0  ;;  %v2151_v62 = vmax.f32 %v2084_v12, 0.0  ;;  %v2246_v23 = vpop.f32.mrf.mxu0  ;;  %v2359_v7 = vpop.f32.mrf.mxu1  ;;  %v8398_v10 = vld [vmem:[%s8798_s18 + $0xf0] sm:$0xff]  ;;  %v8399_v12 = vld [vmem:[%s8798_s18 + $0xe0] sm:$0xff] }
 0x3a5   : > { %v2360_v39 = vadd.f32 %v2359_v7, %v2246_v23  ;;  %3214 = vperm.xlu0 %8362, %v8398_v10   ;;  %3208 = vperm.xlu1 %8363, %v8399_v12   ;;  %v8400_v23 = vld [vmem:[%s8798_s18 + $0xd0] sm:$0xff]  ;;  %v8402_v10 = vld [vmem:[%s8798_s18 + $0xe8] sm:$0xff] }
 0x3a6   : > { %2293 = vmatmul.f32.gmra.mxu0 %v2150_v37  ;;  %2406 = vmatmul.f32.gmra.mxu1 %v2151_v62 }
 0x3a7   : > { %v9813_v53 = vadd.f32 %v2360_v39, %v9605_v26  ;;  %3202 = vperm.xlu2 %8361, %v8400_v23   ;;  %v3685_v39 = vld [vmem:[#allocation6 + $0x270] sm:$0xff] }
 0x3a8   : > { %3704 = vmatpush.msra.mxu0 %v3685_v39 }
 0x3a9   : > { %12375 = vst [vmem:[#allocation72_spill] sm:$0xff] %v9813_v53  ;;  %2536 = vmatmul.f32.gmra.mxu2 %v9813_v53  ;;  %2649 = vmatmul.f32.gmra.mxu3 %v9813_v53 }
 0x3ab   : > { %v1974_v42 = vpop.f32.mrf.mxu2  ;;  %v2087_v22 = vpop.f32.mrf.mxu3 }
 0x3ac   : > { %v2152_v45 = vmax.f32 %v1974_v42, 0.0  ;;  %v2153_v55 = vmax.f32 %v2087_v22, 0.0  ;;  %v2249_v26 = vpop.f32.mrf.mxu0  ;;  %v2362_v37 = vpop.f32.mrf.mxu1 }
 0x3ad   : > { %v2363_v62 = vadd.f32 %v2362_v37, %v2249_v26  ;;  %3217 = vperm.xlu1 %8363, %v8401_v34  }
 0x3ae   : > { %2296 = vmatmul.f32.gmra.mxu0 %v2152_v45  ;;  %2409 = vmatmul.f32.gmra.mxu1 %v2153_v55  ;;  %v3433_v45 = vld [vmem:[#allocation3 + $0x2a8] sm:$0xff] }
 0x3af   : > { %v9821_v7 = vadd.f32 %v2363_v62, %v9615_v33  ;;  %3211 = vperm.xlu2 %8361, %v8402_v10   ;;  %v3417_v33 = vld [vmem:[#allocation3 + $0x228] sm:$0xff]  ;;  %3567 = vmatpush.msra.mxu3 %v3433_v45 }
 0x3b0   : > { %3454 = vmatpush.msra.mxu2 %v3417_v33 }
 0x3b1   : > { %12376 = vst [vmem:[#allocation73_spill] sm:$0xff] %v9821_v7  ;;  %2539 = vmatmul.f32.gmra.mxu2 %v9821_v7  ;;  %2652 = vmatmul.f32.gmra.mxu3 %v9821_v7 }
 0x3b4   : > { %v2252_v18 = vpop.f32.mrf.mxu0  ;;  %v2365_v42 = vpop.f32.mrf.mxu1 }
 0x3b5   : > { %v2366_v22 = vadd.f32 %v2365_v42, %v2252_v18  ;;  %v3700_v18 = vld [vmem:[#allocation6 + $0x2e8] sm:$0xff] }
 0x3b6   : > { %3818 = vmatpush.msra.mxu1 %v3700_v18 }
 0x3b7   : > { %v9828_v12 = vadd.f32 %v2366_v22, %v9621_v63  ;;  %v3684_v63 = vld [vmem:[#allocation6 + $0x268] sm:$0xff] }
 0x3b8   : > { %3705 = vmatpush.msra.mxu0 %v3684_v63 }
 0x3b9   : > { %12377 = vst [vmem:[#allocation74_spill] sm:$0xff] %v9828_v12  ;;  %2542 = vmatmul.f32.gmra.mxu2 %v9828_v12  ;;  %2655 = vmatmul.f32.gmra.mxu3 %v9828_v12 }
 0x3bc   : > { %v2255_v55 = vpop.f32.mrf.mxu0  ;;  %v2368_v26 = vpop.f32.mrf.mxu1 }
 0x3bd   : > { %v2369_v37 = vadd.f32 %v2368_v26, %v2255_v55  ;;  %v2495_v62 = vpop.f32.mrf.mxu2  ;;  %v2608_v23 = vpop.f32.mrf.mxu3 }
 0x3be   : > { %v2704_v39 = vmax.f32 %v2495_v62, 0.0  ;;  %v2705_v31 = vmax.f32 %v2608_v23, 0.0  ;;  %v3432_v62 = vld [vmem:[#allocation3 + $0x2a0] sm:$0xff] }
 0x3bf   : > { %v9833_v34 = vadd.f32 %v2369_v37, %v9627_v0  ;;  %v3416_v37 = vld [vmem:[#allocation3 + $0x220] sm:$0xff]  ;;  %3568 = vmatpush.msra.mxu3 %v3432_v62 }
 0x3c0   : > { %2817 = vmatmul.f32.vlgmr.msrb.gmra.mxu0 %v2704_v39  ;;  %2930 = vmatmul.f32.vlgmr.msrb.gmra.mxu1 %v2705_v31 }
 0x3c1   : > { %12378 = vst [vmem:[#allocation75_spill] sm:$0xff] %v9833_v34  ;;  %2545 = vmatmul.f32.gmra.mxu2 %v9833_v34  ;;  %2658 = vmatmul.f32.gmra.mxu3 %v9833_v34 }
 0x3c2   : > { %3455 = vmatpush.msra.mxu2 %v3416_v37 }
 0x3c4   : > { %v2258_v42 = vpop.f32.mrf.mxu0  ;;  %v2371_v22 = vpop.f32.mrf.mxu1 }
 0x3c5   : > { %v2372_v10 = vadd.f32 %v2371_v22, %v2258_v42  ;;  %v2498_v33 = vpop.f32.mrf.mxu2  ;;  %v2611_v45 = vpop.f32.mrf.mxu3 }
 0x3c6   : > { %v2706_v55 = vmax.f32 %v2498_v33, 0.0  ;;  %v2707_v26 = vmax.f32 %v2611_v45, 0.0  ;;  %v3699_v33 = vld [vmem:[#allocation6 + $0x2e0] sm:$0xff] }
 0x3c7   : > { %v9838_v0 = vadd.f32 %v2372_v10, %v9633_v30  ;;  %v3683_v10 = vld [vmem:[#allocation6 + $0x260] sm:$0xff]  ;;  %3819 = vmatpush.msra.mxu1 %v3699_v33 }
 0x3c8   : > { %2820 = vmatmul.f32.gmra.mxu0 %v2706_v55  ;;  %2933 = vmatmul.f32.gmra.mxu1 %v2707_v26 }
 0x3c9   : > { %12379 = vst [vmem:[#allocation76_spill] sm:$0xff] %v9838_v0  ;;  %2548 = vmatmul.f32.gmra.mxu2 %v9838_v0  ;;  %2661 = vmatmul.f32.gmra.mxu3 %v9838_v0 }
 0x3ca   : > { %3706 = vmatpush.msra.mxu0 %v3683_v10 }
 0x3cc   : > { %v2261_v23 = vpop.f32.mrf.mxu0  ;;  %v2374_v39 = vpop.f32.mrf.mxu1 }
 0x3cd   : > { %v2375_v31 = vadd.f32 %v2374_v39, %v2261_v23  ;;  %v2501_v63 = vpop.f32.mrf.mxu2  ;;  %v2614_v18 = vpop.f32.mrf.mxu3 }
 0x3ce   : > { %v2708_v42 = vmax.f32 %v2501_v63, 0.0  ;;  %v2709_v22 = vmax.f32 %v2614_v18, 0.0  ;;  %v3431_v63 = vld [vmem:[#allocation3 + $0x298] sm:$0xff] }
 0x3cf   : > { %v9843_v30 = vadd.f32 %v2375_v31, %v9639_v60  ;;  %v3415_v31 = vld [vmem:[#allocation3 + $0x218] sm:$0xff]  ;;  %3569 = vmatpush.msra.mxu3 %v3431_v63 }
 0x3d0   : > { %2823 = vmatmul.f32.gmra.mxu0 %v2708_v42  ;;  %2936 = vmatmul.f32.gmra.mxu1 %v2709_v22 }
 0x3d1   : > { %12380 = vst [vmem:[#allocation77_spill] sm:$0xff] %v9843_v30  ;;  %2551 = vmatmul.f32.gmra.mxu2 %v9843_v30  ;;  %2664 = vmatmul.f32.gmra.mxu3 %v9843_v30 }
 0x3d2   : > { %3456 = vmatpush.msra.mxu2 %v3415_v31 }
 0x3d4   : > { %v2264_v45 = vpop.f32.mrf.mxu0  ;;  %v2377_v55 = vpop.f32.mrf.mxu1 }
 0x3d5   : > { %v2378_v26 = vadd.f32 %v2377_v55, %v2264_v45  ;;  %v2504_v37 = vpop.f32.mrf.mxu2  ;;  %v2617_v62 = vpop.f32.mrf.mxu3 }
 0x3d6   : > { %v2710_v23 = vmax.f32 %v2504_v37, 0.0  ;;  %v2711_v39 = vmax.f32 %v2617_v62, 0.0  ;;  %v3698_v37 = vld [vmem:[#allocation6 + $0x2d8] sm:$0xff] }
 0x3d7   : > { %v9848_v60 = vadd.f32 %v2378_v26, %v9645_v52  ;;  %v3682_v26 = vld [vmem:[#allocation6 + $0x258] sm:$0xff]  ;;  %3820 = vmatpush.msra.mxu1 %v3698_v37 }
 0x3d8   : > { %2826 = vmatmul.f32.gmra.mxu0 %v2710_v23  ;;  %2939 = vmatmul.f32.gmra.mxu1 %v2711_v39 }
 0x3d9   : > { %12381 = vst [vmem:[#allocation78_spill] sm:$0xff] %v9848_v60  ;;  %2554 = vmatmul.f32.gmra.mxu2 %v9848_v60  ;;  %2667 = vmatmul.f32.gmra.mxu3 %v9848_v60 }
 0x3da   : > { %3707 = vmatpush.msra.mxu0 %v3682_v26 }
 0x3dc   : > { %v2267_v18 = vpop.f32.mrf.mxu0  ;;  %v2380_v42 = vpop.f32.mrf.mxu1 }
 0x3dd   : > { %v2381_v22 = vadd.f32 %v2380_v42, %v2267_v18  ;;  %v2507_v10 = vpop.f32.mrf.mxu2  ;;  %v2620_v33 = vpop.f32.mrf.mxu3 }
 0x3de   : > { %v2712_v45 = vmax.f32 %v2507_v10, 0.0  ;;  %v2713_v55 = vmax.f32 %v2620_v33, 0.0  ;;  %v3430_v10 = vld [vmem:[#allocation3 + $0x290] sm:$0xff] }
 0x3df   : > { %v9853_v52 = vadd.f32 %v2381_v22, %v9651_v2  ;;  %v3414_v22 = vld [vmem:[#allocation3 + $0x210] sm:$0xff]  ;;  %3570 = vmatpush.msra.mxu3 %v3430_v10 }
 0x3e0   : > { %2829 = vmatmul.f32.gmra.mxu0 %v2712_v45  ;;  %2942 = vmatmul.f32.gmra.mxu1 %v2713_v55 }
 0x3e1   : > { %12382 = vst [vmem:[#allocation79_spill] sm:$0xff] %v9853_v52  ;;  %2557 = vmatmul.f32.gmra.mxu2 %v9853_v52  ;;  %2670 = vmatmul.f32.gmra.mxu3 %v9853_v52 }
 0x3e2   : > { %3457 = vmatpush.msra.mxu2 %v3414_v22 }
 0x3e4   : > { %v2270_v62 = vpop.f32.mrf.mxu0  ;;  %v2383_v23 = vpop.f32.mrf.mxu1 }
 0x3e5   : > { %v2384_v39 = vadd.f32 %v2383_v23, %v2270_v62  ;;  %v2510_v31 = vpop.f32.mrf.mxu2  ;;  %v2623_v63 = vpop.f32.mrf.mxu3 }
 0x3e6   : > { %v2714_v18 = vmax.f32 %v2510_v31, 0.0  ;;  %v2715_v42 = vmax.f32 %v2623_v63, 0.0  ;;  %v3697_v31 = vld [vmem:[#allocation6 + $0x2d0] sm:$0xff] }
 0x3e7   : > { %v9858_v2 = vadd.f32 %v2384_v39, %v9657_v51  ;;  %v3681_v39 = vld [vmem:[#allocation6 + $0x250] sm:$0xff]  ;;  %3821 = vmatpush.msra.mxu1 %v3697_v31 }
 0x3e8   : > { %2832 = vmatmul.f32.gmra.mxu0 %v2714_v18  ;;  %2945 = vmatmul.f32.gmra.mxu1 %v2715_v42 }
 0x3e9   : > { %12383 = vst [vmem:[#allocation80_spill] sm:$0xff] %v9858_v2  ;;  %2560 = vmatmul.f32.gmra.mxu2 %v9858_v2  ;;  %2673 = vmatmul.f32.gmra.mxu3 %v9858_v2 }
 0x3ea   : > { %3708 = vmatpush.msra.mxu0 %v3681_v39 }
 0x3ec   : > { %v2273_v33 = vpop.f32.mrf.mxu0  ;;  %v2386_v45 = vpop.f32.mrf.mxu1 }
 0x3ed   : > { %v2387_v55 = vadd.f32 %v2386_v45, %v2273_v33  ;;  %v2513_v26 = vpop.f32.mrf.mxu2  ;;  %v2626_v37 = vpop.f32.mrf.mxu3 }
 0x3ee   : > { %v2716_v62 = vmax.f32 %v2513_v26, 0.0  ;;  %v2717_v23 = vmax.f32 %v2626_v37, 0.0  ;;  %v3429_v26 = vld [vmem:[#allocation3 + $0x288] sm:$0xff] }
 0x3ef   : > { %v9863_v51 = vadd.f32 %v2387_v55, %v9663_v28  ;;  %v3413_v55 = vld [vmem:[#allocation3 + $0x208] sm:$0xff]  ;;  %3571 = vmatpush.msra.mxu3 %v3429_v26 }
 0x3f0   : > { %2835 = vmatmul.f32.gmra.mxu0 %v2716_v62  ;;  %2948 = vmatmul.f32.gmra.mxu1 %v2717_v23 }
 0x3f1   : > { %12384 = vst [vmem:[#allocation81_spill] sm:$0xff] %v9863_v51  ;;  %2563 = vmatmul.f32.gmra.mxu2 %v9863_v51  ;;  %2676 = vmatmul.f32.gmra.mxu3 %v9863_v51 }
 0x3f2   : > { %3458 = vmatpush.msra.mxu2 %v3413_v55 }
 0x3f4   : > { %v2276_v63 = vpop.f32.mrf.mxu0  ;;  %v2389_v18 = vpop.f32.mrf.mxu1 }
 0x3f5   : > { %v2390_v42 = vadd.f32 %v2389_v18, %v2276_v63  ;;  %v2516_v22 = vpop.f32.mrf.mxu2  ;;  %v2629_v10 = vpop.f32.mrf.mxu3 }
 0x3f6   : > { %v2718_v33 = vmax.f32 %v2516_v22, 0.0  ;;  %v2719_v45 = vmax.f32 %v2629_v10, 0.0  ;;  %v3696_v22 = vld [vmem:[#allocation6 + $0x2c8] sm:$0xff] }
 0x3f7   : > { %v9868_v28 = vadd.f32 %v2390_v42, %v9669_v6  ;;  %v3680_v42 = vld [vmem:[#allocation6 + $0x248] sm:$0xff]  ;;  %3822 = vmatpush.msra.mxu1 %v3696_v22 }
 0x3f8   : > { %2838 = vmatmul.f32.gmra.mxu0 %v2718_v33  ;;  %2951 = vmatmul.f32.gmra.mxu1 %v2719_v45 }
 0x3f9   : > { %12385 = vst [vmem:[#allocation82_spill] sm:$0xff] %v9868_v28  ;;  %2566 = vmatmul.f32.gmra.mxu2 %v9868_v28  ;;  %2679 = vmatmul.f32.gmra.mxu3 %v9868_v28 }
 0x3fa   : > { %3709 = vmatpush.msra.mxu0 %v3680_v42 }
 0x3fc   : > { %v2279_v37 = vpop.f32.mrf.mxu0  ;;  %v2392_v62 = vpop.f32.mrf.mxu1 }
 0x3fd   : > { %v2393_v23 = vadd.f32 %v2392_v62, %v2279_v37  ;;  %v2519_v39 = vpop.f32.mrf.mxu2  ;;  %v2632_v31 = vpop.f32.mrf.mxu3 }
 0x3fe   : > { %v2720_v63 = vmax.f32 %v2519_v39, 0.0  ;;  %v2721_v18 = vmax.f32 %v2632_v31, 0.0  ;;  %v3428_v39 = vld [vmem:[#allocation3 + $0x280] sm:$0xff] }
 0x3ff   : > { %v9873_v6 = vadd.f32 %v2393_v23, %v9675_v9  ;;  %v3412_v23 = vld [vmem:[#allocation3 + $0x200] sm:$0xff]  ;;  %3572 = vmatpush.msra.mxu3 %v3428_v39 }
 0x400   : > { %2841 = vmatmul.f32.gmra.mxu0 %v2720_v63  ;;  %2954 = vmatmul.f32.gmra.mxu1 %v2721_v18 }
 0x401   : > { %12386 = vst [vmem:[#allocation83_spill] sm:$0xff] %v9873_v6  ;;  %2569 = vmatmul.f32.gmra.mxu2 %v9873_v6  ;;  %2682 = vmatmul.f32.gmra.mxu3 %v9873_v6 }
 0x402   : > { %3459 = vmatpush.msra.mxu2 %v3412_v23 }
 0x404   : > { %v2282_v10 = vpop.f32.mrf.mxu0  ;;  %v2395_v33 = vpop.f32.mrf.mxu1 }
 0x405   : > { %v2396_v45 = vadd.f32 %v2395_v33, %v2282_v10  ;;  %v2522_v55 = vpop.f32.mrf.mxu2  ;;  %v2635_v26 = vpop.f32.mrf.mxu3 }
 0x406   : > { %v2722_v37 = vmax.f32 %v2522_v55, 0.0  ;;  %v2723_v62 = vmax.f32 %v2635_v26, 0.0  ;;  %v3695_v55 = vld [vmem:[#allocation6 + $0x2c0] sm:$0xff] }
 0x407   : > { %v9878_v9 = vadd.f32 %v2396_v45, %v9681_v11  ;;  %v3679_v45 = vld [vmem:[#allocation6 + $0x240] sm:$0xff]  ;;  %3823 = vmatpush.msra.mxu1 %v3695_v55 }
 0x408   : > { %2844 = vmatmul.f32.gmra.mxu0 %v2722_v37  ;;  %2957 = vmatmul.f32.gmra.mxu1 %v2723_v62 }
 0x409   : > { %12387 = vst [vmem:[#allocation84_spill] sm:$0xff] %v9878_v9  ;;  %2572 = vmatmul.f32.gmra.mxu2 %v9878_v9  ;;  %2685 = vmatmul.f32.gmra.mxu3 %v9878_v9 }
 0x40a   : > { %3710 = vmatpush.msra.mxu0 %v3679_v45 }
 0x40c   : > { %v2285_v31 = vpop.f32.mrf.mxu0  ;;  %v2398_v63 = vpop.f32.mrf.mxu1 }
 0x40d   : > { %v2399_v18 = vadd.f32 %v2398_v63, %v2285_v31  ;;  %v2525_v42 = vpop.f32.mrf.mxu2  ;;  %v2638_v22 = vpop.f32.mrf.mxu3 }
 0x40e   : > { %v2724_v10 = vmax.f32 %v2525_v42, 0.0  ;;  %v2725_v33 = vmax.f32 %v2638_v22, 0.0 }
 0x40f   : > { %v9883_v11 = vadd.f32 %v2399_v18, %v9687_v14 }
 0x410   : > { %2847 = vmatmul.f32.gmra.mxu0 %v2724_v10  ;;  %2960 = vmatmul.f32.gmra.mxu1 %v2725_v33 }
 0x411   : > { %12388 = vst [vmem:[#allocation85_spill] sm:$0xff] %v9883_v11  ;;  %2575 = vmatmul.f32.gmra.mxu2 %v9883_v11  ;;  %2688 = vmatmul.f32.gmra.mxu3 %v9883_v11 }
 0x414   : > { %v2288_v26 = vpop.f32.mrf.mxu0  ;;  %v2401_v37 = vpop.f32.mrf.mxu1 }
 0x415   : > { %v2402_v62 = vadd.f32 %v2401_v37, %v2288_v26  ;;  %v2528_v23 = vpop.f32.mrf.mxu2  ;;  %v2641_v39 = vpop.f32.mrf.mxu3  ;;  %v3694_v37 = vld [vmem:[#allocation6 + $0x2b8] sm:$0xff] }
 0x416   : > { %v2726_v31 = vmax.f32 %v2528_v23, 0.0  ;;  %v2727_v63 = vmax.f32 %v2641_v39, 0.0  ;;  %3824 = vmatpush.msra.mxu1 %v3694_v37 }
 0x417   : > { %v9888_v14 = vadd.f32 %v2402_v62, %v9693_v41  ;;  %v3678_v41 = vld [vmem:[#allocation6 + $0x238] sm:$0xff]  ;;  %v4029_v62 = vld [vmem:[#allocation8 + $0x4f0] sm:$0xff] }
 0x418   : > { %2850 = vmatmul.f32.gmra.mxu0 %v2726_v31  ;;  %2963 = vmatmul.f32.gmra.mxu1 %v2727_v63  ;;  %v4030_v31 = vld [vmem:[#allocation8 + $0x4f8] sm:$0xff] }
 0x419   : > { %12389 = vst [vmem:[#allocation86_spill] sm:$0xff] %v9888_v14  ;;  %2578 = vmatmul.f32.gmra.mxu2 %v9888_v14  ;;  %2691 = vmatmul.f32.gmra.mxu3 %v9888_v14 }
 0x41a   : > { %3711 = vmatpush.msra.mxu0 %v3678_v41  ;;  %4031 = vmatpush.msrb.mxu2 %v4029_v62 }
 0x41b   : > { %4144 = vmatpush.msrb.mxu3 %v4030_v31  ;;  %v3693_v31 = vld [vmem:[#allocation6 + $0x2b0] sm:$0xff] }
 0x41c   : > { %v2291_v18 = vpop.f32.mrf.mxu0  ;;  %v2404_v42 = vpop.f32.mrf.mxu1  ;;  %3825 = vmatpush.msra.mxu1 %v3693_v31 }
 0x41d   : > { %v2405_v22 = vadd.f32 %v2404_v42, %v2291_v18  ;;  %v2531_v10 = vpop.f32.mrf.mxu2  ;;  %v2644_v33 = vpop.f32.mrf.mxu3 }
 0x41e   : > { %v2728_v45 = vmax.f32 %v2531_v10, 0.0  ;;  %v2729_v55 = vmax.f32 %v2644_v33, 0.0 }
 0x41f   : > { %v9893_v26 = vadd.f32 %v2405_v22, %v9699_v5 }
 0x420   : > { %2853 = vmatmul.f32.gmra.mxu0 %v2728_v45  ;;  %2966 = vmatmul.f32.gmra.mxu1 %v2729_v55 }
 0x421   : > { %12390 = vst [vmem:[#allocation87_spill] sm:$0xff] %v9893_v26  ;;  %2581 = vmatmul.f32.gmra.mxu2 %v9893_v26  ;;  %2694 = vmatmul.f32.gmra.mxu3 %v9893_v26 }
 0x424   : > { %v2294_v23 = vpop.f32.mrf.mxu0  ;;  %v2407_v39 = vpop.f32.mrf.mxu1 }
 0x425   : > { %v2408_v63 = vadd.f32 %v2407_v39, %v2294_v23  ;;  %v2534_v18 = vpop.f32.mrf.mxu2  ;;  %v2647_v42 = vpop.f32.mrf.mxu3 }
 0x426   : > { %v2730_v5 = vmax.f32 %v2534_v18, 0.0  ;;  %v2731_v22 = vmax.f32 %v2647_v42, 0.0  ;;  %v4028_v18 = vld [vmem:[#allocation8 + $0x4e8] sm:$0xff]  ;;  %v3125_v42 = vpop.permute.xlu2 %3124 }
 0x427   : > { %v9898_v10 = vadd.f32 %v2408_v63, %v9705_v38  ;;  %v3677_v38 = vld [vmem:[#allocation6 + $0x230] sm:$0xff]  ;;  %v4027_v63 = vld [vmem:[#allocation8 + $0x4e0] sm:$0xff]  ;;  %4145 = vmatpush.msrb.mxu3 %v4028_v18  ;;  %vm3219_vm0 = vcmp.eq.s32.totalorder %v3125_v42, %v8895_v25  ;;  %vm3220_vm1 = vcmp.eq.s32.totalorder %v3125_v42, %v8900_v29  ;;  %v3692_v18 = vld [vmem:[#allocation6 + $0x2a8] sm:$0xff] }
 0x428   : > { %2856 = vmatmul.f32.gmra.mxu0 %v2730_v5  ;;  %2969 = vmatmul.f32.gmra.mxu1 %v2731_v22  ;;  %v4025_v42 = vld [vmem:[#allocation8 + $0x4d0] sm:$0xff] }
 0x429   : > { %12391 = vst [vmem:[#allocation88_spill] sm:$0xff] %v9898_v10  ;;  %2584 = vmatmul.f32.gmra.mxu2 %v9898_v10  ;;  %2697 = vmatmul.f32.gmra.mxu3 %v9898_v10 }
 0x42a   : > { %3712 = vmatpush.msra.mxu0 %v3677_v38  ;;  %4032 = vmatpush.msrb.mxu2 %v4027_v63  ;;  %v3676_v63 = vld [vmem:[#allocation6 + $0x228] sm:$0xff] }
 0x42b   : > { %3826 = vmatpush.msra.mxu1 %v3692_v18 }
 0x42c   : > { %v2297_v33 = vpop.f32.mrf.mxu0  ;;  %v2410_v45 = vpop.f32.mrf.mxu1  ;;  %3713 = vmatpush.msra.mxu0 %v3676_v63  ;;  %4033 = vmatpush.msrb.mxu2 %v4025_v42 }
 0x42d   : > { %v2411_v55 = vadd.f32 %v2410_v45, %v2297_v33  ;;  %v2537_v41 = vpop.f32.mrf.mxu2  ;;  %v2650_v37 = vpop.f32.mrf.mxu3  ;;  %v12393_v45 = vmov 1.0  }
 0x42e   : > { %v2732_v23 = vmax.f32 %v2537_v41, 0.0  ;;  %v2733_v39 = vmax.f32 %v2650_v37, 0.0 }
 0x42f   : > { %v9903_v62 = vadd.f32 %v2411_v55, %v9711_v24  ;;  %v3128_v55 = vpop.permute.xlu0 %3127 }
 0x430   : > { %2859 = vmatmul.f32.gmra.mxu0 %v2732_v23  ;;  %2972 = vmatmul.f32.gmra.mxu1 %v2733_v39  ;;  %vm3221_vm2 = vcmp.eq.s32.totalorder %v3128_v55, %v8895_v25  ;;  %vm3222_vm3 = vcmp.eq.s32.totalorder %v3128_v55, %v8900_v29 }
 0x431   : > { %12392 = vst [vmem:[#allocation89_spill] sm:$0xff] %v9903_v62  ;;  %2587 = vmatmul.f32.gmra.mxu2 %v9903_v62  ;;  %2700 = vmatmul.f32.gmra.mxu3 %v9903_v62 }
 0x435   : > { %v2540_v5 = vpop.f32.mrf.mxu2  ;;  %v2653_v22 = vpop.f32.mrf.mxu3 }
 0x436   : > { %v2734_v24 = vmax.f32 %v2540_v5, 0.0  ;;  %v2735_v33 = vmax.f32 %v2653_v22, 0.0  ;;  %v4026_v5 = vld [vmem:[#allocation8 + $0x4d8] sm:$0xff]  ;;  %v3131_v22 = vpop.permute.xlu1 %3130 }
 0x437   : > { %4146 = vmatpush.msrb.mxu3 %v4026_v5  ;;  %vm3223_vm4 = vcmp.eq.s32.totalorder %v3131_v22, %v8895_v25  ;;  %vm3224_vm5 = vcmp.eq.s32.totalorder %v3131_v22, %v8900_v29  ;;  %v3134_v22 = vpop.permute.xlu2 %3133 }
 0x438   : > { %2862 = vmatmul.f32.gmra.mxu0 %v2734_v24  ;;  %2975 = vmatmul.f32.gmra.mxu1 %v2735_v33  ;;  %vm3225_vm6 = vcmp.eq.s32.totalorder %v3134_v22, %v8895_v25  ;;  %vm3226_vm7 = vcmp.eq.s32.totalorder %v3134_v22, %v8900_v29 }
 0x439   : > { %8014 = vmatmul.msk.f32.vlgmr.msra.gmra.mxu2 %vm3219_vm0, %v12393_v45  ;;  %8046 = vmatmul.msk.f32.vlgmr.msra.gmra.mxu3 %vm3220_vm1, %v12393_v45 }
 0x43d   : > { %v2543_v41 = vpop.f32.mrf.mxu2  ;;  %v2656_v37 = vpop.f32.mrf.mxu3 }
 0x43e   : > { %v2736_v23 = vmax.f32 %v2543_v41, 0.0  ;;  %v2737_v39 = vmax.f32 %v2656_v37, 0.0  ;;  %v9913_v38 = vpop.f32.mrf.mxu0  ;;  %v9915_v31 = vpop.f32.mrf.mxu1 }
 0x440   : > { %2865 = vmatmul.f32.gmra.mxu0 %v2736_v23  ;;  %2978 = vmatmul.f32.gmra.mxu1 %v2737_v39 }
 0x441   : > { %8015 = vmatmul.msk.f32.gmra.mxu2 %vm3221_vm2, %v12393_v45  ;;  %8047 = vmatmul.msk.f32.gmra.mxu3 %vm3222_vm3, %v12393_v45 }
 0x445   : > { %v2546_v24 = vpop.f32.mrf.mxu2  ;;  %v2659_v33 = vpop.f32.mrf.mxu3 }
 0x446   : > { %v2738_v55 = vmax.f32 %v2546_v24, 0.0  ;;  %v2739_v41 = vmax.f32 %v2659_v33, 0.0  ;;  %v9921_v37 = vpop.f32.mrf.mxu0  ;;  %v9923_v23 = vpop.f32.mrf.mxu1  ;;  %v3675_v24 = vld [vmem:[#allocation6 + $0x220] sm:$0xff] }
 0x447   : > { %v3691_v33 = vld [vmem:[#allocation6 + $0x2a0] sm:$0xff]  ;;  %3714 = vmatpush.msra.mxu0 %v3675_v24 }
 0x448   : > { %2868 = vmatmul.f32.gmra.mxu0 %v2738_v55  ;;  %2981 = vmatmul.f32.gmra.mxu1 %v2739_v41  ;;  %v4023_v55 = vld [vmem:[#allocation8 + $0x4c0] sm:$0xff]  ;;  %v4024_v41 = vld [vmem:[#allocation8 + $0x4c8] sm:$0xff] }
 0x449   : > { %8016 = vmatmul.msk.f32.gmra.mxu2 %vm3223_vm4, %v12393_v45  ;;  %8048 = vmatmul.msk.f32.gmra.mxu3 %vm3224_vm5, %v12393_v45 }
 0x44a   : > { %3827 = vmatpush.msra.mxu1 %v3691_v33  ;;  %4034 = vmatpush.msrb.mxu2 %v4023_v55 }
 0x44b   : > { %4147 = vmatpush.msrb.mxu3 %v4024_v41 }
 0x44d   : > { %v2549_v39 = vpop.f32.mrf.mxu2  ;;  %v2662_v63 = vpop.f32.mrf.mxu3 }
 0x44e   : > { %v2740_v18 = vmax.f32 %v2549_v39, 0.0  ;;  %v2741_v42 = vmax.f32 %v2662_v63, 0.0  ;;  %v9927_v5 = vpop.f32.mrf.mxu0  ;;  %v9929_v62 = vpop.f32.mrf.mxu1 }
 0x450   : > { %2871 = vmatmul.f32.gmra.mxu0 %v2740_v18  ;;  %2984 = vmatmul.f32.gmra.mxu1 %v2741_v42  ;;  %v3137_v42 = vpop.permute.xlu1 %3136 }
 0x451   : > { %8017 = vmatmul.msk.f32.gmra.mxu2 %vm3225_vm6, %v12393_v45  ;;  %8049 = vmatmul.msk.f32.gmra.mxu3 %vm3226_vm7, %v12393_v45  ;;  %vm3227_vm8 = vcmp.eq.s32.totalorder %v3137_v42, %v8895_v25  ;;  %vm3228_vm9 = vcmp.eq.s32.totalorder %v3137_v42, %v8900_v29  ;;  %v4021_v42 = vld [vmem:[#allocation8 + $0x4b0] sm:$0xff] }
 0x452   : > { %4035 = vmatpush.msrb.mxu2 %v4021_v42 }
 0x455   : > { %v2552_v39 = vpop.f32.mrf.mxu2  ;;  %v2665_v63 = vpop.f32.mrf.mxu3 }
 0x456   : > { %v2742_v10 = vmax.f32 %v2552_v39, 0.0  ;;  %v2743_v26 = vmax.f32 %v2665_v63, 0.0  ;;  %v9935_v14 = vpop.f32.mrf.mxu0  ;;  %v9937_v18 = vpop.f32.mrf.mxu1 }
 0x457   : > { %v3140_v63 = vpop.permute.xlu2 %3139 }
 0x458   : > { %2874 = vmatmul.f32.gmra.mxu0 %v2742_v10  ;;  %2987 = vmatmul.f32.gmra.mxu1 %v2743_v26  ;;  %vm3229_vm10 = vcmp.eq.s32.totalorder %v3140_v63, %v8895_v25  ;;  %vm3230_vm11 = vcmp.eq.s32.totalorder %v3140_v63, %v8900_v29  ;;  %v3674_v26 = vld [vmem:[#allocation6 + $0x218] sm:$0xff] }
 0x459   : > { %8018 = vmatmul.msk.f32.gmra.mxu2 %vm3227_vm8, %v12393_v45  ;;  %8050 = vmatmul.msk.f32.gmra.mxu3 %vm3228_vm9, %v12393_v45  ;;  %v3690_v10 = vld [vmem:[#allocation6 + $0x298] sm:$0xff] }
 0x45a   : > { %3715 = vmatpush.msra.mxu0 %v3674_v26  ;;  %3828 = vmatpush.msra.mxu1 %v3690_v10 }
 0x45d   : > { %v2555_v22 = vpop.f32.mrf.mxu2  ;;  %v2668_v24 = vpop.f32.mrf.mxu3 }
 0x45e   : > { %v2744_v33 = vmax.f32 %v2555_v22, 0.0  ;;  %v2745_v55 = vmax.f32 %v2668_v24, 0.0  ;;  %v9943_v41 = vpop.f32.mrf.mxu0  ;;  %v9945_v39 = vpop.f32.mrf.mxu1  ;;  %v4022_v22 = vld [vmem:[#allocation8 + $0x4b8] sm:$0xff] }
 0x45f   : > { %4148 = vmatpush.msrb.mxu3 %v4022_v22 }
 0x460   : > { %2877 = vmatmul.f32.gmra.mxu0 %v2744_v33  ;;  %2990 = vmatmul.f32.gmra.mxu1 %v2745_v55  ;;  %v3143_v55 = vpop.permute.xlu0 %3142 }
 0x461   : > { %8019 = vmatmul.msk.f32.gmra.mxu2 %vm3229_vm10, %v12393_v45  ;;  %8051 = vmatmul.msk.f32.gmra.mxu3 %vm3230_vm11, %v12393_v45  ;;  %vm3231_vm12 = vcmp.eq.s32.totalorder %v3143_v55, %v8895_v25  ;;  %vm3232_vm13 = vcmp.eq.s32.totalorder %v3143_v55, %v8900_v29  ;;  %v4019_v55 = vld [vmem:[#allocation8 + $0x4a0] sm:$0xff] }
 0x462   : > { %4036 = vmatpush.msrb.mxu2 %v4019_v55 }
 0x465   : > { %v2558_v24 = vpop.f32.mrf.mxu2  ;;  %v2671_v11 = vpop.f32.mrf.mxu3 }
 0x466   : > { %v2746_v9 = vmax.f32 %v2558_v24, 0.0  ;;  %v2747_v6 = vmax.f32 %v2671_v11, 0.0  ;;  %v9951_v36 = vpop.f32.mrf.mxu0  ;;  %v9953_v33 = vpop.f32.mrf.mxu1 }
 0x467   : > { %v3146_v24 = vpop.permute.xlu1 %3145 }
 0x468   : > { %2880 = vmatmul.f32.gmra.mxu0 %v2746_v9  ;;  %2993 = vmatmul.f32.gmra.mxu1 %v2747_v6  ;;  %vm3233_vm14 = vcmp.eq.s32.totalorder %v3146_v24, %v8895_v25  ;;  %vm3234_vm15 = vcmp.eq.s32.totalorder %v3146_v24, %v8900_v29  ;;  %v3673_v6 = vld [vmem:[#allocation6 + $0x210] sm:$0xff] }
 0x469   : > { %8020 = vmatmul.msk.f32.gmra.mxu2 %vm3231_vm12, %v12393_v45  ;;  %8052 = vmatmul.msk.f32.gmra.mxu3 %vm3232_vm13, %v12393_v45  ;;  %v3689_v9 = vld [vmem:[#allocation6 + $0x290] sm:$0xff] }
 0x46a   : > { %3716 = vmatpush.msra.mxu0 %v3673_v6  ;;  %3829 = vmatpush.msra.mxu1 %v3689_v9 }
 0x46d   : > { %v2561_v63 = vpop.f32.mrf.mxu2  ;;  %v2674_v26 = vpop.f32.mrf.mxu3 }
 0x46e   : > { %v2748_v10 = vmax.f32 %v2561_v63, 0.0  ;;  %v2749_v42 = vmax.f32 %v2674_v26, 0.0  ;;  %v9959_v11 = vpop.f32.mrf.mxu0  ;;  %v9961_v22 = vpop.f32.mrf.mxu1  ;;  %v4020_v63 = vld [vmem:[#allocation8 + $0x4a8] sm:$0xff] }
 0x46f   : > { %4149 = vmatpush.msrb.mxu3 %v4020_v63 }
 0x470   : > { %2883 = vmatmul.f32.gmra.mxu0 %v2748_v10  ;;  %2996 = vmatmul.f32.gmra.mxu1 %v2749_v42  ;;  %v3149_v42 = vpop.permute.xlu2 %3148 }
 0x471   : > { %8021 = vmatmul.msk.f32.gmra.mxu2 %vm3233_vm14, %v12393_v45  ;;  %8053 = vmatmul.msk.f32.gmra.mxu3 %vm3234_vm15, %v12393_v45  ;;  %vm3235_vm0 = vcmp.eq.s32.totalorder %v3149_v42, %v8895_v25  ;;  %vm3236_vm1 = vcmp.eq.s32.totalorder %v3149_v42, %v8900_v29  ;;  %v4017_v42 = vld [vmem:[#allocation8 + $0x490] sm:$0xff] }
 0x472   : > { %4037 = vmatpush.msrb.mxu2 %v4017_v42 }
 0x475   : > { %v2564_v26 = vpop.f32.mrf.mxu2  ;;  %v2677_v28 = vpop.f32.mrf.mxu3 }
 0x476   : > { %v2750_v51 = vmax.f32 %v2564_v26, 0.0  ;;  %v2751_v2 = vmax.f32 %v2677_v28, 0.0  ;;  %v9967_v52 = vpop.f32.mrf.mxu0  ;;  %v9969_v10 = vpop.f32.mrf.mxu1 }
 0x477   : > { %v3152_v26 = vpop.permute.xlu0 %3151 }
 0x478   : > { %2886 = vmatmul.f32.gmra.mxu0 %v2750_v51  ;;  %2999 = vmatmul.f32.gmra.mxu1 %v2751_v2  ;;  %vm3237_vm2 = vcmp.eq.s32.totalorder %v3152_v26, %v8895_v25  ;;  %vm3238_vm3 = vcmp.eq.s32.totalorder %v3152_v26, %v8900_v29  ;;  %v3672_v2 = vld [vmem:[#allocation6 + $0x208] sm:$0xff] }
 0x479   : > { %8022 = vmatmul.msk.f32.gmra.mxu2 %vm3235_vm0, %v12393_v45  ;;  %8054 = vmatmul.msk.f32.gmra.mxu3 %vm3236_vm1, %v12393_v45  ;;  %v3688_v51 = vld [vmem:[#allocation6 + $0x288] sm:$0xff] }
 0x47a   : > { %3717 = vmatpush.msra.mxu0 %v3672_v2  ;;  %3830 = vmatpush.msra.mxu1 %v3688_v51 }
 0x47d   : > { %v2567_v24 = vpop.f32.mrf.mxu2  ;;  %v2680_v6 = vpop.f32.mrf.mxu3 }
 0x47e   : > { %v2752_v9 = vmax.f32 %v2567_v24, 0.0  ;;  %v2753_v55 = vmax.f32 %v2680_v6, 0.0  ;;  %v9975_v28 = vpop.f32.mrf.mxu0  ;;  %v9977_v63 = vpop.f32.mrf.mxu1  ;;  %v4018_v24 = vld [vmem:[#allocation8 + $0x498] sm:$0xff] }
 0x47f   : > { %4150 = vmatpush.msrb.mxu3 %v4018_v24 }
 0x480   : > { %2889 = vmatmul.f32.gmra.mxu0 %v2752_v9  ;;  %3002 = vmatmul.f32.gmra.mxu1 %v2753_v55  ;;  %v3155_v55 = vpop.permute.xlu1 %3154 }
 0x481   : > { %8023 = vmatmul.msk.f32.gmra.mxu2 %vm3237_vm2, %v12393_v45  ;;  %8055 = vmatmul.msk.f32.gmra.mxu3 %vm3238_vm3, %v12393_v45  ;;  %vm3239_vm4 = vcmp.eq.s32.totalorder %v3155_v55, %v8895_v25  ;;  %vm3240_vm5 = vcmp.eq.s32.totalorder %v3155_v55, %v8900_v29  ;;  %v4015_v55 = vld [vmem:[#allocation8 + $0x480] sm:$0xff] }
 0x482   : > { %4038 = vmatpush.msrb.mxu2 %v4015_v55 }
 0x485   : > { %v2570_v6 = vpop.f32.mrf.mxu2  ;;  %v2683_v40 = vpop.f32.mrf.mxu3 }
 0x486   : > { %v2754_v60 = vmax.f32 %v2570_v6, 0.0  ;;  %v2755_v30 = vmax.f32 %v2683_v40, 0.0  ;;  %v9983_v0 = vpop.f32.mrf.mxu0  ;;  %v9985_v9 = vpop.f32.mrf.mxu1 }
 0x487   : > { %v3158_v6 = vpop.permute.xlu2 %3157 }
 0x488   : > { %2892 = vmatmul.f32.gmra.mxu0 %v2754_v60  ;;  %3005 = vmatmul.f32.gmra.mxu1 %v2755_v30  ;;  %vm3241_vm6 = vcmp.eq.s32.totalorder %v3158_v6, %v8895_v25  ;;  %vm3242_vm7 = vcmp.eq.s32.totalorder %v3158_v6, %v8900_v29  ;;  %v3671_v30 = vld [vmem:[#allocation6 + $0x200] sm:$0xff] }
 0x489   : > { %8024 = vmatmul.msk.f32.gmra.mxu2 %vm3239_vm4, %v12393_v45  ;;  %8056 = vmatmul.msk.f32.gmra.mxu3 %vm3240_vm5, %v12393_v45  ;;  %v3687_v60 = vld [vmem:[#allocation6 + $0x280] sm:$0xff] }
 0x48a   : > { %3718 = vmatpush.msra.mxu0 %v3671_v30  ;;  %3831 = vmatpush.msra.mxu1 %v3687_v60 }
 0x48d   : > { %v2573_v26 = vpop.f32.mrf.mxu2  ;;  %v2686_v2 = vpop.f32.mrf.mxu3 }
 0x48e   : > { %v2756_v51 = vmax.f32 %v2573_v26, 0.0  ;;  %v2757_v42 = vmax.f32 %v2686_v2, 0.0  ;;  %v9991_v40 = vpop.f32.mrf.mxu0  ;;  %v9993_v24 = vpop.f32.mrf.mxu1  ;;  %v4016_v26 = vld [vmem:[#allocation8 + $0x488] sm:$0xff] }
 0x48f   : > { %4151 = vmatpush.msrb.mxu3 %v4016_v26 }
 0x490   : > { %2895 = vmatmul.f32.gmra.mxu0 %v2756_v51  ;;  %3008 = vmatmul.f32.gmra.mxu1 %v2757_v42  ;;  %v3161_v42 = vpop.permute.xlu0 %3160 }
 0x491   : > { %8025 = vmatmul.msk.f32.gmra.mxu2 %vm3241_vm6, %v12393_v45  ;;  %8057 = vmatmul.msk.f32.gmra.mxu3 %vm3242_vm7, %v12393_v45  ;;  %vm3243_vm8 = vcmp.eq.s32.totalorder %v3161_v42, %v8895_v25  ;;  %vm3244_vm9 = vcmp.eq.s32.totalorder %v3161_v42, %v8900_v29 }
 0x495   : > { %v2576_v2 = vpop.f32.mrf.mxu2  ;;  %v2689_v34 = vpop.f32.mrf.mxu3 }
 0x496   : > { %v2758_v12 = vmax.f32 %v2576_v2, 0.0  ;;  %v2759_v7 = vmax.f32 %v2689_v34, 0.0  ;;  %v9999_v53 = vpop.f32.mrf.mxu0  ;;  %v10001_v51 = vpop.f32.mrf.mxu1 }
 0x497   : > { %v3164_v2 = vpop.permute.xlu1 %3163 }
 0x498   : > { %2898 = vmatmul.f32.gmra.mxu0 %v2758_v12  ;;  %3011 = vmatmul.f32.gmra.mxu1 %v2759_v7  ;;  %vm3245_vm10 = vcmp.eq.s32.totalorder %v3164_v2, %v8895_v25  ;;  %vm3246_vm11 = vcmp.eq.s32.totalorder %v3164_v2, %v8900_v29  ;;  %v4013_v7 = vld [vmem:[#allocation8 + $0x470] sm:$0xff]  ;;  %v4014_v12 = vld [vmem:[#allocation8 + $0x478] sm:$0xff] }
 0x499   : > { %8026 = vmatmul.msk.f32.gmra.mxu2 %vm3243_vm8, %v12393_v45  ;;  %8058 = vmatmul.msk.f32.gmra.mxu3 %vm3244_vm9, %v12393_v45 }
 0x49a   : > { %4039 = vmatpush.msrb.mxu2 %v4013_v7  ;;  %4152 = vmatpush.msrb.mxu3 %v4014_v12 }
 0x49d   : > { %v2579_v6 = vpop.f32.mrf.mxu2  ;;  %v2692_v30 = vpop.f32.mrf.mxu3 }
 0x49e   : > { %v2760_v60 = vmax.f32 %v2579_v6, 0.0  ;;  %v2761_v55 = vmax.f32 %v2692_v30, 0.0  ;;  %v10007_v34 = vpop.f32.mrf.mxu0  ;;  %v10009_v26 = vpop.f32.mrf.mxu1 }
 0x49f   : > { %12394 = vst [vmem:[#allocation90_spill] sm:$0xff] %v10007_v34  ;;  %v3167_v34 = vpop.permute.xlu2 %3166 }
 0x4a0   : > { %12395 = vst [vmem:[#allocation91_spill] sm:$0xff] %v10009_v26  ;;  %2901 = vmatmul.f32.gmra.mxu0 %v2760_v60  ;;  %3014 = vmatmul.f32.gmra.mxu1 %v2761_v55  ;;  %vm3247_vm12 = vcmp.eq.s32.totalorder %v3167_v34, %v8895_v25  ;;  %vm3248_vm13 = vcmp.eq.s32.totalorder %v3167_v34, %v8900_v29  ;;  %v4337_v60 = vld [vmem:[#allocation9 + $0x478] sm:$0xff]  ;;  %v4012_v34 = vld [vmem:[#allocation8 + $0x468] sm:$0xff] }
 0x4a1   : > { %8027 = vmatmul.msk.f32.gmra.mxu2 %vm3245_vm10, %v12393_v45  ;;  %8059 = vmatmul.msk.f32.gmra.mxu3 %vm3246_vm11, %v12393_v45  ;;  %v4353_v55 = vld [vmem:[#allocation9 + $0x4f8] sm:$0xff] }
 0x4a2   : > { %4354 = vmatpush.msrb.mxu0 %v4337_v60  ;;  %4467 = vmatpush.msrb.mxu1 %v4353_v55  ;;  %v2932_v55 = vadd.f32 %v9915_v31, %v9913_v38  ;;  %v3059_v31 = vadd.f32 %v9286_v8, %v9166_v35  ;;  %v4009_v35 = vld [vmem:[#allocation8 + $0x450] sm:$0xff]  ;;  %v4010_v8 = vld [vmem:[#allocation8 + $0x458] sm:$0xff] }
 0x4a3   : > { %4153 = vmatpush.msrb.mxu3 %v4012_v34 }
 0x4a4   : > { %v3027_v38 = vadd.f32 %v2932_v55, %v9716_v54 }
 0x4a5   : > { %v2582_v42 = vpop.f32.mrf.mxu2  ;;  %v2695_v6 = vpop.f32.mrf.mxu3  ;;  %4154 = vmatpush.msrb.mxu3 %v4010_v8 }
 0x4a6   : > { %v2762_v30 = vmax.f32 %v2582_v42, 0.0  ;;  %v2763_v32 = vmax.f32 %v2695_v6, 0.0  ;;  %v10015_v20 = vpop.f32.mrf.mxu0  ;;  %v10017_v26 = vpop.f32.mrf.mxu1 }
 0x4a7   : > { %12396 = vst [vmem:[#allocation92_spill] sm:$0xff] %v10015_v20  ;;  %v3170_v20 = vpop.permute.xlu0 %3169 }
 0x4a8   : > { %12397 = vst [vmem:[#allocation93_spill] sm:$0xff] %v10017_v26  ;;  %2904 = vmatmul.f32.gmra.mxu0 %v2762_v30  ;;  %3017 = vmatmul.f32.gmra.mxu1 %v2763_v32  ;;  %vm3249_vm14 = vcmp.eq.s32.totalorder %v3170_v20, %v8895_v25  ;;  %vm3250_vm15 = vcmp.eq.s32.totalorder %v3170_v20, %v8900_v29  ;;  %v4011_v32 = vld [vmem:[#allocation8 + $0x460] sm:$0xff] }
 0x4a9   : > { %8028 = vmatmul.msk.f32.gmra.mxu2 %vm3247_vm12, %v12393_v45  ;;  %8060 = vmatmul.msk.f32.gmra.mxu3 %vm3248_vm13, %v12393_v45 }
 0x4aa   : > { %4040 = vmatpush.msrb.mxu2 %v4011_v32  ;;  %v4352_v32 = vld [vmem:[#allocation9 + $0x4f0] sm:$0xff] }
 0x4ab   : > { %4468 = vmatpush.msrb.mxu1 %v4352_v32 }
 0x4ac   : > { %4041 = vmatpush.msrb.mxu2 %v4009_v35 }
 0x4ad   : > { %v2585_v2 = vpop.f32.mrf.mxu2  ;;  %v2698_v7 = vpop.f32.mrf.mxu3 }
 0x4ae   : > { %v2764_v12 = vmax.f32 %v2585_v2, 0.0  ;;  %v2765_v42 = vmax.f32 %v2698_v7, 0.0  ;;  %v10023_v6 = vpop.f32.mrf.mxu0  ;;  %v10025_v26 = vpop.f32.mrf.mxu1 }
 0x4af   : > { %12398 = vst [vmem:[#allocation94_spill] sm:$0xff] %v10025_v26 }
 0x4b0   : > { %2907 = vmatmul.f32.gmra.mxu0 %v2764_v12  ;;  %3020 = vmatmul.f32.gmra.mxu1 %v2765_v42  ;;  %v3173_v12 = vpop.permute.xlu1 %3172  ;;  %v4336_v42 = vld [vmem:[#allocation9 + $0x470] sm:$0xff] }
 0x4b1   : > { %8029 = vmatmul.msk.f32.gmra.mxu2 %vm3249_vm14, %v12393_v45  ;;  %8061 = vmatmul.msk.f32.gmra.mxu3 %vm3250_vm15, %v12393_v45  ;;  %vm3251_vm0 = vcmp.eq.s32.totalorder %v3173_v12, %v8895_v25  ;;  %vm3252_vm1 = vcmp.eq.s32.totalorder %v3173_v12, %v8900_v29 }
 0x4b2   : > { %4355 = vmatpush.msrb.mxu0 %v4336_v42 }
 0x4b5   : > { %v2588_v30 = vpop.f32.mrf.mxu2  ;;  %v2701_v60 = vpop.f32.mrf.mxu3 }
 0x4b6   : > { %v2766_v2 = vmax.f32 %v2588_v30, 0.0  ;;  %v2767_v7 = vmax.f32 %v2701_v60, 0.0  ;;  %v10033_v26 = vpop.f32.mrf.mxu0  ;;  %v10035_v20 = vpop.f32.mrf.mxu1  ;;  %v10044_v60 = vadd.f32 %v3059_v31, %v3027_v38 }
 0x4b7   : > { %12399 = vst [vmem:[#allocation95_spill] sm:$0xff] %v10033_v26  ;;  %v3176_v26 = vpop.permute.xlu2 %3175 }
 0x4b8   : > { %12400 = vst [vmem:[#allocation96_spill] sm:$0xff] %v10035_v20  ;;  %2910 = vmatmul.f32.gmra.mxu0 %v2766_v2  ;;  %3023 = vmatmul.f32.gmra.mxu1 %v2767_v7  ;;  %v2935_v2 = vadd.f32 %v9923_v23, %v9921_v37  ;;  %vm3253_vm2 = vcmp.eq.s32.totalorder %v3176_v26, %v8895_v25 }
 0x4b9   : > { %8030 = vmatmul.msk.f32.gmra.mxu2 %vm3251_vm0, %v12393_v45  ;;  %8062 = vmatmul.msk.f32.gmra.mxu3 %vm3252_vm1, %v12393_v45  ;;  %12401 = vst [vmem:[#allocation97_spill] sm:$0xff] %v10044_v60  ;;  %vm3254_vm3 = vcmp.eq.s32.totalorder %v3176_v26, %v8900_v29  ;;  %v3060_v37 = vadd.f32 %v9296_v47, %v9179_v44  ;;  %v4335_v44 = vld [vmem:[#allocation9 + $0x468] sm:$0xff] }
 0x4ba   : > { %v3028_v54 = vadd.f32 %v2935_v2, %v9721_v49  ;;  %v2938_v26 = vadd.f32 %v9929_v62, %v9927_v5  ;;  %v4351_v47 = vld [vmem:[#allocation9 + $0x4e8] sm:$0xff]  ;;  %4356 = vmatpush.msrb.mxu0 %v4335_v44  ;;  %v3061_v62 = vadd.f32 %v9306_v58, %v9190_v48  ;;  %v2941_v2 = vadd.f32 %v9937_v18, %v9935_v14  ;;  %v4007_v48 = vld [vmem:[#allocation8 + $0x440] sm:$0xff] }
 0x4bb   : > { %4469 = vmatpush.msrb.mxu1 %v4351_v47  ;;  %v4008_v58 = vld [vmem:[#allocation8 + $0x448] sm:$0xff]  ;;  %4042 = vmatpush.msrb.mxu2 %v4007_v48  ;;  %v3062_v14 = vadd.f32 %v9316_v21, %v9201_v56  ;;  %v4334_v56 = vld [vmem:[#allocation9 + $0x460] sm:$0xff] }
 0x4bc   : > { %v10071_v31 = vadd.f32 %v3060_v37, %v3028_v54  ;;  %v3029_v49 = vadd.f32 %v2938_v26, %v9726_v43  ;;  %v3030_v43 = vadd.f32 %v2941_v2, %v9731_v16  ;;  %4155 = vmatpush.msrb.mxu3 %v4008_v58  ;;  %v2944_v26 = vadd.f32 %v9945_v39, %v9943_v41  ;;  %v4350_v21 = vld [vmem:[#allocation9 + $0x4e0] sm:$0xff] }
 0x4bd   : > { %v3461_v34 = vpop.f32.mrf.mxu2  ;;  %v3574_v30 = vpop.f32.mrf.mxu3  ;;  %4357 = vmatpush.msrb.mxu0 %v4334_v56  ;;  %4470 = vmatpush.msrb.mxu1 %v4350_v21  ;;  %v3063_v41 = vadd.f32 %v9326_v19, %v9212_v61  ;;  %v4005_v61 = vld [vmem:[#allocation8 + $0x430] sm:$0xff]  ;;  %v4006_v19 = vld [vmem:[#allocation8 + $0x438] sm:$0xff] }
 0x4be   : > { %v10048_v7 = vpop.f32.mrf.mxu0  ;;  %v10050_v12 = vpop.f32.mrf.mxu1  ;;  %v10052_v20 = vadd.f32 %v3574_v30, %v3461_v34  ;;  %12402 = vst [vmem:[#allocation98_spill] sm:$0xff] %v10071_v31  ;;  %v10090_v37 = vadd.f32 %v3061_v62, %v3029_v49  ;;  %v10109_v49 = vadd.f32 %v3062_v14, %v3030_v43  ;;  %v3031_v16 = vadd.f32 %v2944_v26, %v9736_v1 }
 0x4bf   : > { %v3179_v34 = vpop.permute.xlu0 %3178  ;;  %v3185_v62 = vpop.permute.xlu2 %3184  ;;  %4043 = vmatpush.msrb.mxu2 %v4005_v61  ;;  %4156 = vmatpush.msrb.mxu3 %v4006_v19  ;;  %v3064_v1 = vadd.f32 %v9334_v50, %v9223_v57  ;;  %v4333_v57 = vld [vmem:[#allocation9 + $0x458] sm:$0xff] }
 0x4c0   : > { %3719 = vmatmul.f32.vlgmr.msra.gmra.mxu0 %v10052_v20  ;;  %3832 = vmatmul.f32.vlgmr.msra.gmra.mxu1 %v10044_v60  ;;  %vm3255_vm4 = vcmp.eq.s32.totalorder %v3179_v34, %v8895_v25  ;;  %vm3256_vm5 = vcmp.eq.s32.totalorder %v3179_v34, %v8900_v29  ;;  %12403 = vst [vmem:[#allocation99_spill] sm:$0xff] %v10090_v37  ;;  %v4349_v50 = vld [vmem:[#allocation9 + $0x4d8] sm:$0xff] }
 0x4c1   : > { %8031 = vmatmul.msk.f32.gmra.mxu2 %vm3253_vm2, %v12393_v45  ;;  %8063 = vmatmul.msk.f32.gmra.mxu3 %vm3254_vm3, %v12393_v45  ;;  %12404 = vst [vmem:[#allocation100_spill] sm:$0xff] %v10109_v49  ;;  %vm3259_vm8 = vcmp.eq.s32.totalorder %v3185_v62, %v8895_v25  ;;  %vm3260_vm9 = vcmp.eq.s32.totalorder %v3185_v62, %v8900_v29 }
 0x4c2   : > { %v10128_v58 = vadd.f32 %v3063_v41, %v3031_v16  ;;  %4358 = vmatpush.msrb.mxu0 %v4333_v57  ;;  %4471 = vmatpush.msrb.mxu1 %v4349_v50 }
 0x4c4   : > { %12405 = vst [vmem:[#allocation101_spill] sm:$0xff] %v10128_v58 }
 0x4c5   : > { %v3464_v23 = vpop.f32.mrf.mxu2  ;;  %v3577_v55 = vpop.f32.mrf.mxu3 }
 0x4c6   : > { %v10065_v42 = vpop.f32.mrf.mxu0  ;;  %v10067_v32 = vpop.f32.mrf.mxu1  ;;  %v10069_v38 = vadd.f32 %v3577_v55, %v3464_v23 }
 0x4c7   : > { %v3182_v23 = vpop.permute.xlu1 %3181  ;;  %v3188_v43 = vpop.permute.xlu0 %3187 }
 0x4c8   : > { %3722 = vmatmul.f32.gmra.mxu0 %v10069_v38  ;;  %3835 = vmatmul.f32.gmra.mxu1 %v10071_v31  ;;  %vm3257_vm6 = vcmp.eq.s32.totalorder %v3182_v23, %v8895_v25  ;;  %vm3258_vm7 = vcmp.eq.s32.totalorder %v3182_v23, %v8900_v29  ;;  %vm3261_vm10 = vcmp.eq.s32.totalorder %v3188_v43, %v8895_v25  ;;  %v3194_v19 = vpop.permute.xlu2 %3193 }
 0x4c9   : > { %8032 = vmatmul.msk.f32.gmra.mxu2 %vm3255_vm4, %v12393_v45  ;;  %8064 = vmatmul.msk.f32.gmra.mxu3 %vm3256_vm5, %v12393_v45  ;;  %vm3262_vm11 = vcmp.eq.s32.totalorder %v3188_v43, %v8900_v29  ;;  %vm3265_vm14 = vcmp.eq.s32.totalorder %v3194_v19, %v8895_v25  ;;  %vm3266_vm15 = vcmp.eq.s32.totalorder %v3194_v19, %v8900_v29 }
 0x4cd   : > { %v3467_v5 = vpop.f32.mrf.mxu2  ;;  %v3580_v30 = vpop.f32.mrf.mxu3 }
 0x4ce   : > { %v10084_v35 = vpop.f32.mrf.mxu0  ;;  %v10086_v8 = vpop.f32.mrf.mxu1  ;;  %v10088_v54 = vadd.f32 %v3580_v30, %v3467_v5  ;;  %v2947_v30 = vadd.f32 %v9953_v33, %v9951_v36 }
 0x4cf   : > { %v3191_v21 = vpop.permute.xlu1 %3190 }
 0x4d0   : > { %3725 = vmatmul.f32.gmra.mxu0 %v10088_v54  ;;  %3838 = vmatmul.f32.gmra.mxu1 %v10090_v37  ;;  %v3032_v36 = vadd.f32 %v2947_v30, %v9741_v13  ;;  %vm3263_vm12 = vcmp.eq.s32.totalorder %v3191_v21, %v8895_v25  ;;  %vm3264_vm13 = vcmp.eq.s32.totalorder %v3191_v21, %v8900_v29 }
 0x4d1   : > { %8033 = vmatmul.msk.f32.gmra.mxu2 %vm3257_vm6, %v12393_v45  ;;  %8065 = vmatmul.msk.f32.gmra.mxu3 %vm3258_vm7, %v12393_v45 }
 0x4d2   : > { %v10147_v56 = vadd.f32 %v3064_v1, %v3032_v36  ;;  %v12410_v36 = vld [vmem:[#allocation45_spill] sm:$0xff] }
 0x4d4   : > { %12406 = vst [vmem:[#allocation102_spill] sm:$0xff] %v10147_v56 }
 0x4d5   : > { %v3470_v18 = vpop.f32.mrf.mxu2  ;;  %v3583_v55 = vpop.f32.mrf.mxu3 }
 0x4d6   : > { %v10103_v34 = vpop.f32.mrf.mxu0  ;;  %v10105_v44 = vpop.f32.mrf.mxu1  ;;  %v10107_v47 = vadd.f32 %v3583_v55, %v3470_v18  ;;  %v2950_v18 = vadd.f32 %v9961_v22, %v9959_v11  ;;  %v12407_v11 = vld [vmem:[#allocation44_spill] sm:$0xff] }
 0x4d7   : > { %v3065_v22 = vadd.f32 %v12407_v11, %v9234_v27  ;;  %v4003_v27 = vld [vmem:[#allocation8 + $0x420] sm:$0xff]  ;;  %v3197_v11 = vpop.permute.xlu0 %3196 }
 0x4d8   : > { %3728 = vmatmul.f32.gmra.mxu0 %v10107_v47  ;;  %3841 = vmatmul.f32.gmra.mxu1 %v10109_v49  ;;  %v3033_v13 = vadd.f32 %v2950_v18, %v9749_v4  ;;  %v4004_v4 = vld [vmem:[#allocation8 + $0x428] sm:$0xff]  ;;  %v2956_v18 = vadd.f32 %v9977_v63, %v9975_v28  ;;  %vm3267_vm0 = vcmp.eq.s32.totalorder %v3197_v11, %v8895_v25  ;;  %v4348_v28 = vld [vmem:[#allocation9 + $0x4d0] sm:$0xff] }
 0x4d9   : > { %8034 = vmatmul.msk.f32.gmra.mxu2 %vm3259_vm8, %v12393_v45  ;;  %8066 = vmatmul.msk.f32.gmra.mxu3 %vm3260_vm9, %v12393_v45  ;;  %vm3268_vm1 = vcmp.eq.s32.totalorder %v3197_v11, %v8900_v29 }
 0x4da   : > { %v10166_v61 = vadd.f32 %v3065_v22, %v3033_v13  ;;  %4044 = vmatpush.msrb.mxu2 %v4003_v27  ;;  %4157 = vmatpush.msrb.mxu3 %v4004_v4  ;;  %v3035_v63 = vadd.f32 %v2956_v18, %v9765_v3  ;;  %v12412_v22 = vld [vmem:[#allocation33_spill] sm:$0xff]  ;;  %v2959_v27 = vadd.f32 %v9985_v9, %v9983_v0  ;;  %v4001_v3 = vld [vmem:[#allocation8 + $0x410] sm:$0xff] }
 0x4db   : > { %4472 = vmatpush.msrb.mxu1 %v4348_v28  ;;  %v4002_v0 = vld [vmem:[#allocation8 + $0x418] sm:$0xff]  ;;  %v2962_v28 = vadd.f32 %v9993_v24, %v9991_v40  ;;  %v4347_v40 = vld [vmem:[#allocation9 + $0x4c8] sm:$0xff] }
 0x4dc   : > { %12408 = vst [vmem:[#allocation44_spill] sm:$0xff] %v10166_v61  ;;  %v3036_v9 = vadd.f32 %v2959_v27, %v9773_v15  ;;  %4045 = vmatpush.msrb.mxu2 %v4001_v3  ;;  %4158 = vmatpush.msrb.mxu3 %v4002_v0  ;;  %v4331_v15 = vld [vmem:[#allocation9 + $0x448] sm:$0xff]  ;;  %v12419_v27 = vld [vmem:[#allocation48_spill] sm:$0xff] }
 0x4dd   : > { %v3473_v39 = vpop.f32.mrf.mxu2  ;;  %v3586_v5 = vpop.f32.mrf.mxu3  ;;  %v3037_v24 = vadd.f32 %v2962_v28, %v9781_v46  ;;  %4473 = vmatpush.msrb.mxu1 %v4347_v40  ;;  %v3999_v46 = vld [vmem:[#allocation8 + $0x400] sm:$0xff]  ;;  %v12421_v28 = vld [vmem:[#allocation39_spill] sm:$0xff] }
 0x4de   : > { %v10122_v2 = vpop.f32.mrf.mxu0  ;;  %v10124_v23 = vpop.f32.mrf.mxu1  ;;  %v10126_v48 = vadd.f32 %v3586_v5, %v3473_v39  ;;  %v2953_v39 = vadd.f32 %v9969_v10, %v9967_v52  ;;  %v12409_v10 = vld [vmem:[#allocation31_spill] sm:$0xff]  ;;  %4046 = vmatpush.msrb.mxu2 %v3999_v46  ;;  %v12426_v46 = vld [vmem:[#allocation70_spill] sm:$0xff] }
 0x4df   : > { %v3066_v1 = vadd.f32 %v12410_v36, %v12409_v10 }
 0x4e0   : > { %3731 = vmatmul.f32.gmra.mxu0 %v10126_v48  ;;  %3844 = vmatmul.f32.gmra.mxu1 %v10128_v58  ;;  %v3034_v52 = vadd.f32 %v2953_v39, %v9757_v59  ;;  %v4332_v59 = vld [vmem:[#allocation9 + $0x450] sm:$0xff]  ;;  %v12442_v58 = vld [vmem:[#allocation95_spill] sm:$0xff] }
 0x4e1   : > { %8035 = vmatmul.msk.f32.gmra.mxu2 %vm3261_vm10, %v12393_v45  ;;  %8067 = vmatmul.msk.f32.gmra.mxu3 %vm3262_vm11, %v12393_v45 }
 0x4e2   : > { %v10185_v13 = vadd.f32 %v3066_v1, %v3034_v52  ;;  %4359 = vmatpush.msrb.mxu0 %v4332_v59  ;;  %v3200_v1 = vpop.permute.xlu1 %3199 }
 0x4e3   : > { %vm3269_vm2 = vcmp.eq.s32.totalorder %v3200_v1, %v8895_v25  ;;  %vm3270_vm3 = vcmp.eq.s32.totalorder %v3200_v1, %v8900_v29 }
 0x4e4   : > { %12411 = vst [vmem:[#allocation31_spill] sm:$0xff] %v10185_v13  ;;  %4360 = vmatpush.msrb.mxu0 %v4331_v15 }
 0x4e5   : > { %v3476_v33 = vpop.f32.mrf.mxu2  ;;  %v3589_v14 = vpop.f32.mrf.mxu3 }
 0x4e6   : > { %v10141_v55 = vpop.f32.mrf.mxu0  ;;  %v10143_v26 = vpop.f32.mrf.mxu1  ;;  %v10145_v62 = vadd.f32 %v3589_v14, %v3476_v33 }
 0x4e8   : > { %3734 = vmatmul.f32.gmra.mxu0 %v10145_v62  ;;  %3847 = vmatmul.f32.gmra.mxu1 %v10147_v56  ;;  %v4644_v56 = vld [vmem:[#allocation8 + $0x5f8] sm:$0xff] }
 0x4e9   : > { %8036 = vmatmul.msk.f32.gmra.mxu2 %vm3263_vm12, %v12393_v45  ;;  %8068 = vmatmul.msk.f32.gmra.mxu3 %vm3264_vm13, %v12393_v45 }
 0x4ed   : > { %v3479_v16 = vpop.f32.mrf.mxu2  ;;  %v3592_v41 = vpop.f32.mrf.mxu3 }
 0x4ee   : > { %v10160_v5 = vpop.f32.mrf.mxu0  ;;  %v10162_v30 = vpop.f32.mrf.mxu1  ;;  %v10164_v43 = vadd.f32 %v3592_v41, %v3479_v16  ;;  %v12413_v16 = vld [vmem:[#allocation46_spill] sm:$0xff] }
 0x4ef   : > { %v3067_v41 = vadd.f32 %v12413_v16, %v12412_v22 }
 0x4f0   : > { %3737 = vmatmul.f32.gmra.mxu0 %v10164_v43  ;;  %3850 = vmatmul.f32.gmra.mxu1 %v10166_v61 }
 0x4f1   : > { %8037 = vmatmul.msk.f32.gmra.mxu2 %vm3265_vm14, %v12393_v45  ;;  %8069 = vmatmul.msk.f32.gmra.mxu3 %vm3266_vm15, %v12393_v45  ;;  %v10204_v36 = vadd.f32 %v3067_v41, %v3035_v63 }
 0x4f3   : > { %12414 = vst [vmem:[#allocation45_spill] sm:$0xff] %v10204_v36 }
 0x4f5   : > { %v3482_v33 = vpop.f32.mrf.mxu2  ;;  %v3595_v14 = vpop.f32.mrf.mxu3 }
 0x4f6   : > { %v10179_v21 = vpop.f32.mrf.mxu0  ;;  %v10181_v57 = vpop.f32.mrf.mxu1  ;;  %v10183_v50 = vadd.f32 %v3595_v14, %v3482_v33  ;;  %v12415_v33 = vld [vmem:[#allocation35_spill] sm:$0xff] }
 0x4f7   : > { %v12416_v14 = vld [vmem:[#allocation47_spill] sm:$0xff] }
 0x4f8   : > { %3740 = vmatmul.f32.gmra.mxu0 %v10183_v50  ;;  %3853 = vmatmul.f32.gmra.mxu1 %v10185_v13  ;;  %v3068_v18 = vadd.f32 %v12416_v14, %v12415_v33 }
 0x4f9   : > { %8038 = vmatmul.msk.f32.gmra.mxu2 %vm3267_vm0, %v12393_v45  ;;  %8070 = vmatmul.msk.f32.gmra.mxu3 %vm3268_vm1, %v12393_v45 }
 0x4fa   : > { %v10223_v41 = vadd.f32 %v3068_v18, %v3036_v9  ;;  %v2965_v9 = vadd.f32 %v10001_v51, %v9999_v53  ;;  %v4000_v53 = vld [vmem:[#allocation8 + $0x408] sm:$0xff] }
 0x4fb   : > { %4159 = vmatpush.msrb.mxu3 %v4000_v53 }
 0x4fc   : > { %12417 = vst [vmem:[#allocation33_spill] sm:$0xff] %v10223_v41  ;;  %v3038_v51 = vadd.f32 %v2965_v9, %v9789_v17  ;;  %v4330_v17 = vld [vmem:[#allocation9 + $0x440] sm:$0xff] }
 0x4fd   : > { %v3485_v39 = vpop.f32.mrf.mxu2  ;;  %v3598_v19 = vpop.f32.mrf.mxu3  ;;  %v4346_v9 = vld [vmem:[#allocation9 + $0x4c0] sm:$0xff]  ;;  %4361 = vmatpush.msrb.mxu0 %v4330_v17  ;;  %4758 = vmatpush.msra.mxu3 %v4644_v56  ;;  %v2980_v56 = vadd.f32 %v10050_v12, %v10048_v7 }
 0x4fe   : > { %v10198_v4 = vpop.f32.mrf.mxu0  ;;  %v10200_v52 = vpop.f32.mrf.mxu1  ;;  %v10202_v10 = vadd.f32 %v3598_v19, %v3485_v39  ;;  %v12418_v19 = vld [vmem:[#allocation37_spill] sm:$0xff]  ;;  %4474 = vmatpush.msrb.mxu1 %v4346_v9  ;;  %v12453_v7 = vld [vmem:[#allocation54_spill] sm:$0xff] }
 0x4ff   : > { %v3203_v39 = vpop.permute.xlu2 %3202  ;;  %v3069_v1 = vadd.f32 %v12419_v27, %v12418_v19  ;;  %v12423_v19 = vld [vmem:[#allocation90_spill] sm:$0xff]  ;;  %v12424_v27 = vld [vmem:[#allocation91_spill] sm:$0xff] }
 0x500   : > { %3743 = vmatmul.f32.gmra.mxu0 %v10202_v10  ;;  %3856 = vmatmul.f32.gmra.mxu1 %v10204_v36  ;;  %vm3271_vm4 = vcmp.eq.s32.totalorder %v3203_v39, %v8895_v25  ;;  %vm3272_vm5 = vcmp.eq.s32.totalorder %v3203_v39, %v8900_v29  ;;  %v12422_v39 = vld [vmem:[#allocation49_spill] sm:$0xff] }
 0x501   : > { %8039 = vmatmul.msk.f32.gmra.mxu2 %vm3269_vm2, %v12393_v45  ;;  %8071 = vmatmul.msk.f32.gmra.mxu3 %vm3270_vm3, %v12393_v45  ;;  %v3070_v15 = vadd.f32 %v12422_v39, %v12421_v28  ;;  %v12427_v28 = vld [vmem:[#allocation40_spill] sm:$0xff]  ;;  %v12428_v39 = vld [vmem:[#allocation50_spill] sm:$0xff] }
 0x505   : > { %v3488_v11 = vpop.f32.mrf.mxu2  ;;  %v3601_v59 = vpop.f32.mrf.mxu3 }
 0x506   : > { %v10217_v63 = vpop.f32.mrf.mxu0  ;;  %v10219_v22 = vpop.f32.mrf.mxu1  ;;  %v10221_v16 = vadd.f32 %v3601_v59, %v3488_v11  ;;  %v10242_v11 = vadd.f32 %v3069_v1, %v3037_v24  ;;  %v2968_v1 = vadd.f32 %v12424_v27, %v12423_v19  ;;  %v12430_v19 = vld [vmem:[#allocation93_spill] sm:$0xff] }
 0x507   : > { %v3206_v59 = vpop.permute.xlu0 %3205 }
 0x508   : > { %3746 = vmatmul.f32.gmra.mxu0 %v10221_v16  ;;  %3859 = vmatmul.f32.gmra.mxu1 %v10223_v41  ;;  %12420 = vst [vmem:[#allocation46_spill] sm:$0xff] %v10242_v11  ;;  %vm3273_vm6 = vcmp.eq.s32.totalorder %v3206_v59, %v8895_v25  ;;  %vm3274_vm7 = vcmp.eq.s32.totalorder %v3206_v59, %v8900_v29  ;;  %v3209_v41 = vpop.permute.xlu1 %3208 }
 0x509   : > { %8040 = vmatmul.msk.f32.gmra.mxu2 %vm3271_vm4, %v12393_v45  ;;  %8072 = vmatmul.msk.f32.gmra.mxu3 %vm3272_vm5, %v12393_v45  ;;  %vm3275_vm8 = vcmp.eq.s32.totalorder %v3209_v41, %v8895_v25  ;;  %vm3276_vm9 = vcmp.eq.s32.totalorder %v3209_v41, %v8900_v29  ;;  %v3039_v53 = vadd.f32 %v2968_v1, %v12426_v46  ;;  %v12433_v1 = vld [vmem:[#allocation71_spill] sm:$0xff]  ;;  %v12434_v46 = vld [vmem:[#allocation41_spill] sm:$0xff] }
 0x50d   : > { %v3491_v3 = vpop.f32.mrf.mxu2  ;;  %v3604_v0 = vpop.f32.mrf.mxu3 }
 0x50e   : > { %v10236_v33 = vpop.f32.mrf.mxu0  ;;  %v10238_v14 = vpop.f32.mrf.mxu1  ;;  %v10240_v18 = vadd.f32 %v3604_v0, %v3491_v3 }
 0x50f   : > { %v3215_v9 = vpop.permute.xlu0 %3214 }
 0x510   : > { %3749 = vmatmul.f32.gmra.mxu0 %v10240_v18  ;;  %3862 = vmatmul.f32.gmra.mxu1 %v10242_v11  ;;  %v10261_v11 = vadd.f32 %v3070_v15, %v3038_v51  ;;  %v3212_v51 = vpop.permute.xlu2 %3211  ;;  %v3071_v15 = vadd.f32 %v12428_v39, %v12427_v28  ;;  %v12435_v28 = vld [vmem:[#allocation51_spill] sm:$0xff]  ;;  %vm3279_vm12 = vcmp.eq.s32.totalorder %v3215_v9, %v8895_v25 }
 0x511   : > { %8041 = vmatmul.msk.f32.gmra.mxu2 %vm3273_vm6, %v12393_v45  ;;  %8073 = vmatmul.msk.f32.gmra.mxu3 %vm3274_vm7, %v12393_v45  ;;  %vm3277_vm10 = vcmp.eq.s32.totalorder %v3212_v51, %v8895_v25  ;;  %vm3278_vm11 = vcmp.eq.s32.totalorder %v3212_v51, %v8900_v29  ;;  %v3072_v39 = vadd.f32 %v12435_v28, %v12434_v46  ;;  %v12440_v28 = vld [vmem:[#allocation42_spill] sm:$0xff] }
 0x512   : > { %12425 = vst [vmem:[#allocation35_spill] sm:$0xff] %v10261_v11  ;;  %v10280_v61 = vadd.f32 %v3071_v15, %v3039_v53  ;;  %vm3280_vm13 = vcmp.eq.s32.totalorder %v3215_v9, %v8900_v29 }
 0x514   : > { %12432 = vst [vmem:[#allocation37_spill] sm:$0xff] %v10280_v61 }
 0x515   : > { %v3494_v40 = vpop.f32.mrf.mxu2  ;;  %v3607_v24 = vpop.f32.mrf.mxu3 }
 0x516   : > { %v10255_v3 = vpop.f32.mrf.mxu0  ;;  %v10257_v0 = vpop.f32.mrf.mxu1  ;;  %v10259_v59 = vadd.f32 %v3607_v24, %v3494_v40  ;;  %v12429_v24 = vld [vmem:[#allocation92_spill] sm:$0xff] }
 0x517   : > { %v2971_v27 = vadd.f32 %v12430_v19, %v12429_v24 }
 0x518   : > { %3752 = vmatmul.f32.gmra.mxu0 %v10259_v59  ;;  %3865 = vmatmul.f32.gmra.mxu1 %v10261_v11 }
 0x519   : > { %8042 = vmatmul.msk.f32.gmra.mxu2 %vm3275_vm8, %v12393_v45  ;;  %8074 = vmatmul.msk.f32.gmra.mxu3 %vm3276_vm9, %v12393_v45  ;;  %v3040_v17 = vadd.f32 %v2971_v27, %v12433_v1  ;;  %v4345_v27 = vld [vmem:[#allocation9 + $0x4b8] sm:$0xff]  ;;  %v12439_v1 = vld [vmem:[#allocation72_spill] sm:$0xff] }
 0x51a   : > { %4475 = vmatpush.msrb.mxu1 %v4345_v27  ;;  %v12448_v27 = vld [vmem:[#allocation53_spill] sm:$0xff] }
 0x51d   : > { %v3497_v40 = vpop.f32.mrf.mxu2  ;;  %v3610_v41 = vpop.f32.mrf.mxu3 }
 0x51e   : > { %v10274_v11 = vpop.f32.mrf.mxu0  ;;  %v10276_v36 = vpop.f32.mrf.mxu1  ;;  %v10278_v13 = vadd.f32 %v3610_v41, %v3497_v40  ;;  %v12436_v40 = vld [vmem:[#allocation94_spill] sm:$0xff] }
 0x51f   : > { %v2974_v41 = vadd.f32 %v12436_v40, %v10023_v6  ;;  %v4329_v6 = vld [vmem:[#allocation9 + $0x438] sm:$0xff]  ;;  %v4643_v40 = vld [vmem:[#allocation8 + $0x5f0] sm:$0xff] }
 0x520   : > { %12431 = vst [vmem:[#allocation47_spill] sm:$0xff] %v10278_v13  ;;  %3755 = vmatmul.f32.gmra.mxu0 %v10278_v13  ;;  %3868 = vmatmul.f32.gmra.mxu1 %v10280_v61  ;;  %v10299_v61 = vadd.f32 %v3072_v39, %v3040_v17  ;;  %v3218_v17 = vpop.permute.xlu1 %3217  ;;  %v12441_v39 = vld [vmem:[#allocation52_spill] sm:$0xff] }
 0x521   : > { %8043 = vmatmul.msk.f32.gmra.mxu2 %vm3277_vm10, %v12393_v45  ;;  %8075 = vmatmul.msk.f32.gmra.mxu3 %vm3278_vm11, %v12393_v45  ;;  %v3041_v46 = vadd.f32 %v2974_v41, %v12439_v1  ;;  %vm3281_vm14 = vcmp.eq.s32.totalorder %v3218_v17, %v8895_v25  ;;  %vm3282_vm15 = vcmp.eq.s32.totalorder %v3218_v17, %v8900_v29 }
 0x522   : > { %12438 = vst [vmem:[#allocation39_spill] sm:$0xff] %v10299_v61  ;;  %4362 = vmatpush.msrb.mxu0 %v4329_v6  ;;  %4645 = vmatpush.msra.mxu2 %v4643_v40  ;;  %v12447_v6 = vld [vmem:[#allocation43_spill] sm:$0xff]  ;;  %v12451_v40 = vld [vmem:[#allocation74_spill] sm:$0xff] }
 0x523   : > { %v3074_v1 = vadd.f32 %v12448_v27, %v12447_v6  ;;  %v12452_v6 = vld [vmem:[#allocation19_spill] sm:$0xff] }
 0x524   : > { %v3075_v12 = vadd.f32 %v12453_v7, %v12452_v6  ;;  %v2986_v7 = vadd.f32 %v10086_v8, %v10084_v35  ;;  %v12462_v8 = vld [vmem:[#allocation21_spill] sm:$0xff] }
 0x525   : > { %v3500_v53 = vpop.f32.mrf.mxu2  ;;  %v3613_v15 = vpop.f32.mrf.mxu3 }
 0x526   : > { %v10293_v51 = vpop.f32.mrf.mxu0  ;;  %v10295_v24 = vpop.f32.mrf.mxu1  ;;  %v10297_v19 = vadd.f32 %v3613_v15, %v3500_v53  ;;  %v3073_v53 = vadd.f32 %v12441_v39, %v12440_v28 }
 0x528   : > { %12437 = vst [vmem:[#allocation48_spill] sm:$0xff] %v10297_v19  ;;  %3758 = vmatmul.f32.gmra.mxu0 %v10297_v19  ;;  %3871 = vmatmul.f32.gmra.mxu1 %v10299_v61  ;;  %v12443_v61 = vld [vmem:[#allocation96_spill] sm:$0xff]  ;;  %v10318_v41 = vadd.f32 %v3073_v53, %v3041_v46 }
 0x529   : > { %8044 = vmatmul.msk.f32.gmra.mxu2 %vm3279_vm12, %v12393_v45  ;;  %8076 = vmatmul.msk.f32.gmra.mxu3 %vm3280_vm13, %v12393_v45  ;;  %v2977_v49 = vadd.f32 %v12443_v61, %v12442_v58  ;;  %v12446_v58 = vld [vmem:[#allocation73_spill] sm:$0xff] }
 0x52a   : > { %12445 = vst [vmem:[#allocation90_spill] sm:$0xff] %v10318_v41 }
 0x52b   : > { %v3042_v61 = vadd.f32 %v2977_v49, %v12446_v58  ;;  %v4328_v49 = vld [vmem:[#allocation9 + $0x430] sm:$0xff]  ;;  %v3043_v58 = vadd.f32 %v2980_v56, %v12451_v40 }
 0x52c   : > { %4363 = vmatpush.msrb.mxu0 %v4328_v49  ;;  %v10353_v49 = vld [vmem:[%s12108_s3 + $0x2] ss:$0 sm:$0xff]  ;;  %v12457_v40 = vld [vmem:[#allocation20_spill] sm:$0xff] }
 0x52d   : > { %v3503_v15 = vpop.f32.mrf.mxu2  ;;  %v3616_v9 = vpop.f32.mrf.mxu3  ;;  %v10348_v29 = vadd.f32 %v3075_v12, %v3043_v58 }
 0x52e   : > { %v10312_v37 = vpop.f32.mrf.mxu0  ;;  %v10314_v31 = vpop.f32.mrf.mxu1  ;;  %v10316_v60 = vadd.f32 %v3616_v9, %v3503_v15  ;;  %v10337_v15 = vadd.f32 %v3074_v1, %v3042_v61  ;;  %v4344_v9 = vld [vmem:[#allocation9 + $0x4b0] sm:$0xff]  ;;  %v2983_v61 = vadd.f32 %v10067_v32, %v10065_v42  ;;  %v12456_v32 = vld [vmem:[#allocation75_spill] sm:$0xff] }
 0x52f   : > { %4476 = vmatpush.msrb.mxu1 %v4344_v9  ;;  %12455 = vst [vmem:[#allocation50_spill] sm:$0xff] %v10348_v29 }
 0x530   : > { %12444 = vst [vmem:[#allocation49_spill] sm:$0xff] %v10316_v60  ;;  %3761 = vmatmul.f32.gmra.mxu0 %v10316_v60  ;;  %3874 = vmatmul.f32.gmra.mxu1 %v10318_v41 }
 0x531   : > { %8045 = vmatmul.msk.f32.gmra.mxu2 %vm3281_vm14, %v12393_v45  ;;  %8077 = vmatmul.msk.f32.gmra.mxu3 %vm3282_vm15, %v12393_v45  ;;  %12450 = vst [vmem:[#allocation70_spill] sm:$0xff] %v10337_v15  ;;  %v4641_v45 = vld [vmem:[#allocation8 + $0x5e0] sm:$0xff] }
 0x532   : > { %4646 = vmatpush.msra.mxu2 %v4641_v45  ;;  %v12458_v45 = vld [vmem:[#allocation55_spill] sm:$0xff] }
 0x533   : > { %v3076_v58 = vadd.f32 %v12458_v45, %v12457_v40  ;;  %v12461_v40 = vld [vmem:[#allocation76_spill] sm:$0xff] }
 0x534   : > { %v3045_v45 = vadd.f32 %v2986_v7, %v12461_v40 }
 0x535   : > { %v3506_v46 = vpop.f32.mrf.mxu2  ;;  %v3619_v28 = vpop.f32.mrf.mxu3 }
 0x536   : > { %v10331_v39 = vpop.f32.mrf.mxu0  ;;  %v10333_v17 = vpop.f32.mrf.mxu1  ;;  %v10335_v53 = vadd.f32 %v3619_v28, %v3506_v46  ;;  %v4642_v46 = vld [vmem:[#allocation8 + $0x5e8] sm:$0xff] }
 0x537   : > { %4759 = vmatpush.msra.mxu3 %v4642_v46 }
 0x538   : > { %12449 = vst [vmem:[#allocation91_spill] sm:$0xff] %v10335_v53  ;;  %3764 = vmatmul.f32.gmra.mxu0 %v10335_v53  ;;  %3877 = vmatmul.f32.gmra.mxu1 %v10337_v15 }
 0x53d   : > { %v3509_v27 = vpop.f32.mrf.mxu2  ;;  %v3622_v41 = vpop.f32.mrf.mxu3 }
 0x53e   : > { %v10346_v1 = vadd.f32 %v3622_v41, %v3509_v27  ;;  %v3720_v28 = vpop.f32.mrf.mxu0  ;;  %v3833_v15 = vpop.f32.mrf.mxu1  ;;  %v3044_v41 = vadd.f32 %v2983_v61, %v12456_v32  ;;  %v4343_v32 = vld [vmem:[#allocation9 + $0x4a8] sm:$0xff] }
 0x53f   : > { %v3834_v56 = vadd.f32 %v3833_v15, %v3720_v28  ;;  %4477 = vmatpush.msrb.mxu1 %v4343_v32 }
 0x540   : > { %12454 = vst [vmem:[#allocation40_spill] sm:$0xff] %v10346_v1  ;;  %3767 = vmatmul.f32.gmra.mxu0 %v10346_v1  ;;  %3880 = vmatmul.f32.gmra.mxu1 %v10348_v29  ;;  %v10370_v61 = vadd.f32 %v3076_v58, %v3044_v41 }
 0x541   : > { %v3929_v42 = vadd.f32 %v3834_v56, %v10052_v20 }
 0x542   : > { %12460 = vst [vmem:[#allocation93_spill] sm:$0xff] %v10370_v61 }
 0x543   : > { %v10360_v9 = vadd.f32 %v10353_v49, %v3929_v42  ;;  %v4327_v42 = vld [vmem:[#allocation9 + $0x428] sm:$0xff] }
 0x544   : > { %4364 = vmatpush.msrb.mxu0 %v4327_v42 }
 0x545   : > { %4047 = vmatmul.f32.vlgmr.msrb.gmra.mxu2 %v10360_v9  ;;  %4160 = vmatmul.f32.vlgmr.msrb.gmra.mxu3 %v10360_v9  ;;  %v3512_v15 = vpop.f32.mrf.mxu2  ;;  %v3625_v6 = vpop.f32.mrf.mxu3 }
 0x546   : > { %v10368_v12 = vadd.f32 %v3625_v6, %v3512_v15  ;;  %v3723_v27 = vpop.f32.mrf.mxu0  ;;  %v3836_v46 = vpop.f32.mrf.mxu1  ;;  %v12463_v15 = vld [vmem:[#allocation56_spill] sm:$0xff] }
 0x547   : > { %v3837_v28 = vadd.f32 %v3836_v46, %v3723_v27  ;;  %v3077_v41 = vadd.f32 %v12463_v15, %v12462_v8  ;;  %v4639_v27 = vld [vmem:[#allocation8 + $0x5d0] sm:$0xff]  ;;  %v4640_v46 = vld [vmem:[#allocation8 + $0x5d8] sm:$0xff] }
 0x548   : > { %12459 = vst [vmem:[#allocation92_spill] sm:$0xff] %v10368_v12  ;;  %3770 = vmatmul.f32.gmra.mxu0 %v10368_v12  ;;  %3883 = vmatmul.f32.gmra.mxu1 %v10370_v61  ;;  %v12466_v15 = vld [vmem:[#allocation77_spill] sm:$0xff] }
 0x549   : > { %v3930_v56 = vadd.f32 %v3837_v28, %v10069_v38  ;;  %v2989_v28 = vadd.f32 %v10105_v44, %v10103_v34  ;;  %4647 = vmatpush.msra.mxu2 %v4639_v27  ;;  %4760 = vmatpush.msra.mxu3 %v4640_v46  ;;  %v12467_v34 = vld [vmem:[#allocation22_spill] sm:$0xff]  ;;  %v12468_v44 = vld [vmem:[#allocation57_spill] sm:$0xff] }
 0x54b   : > { %v10377_v35 = vadd.f32 %v10353_v49, %v3930_v56  ;;  %v10387_v56 = vadd.f32 %v3077_v41, %v3045_v45  ;;  %v3046_v61 = vadd.f32 %v2989_v28, %v12466_v15  ;;  %v4342_v15 = vld [vmem:[#allocation9 + $0x4a0] sm:$0xff] }
 0x54c   : > { %4478 = vmatpush.msrb.mxu1 %v4342_v15 }
 0x54d   : > { %4050 = vmatmul.f32.gmra.mxu2 %v10377_v35  ;;  %4163 = vmatmul.f32.gmra.mxu3 %v10377_v35  ;;  %v3515_v58 = vpop.f32.mrf.mxu2  ;;  %v3628_v6 = vpop.f32.mrf.mxu3  ;;  %12465 = vst [vmem:[#allocation41_spill] sm:$0xff] %v10387_v56 }
 0x54e   : > { %v10385_v7 = vadd.f32 %v3628_v6, %v3515_v58  ;;  %v3726_v42 = vpop.f32.mrf.mxu0  ;;  %v3839_v32 = vpop.f32.mrf.mxu1  ;;  %v3078_v58 = vadd.f32 %v12468_v44, %v12467_v34  ;;  %v2992_v6 = vadd.f32 %v10124_v23, %v10122_v2  ;;  %v12471_v34 = vld [vmem:[#allocation78_spill] sm:$0xff]  ;;  %v12472_v23 = vld [vmem:[#allocation23_spill] sm:$0xff] }
 0x54f   : > { %v3840_v40 = vadd.f32 %v3839_v32, %v3726_v42 }
 0x550   : > { %12464 = vst [vmem:[#allocation71_spill] sm:$0xff] %v10385_v7  ;;  %3773 = vmatmul.f32.gmra.mxu0 %v10385_v7  ;;  %3886 = vmatmul.f32.gmra.mxu1 %v10387_v56  ;;  %v10404_v28 = vadd.f32 %v3078_v58, %v3046_v61  ;;  %v3047_v44 = vadd.f32 %v2992_v6, %v12471_v34 }
 0x551   : > { %v3931_v8 = vadd.f32 %v3840_v40, %v10088_v54 }
 0x552   : > { %12470 = vst [vmem:[#allocation94_spill] sm:$0xff] %v10404_v28 }
 0x553   : > { %v10394_v29 = vadd.f32 %v10353_v49, %v3931_v8  ;;  %v4326_v8 = vld [vmem:[#allocation9 + $0x420] sm:$0xff] }
 0x554   : > { %4365 = vmatpush.msrb.mxu0 %v4326_v8 }
 0x555   : > { %4053 = vmatmul.f32.gmra.mxu2 %v10394_v29  ;;  %4166 = vmatmul.f32.gmra.mxu3 %v10394_v29  ;;  %v3518_v45 = vpop.f32.mrf.mxu2  ;;  %v3631_v41 = vpop.f32.mrf.mxu3 }
 0x556   : > { %v10402_v27 = vadd.f32 %v3631_v41, %v3518_v45  ;;  %v3729_v46 = vpop.f32.mrf.mxu0  ;;  %v3842_v42 = vpop.f32.mrf.mxu1  ;;  %v12473_v45 = vld [vmem:[#allocation58_spill] sm:$0xff] }
 0x557   : > { %v3843_v32 = vadd.f32 %v3842_v42, %v3729_v46  ;;  %v3079_v61 = vadd.f32 %v12473_v45, %v12472_v23  ;;  %v4637_v46 = vld [vmem:[#allocation8 + $0x5c0] sm:$0xff]  ;;  %v4638_v42 = vld [vmem:[#allocation8 + $0x5c8] sm:$0xff] }
 0x558   : > { %12469 = vst [vmem:[#allocation51_spill] sm:$0xff] %v10402_v27  ;;  %3776 = vmatmul.f32.gmra.mxu0 %v10402_v27  ;;  %3889 = vmatmul.f32.gmra.mxu1 %v10404_v28  ;;  %v12476_v45 = vld [vmem:[#allocation79_spill] sm:$0xff] }
 0x559   : > { %v3932_v40 = vadd.f32 %v3843_v32, %v10107_v47  ;;  %v2995_v32 = vadd.f32 %v10143_v26, %v10141_v55  ;;  %4648 = vmatpush.msra.mxu2 %v4637_v46  ;;  %4761 = vmatpush.msra.mxu3 %v4638_v42  ;;  %v12477_v55 = vld [vmem:[#allocation24_spill] sm:$0xff]  ;;  %v12478_v26 = vld [vmem:[#allocation59_spill] sm:$0xff] }
 0x55b   : > { %v10411_v2 = vadd.f32 %v10353_v49, %v3932_v40  ;;  %v10421_v40 = vadd.f32 %v3079_v61, %v3047_v44  ;;  %v3048_v28 = vadd.f32 %v2995_v32, %v12476_v45  ;;  %v4341_v45 = vld [vmem:[#allocation9 + $0x498] sm:$0xff] }
 0x55c   : > { %4479 = vmatpush.msrb.mxu1 %v4341_v45 }
 0x55d   : > { %4056 = vmatmul.f32.gmra.mxu2 %v10411_v2  ;;  %4169 = vmatmul.f32.gmra.mxu3 %v10411_v2  ;;  %v3521_v58 = vpop.f32.mrf.mxu2  ;;  %v3634_v41 = vpop.f32.mrf.mxu3  ;;  %12475 = vst [vmem:[#allocation42_spill] sm:$0xff] %v10421_v40 }
 0x55e   : > { %v10419_v6 = vadd.f32 %v3634_v41, %v3521_v58  ;;  %v3732_v8 = vpop.f32.mrf.mxu0  ;;  %v3845_v15 = vpop.f32.mrf.mxu1  ;;  %v3080_v58 = vadd.f32 %v12478_v26, %v12477_v55  ;;  %v2998_v41 = vadd.f32 %v10162_v30, %v10160_v5  ;;  %v12481_v55 = vld [vmem:[#allocation80_spill] sm:$0xff]  ;;  %v12482_v30 = vld [vmem:[#allocation25_spill] sm:$0xff] }
 0x55f   : > { %v3846_v34 = vadd.f32 %v3845_v15, %v3732_v8 }
 0x560   : > { %12474 = vst [vmem:[#allocation72_spill] sm:$0xff] %v10419_v6  ;;  %3779 = vmatmul.f32.gmra.mxu0 %v10419_v6  ;;  %3892 = vmatmul.f32.gmra.mxu1 %v10421_v40  ;;  %v10438_v32 = vadd.f32 %v3080_v58, %v3048_v28  ;;  %v3049_v26 = vadd.f32 %v2998_v41, %v12481_v55 }
 0x561   : > { %v3933_v23 = vadd.f32 %v3846_v34, %v10126_v48 }
 0x562   : > { %12480 = vst [vmem:[#allocation95_spill] sm:$0xff] %v10438_v32 }
 0x563   : > { %v10428_v56 = vadd.f32 %v10353_v49, %v3933_v23  ;;  %v4325_v23 = vld [vmem:[#allocation9 + $0x418] sm:$0xff] }
 0x564   : > { %4366 = vmatpush.msrb.mxu0 %v4325_v23 }
 0x565   : > { %4059 = vmatmul.f32.gmra.mxu2 %v10428_v56  ;;  %4172 = vmatmul.f32.gmra.mxu3 %v10428_v56  ;;  %v3524_v44 = vpop.f32.mrf.mxu2  ;;  %v3637_v61 = vpop.f32.mrf.mxu3 }
 0x566   : > { %v10436_v46 = vadd.f32 %v3637_v61, %v3524_v44  ;;  %v3735_v42 = vpop.f32.mrf.mxu0  ;;  %v3848_v8 = vpop.f32.mrf.mxu1  ;;  %v12483_v44 = vld [vmem:[#allocation60_spill] sm:$0xff] }
 0x567   : > { %v3849_v15 = vadd.f32 %v3848_v8, %v3735_v42  ;;  %v3081_v28 = vadd.f32 %v12483_v44, %v12482_v30  ;;  %v4635_v42 = vld [vmem:[#allocation8 + $0x5b0] sm:$0xff]  ;;  %v4636_v8 = vld [vmem:[#allocation8 + $0x5b8] sm:$0xff] }
 0x568   : > { %12479 = vst [vmem:[#allocation52_spill] sm:$0xff] %v10436_v46  ;;  %3782 = vmatmul.f32.gmra.mxu0 %v10436_v46  ;;  %3895 = vmatmul.f32.gmra.mxu1 %v10438_v32  ;;  %v12486_v44 = vld [vmem:[#allocation81_spill] sm:$0xff] }
 0x569   : > { %v3934_v34 = vadd.f32 %v3849_v15, %v10145_v62  ;;  %v3001_v15 = vadd.f32 %v10181_v57, %v10179_v21  ;;  %4649 = vmatpush.msra.mxu2 %v4635_v42  ;;  %4762 = vmatpush.msra.mxu3 %v4636_v8  ;;  %v12487_v21 = vld [vmem:[#allocation26_spill] sm:$0xff]  ;;  %v12488_v57 = vld [vmem:[#allocation61_spill] sm:$0xff] }
 0x56b   : > { %v10445_v5 = vadd.f32 %v10353_v49, %v3934_v34  ;;  %v10455_v34 = vadd.f32 %v3081_v28, %v3049_v26  ;;  %v3050_v32 = vadd.f32 %v3001_v15, %v12486_v44  ;;  %v4340_v44 = vld [vmem:[#allocation9 + $0x490] sm:$0xff] }
 0x56c   : > { %4480 = vmatpush.msrb.mxu1 %v4340_v44 }
 0x56d   : > { %4062 = vmatmul.f32.gmra.mxu2 %v10445_v5  ;;  %4175 = vmatmul.f32.gmra.mxu3 %v10445_v5  ;;  %v3527_v58 = vpop.f32.mrf.mxu2  ;;  %v3640_v61 = vpop.f32.mrf.mxu3  ;;  %12485 = vst [vmem:[#allocation73_spill] sm:$0xff] %v10455_v34 }
 0x56e   : > { %v10453_v41 = vadd.f32 %v3640_v61, %v3527_v58  ;;  %v3738_v23 = vpop.f32.mrf.mxu0  ;;  %v3851_v45 = vpop.f32.mrf.mxu1  ;;  %v3082_v58 = vadd.f32 %v12488_v57, %v12487_v21  ;;  %v3004_v61 = vadd.f32 %v10200_v52, %v10198_v4  ;;  %v12491_v21 = vld [vmem:[#allocation82_spill] sm:$0xff]  ;;  %v12492_v52 = vld [vmem:[#allocation27_spill] sm:$0xff] }
 0x56f   : > { %v3852_v55 = vadd.f32 %v3851_v45, %v3738_v23 }
 0x570   : > { %12484 = vst [vmem:[#allocation96_spill] sm:$0xff] %v10453_v41  ;;  %3785 = vmatmul.f32.gmra.mxu0 %v10453_v41  ;;  %3898 = vmatmul.f32.gmra.mxu1 %v10455_v34  ;;  %v10472_v15 = vadd.f32 %v3082_v58, %v3050_v32  ;;  %v3051_v57 = vadd.f32 %v3004_v61, %v12491_v21 }
 0x571   : > { %v3935_v30 = vadd.f32 %v3852_v55, %v10164_v43 }
 0x572   : > { %12490 = vst [vmem:[#allocation53_spill] sm:$0xff] %v10472_v15 }
 0x573   : > { %v10462_v40 = vadd.f32 %v10353_v49, %v3935_v30  ;;  %v4324_v30 = vld [vmem:[#allocation9 + $0x410] sm:$0xff] }
 0x574   : > { %4367 = vmatpush.msrb.mxu0 %v4324_v30 }
 0x575   : > { %4065 = vmatmul.f32.gmra.mxu2 %v10462_v40  ;;  %4178 = vmatmul.f32.gmra.mxu3 %v10462_v40  ;;  %v3530_v26 = vpop.f32.mrf.mxu2  ;;  %v3643_v28 = vpop.f32.mrf.mxu3 }
 0x576   : > { %v10470_v42 = vadd.f32 %v3643_v28, %v3530_v26  ;;  %v3741_v8 = vpop.f32.mrf.mxu0  ;;  %v3854_v23 = vpop.f32.mrf.mxu1  ;;  %v12493_v26 = vld [vmem:[#allocation62_spill] sm:$0xff] }
 0x577   : > { %v3855_v45 = vadd.f32 %v3854_v23, %v3741_v8  ;;  %v3083_v32 = vadd.f32 %v12493_v26, %v12492_v52  ;;  %v4633_v8 = vld [vmem:[#allocation8 + $0x5a0] sm:$0xff]  ;;  %v4634_v23 = vld [vmem:[#allocation8 + $0x5a8] sm:$0xff] }
 0x578   : > { %12489 = vst [vmem:[#allocation43_spill] sm:$0xff] %v10470_v42  ;;  %3788 = vmatmul.f32.gmra.mxu0 %v10470_v42  ;;  %3901 = vmatmul.f32.gmra.mxu1 %v10472_v15  ;;  %v12496_v26 = vld [vmem:[#allocation83_spill] sm:$0xff] }
 0x579   : > { %v3936_v55 = vadd.f32 %v3855_v45, %v10183_v50  ;;  %v3007_v45 = vadd.f32 %v10219_v22, %v10217_v63  ;;  %4650 = vmatpush.msra.mxu2 %v4633_v8  ;;  %4763 = vmatpush.msra.mxu3 %v4634_v23  ;;  %v12497_v63 = vld [vmem:[#allocation28_spill] sm:$0xff]  ;;  %v12498_v22 = vld [vmem:[#allocation63_spill] sm:$0xff] }
 0x57b   : > { %v10479_v4 = vadd.f32 %v10353_v49, %v3936_v55  ;;  %v10489_v55 = vadd.f32 %v3083_v32, %v3051_v57  ;;  %v3052_v15 = vadd.f32 %v3007_v45, %v12496_v26  ;;  %v4339_v26 = vld [vmem:[#allocation9 + $0x488] sm:$0xff] }
 0x57c   : > { %4481 = vmatpush.msrb.mxu1 %v4339_v26 }
 0x57d   : > { %4068 = vmatmul.f32.gmra.mxu2 %v10479_v4  ;;  %4181 = vmatmul.f32.gmra.mxu3 %v10479_v4  ;;  %v3533_v58 = vpop.f32.mrf.mxu2  ;;  %v3646_v28 = vpop.f32.mrf.mxu3  ;;  %12495 = vst [vmem:[#allocation19_spill] sm:$0xff] %v10489_v55 }
 0x57e   : > { %v10487_v61 = vadd.f32 %v3646_v28, %v3533_v58  ;;  %v3744_v30 = vpop.f32.mrf.mxu0  ;;  %v3857_v44 = vpop.f32.mrf.mxu1  ;;  %v3084_v58 = vadd.f32 %v12498_v22, %v12497_v63  ;;  %v3010_v28 = vadd.f32 %v10238_v14, %v10236_v33  ;;  %v12501_v63 = vld [vmem:[#allocation84_spill] sm:$0xff]  ;;  %v12502_v14 = vld [vmem:[#allocation29_spill] sm:$0xff] }
 0x57f   : > { %v3858_v21 = vadd.f32 %v3857_v44, %v3744_v30 }
 0x580   : > { %12494 = vst [vmem:[#allocation74_spill] sm:$0xff] %v10487_v61  ;;  %3791 = vmatmul.f32.gmra.mxu0 %v10487_v61  ;;  %3904 = vmatmul.f32.gmra.mxu1 %v10489_v55  ;;  %v10506_v45 = vadd.f32 %v3084_v58, %v3052_v15  ;;  %v3053_v22 = vadd.f32 %v3010_v28, %v12501_v63 }
 0x581   : > { %v3937_v52 = vadd.f32 %v3858_v21, %v10202_v10 }
 0x582   : > { %12500 = vst [vmem:[#allocation75_spill] sm:$0xff] %v10506_v45 }
 0x583   : > { %v10496_v34 = vadd.f32 %v10353_v49, %v3937_v52  ;;  %v4323_v52 = vld [vmem:[#allocation9 + $0x408] sm:$0xff] }
 0x584   : > { %4368 = vmatpush.msrb.mxu0 %v4323_v52 }
 0x585   : > { %4071 = vmatmul.f32.gmra.mxu2 %v10496_v34  ;;  %4184 = vmatmul.f32.gmra.mxu3 %v10496_v34  ;;  %v3536_v57 = vpop.f32.mrf.mxu2  ;;  %v3649_v32 = vpop.f32.mrf.mxu3 }
 0x586   : > { %v10504_v8 = vadd.f32 %v3649_v32, %v3536_v57  ;;  %v3747_v23 = vpop.f32.mrf.mxu0  ;;  %v3860_v30 = vpop.f32.mrf.mxu1  ;;  %v12503_v57 = vld [vmem:[#allocation64_spill] sm:$0xff] }
 0x587   : > { %v3861_v44 = vadd.f32 %v3860_v30, %v3747_v23  ;;  %v3085_v15 = vadd.f32 %v12503_v57, %v12502_v14  ;;  %v4631_v23 = vld [vmem:[#allocation8 + $0x590] sm:$0xff]  ;;  %v4632_v30 = vld [vmem:[#allocation8 + $0x598] sm:$0xff] }
 0x588   : > { %12499 = vst [vmem:[#allocation54_spill] sm:$0xff] %v10504_v8  ;;  %3794 = vmatmul.f32.gmra.mxu0 %v10504_v8  ;;  %3907 = vmatmul.f32.gmra.mxu1 %v10506_v45  ;;  %v12506_v57 = vld [vmem:[#allocation85_spill] sm:$0xff] }
 0x589   : > { %v3938_v21 = vadd.f32 %v3861_v44, %v10221_v16  ;;  %v3013_v44 = vadd.f32 %v10257_v0, %v10255_v3  ;;  %4651 = vmatpush.msra.mxu2 %v4631_v23  ;;  %4764 = vmatpush.msra.mxu3 %v4632_v30  ;;  %v12507_v3 = vld [vmem:[#allocation30_spill] sm:$0xff]  ;;  %v12508_v0 = vld [vmem:[#allocation65_spill] sm:$0xff] }
 0x58b   : > { %v10513_v33 = vadd.f32 %v10353_v49, %v3938_v21  ;;  %v10523_v21 = vadd.f32 %v3085_v15, %v3053_v22  ;;  %v3054_v45 = vadd.f32 %v3013_v44, %v12506_v57  ;;  %v4338_v57 = vld [vmem:[#allocation9 + $0x480] sm:$0xff] }
 0x58c   : > { %4482 = vmatpush.msrb.mxu1 %v4338_v57 }
 0x58d   : > { %4074 = vmatmul.f32.gmra.mxu2 %v10513_v33  ;;  %4187 = vmatmul.f32.gmra.mxu3 %v10513_v33  ;;  %v3539_v58 = vpop.f32.mrf.mxu2  ;;  %v3652_v32 = vpop.f32.mrf.mxu3  ;;  %12505 = vst [vmem:[#allocation55_spill] sm:$0xff] %v10523_v21 }
 0x58e   : > { %v10521_v28 = vadd.f32 %v3652_v32, %v3539_v58  ;;  %v3750_v52 = vpop.f32.mrf.mxu0  ;;  %v3863_v26 = vpop.f32.mrf.mxu1  ;;  %v3086_v58 = vadd.f32 %v12508_v0, %v12507_v3  ;;  %v3016_v32 = vadd.f32 %v10276_v36, %v10274_v11  ;;  %v12511_v3 = vld [vmem:[#allocation86_spill] sm:$0xff]  ;;  %v12512_v11 = vld [vmem:[#allocation32_spill] sm:$0xff] }
 0x58f   : > { %v3864_v63 = vadd.f32 %v3863_v26, %v3750_v52 }
 0x590   : > { %12504 = vst [vmem:[#allocation20_spill] sm:$0xff] %v10521_v28  ;;  %3797 = vmatmul.f32.gmra.mxu0 %v10521_v28  ;;  %3910 = vmatmul.f32.gmra.mxu1 %v10523_v21  ;;  %v10540_v44 = vadd.f32 %v3086_v58, %v3054_v45  ;;  %v3055_v0 = vadd.f32 %v3016_v32, %v12511_v3 }
 0x591   : > { %v3939_v14 = vadd.f32 %v3864_v63, %v10240_v18 }
 0x592   : > { %12510 = vst [vmem:[#allocation21_spill] sm:$0xff] %v10540_v44 }
 0x593   : > { %v10530_v55 = vadd.f32 %v10353_v49, %v3939_v14  ;;  %v4322_v14 = vld [vmem:[#allocation9 + $0x400] sm:$0xff] }
 0x594   : > { %4369 = vmatpush.msrb.mxu0 %v4322_v14 }
 0x595   : > { %4077 = vmatmul.f32.gmra.mxu2 %v10530_v55  ;;  %4190 = vmatmul.f32.gmra.mxu3 %v10530_v55  ;;  %v3542_v22 = vpop.f32.mrf.mxu2  ;;  %v3655_v15 = vpop.f32.mrf.mxu3 }
 0x596   : > { %v10538_v23 = vadd.f32 %v3655_v15, %v3542_v22  ;;  %v3753_v30 = vpop.f32.mrf.mxu0  ;;  %v3866_v52 = vpop.f32.mrf.mxu1  ;;  %v12513_v22 = vld [vmem:[#allocation66_spill] sm:$0xff] }
 0x597   : > { %v3867_v26 = vadd.f32 %v3866_v52, %v3753_v30  ;;  %v3087_v45 = vadd.f32 %v12513_v22, %v12512_v11  ;;  %v4629_v30 = vld [vmem:[#allocation8 + $0x580] sm:$0xff]  ;;  %v4630_v52 = vld [vmem:[#allocation8 + $0x588] sm:$0xff] }
 0x598   : > { %12509 = vst [vmem:[#allocation76_spill] sm:$0xff] %v10538_v23  ;;  %3800 = vmatmul.f32.gmra.mxu0 %v10538_v23  ;;  %3913 = vmatmul.f32.gmra.mxu1 %v10540_v44  ;;  %v12516_v22 = vld [vmem:[#allocation87_spill] sm:$0xff] }
 0x599   : > { %v3940_v63 = vadd.f32 %v3867_v26, %v10259_v59  ;;  %v3019_v26 = vadd.f32 %v10295_v24, %v10293_v51  ;;  %4652 = vmatpush.msra.mxu2 %v4629_v30  ;;  %4765 = vmatpush.msra.mxu3 %v4630_v52  ;;  %v12517_v51 = vld [vmem:[#allocation34_spill] sm:$0xff]  ;;  %v12518_v24 = vld [vmem:[#allocation67_spill] sm:$0xff] }
 0x59b   : > { %v10547_v36 = vadd.f32 %v10353_v49, %v3940_v63  ;;  %v10557_v63 = vadd.f32 %v3087_v45, %v3055_v0  ;;  %v3056_v44 = vadd.f32 %v3019_v26, %v12516_v22 }
 0x59d   : > { %4080 = vmatmul.f32.gmra.mxu2 %v10547_v36  ;;  %4193 = vmatmul.f32.gmra.mxu3 %v10547_v36  ;;  %v3545_v58 = vpop.f32.mrf.mxu2  ;;  %v3658_v15 = vpop.f32.mrf.mxu3  ;;  %12515 = vst [vmem:[#allocation77_spill] sm:$0xff] %v10557_v63 }
 0x59e   : > { %v10555_v32 = vadd.f32 %v3658_v15, %v3545_v58  ;;  %v3756_v14 = vpop.f32.mrf.mxu0  ;;  %v3869_v57 = vpop.f32.mrf.mxu1  ;;  %v3088_v58 = vadd.f32 %v12518_v24, %v12517_v51  ;;  %v3022_v15 = vadd.f32 %v10314_v31, %v10312_v37  ;;  %v12522_v24 = vld [vmem:[#allocation36_spill] sm:$0xff] }
 0x59f   : > { %v3870_v3 = vadd.f32 %v3869_v57, %v3756_v14  ;;  %v12523_v31 = vld [vmem:[#allocation68_spill] sm:$0xff] }
 0x5a0   : > { %12514 = vst [vmem:[#allocation56_spill] sm:$0xff] %v10555_v32  ;;  %3803 = vmatmul.f32.gmra.mxu0 %v10555_v32  ;;  %3916 = vmatmul.f32.gmra.mxu1 %v10557_v63  ;;  %v10574_v26 = vadd.f32 %v3088_v58, %v3056_v44  ;;  %v3089_v37 = vadd.f32 %v12523_v31, %v12522_v24  ;;  %v12526_v31 = vld [vmem:[#allocation89_spill] sm:$0xff] }
 0x5a1   : > { %v3941_v11 = vadd.f32 %v3870_v3, %v10278_v13 }
 0x5a2   : > { %12520 = vst [vmem:[#allocation57_spill] sm:$0xff] %v10574_v26 }
 0x5a3   : > { %v10564_v21 = vadd.f32 %v10353_v49, %v3941_v11  ;;  %v12521_v11 = vld [vmem:[#allocation88_spill] sm:$0xff] }
 0x5a4   : > { %v3057_v22 = vadd.f32 %v3022_v15, %v12521_v11 }
 0x5a5   : > { %4083 = vmatmul.f32.gmra.mxu2 %v10564_v21  ;;  %4196 = vmatmul.f32.gmra.mxu3 %v10564_v21  ;;  %v3548_v0 = vpop.f32.mrf.mxu2  ;;  %v3661_v45 = vpop.f32.mrf.mxu3 }
 0x5a6   : > { %v10572_v30 = vadd.f32 %v3661_v45, %v3548_v0  ;;  %v3759_v52 = vpop.f32.mrf.mxu0  ;;  %v3872_v14 = vpop.f32.mrf.mxu1  ;;  %v4627_v0 = vld [vmem:[#allocation8 + $0x570] sm:$0xff]  ;;  %v4628_v45 = vld [vmem:[#allocation8 + $0x578] sm:$0xff] }
 0x5a7   : > { %v3873_v57 = vadd.f32 %v3872_v14, %v3759_v52  ;;  %v3025_v52 = vadd.f32 %v10333_v17, %v10331_v39  ;;  %4653 = vmatpush.msra.mxu2 %v4627_v0  ;;  %4766 = vmatpush.msra.mxu3 %v4628_v45  ;;  %v4951_v39 = vld [vmem:[#allocation9 + $0x578] sm:$0xff] }
 0x5a8   : > { %12519 = vst [vmem:[#allocation22_spill] sm:$0xff] %v10572_v30  ;;  %3806 = vmatmul.f32.gmra.mxu0 %v10572_v30  ;;  %3919 = vmatmul.f32.gmra.mxu1 %v10574_v26  ;;  %v4967_v17 = vld [vmem:[#allocation9 + $0x5f8] sm:$0xff] }
 0x5a9   : > { %v3942_v3 = vadd.f32 %v3873_v57, %v10297_v19  ;;  %v3058_v26 = vadd.f32 %v3025_v52, %v12526_v31  ;;  %4968 = vmatpush.msra.mxu0 %v4951_v39  ;;  %5081 = vmatpush.msra.mxu1 %v4967_v17  ;;  %v4625_v39 = vld [vmem:[#allocation8 + $0x560] sm:$0xff]  ;;  %v4626_v17 = vld [vmem:[#allocation8 + $0x568] sm:$0xff] }
 0x5aa   : > { %4654 = vmatpush.msra.mxu2 %v4625_v39  ;;  %4767 = vmatpush.msra.mxu3 %v4626_v17 }
 0x5ab   : > { %v10581_v51 = vadd.f32 %v10353_v49, %v3942_v3  ;;  %v10591_v3 = vadd.f32 %v3089_v37, %v3057_v22 }
 0x5ad   : > { %4086 = vmatmul.f32.gmra.mxu2 %v10581_v51  ;;  %4199 = vmatmul.f32.gmra.mxu3 %v10581_v51  ;;  %v3551_v44 = vpop.f32.mrf.mxu2  ;;  %v3664_v58 = vpop.f32.mrf.mxu3  ;;  %12525 = vst [vmem:[#allocation23_spill] sm:$0xff] %v10591_v3 }
 0x5ae   : > { %v10589_v14 = vadd.f32 %v3664_v58, %v3551_v44  ;;  %v3762_v15 = vpop.f32.mrf.mxu0  ;;  %v3875_v57 = vpop.f32.mrf.mxu1  ;;  %v12527_v44 = vld [vmem:[#allocation38_spill] sm:$0xff]  ;;  %v12528_v58 = vld [vmem:[#allocation69_spill] sm:$0xff] }
 0x5af   : > { %v3876_v11 = vadd.f32 %v3875_v57, %v3762_v15  ;;  %v3090_v22 = vadd.f32 %v12528_v58, %v12527_v44 }
 0x5b0   : > { %12524 = vst [vmem:[#allocation78_spill] sm:$0xff] %v10589_v14  ;;  %3809 = vmatmul.f32.gmra.mxu0 %v10589_v14  ;;  %3922 = vmatmul.f32.gmra.mxu1 %v10591_v3 }
 0x5b1   : > { %v3943_v24 = vadd.f32 %v3876_v11, %v10316_v60  ;;  %v10606_v57 = vadd.f32 %v3090_v22, %v3058_v26 }
 0x5b3   : > { %v10598_v63 = vadd.f32 %v10353_v49, %v3943_v24  ;;  %12530 = vst [vmem:[#allocation79_spill] sm:$0xff] %v10606_v57 }
 0x5b5   : > { %4089 = vmatmul.f32.gmra.mxu2 %v10598_v63  ;;  %4202 = vmatmul.f32.gmra.mxu3 %v10598_v63  ;;  %v3554_v37 = vpop.f32.mrf.mxu2  ;;  %v3667_v0 = vpop.f32.mrf.mxu3 }
 0x5b6   : > { %v10604_v45 = vadd.f32 %v3667_v0, %v3554_v37  ;;  %v3765_v15 = vpop.f32.mrf.mxu0  ;;  %v3878_v52 = vpop.f32.mrf.mxu1  ;;  %v4950_v0 = vld [vmem:[#allocation9 + $0x570] sm:$0xff] }
 0x5b7   : > { %v3879_v11 = vadd.f32 %v3878_v52, %v3765_v15  ;;  %v4966_v15 = vld [vmem:[#allocation9 + $0x5f0] sm:$0xff]  ;;  %4969 = vmatpush.msra.mxu0 %v4950_v0  ;;  %v4624_v0 = vld [vmem:[#allocation8 + $0x558] sm:$0xff] }
 0x5b8   : > { %12529 = vst [vmem:[#allocation58_spill] sm:$0xff] %v10604_v45  ;;  %3812 = vmatmul.f32.gmra.mxu0 %v10604_v45  ;;  %3925 = vmatmul.f32.gmra.mxu1 %v10606_v57 }
 0x5b9   : > { %v3944_v24 = vadd.f32 %v3879_v11, %v10335_v53  ;;  %5082 = vmatpush.msra.mxu1 %v4966_v15  ;;  %4768 = vmatpush.msra.mxu3 %v4624_v0 }
 0x5bb   : > { %v10612_v31 = vadd.f32 %v10353_v49, %v3944_v24 }
 0x5bd   : > { %4092 = vmatmul.f32.gmra.mxu2 %v10612_v31  ;;  %4205 = vmatmul.f32.gmra.mxu3 %v10612_v31 }
 0x5be   : > { %v3768_v44 = vpop.f32.mrf.mxu0  ;;  %v3881_v58 = vpop.f32.mrf.mxu1 }
 0x5bf   : > { %v3882_v26 = vadd.f32 %v3881_v58, %v3768_v44 }
 0x5c1   : > { %v3945_v22 = vadd.f32 %v3882_v26, %v10346_v1 }
 0x5c3   : > { %v10618_v37 = vadd.f32 %v10353_v49, %v3945_v22  ;;  %v4623_v22 = vld [vmem:[#allocation8 + $0x550] sm:$0xff] }
 0x5c4   : > { %4655 = vmatpush.msra.mxu2 %v4623_v22 }
 0x5c5   : > { %4095 = vmatmul.f32.gmra.mxu2 %v10618_v37  ;;  %4208 = vmatmul.f32.gmra.mxu3 %v10618_v37 }
 0x5c6   : > { %v3771_v52 = vpop.f32.mrf.mxu0  ;;  %v3884_v11 = vpop.f32.mrf.mxu1 }
 0x5c7   : > { %v3885_v24 = vadd.f32 %v3884_v11, %v3771_v52 }
 0x5c8   : > { %v4048_v57 = vpop.f32.mrf.mxu2  ;;  %v4161_v39 = vpop.f32.mrf.mxu3 }
 0x5c9   : > { %v3946_v17 = vadd.f32 %v3885_v24, %v10368_v12  ;;  %v4257_v44 = vmax.f32 %v4048_v57, 0.0  ;;  %v4258_v58 = vmax.f32 %v4161_v39, 0.0  ;;  %v4965_v12 = vld [vmem:[#allocation9 + $0x5e8] sm:$0xff] }
 0x5ca   : > { %5083 = vmatpush.msra.mxu1 %v4965_v12  ;;  %v4621_v12 = vld [vmem:[#allocation8 + $0x540] sm:$0xff] }
 0x5cb   : > { %4370 = vmatmul.f32.vlgmr.msrb.gmra.mxu0 %v4257_v44  ;;  %4483 = vmatmul.f32.vlgmr.msrb.gmra.mxu1 %v4258_v58  ;;  %v10624_v26 = vadd.f32 %v10353_v49, %v3946_v17  ;;  %v4949_v58 = vld [vmem:[#allocation9 + $0x568] sm:$0xff] }
 0x5cc   : > { %4970 = vmatpush.msra.mxu0 %v4949_v58  ;;  %4656 = vmatpush.msra.mxu2 %v4621_v12 }
 0x5cd   : > { %4098 = vmatmul.f32.gmra.mxu2 %v10624_v26  ;;  %4211 = vmatmul.f32.gmra.mxu3 %v10624_v26 }
 0x5ce   : > { %v3774_v15 = vpop.f32.mrf.mxu0  ;;  %v3887_v3 = vpop.f32.mrf.mxu1 }
 0x5cf   : > { %v3888_v52 = vadd.f32 %v3887_v3, %v3774_v15 }
 0x5d0   : > { %v4051_v11 = vpop.f32.mrf.mxu2  ;;  %v4164_v24 = vpop.f32.mrf.mxu3 }
 0x5d1   : > { %v3947_v57 = vadd.f32 %v3888_v52, %v10385_v7  ;;  %v4259_v39 = vmax.f32 %v4051_v11, 0.0  ;;  %v4260_v44 = vmax.f32 %v4164_v24, 0.0 }
 0x5d3   : > { %4373 = vmatmul.f32.gmra.mxu0 %v4259_v39  ;;  %4486 = vmatmul.f32.gmra.mxu1 %v4260_v44  ;;  %v10630_v17 = vadd.f32 %v10353_v49, %v3947_v57  ;;  %v4622_v44 = vld [vmem:[#allocation8 + $0x548] sm:$0xff] }
 0x5d4   : > { %4769 = vmatpush.msra.mxu3 %v4622_v44 }
 0x5d5   : > { %4101 = vmatmul.f32.gmra.mxu2 %v10630_v17  ;;  %4214 = vmatmul.f32.gmra.mxu3 %v10630_v17 }
 0x5d6   : > { %v3777_v3 = vpop.f32.mrf.mxu0  ;;  %v3890_v22 = vpop.f32.mrf.mxu1 }
 0x5d7   : > { %v3891_v0 = vadd.f32 %v3890_v22, %v3777_v3 }
 0x5d8   : > { %v4054_v15 = vpop.f32.mrf.mxu2  ;;  %v4167_v52 = vpop.f32.mrf.mxu3 }
 0x5d9   : > { %v3948_v11 = vadd.f32 %v3891_v0, %v10402_v27  ;;  %v4261_v24 = vmax.f32 %v4054_v15, 0.0  ;;  %v4262_v39 = vmax.f32 %v4167_v52, 0.0  ;;  %v4964_v27 = vld [vmem:[#allocation9 + $0x5e0] sm:$0xff] }
 0x5da   : > { %5084 = vmatpush.msra.mxu1 %v4964_v27  ;;  %v4619_v27 = vld [vmem:[#allocation8 + $0x530] sm:$0xff] }
 0x5db   : > { %4376 = vmatmul.f32.gmra.mxu0 %v4261_v24  ;;  %4489 = vmatmul.f32.gmra.mxu1 %v4262_v39  ;;  %v10636_v57 = vadd.f32 %v10353_v49, %v3948_v11  ;;  %v4948_v39 = vld [vmem:[#allocation9 + $0x560] sm:$0xff] }
 0x5dc   : > { %4971 = vmatpush.msra.mxu0 %v4948_v39  ;;  %4657 = vmatpush.msra.mxu2 %v4619_v27 }
 0x5dd   : > { %4104 = vmatmul.f32.gmra.mxu2 %v10636_v57  ;;  %4217 = vmatmul.f32.gmra.mxu3 %v10636_v57 }
 0x5de   : > { %v3780_v58 = vpop.f32.mrf.mxu0  ;;  %v3893_v7 = vpop.f32.mrf.mxu1 }
 0x5df   : > { %v3894_v3 = vadd.f32 %v3893_v7, %v3780_v58 }
 0x5e0   : > { %v4057_v22 = vpop.f32.mrf.mxu2  ;;  %v4170_v0 = vpop.f32.mrf.mxu3 }
 0x5e1   : > { %v3949_v15 = vadd.f32 %v3894_v3, %v10419_v6  ;;  %v4263_v52 = vmax.f32 %v4057_v22, 0.0  ;;  %v4264_v24 = vmax.f32 %v4170_v0, 0.0 }
 0x5e3   : > { %4379 = vmatmul.f32.gmra.mxu0 %v4263_v52  ;;  %4492 = vmatmul.f32.gmra.mxu1 %v4264_v24  ;;  %v10642_v11 = vadd.f32 %v10353_v49, %v3949_v15  ;;  %v4620_v24 = vld [vmem:[#allocation8 + $0x538] sm:$0xff] }
 0x5e4   : > { %4770 = vmatpush.msra.mxu3 %v4620_v24 }
 0x5e5   : > { %4107 = vmatmul.f32.gmra.mxu2 %v10642_v11  ;;  %4220 = vmatmul.f32.gmra.mxu3 %v10642_v11 }
 0x5e6   : > { %v3783_v7 = vpop.f32.mrf.mxu0  ;;  %v3896_v12 = vpop.f32.mrf.mxu1 }
 0x5e7   : > { %v3897_v44 = vadd.f32 %v3896_v12, %v3783_v7 }
 0x5e8   : > { %v4060_v58 = vpop.f32.mrf.mxu2  ;;  %v4173_v3 = vpop.f32.mrf.mxu3 }
 0x5e9   : > { %v3950_v22 = vadd.f32 %v3897_v44, %v10436_v46  ;;  %v4265_v0 = vmax.f32 %v4060_v58, 0.0  ;;  %v4266_v52 = vmax.f32 %v4173_v3, 0.0  ;;  %v4963_v46 = vld [vmem:[#allocation9 + $0x5d8] sm:$0xff] }
 0x5ea   : > { %5085 = vmatpush.msra.mxu1 %v4963_v46  ;;  %v4617_v46 = vld [vmem:[#allocation8 + $0x520] sm:$0xff] }
 0x5eb   : > { %4382 = vmatmul.f32.gmra.mxu0 %v4265_v0  ;;  %4495 = vmatmul.f32.gmra.mxu1 %v4266_v52  ;;  %v10648_v15 = vadd.f32 %v10353_v49, %v3950_v22  ;;  %v4947_v52 = vld [vmem:[#allocation9 + $0x558] sm:$0xff] }
 0x5ec   : > { %4972 = vmatpush.msra.mxu0 %v4947_v52  ;;  %4658 = vmatpush.msra.mxu2 %v4617_v46 }
 0x5ed   : > { %4110 = vmatmul.f32.gmra.mxu2 %v10648_v15  ;;  %4223 = vmatmul.f32.gmra.mxu3 %v10648_v15 }
 0x5ee   : > { %v3786_v39 = vpop.f32.mrf.mxu0  ;;  %v3899_v6 = vpop.f32.mrf.mxu1 }
 0x5ef   : > { %v3900_v7 = vadd.f32 %v3899_v6, %v3786_v39 }
 0x5f0   : > { %v4063_v12 = vpop.f32.mrf.mxu2  ;;  %v4176_v44 = vpop.f32.mrf.mxu3 }
 0x5f1   : > { %v3951_v58 = vadd.f32 %v3900_v7, %v10453_v41  ;;  %v4267_v3 = vmax.f32 %v4063_v12, 0.0  ;;  %v4268_v0 = vmax.f32 %v4176_v44, 0.0 }
 0x5f3   : > { %4385 = vmatmul.f32.gmra.mxu0 %v4267_v3  ;;  %4498 = vmatmul.f32.gmra.mxu1 %v4268_v0  ;;  %v10654_v22 = vadd.f32 %v10353_v49, %v3951_v58  ;;  %v4618_v0 = vld [vmem:[#allocation8 + $0x528] sm:$0xff] }
 0x5f4   : > { %4771 = vmatpush.msra.mxu3 %v4618_v0 }
 0x5f5   : > { %4113 = vmatmul.f32.gmra.mxu2 %v10654_v22  ;;  %4226 = vmatmul.f32.gmra.mxu3 %v10654_v22 }
 0x5f6   : > { %v3789_v6 = vpop.f32.mrf.mxu0  ;;  %v3902_v27 = vpop.f32.mrf.mxu1 }
 0x5f7   : > { %v3903_v24 = vadd.f32 %v3902_v27, %v3789_v6 }
 0x5f8   : > { %v4066_v39 = vpop.f32.mrf.mxu2  ;;  %v4179_v7 = vpop.f32.mrf.mxu3 }
 0x5f9   : > { %v3952_v12 = vadd.f32 %v3903_v24, %v10470_v42  ;;  %v4269_v44 = vmax.f32 %v4066_v39, 0.0  ;;  %v4270_v3 = vmax.f32 %v4179_v7, 0.0  ;;  %v4962_v42 = vld [vmem:[#allocation9 + $0x5d0] sm:$0xff] }
 0x5fa   : > { %5086 = vmatpush.msra.mxu1 %v4962_v42  ;;  %v4615_v42 = vld [vmem:[#allocation8 + $0x510] sm:$0xff] }
 0x5fb   : > { %4388 = vmatmul.f32.gmra.mxu0 %v4269_v44  ;;  %4501 = vmatmul.f32.gmra.mxu1 %v4270_v3  ;;  %v10660_v58 = vadd.f32 %v10353_v49, %v3952_v12  ;;  %v4946_v3 = vld [vmem:[#allocation9 + $0x550] sm:$0xff] }
 0x5fc   : > { %4973 = vmatpush.msra.mxu0 %v4946_v3  ;;  %4659 = vmatpush.msra.mxu2 %v4615_v42 }
 0x5fd   : > { %4116 = vmatmul.f32.gmra.mxu2 %v10660_v58  ;;  %4229 = vmatmul.f32.gmra.mxu3 %v10660_v58 }
 0x5fe   : > { %v3792_v52 = vpop.f32.mrf.mxu0  ;;  %v3905_v41 = vpop.f32.mrf.mxu1 }
 0x5ff   : > { %v3906_v6 = vadd.f32 %v3905_v41, %v3792_v52 }
 0x600   : > { %v4069_v27 = vpop.f32.mrf.mxu2  ;;  %v4182_v24 = vpop.f32.mrf.mxu3 }
 0x601   : > { %v3953_v39 = vadd.f32 %v3906_v6, %v10487_v61  ;;  %v4271_v7 = vmax.f32 %v4069_v27, 0.0  ;;  %v4272_v44 = vmax.f32 %v4182_v24, 0.0 }
 0x603   : > { %4391 = vmatmul.f32.gmra.mxu0 %v4271_v7  ;;  %4504 = vmatmul.f32.gmra.mxu1 %v4272_v44  ;;  %v10666_v12 = vadd.f32 %v10353_v49, %v3953_v39  ;;  %v4616_v44 = vld [vmem:[#allocation8 + $0x518] sm:$0xff] }
 0x604   : > { %4772 = vmatpush.msra.mxu3 %v4616_v44 }
 0x605   : > { %4119 = vmatmul.f32.gmra.mxu2 %v10666_v12  ;;  %4232 = vmatmul.f32.gmra.mxu3 %v10666_v12 }
 0x606   : > { %v3795_v41 = vpop.f32.mrf.mxu0  ;;  %v3908_v46 = vpop.f32.mrf.mxu1 }
 0x607   : > { %v3909_v0 = vadd.f32 %v3908_v46, %v3795_v41 }
 0x608   : > { %v4072_v52 = vpop.f32.mrf.mxu2  ;;  %v4185_v6 = vpop.f32.mrf.mxu3 }
 0x609   : > { %v3954_v27 = vadd.f32 %v3909_v0, %v10504_v8  ;;  %v4273_v24 = vmax.f32 %v4072_v52, 0.0  ;;  %v4274_v7 = vmax.f32 %v4185_v6, 0.0  ;;  %v4961_v8 = vld [vmem:[#allocation9 + $0x5c8] sm:$0xff] }
 0x60a   : > { %5087 = vmatpush.msra.mxu1 %v4961_v8  ;;  %v4613_v8 = vld [vmem:[#allocation8 + $0x500] sm:$0xff] }
 0x60b   : > { %4394 = vmatmul.f32.gmra.mxu0 %v4273_v24  ;;  %4507 = vmatmul.f32.gmra.mxu1 %v4274_v7  ;;  %v10672_v39 = vadd.f32 %v10353_v49, %v3954_v27  ;;  %v4945_v7 = vld [vmem:[#allocation9 + $0x548] sm:$0xff] }
 0x60c   : > { %4974 = vmatpush.msra.mxu0 %v4945_v7  ;;  %4660 = vmatpush.msra.mxu2 %v4613_v8 }
 0x60d   : > { %4122 = vmatmul.f32.gmra.mxu2 %v10672_v39  ;;  %4235 = vmatmul.f32.gmra.mxu3 %v10672_v39 }
 0x60e   : > { %v3798_v3 = vpop.f32.mrf.mxu0  ;;  %v3911_v61 = vpop.f32.mrf.mxu1 }
 0x60f   : > { %v3912_v41 = vadd.f32 %v3911_v61, %v3798_v3 }
 0x610   : > { %v4075_v46 = vpop.f32.mrf.mxu2  ;;  %v4188_v0 = vpop.f32.mrf.mxu3 }
 0x611   : > { %v3955_v52 = vadd.f32 %v3912_v41, %v10521_v28  ;;  %v4275_v6 = vmax.f32 %v4075_v46, 0.0  ;;  %v4276_v24 = vmax.f32 %v4188_v0, 0.0 }
 0x613   : > { %4397 = vmatmul.f32.gmra.mxu0 %v4275_v6  ;;  %4510 = vmatmul.f32.gmra.mxu1 %v4276_v24  ;;  %v10678_v27 = vadd.f32 %v10353_v49, %v3955_v52  ;;  %v4614_v24 = vld [vmem:[#allocation8 + $0x508] sm:$0xff] }
 0x614   : > { %4773 = vmatpush.msra.mxu3 %v4614_v24 }
 0x615   : > { %4125 = vmatmul.f32.gmra.mxu2 %v10678_v27  ;;  %4238 = vmatmul.f32.gmra.mxu3 %v10678_v27 }
 0x616   : > { %v3801_v61 = vpop.f32.mrf.mxu0  ;;  %v3914_v42 = vpop.f32.mrf.mxu1 }
 0x617   : > { %v3915_v44 = vadd.f32 %v3914_v42, %v3801_v61 }
 0x618   : > { %v4078_v3 = vpop.f32.mrf.mxu2  ;;  %v4191_v41 = vpop.f32.mrf.mxu3 }
 0x619   : > { %v3956_v46 = vadd.f32 %v3915_v44, %v10538_v23  ;;  %v4277_v0 = vmax.f32 %v4078_v3, 0.0  ;;  %v4278_v6 = vmax.f32 %v4191_v41, 0.0  ;;  %v4960_v23 = vld [vmem:[#allocation9 + $0x5c0] sm:$0xff] }
 0x61a   : > { %5088 = vmatpush.msra.mxu1 %v4960_v23 }
 0x61b   : > { %4400 = vmatmul.f32.gmra.mxu0 %v4277_v0  ;;  %4513 = vmatmul.f32.gmra.mxu1 %v4278_v6  ;;  %v10684_v52 = vadd.f32 %v10353_v49, %v3956_v46  ;;  %v8403_v49 = vld [vmem:[%s12108_s3 + $0x2] ss:$0 sm:$0xff] }
 0x61c   : > { %v4944_v6 = vld [vmem:[#allocation9 + $0x540] sm:$0xff] }
 0x61d   : > { %4128 = vmatmul.f32.gmra.mxu2 %v10684_v52  ;;  %4241 = vmatmul.f32.gmra.mxu3 %v10684_v52 }
 0x61e   : > { %v3804_v7 = vpop.f32.mrf.mxu0  ;;  %v3917_v28 = vpop.f32.mrf.mxu1  ;;  %4975 = vmatpush.msra.mxu0 %v4944_v6  ;;  %v5594_v6 = vld [vmem:[#allocation3 + $0x378] sm:$0xff] }
 0x61f   : > { %v3918_v61 = vadd.f32 %v3917_v28, %v3804_v7  ;;  %5611 = vmatpush.msrb.mxu2 %v5594_v6 }
 0x620   : > { %v4081_v42 = vpop.f32.mrf.mxu2  ;;  %v4194_v44 = vpop.f32.mrf.mxu3 }
 0x621   : > { %v3957_v3 = vadd.f32 %v3918_v61, %v10555_v32  ;;  %v4279_v41 = vmax.f32 %v4081_v42, 0.0  ;;  %v4280_v0 = vmax.f32 %v4194_v44, 0.0  ;;  %v5610_v32 = vld [vmem:[#allocation3 + $0x3f8] sm:$0xff] }
 0x622   : > { %5724 = vmatpush.msrb.mxu3 %v5610_v32 }
 0x623   : > { %4403 = vmatmul.f32.gmra.mxu0 %v4279_v41  ;;  %4516 = vmatmul.f32.gmra.mxu1 %v4280_v0  ;;  %v10692_v46 = vadd.f32 %v8403_v49, %v3957_v3 }
 0x625   : > { %4131 = vmatmul.f32.gmra.mxu2 %v10692_v46  ;;  %4244 = vmatmul.f32.gmra.mxu3 %v10692_v46 }
 0x626   : > { %v3807_v28 = vpop.f32.mrf.mxu0  ;;  %v3920_v8 = vpop.f32.mrf.mxu1 }
 0x627   : > { %v3921_v24 = vadd.f32 %v3920_v8, %v3807_v28 }
 0x628   : > { %v4084_v7 = vpop.f32.mrf.mxu2  ;;  %v4197_v61 = vpop.f32.mrf.mxu3 }
 0x629   : > { %v3958_v42 = vadd.f32 %v3921_v24, %v10572_v30  ;;  %v4281_v44 = vmax.f32 %v4084_v7, 0.0  ;;  %v4282_v41 = vmax.f32 %v4197_v61, 0.0 }
 0x62b   : > { %4406 = vmatmul.f32.gmra.mxu0 %v4281_v44  ;;  %4519 = vmatmul.f32.gmra.mxu1 %v4282_v41  ;;  %v10697_v3 = vadd.f32 %v8403_v49, %v3958_v42  ;;  %v4943_v44 = vld [vmem:[#allocation9 + $0x538] sm:$0xff] }
 0x62c   : > { %v4959_v41 = vld [vmem:[#allocation9 + $0x5b8] sm:$0xff]  ;;  %4976 = vmatpush.msra.mxu0 %v4943_v44 }
 0x62d   : > { %4134 = vmatmul.f32.gmra.mxu2 %v10697_v3  ;;  %4247 = vmatmul.f32.gmra.mxu3 %v10697_v3 }
 0x62e   : > { %v3810_v23 = vpop.f32.mrf.mxu0  ;;  %v3923_v0 = vpop.f32.mrf.mxu1  ;;  %5089 = vmatpush.msra.mxu1 %v4959_v41 }
 0x62f   : > { %v3924_v1 = vadd.f32 %v3923_v0, %v3810_v23 }
 0x630   : > { %v4087_v28 = vpop.f32.mrf.mxu2  ;;  %v4200_v8 = vpop.f32.mrf.mxu3 }
 0x631   : > { %v3959_v24 = vadd.f32 %v3924_v1, %v10589_v14  ;;  %v4283_v7 = vmax.f32 %v4087_v28, 0.0  ;;  %v4284_v61 = vmax.f32 %v4200_v8, 0.0 }
 0x633   : > { %4409 = vmatmul.f32.gmra.mxu0 %v4283_v7  ;;  %4522 = vmatmul.f32.gmra.mxu1 %v4284_v61  ;;  %v10702_v42 = vadd.f32 %v8403_v49, %v3959_v24  ;;  %v5593_v7 = vld [vmem:[#allocation3 + $0x370] sm:$0xff] }
 0x634   : > { %v5609_v61 = vld [vmem:[#allocation3 + $0x3f0] sm:$0xff]  ;;  %5612 = vmatpush.msrb.mxu2 %v5593_v7 }
 0x635   : > { %4137 = vmatmul.f32.gmra.mxu2 %v10702_v42  ;;  %4250 = vmatmul.f32.gmra.mxu3 %v10702_v42 }
 0x636   : > { %v3813_v30 = vpop.f32.mrf.mxu0  ;;  %v3926_v23 = vpop.f32.mrf.mxu1  ;;  %5725 = vmatpush.msrb.mxu3 %v5609_v61  ;;  %v5592_v61 = vld [vmem:[#allocation3 + $0x368] sm:$0xff] }
 0x637   : > { %v3927_v32 = vadd.f32 %v3926_v23, %v3813_v30  ;;  %5613 = vmatpush.msrb.mxu2 %v5592_v61 }
 0x638   : > { %v4090_v0 = vpop.f32.mrf.mxu2  ;;  %v4203_v6 = vpop.f32.mrf.mxu3 }
 0x639   : > { %v3960_v1 = vadd.f32 %v3927_v32, %v10604_v45  ;;  %v4285_v28 = vmax.f32 %v4090_v0, 0.0  ;;  %v4286_v8 = vmax.f32 %v4203_v6, 0.0  ;;  %v4942_v32 = vld [vmem:[#allocation9 + $0x530] sm:$0xff] }
 0x63a   : > { %v4958_v0 = vld [vmem:[#allocation9 + $0x5b0] sm:$0xff]  ;;  %4977 = vmatpush.msra.mxu0 %v4942_v32 }
 0x63b   : > { %4412 = vmatmul.f32.gmra.mxu0 %v4285_v28  ;;  %4525 = vmatmul.f32.gmra.mxu1 %v4286_v8  ;;  %v10707_v24 = vadd.f32 %v8403_v49, %v3960_v1 }
 0x63c   : > { %5090 = vmatpush.msra.mxu1 %v4958_v0 }
 0x63d   : > { %4140 = vmatmul.f32.gmra.mxu2 %v10707_v24  ;;  %4253 = vmatmul.f32.gmra.mxu3 %v10707_v24 }
 0x640   : > { %v4093_v44 = vpop.f32.mrf.mxu2  ;;  %v4206_v30 = vpop.f32.mrf.mxu3 }
 0x641   : > { %v4287_v41 = vmax.f32 %v4093_v44, 0.0  ;;  %v4288_v23 = vmax.f32 %v4206_v30, 0.0  ;;  %v5608_v44 = vld [vmem:[#allocation3 + $0x3e8] sm:$0xff] }
 0x642   : > { %5726 = vmatpush.msrb.mxu3 %v5608_v44 }
 0x643   : > { %4415 = vmatmul.f32.gmra.mxu0 %v4287_v41  ;;  %4528 = vmatmul.f32.gmra.mxu1 %v4288_v23 }
 0x648   : > { %v4096_v49 = vpop.f32.mrf.mxu2  ;;  %v4209_v6 = vpop.f32.mrf.mxu3 }
 0x649   : > { %v4289_v1 = vmax.f32 %v4096_v49, 0.0  ;;  %v4290_v28 = vmax.f32 %v4209_v6, 0.0  ;;  %v4371_v8 = vpop.f32.mrf.mxu0  ;;  %v4484_v45 = vpop.f32.mrf.mxu1  ;;  %v4957_v6 = vld [vmem:[#allocation9 + $0x5a8] sm:$0xff] }
 0x64a   : > { %v4485_v14 = vadd.f32 %v4484_v45, %v4371_v8  ;;  %5091 = vmatpush.msra.mxu1 %v4957_v6 }
 0x64b   : > { %4418 = vmatmul.f32.gmra.mxu0 %v4289_v1  ;;  %4531 = vmatmul.f32.gmra.mxu1 %v4290_v28 }
 0x64c   : > { %v10712_v7 = vadd.f32 %v4485_v14, %v10360_v9  ;;  %v4941_v14 = vld [vmem:[#allocation9 + $0x528] sm:$0xff] }
 0x64d   : > { %4978 = vmatpush.msra.mxu0 %v4941_v14 }
 0x64e   : > { %4661 = vmatmul.f32.vlgmr.msra.gmra.mxu2 %v10712_v7  ;;  %4774 = vmatmul.f32.vlgmr.msra.gmra.mxu3 %v10712_v7 }
 0x650   : > { %v4099_v30 = vpop.f32.mrf.mxu2  ;;  %v4212_v41 = vpop.f32.mrf.mxu3 }
 0x651   : > { %v4291_v23 = vmax.f32 %v4099_v30, 0.0  ;;  %v4292_v32 = vmax.f32 %v4212_v41, 0.0  ;;  %v4374_v0 = vpop.f32.mrf.mxu0  ;;  %v4487_v49 = vpop.f32.mrf.mxu1 }
 0x652   : > { %v4488_v45 = vadd.f32 %v4487_v49, %v4374_v0 }
 0x653   : > { %4421 = vmatmul.f32.gmra.mxu0 %v4291_v23  ;;  %4534 = vmatmul.f32.gmra.mxu1 %v4292_v32  ;;  %v5591_v23 = vld [vmem:[#allocation3 + $0x360] sm:$0xff] }
 0x654   : > { %v10717_v9 = vadd.f32 %v4488_v45, %v10377_v35  ;;  %v5607_v32 = vld [vmem:[#allocation3 + $0x3e0] sm:$0xff]  ;;  %5614 = vmatpush.msrb.mxu2 %v5591_v23 }
 0x655   : > { %5727 = vmatpush.msrb.mxu3 %v5607_v32 }
 0x656   : > { %4664 = vmatmul.f32.gmra.mxu2 %v10717_v9  ;;  %4777 = vmatmul.f32.gmra.mxu3 %v10717_v9 }
 0x658   : > { %v4102_v1 = vpop.f32.mrf.mxu2  ;;  %v4215_v28 = vpop.f32.mrf.mxu3 }
 0x659   : > { %v4293_v8 = vmax.f32 %v4102_v1, 0.0  ;;  %v4294_v61 = vmax.f32 %v4215_v28, 0.0  ;;  %v4377_v44 = vpop.f32.mrf.mxu0  ;;  %v4490_v30 = vpop.f32.mrf.mxu1 }
 0x65a   : > { %v4491_v41 = vadd.f32 %v4490_v30, %v4377_v44 }
 0x65b   : > { %4424 = vmatmul.f32.gmra.mxu0 %v4293_v8  ;;  %4537 = vmatmul.f32.gmra.mxu1 %v4294_v61  ;;  %v4940_v8 = vld [vmem:[#allocation9 + $0x520] sm:$0xff] }
 0x65c   : > { %v10722_v35 = vadd.f32 %v4491_v41, %v10394_v29  ;;  %v4956_v61 = vld [vmem:[#allocation9 + $0x5a0] sm:$0xff]  ;;  %4979 = vmatpush.msra.mxu0 %v4940_v8 }
 0x65d   : > { %5092 = vmatpush.msra.mxu1 %v4956_v61 }
 0x65e   : > { %4667 = vmatmul.f32.gmra.mxu2 %v10722_v35  ;;  %4780 = vmatmul.f32.gmra.mxu3 %v10722_v35 }
 0x660   : > { %v4105_v0 = vpop.f32.mrf.mxu2  ;;  %v4218_v49 = vpop.f32.mrf.mxu3 }
 0x661   : > { %v4295_v45 = vmax.f32 %v4105_v0, 0.0  ;;  %v4296_v14 = vmax.f32 %v4218_v49, 0.0  ;;  %v4380_v6 = vpop.f32.mrf.mxu0  ;;  %v4493_v1 = vpop.f32.mrf.mxu1 }
 0x662   : > { %v4494_v28 = vadd.f32 %v4493_v1, %v4380_v6 }
 0x663   : > { %4427 = vmatmul.f32.gmra.mxu0 %v4295_v45  ;;  %4540 = vmatmul.f32.gmra.mxu1 %v4296_v14  ;;  %v5590_v45 = vld [vmem:[#allocation3 + $0x358] sm:$0xff] }
 0x664   : > { %v10727_v29 = vadd.f32 %v4494_v28, %v10411_v2  ;;  %v5606_v14 = vld [vmem:[#allocation3 + $0x3d8] sm:$0xff]  ;;  %5615 = vmatpush.msrb.mxu2 %v5590_v45  ;;  %v8404_v45 = vld [vmem:[%s8798_s18 + $0x8] sm:$0xff] }
 0x665   : > { %5728 = vmatpush.msrb.mxu3 %v5606_v14  ;;  %v8405_v14 = vld [vmem:[%s8798_s18 + $0x10] sm:$0xff] }
 0x666   : > { %4670 = vmatmul.f32.gmra.mxu2 %v10727_v29  ;;  %4783 = vmatmul.f32.gmra.mxu3 %v10727_v29 }
 0x668   : > { %v4108_v44 = vpop.f32.mrf.mxu2  ;;  %v4221_v30 = vpop.f32.mrf.mxu3 }
 0x669   : > { %v4297_v41 = vmax.f32 %v4108_v44, 0.0  ;;  %v4298_v23 = vmax.f32 %v4221_v30, 0.0  ;;  %v4383_v32 = vpop.f32.mrf.mxu0  ;;  %v4496_v0 = vpop.f32.mrf.mxu1 }
 0x66a   : > { %v4497_v49 = vadd.f32 %v4496_v0, %v4383_v32  ;;  %v8645_v32 = vmov 3  }
 0x66b   : > { %4430 = vmatmul.f32.gmra.mxu0 %v4297_v41  ;;  %4543 = vmatmul.f32.gmra.mxu1 %v4298_v23  ;;  %v4939_v41 = vld [vmem:[#allocation9 + $0x518] sm:$0xff] }
 0x66c   : > { %v10732_v2 = vadd.f32 %v4497_v49, %v10428_v56  ;;  %v4955_v23 = vld [vmem:[#allocation9 + $0x598] sm:$0xff]  ;;  %4980 = vmatpush.msra.mxu0 %v4939_v41  ;;  %8365 = vset.pattern.permute.xlu0 %v8645_v32  ;;  %v5605_v41 = vld [vmem:[#allocation3 + $0x3d0] sm:$0xff] }
 0x66d   : > { %5093 = vmatpush.msra.mxu1 %v4955_v23  ;;  %8366 = vset.pattern.permute.xlu1 %v8645_v32 }
 0x66e   : > { %4673 = vmatmul.f32.gmra.mxu2 %v10732_v2  ;;  %4786 = vmatmul.f32.gmra.mxu3 %v10732_v2 }
 0x66f   : > { %5294 = vperm.xlu0 %8365, %v8404_v45   ;;  %5297 = vperm.xlu1 %8366, %v8405_v14  }
 0x670   : > { %v4111_v6 = vpop.f32.mrf.mxu2  ;;  %v4224_v1 = vpop.f32.mrf.mxu3  ;;  %8364 = vset.pattern.permute.xlu2 %v8645_v32  ;;  %5729 = vmatpush.msrb.mxu3 %v5605_v41 }
 0x671   : > { %v4299_v28 = vmax.f32 %v4111_v6, 0.0  ;;  %v4300_v8 = vmax.f32 %v4224_v1, 0.0  ;;  %v4386_v61 = vpop.f32.mrf.mxu0  ;;  %v4499_v44 = vpop.f32.mrf.mxu1 }
 0x672   : > { %v4500_v30 = vadd.f32 %v4499_v44, %v4386_v61  ;;  %v8406_v61 = vld [vmem:[%s8798_s18] sm:$0xff] }
 0x673   : > { %4433 = vmatmul.f32.gmra.mxu0 %v4299_v28  ;;  %4546 = vmatmul.f32.gmra.mxu1 %v4300_v8 }
 0x674   : > { %v10737_v56 = vadd.f32 %v4500_v30, %v10445_v5  ;;  %5291 = vperm.xlu2 %8364, %v8406_v61   ;;  %v5589_v30 = vld [vmem:[#allocation3 + $0x350] sm:$0xff] }
 0x675   : > { %5616 = vmatpush.msrb.mxu2 %v5589_v30  ;;  %v4954_v61 = vld [vmem:[#allocation9 + $0x590] sm:$0xff] }
 0x676   : > { %4676 = vmatmul.f32.gmra.mxu2 %v10737_v56  ;;  %4789 = vmatmul.f32.gmra.mxu3 %v10737_v56 }
 0x677   : > { %5094 = vmatpush.msra.mxu1 %v4954_v61 }
 0x678   : > { %v4114_v0 = vpop.f32.mrf.mxu2  ;;  %v4227_v49 = vpop.f32.mrf.mxu3 }
 0x679   : > { %v4301_v5 = vmax.f32 %v4114_v0, 0.0  ;;  %v4302_v6 = vmax.f32 %v4227_v49, 0.0  ;;  %v4389_v1 = vpop.f32.mrf.mxu0  ;;  %v4502_v28 = vpop.f32.mrf.mxu1  ;;  %v8407_v0 = vld [vmem:[%s8798_s18 + $0x30] sm:$0xff]  ;;  %v8408_v49 = vld [vmem:[%s8798_s18 + $0x20] sm:$0xff] }
 0x67a   : > { %v4503_v8 = vadd.f32 %v4502_v28, %v4389_v1  ;;  %5309 = vperm.xlu0 %8365, %v8407_v0   ;;  %5303 = vperm.xlu1 %8366, %v8408_v49   ;;  %v8409_v1 = vld [vmem:[%s8798_s18 + $0x18] sm:$0xff] }
 0x67b   : > { %4436 = vmatmul.f32.gmra.mxu0 %v4301_v5  ;;  %4549 = vmatmul.f32.gmra.mxu1 %v4302_v6 }
 0x67c   : > { %v10745_v44 = vadd.f32 %v4503_v8, %v10462_v40  ;;  %5300 = vperm.xlu2 %8364, %v8409_v1   ;;  %v4938_v8 = vld [vmem:[#allocation9 + $0x510] sm:$0xff]  ;;  %v5604_v1 = vld [vmem:[#allocation3 + $0x3c8] sm:$0xff] }
 0x67d   : > { %4981 = vmatpush.msra.mxu0 %v4938_v8  ;;  %5730 = vmatpush.msrb.mxu3 %v5604_v1 }
 0x67e   : > { %4679 = vmatmul.f32.gmra.mxu2 %v10745_v44  ;;  %4792 = vmatmul.f32.gmra.mxu3 %v10745_v44 }
 0x680   : > { %v4117_v23 = vpop.f32.mrf.mxu2  ;;  %v4230_v32 = vpop.f32.mrf.mxu3 }
 0x681   : > { %v4303_v45 = vmax.f32 %v4117_v23, 0.0  ;;  %v4304_v14 = vmax.f32 %v4230_v32, 0.0  ;;  %v4392_v5 = vpop.f32.mrf.mxu0  ;;  %v4505_v40 = vpop.f32.mrf.mxu1  ;;  %v8410_v23 = vld [vmem:[%s8798_s18 + $0x48] sm:$0xff]  ;;  %v8411_v32 = vld [vmem:[%s8798_s18 + $0x38] sm:$0xff] }
 0x682   : > { %v4506_v6 = vadd.f32 %v4505_v40, %v4392_v5  ;;  %5318 = vperm.xlu0 %8365, %v8410_v23   ;;  %5312 = vperm.xlu1 %8366, %v8411_v32   ;;  %v8412_v5 = vld [vmem:[%s8798_s18 + $0x28] sm:$0xff] }
 0x683   : > { %4439 = vmatmul.f32.gmra.mxu0 %v4303_v45  ;;  %4552 = vmatmul.f32.gmra.mxu1 %v4304_v14 }
 0x684   : > { %v10753_v28 = vadd.f32 %v4506_v6, %v10479_v4  ;;  %5306 = vperm.xlu2 %8364, %v8412_v5   ;;  %v5588_v6 = vld [vmem:[#allocation3 + $0x348] sm:$0xff] }
 0x685   : > { %5617 = vmatpush.msrb.mxu2 %v5588_v6  ;;  %v4953_v5 = vld [vmem:[#allocation9 + $0x588] sm:$0xff] }
 0x686   : > { %4682 = vmatmul.f32.gmra.mxu2 %v10753_v28  ;;  %4795 = vmatmul.f32.gmra.mxu3 %v10753_v28 }
 0x687   : > { %5095 = vmatpush.msra.mxu1 %v4953_v5 }
 0x688   : > { %v4120_v30 = vpop.f32.mrf.mxu2  ;;  %v4233_v41 = vpop.f32.mrf.mxu3 }
 0x689   : > { %v4305_v0 = vmax.f32 %v4120_v30, 0.0  ;;  %v4306_v49 = vmax.f32 %v4233_v41, 0.0  ;;  %v4395_v45 = vpop.f32.mrf.mxu0  ;;  %v4508_v4 = vpop.f32.mrf.mxu1  ;;  %v8413_v30 = vld [vmem:[%s8798_s18 + $0x60] sm:$0xff]  ;;  %v8414_v41 = vld [vmem:[%s8798_s18 + $0x50] sm:$0xff] }
 0x68a   : > { %v4509_v14 = vadd.f32 %v4508_v4, %v4395_v45  ;;  %5327 = vperm.xlu0 %8365, %v8413_v30   ;;  %5321 = vperm.xlu1 %8366, %v8414_v41   ;;  %v8415_v45 = vld [vmem:[%s8798_s18 + $0x40] sm:$0xff] }
 0x68b   : > { %4442 = vmatmul.f32.gmra.mxu0 %v4305_v0  ;;  %4555 = vmatmul.f32.gmra.mxu1 %v4306_v49 }
 0x68c   : > { %v10761_v40 = vadd.f32 %v4509_v14, %v10496_v34  ;;  %5315 = vperm.xlu2 %8364, %v8415_v45   ;;  %v4937_v14 = vld [vmem:[#allocation9 + $0x508] sm:$0xff]  ;;  %v5603_v45 = vld [vmem:[#allocation3 + $0x3c0] sm:$0xff] }
 0x68d   : > { %4982 = vmatpush.msra.mxu0 %v4937_v14  ;;  %5731 = vmatpush.msrb.mxu3 %v5603_v45 }
 0x68e   : > { %4685 = vmatmul.f32.gmra.mxu2 %v10761_v40  ;;  %4798 = vmatmul.f32.gmra.mxu3 %v10761_v40 }
 0x690   : > { %v4123_v8 = vpop.f32.mrf.mxu2  ;;  %v4236_v61 = vpop.f32.mrf.mxu3 }
 0x691   : > { %v4307_v23 = vmax.f32 %v4123_v8, 0.0  ;;  %v4308_v32 = vmax.f32 %v4236_v61, 0.0  ;;  %v4398_v0 = vpop.f32.mrf.mxu0  ;;  %v4511_v34 = vpop.f32.mrf.mxu1  ;;  %v8416_v8 = vld [vmem:[%s8798_s18 + $0x78] sm:$0xff]  ;;  %v8417_v61 = vld [vmem:[%s8798_s18 + $0x68] sm:$0xff] }
 0x692   : > { %v4512_v49 = vadd.f32 %v4511_v34, %v4398_v0  ;;  %5336 = vperm.xlu0 %8365, %v8416_v8   ;;  %5330 = vperm.xlu1 %8366, %v8417_v61   ;;  %v8418_v0 = vld [vmem:[%s8798_s18 + $0x58] sm:$0xff] }
 0x693   : > { %4445 = vmatmul.f32.gmra.mxu0 %v4307_v23  ;;  %4558 = vmatmul.f32.gmra.mxu1 %v4308_v32 }
 0x694   : > { %v10769_v4 = vadd.f32 %v4512_v49, %v10513_v33  ;;  %5324 = vperm.xlu2 %8364, %v8418_v0   ;;  %v5587_v49 = vld [vmem:[#allocation3 + $0x340] sm:$0xff] }
 0x695   : > { %5618 = vmatpush.msrb.mxu2 %v5587_v49  ;;  %v4952_v0 = vld [vmem:[#allocation9 + $0x580] sm:$0xff] }
 0x696   : > { %4688 = vmatmul.f32.gmra.mxu2 %v10769_v4  ;;  %4801 = vmatmul.f32.gmra.mxu3 %v10769_v4 }
 0x697   : > { %5096 = vmatpush.msra.mxu1 %v4952_v0 }
 0x698   : > { %v4126_v6 = vpop.f32.mrf.mxu2  ;;  %v4239_v1 = vpop.f32.mrf.mxu3 }
 0x699   : > { %v4309_v30 = vmax.f32 %v4126_v6, 0.0  ;;  %v4310_v41 = vmax.f32 %v4239_v1, 0.0  ;;  %v4401_v23 = vpop.f32.mrf.mxu0  ;;  %v4514_v33 = vpop.f32.mrf.mxu1  ;;  %v8419_v6 = vld [vmem:[%s8798_s18 + $0x90] sm:$0xff]  ;;  %v8420_v1 = vld [vmem:[%s8798_s18 + $0x80] sm:$0xff] }
 0x69a   : > { %v4515_v32 = vadd.f32 %v4514_v33, %v4401_v23  ;;  %5345 = vperm.xlu0 %8365, %v8419_v6   ;;  %5339 = vperm.xlu1 %8366, %v8420_v1   ;;  %v8421_v23 = vld [vmem:[%s8798_s18 + $0x70] sm:$0xff] }
 0x69b   : > { %4448 = vmatmul.f32.gmra.mxu0 %v4309_v30  ;;  %4561 = vmatmul.f32.gmra.mxu1 %v4310_v41 }
 0x69c   : > { %v10777_v34 = vadd.f32 %v4515_v32, %v10530_v55  ;;  %5333 = vperm.xlu2 %8364, %v8421_v23   ;;  %v4936_v32 = vld [vmem:[#allocation9 + $0x500] sm:$0xff]  ;;  %v5602_v23 = vld [vmem:[#allocation3 + $0x3b8] sm:$0xff] }
 0x69d   : > { %4983 = vmatpush.msra.mxu0 %v4936_v32  ;;  %5732 = vmatpush.msrb.mxu3 %v5602_v23 }
 0x69e   : > { %4691 = vmatmul.f32.gmra.mxu2 %v10777_v34  ;;  %4804 = vmatmul.f32.gmra.mxu3 %v10777_v34 }
 0x6a0   : > { %v4129_v14 = vpop.f32.mrf.mxu2  ;;  %v4242_v5 = vpop.f32.mrf.mxu3 }
 0x6a1   : > { %v4311_v8 = vmax.f32 %v4129_v14, 0.0  ;;  %v4312_v61 = vmax.f32 %v4242_v5, 0.0  ;;  %v4404_v30 = vpop.f32.mrf.mxu0  ;;  %v4517_v55 = vpop.f32.mrf.mxu1  ;;  %v8422_v14 = vld [vmem:[%s8798_s18 + $0xa8] sm:$0xff]  ;;  %v8423_v5 = vld [vmem:[%s8798_s18 + $0x98] sm:$0xff] }
 0x6a2   : > { %v4518_v41 = vadd.f32 %v4517_v55, %v4404_v30  ;;  %5354 = vperm.xlu0 %8365, %v8422_v14   ;;  %5348 = vperm.xlu1 %8366, %v8423_v5   ;;  %v8424_v30 = vld [vmem:[%s8798_s18 + $0x88] sm:$0xff] }
 0x6a3   : > { %4451 = vmatmul.f32.gmra.mxu0 %v4311_v8  ;;  %4564 = vmatmul.f32.gmra.mxu1 %v4312_v61 }
 0x6a4   : > { %v10785_v33 = vadd.f32 %v4518_v41, %v10547_v36  ;;  %5342 = vperm.xlu2 %8364, %v8424_v30   ;;  %v5586_v41 = vld [vmem:[#allocation3 + $0x338] sm:$0xff] }
 0x6a5   : > { %5619 = vmatpush.msrb.mxu2 %v5586_v41  ;;  %v5869_v30 = vld [vmem:[#allocation6 + $0x3f8] sm:$0xff] }
 0x6a6   : > { %4694 = vmatmul.f32.gmra.mxu2 %v10785_v33  ;;  %4807 = vmatmul.f32.gmra.mxu3 %v10785_v33 }
 0x6a7   : > { %5983 = vmatpush.msrb.mxu1 %v5869_v30 }
 0x6a8   : > { %v4132_v49 = vpop.f32.mrf.mxu2  ;;  %v4245_v45 = vpop.f32.mrf.mxu3 }
 0x6a9   : > { %v4313_v6 = vmax.f32 %v4132_v49, 0.0  ;;  %v4314_v1 = vmax.f32 %v4245_v45, 0.0  ;;  %v4407_v8 = vpop.f32.mrf.mxu0  ;;  %v4520_v36 = vpop.f32.mrf.mxu1  ;;  %v8425_v49 = vld [vmem:[%s8798_s18 + $0xc0] sm:$0xff]  ;;  %v8426_v45 = vld [vmem:[%s8798_s18 + $0xb0] sm:$0xff] }
 0x6aa   : > { %v4521_v61 = vadd.f32 %v4520_v36, %v4407_v8  ;;  %5363 = vperm.xlu0 %8365, %v8425_v49   ;;  %5357 = vperm.xlu1 %8366, %v8426_v45   ;;  %v8427_v8 = vld [vmem:[%s8798_s18 + $0xa0] sm:$0xff] }
 0x6ab   : > { %4454 = vmatmul.f32.gmra.mxu0 %v4313_v6  ;;  %4567 = vmatmul.f32.gmra.mxu1 %v4314_v1 }
 0x6ac   : > { %v10793_v55 = vadd.f32 %v4521_v61, %v10564_v21  ;;  %5351 = vperm.xlu2 %8364, %v8427_v8   ;;  %v5853_v61 = vld [vmem:[#allocation6 + $0x378] sm:$0xff]  ;;  %v5601_v8 = vld [vmem:[#allocation3 + $0x3b0] sm:$0xff] }
 0x6ad   : > { %5870 = vmatpush.msrb.mxu0 %v5853_v61  ;;  %5733 = vmatpush.msrb.mxu3 %v5601_v8 }
 0x6ae   : > { %12531 = vst [vmem:[#allocation24_spill] sm:$0xff] %v10793_v55  ;;  %4697 = vmatmul.f32.gmra.mxu2 %v10793_v55  ;;  %4810 = vmatmul.f32.gmra.mxu3 %v10793_v55 }
 0x6b0   : > { %v4135_v32 = vpop.f32.mrf.mxu2  ;;  %v4248_v0 = vpop.f32.mrf.mxu3 }
 0x6b1   : > { %v4315_v14 = vmax.f32 %v4135_v32, 0.0  ;;  %v4316_v5 = vmax.f32 %v4248_v0, 0.0  ;;  %v4410_v6 = vpop.f32.mrf.mxu0  ;;  %v4523_v21 = vpop.f32.mrf.mxu1  ;;  %v8428_v32 = vld [vmem:[%s8798_s18 + $0xd8] sm:$0xff]  ;;  %v8429_v0 = vld [vmem:[%s8798_s18 + $0xc8] sm:$0xff] }
 0x6b2   : > { %v4524_v1 = vadd.f32 %v4523_v21, %v4410_v6  ;;  %5372 = vperm.xlu0 %8365, %v8428_v32   ;;  %5366 = vperm.xlu1 %8366, %v8429_v0   ;;  %v8430_v6 = vld [vmem:[%s8798_s18 + $0xb8] sm:$0xff] }
 0x6b3   : > { %4457 = vmatmul.f32.gmra.mxu0 %v4315_v14  ;;  %4570 = vmatmul.f32.gmra.mxu1 %v4316_v5 }
 0x6b4   : > { %v10801_v36 = vadd.f32 %v4524_v1, %v10581_v51  ;;  %5360 = vperm.xlu2 %8364, %v8430_v6   ;;  %v5585_v1 = vld [vmem:[#allocation3 + $0x330] sm:$0xff] }
 0x6b5   : > { %5620 = vmatpush.msrb.mxu2 %v5585_v1  ;;  %v5868_v6 = vld [vmem:[#allocation6 + $0x3f0] sm:$0xff]  ;;  %v8434_v1 = vld [vmem:[%s8798_s18 + $0xf8] sm:$0xff] }
 0x6b6   : > { %12532 = vst [vmem:[#allocation59_spill] sm:$0xff] %v10801_v36  ;;  %4700 = vmatmul.f32.gmra.mxu2 %v10801_v36  ;;  %4813 = vmatmul.f32.gmra.mxu3 %v10801_v36 }
 0x6b7   : > { %5984 = vmatpush.msrb.mxu1 %v5868_v6 }
 0x6b8   : > { %v4138_v41 = vpop.f32.mrf.mxu2  ;;  %v4251_v23 = vpop.f32.mrf.mxu3 }
 0x6b9   : > { %v4317_v49 = vmax.f32 %v4138_v41, 0.0  ;;  %v4318_v45 = vmax.f32 %v4251_v23, 0.0  ;;  %v4413_v14 = vpop.f32.mrf.mxu0  ;;  %v4526_v51 = vpop.f32.mrf.mxu1  ;;  %v8431_v41 = vld [vmem:[%s8798_s18 + $0xf0] sm:$0xff]  ;;  %v8432_v23 = vld [vmem:[%s8798_s18 + $0xe0] sm:$0xff] }
 0x6ba   : > { %v4527_v5 = vadd.f32 %v4526_v51, %v4413_v14  ;;  %5381 = vperm.xlu0 %8365, %v8431_v41   ;;  %5375 = vperm.xlu1 %8366, %v8432_v23   ;;  %v8433_v14 = vld [vmem:[%s8798_s18 + $0xd0] sm:$0xff]  ;;  %v8435_v41 = vld [vmem:[%s8798_s18 + $0xe8] sm:$0xff] }
 0x6bb   : > { %4460 = vmatmul.f32.gmra.mxu0 %v4317_v49  ;;  %4573 = vmatmul.f32.gmra.mxu1 %v4318_v45 }
 0x6bc   : > { %v10809_v21 = vadd.f32 %v4527_v5, %v10598_v63  ;;  %5369 = vperm.xlu2 %8364, %v8433_v14   ;;  %v5852_v5 = vld [vmem:[#allocation6 + $0x370] sm:$0xff] }
 0x6bd   : > { %5871 = vmatpush.msrb.mxu0 %v5852_v5 }
 0x6be   : > { %12533 = vst [vmem:[#allocation80_spill] sm:$0xff] %v10809_v21  ;;  %4703 = vmatmul.f32.gmra.mxu2 %v10809_v21  ;;  %4816 = vmatmul.f32.gmra.mxu3 %v10809_v21 }
 0x6c0   : > { %v4141_v61 = vpop.f32.mrf.mxu2  ;;  %v4254_v30 = vpop.f32.mrf.mxu3 }
 0x6c1   : > { %v4319_v32 = vmax.f32 %v4141_v61, 0.0  ;;  %v4320_v0 = vmax.f32 %v4254_v30, 0.0  ;;  %v4416_v63 = vpop.f32.mrf.mxu0  ;;  %v4529_v49 = vpop.f32.mrf.mxu1 }
 0x6c2   : > { %v4530_v45 = vadd.f32 %v4529_v49, %v4416_v63  ;;  %5384 = vperm.xlu1 %8366, %v8434_v1  }
 0x6c3   : > { %4463 = vmatmul.f32.gmra.mxu0 %v4319_v32  ;;  %4576 = vmatmul.f32.gmra.mxu1 %v4320_v0  ;;  %v5600_v32 = vld [vmem:[#allocation3 + $0x3a8] sm:$0xff] }
 0x6c4   : > { %v10817_v51 = vadd.f32 %v4530_v45, %v10612_v31  ;;  %5378 = vperm.xlu2 %8364, %v8435_v41   ;;  %v5584_v31 = vld [vmem:[#allocation3 + $0x328] sm:$0xff]  ;;  %5734 = vmatpush.msrb.mxu3 %v5600_v32 }
 0x6c5   : > { %5621 = vmatpush.msrb.mxu2 %v5584_v31 }
 0x6c6   : > { %12534 = vst [vmem:[#allocation25_spill] sm:$0xff] %v10817_v51  ;;  %4706 = vmatmul.f32.gmra.mxu2 %v10817_v51  ;;  %4819 = vmatmul.f32.gmra.mxu3 %v10817_v51 }
 0x6c9   : > { %v4419_v8 = vpop.f32.mrf.mxu0  ;;  %v4532_v61 = vpop.f32.mrf.mxu1 }
 0x6ca   : > { %v4533_v30 = vadd.f32 %v4532_v61, %v4419_v8  ;;  %v5867_v8 = vld [vmem:[#allocation6 + $0x3e8] sm:$0xff] }
 0x6cb   : > { %5985 = vmatpush.msrb.mxu1 %v5867_v8 }
 0x6cc   : > { %v10824_v23 = vadd.f32 %v4533_v30, %v10618_v37  ;;  %v5851_v37 = vld [vmem:[#allocation6 + $0x368] sm:$0xff] }
 0x6cd   : > { %5872 = vmatpush.msrb.mxu0 %v5851_v37 }
 0x6ce   : > { %12535 = vst [vmem:[#allocation60_spill] sm:$0xff] %v10824_v23  ;;  %4709 = vmatmul.f32.gmra.mxu2 %v10824_v23  ;;  %4822 = vmatmul.f32.gmra.mxu3 %v10824_v23 }
 0x6d1   : > { %v4422_v0 = vpop.f32.mrf.mxu0  ;;  %v4535_v63 = vpop.f32.mrf.mxu1 }
 0x6d2   : > { %v4536_v49 = vadd.f32 %v4535_v63, %v4422_v0  ;;  %v4662_v45 = vpop.f32.mrf.mxu2  ;;  %v4775_v14 = vpop.f32.mrf.mxu3 }
 0x6d3   : > { %v4871_v5 = vmax.f32 %v4662_v45, 0.0  ;;  %v4872_v6 = vmax.f32 %v4775_v14, 0.0  ;;  %v5599_v45 = vld [vmem:[#allocation3 + $0x3a0] sm:$0xff] }
 0x6d4   : > { %v10829_v1 = vadd.f32 %v4536_v49, %v10624_v26  ;;  %v5583_v49 = vld [vmem:[#allocation3 + $0x320] sm:$0xff]  ;;  %5735 = vmatpush.msrb.mxu3 %v5599_v45 }
 0x6d5   : > { %4984 = vmatmul.f32.vlgmr.msra.gmra.mxu0 %v4871_v5  ;;  %5097 = vmatmul.f32.vlgmr.msra.gmra.mxu1 %v4872_v6 }
 0x6d6   : > { %12536 = vst [vmem:[#allocation81_spill] sm:$0xff] %v10829_v1  ;;  %4712 = vmatmul.f32.gmra.mxu2 %v10829_v1  ;;  %4825 = vmatmul.f32.gmra.mxu3 %v10829_v1 }
 0x6d7   : > { %5622 = vmatpush.msrb.mxu2 %v5583_v49 }
 0x6d9   : > { %v4425_v61 = vpop.f32.mrf.mxu0  ;;  %v4538_v30 = vpop.f32.mrf.mxu1 }
 0x6da   : > { %v4539_v41 = vadd.f32 %v4538_v30, %v4425_v61  ;;  %v4665_v31 = vpop.f32.mrf.mxu2  ;;  %v4778_v32 = vpop.f32.mrf.mxu3 }
 0x6db   : > { %v4873_v0 = vmax.f32 %v4665_v31, 0.0  ;;  %v4874_v63 = vmax.f32 %v4778_v32, 0.0  ;;  %v5866_v31 = vld [vmem:[#allocation6 + $0x3e0] sm:$0xff] }
 0x6dc   : > { %v10834_v26 = vadd.f32 %v4539_v41, %v10630_v17  ;;  %v5850_v41 = vld [vmem:[#allocation6 + $0x360] sm:$0xff]  ;;  %5986 = vmatpush.msrb.mxu1 %v5866_v31 }
 0x6dd   : > { %4987 = vmatmul.f32.gmra.mxu0 %v4873_v0  ;;  %5100 = vmatmul.f32.gmra.mxu1 %v4874_v63 }
 0x6de   : > { %12537 = vst [vmem:[#allocation26_spill] sm:$0xff] %v10834_v26  ;;  %4715 = vmatmul.f32.gmra.mxu2 %v10834_v26  ;;  %4828 = vmatmul.f32.gmra.mxu3 %v10834_v26 }
 0x6df   : > { %5873 = vmatpush.msrb.mxu0 %v5850_v41 }
 0x6e1   : > { %v4428_v14 = vpop.f32.mrf.mxu0  ;;  %v4541_v5 = vpop.f32.mrf.mxu1 }
 0x6e2   : > { %v4542_v6 = vadd.f32 %v4541_v5, %v4428_v14  ;;  %v4668_v37 = vpop.f32.mrf.mxu2  ;;  %v4781_v8 = vpop.f32.mrf.mxu3 }
 0x6e3   : > { %v4875_v61 = vmax.f32 %v4668_v37, 0.0  ;;  %v4876_v30 = vmax.f32 %v4781_v8, 0.0  ;;  %v5598_v37 = vld [vmem:[#allocation3 + $0x398] sm:$0xff] }
 0x6e4   : > { %v10839_v17 = vadd.f32 %v4542_v6, %v10636_v57  ;;  %v5582_v6 = vld [vmem:[#allocation3 + $0x318] sm:$0xff]  ;;  %5736 = vmatpush.msrb.mxu3 %v5598_v37 }
 0x6e5   : > { %4990 = vmatmul.f32.gmra.mxu0 %v4875_v61  ;;  %5103 = vmatmul.f32.gmra.mxu1 %v4876_v30 }
 0x6e6   : > { %12538 = vst [vmem:[#allocation61_spill] sm:$0xff] %v10839_v17  ;;  %4718 = vmatmul.f32.gmra.mxu2 %v10839_v17  ;;  %4831 = vmatmul.f32.gmra.mxu3 %v10839_v17 }
 0x6e7   : > { %5623 = vmatpush.msrb.mxu2 %v5582_v6 }
 0x6e9   : > { %v4431_v32 = vpop.f32.mrf.mxu0  ;;  %v4544_v0 = vpop.f32.mrf.mxu1 }
 0x6ea   : > { %v4545_v63 = vadd.f32 %v4544_v0, %v4431_v32  ;;  %v4671_v49 = vpop.f32.mrf.mxu2  ;;  %v4784_v45 = vpop.f32.mrf.mxu3 }
 0x6eb   : > { %v4877_v14 = vmax.f32 %v4671_v49, 0.0  ;;  %v4878_v5 = vmax.f32 %v4784_v45, 0.0  ;;  %v5865_v49 = vld [vmem:[#allocation6 + $0x3d8] sm:$0xff] }
 0x6ec   : > { %v10844_v57 = vadd.f32 %v4545_v63, %v10642_v11  ;;  %v5849_v63 = vld [vmem:[#allocation6 + $0x358] sm:$0xff]  ;;  %5987 = vmatpush.msrb.mxu1 %v5865_v49 }
 0x6ed   : > { %4993 = vmatmul.f32.gmra.mxu0 %v4877_v14  ;;  %5106 = vmatmul.f32.gmra.mxu1 %v4878_v5 }
 0x6ee   : > { %12539 = vst [vmem:[#allocation82_spill] sm:$0xff] %v10844_v57  ;;  %4721 = vmatmul.f32.gmra.mxu2 %v10844_v57  ;;  %4834 = vmatmul.f32.gmra.mxu3 %v10844_v57 }
 0x6ef   : > { %5874 = vmatpush.msrb.mxu0 %v5849_v63 }
 0x6f1   : > { %v4434_v8 = vpop.f32.mrf.mxu0  ;;  %v4547_v61 = vpop.f32.mrf.mxu1 }
 0x6f2   : > { %v4548_v30 = vadd.f32 %v4547_v61, %v4434_v8  ;;  %v4674_v41 = vpop.f32.mrf.mxu2  ;;  %v4787_v31 = vpop.f32.mrf.mxu3 }
 0x6f3   : > { %v4879_v32 = vmax.f32 %v4674_v41, 0.0  ;;  %v4880_v0 = vmax.f32 %v4787_v31, 0.0  ;;  %v5597_v41 = vld [vmem:[#allocation3 + $0x390] sm:$0xff] }
 0x6f4   : > { %v10849_v11 = vadd.f32 %v4548_v30, %v10648_v15  ;;  %v5581_v30 = vld [vmem:[#allocation3 + $0x310] sm:$0xff]  ;;  %5737 = vmatpush.msrb.mxu3 %v5597_v41 }
 0x6f5   : > { %4996 = vmatmul.f32.gmra.mxu0 %v4879_v32  ;;  %5109 = vmatmul.f32.gmra.mxu1 %v4880_v0 }
 0x6f6   : > { %12540 = vst [vmem:[#allocation27_spill] sm:$0xff] %v10849_v11  ;;  %4724 = vmatmul.f32.gmra.mxu2 %v10849_v11  ;;  %4837 = vmatmul.f32.gmra.mxu3 %v10849_v11 }
 0x6f7   : > { %5624 = vmatpush.msrb.mxu2 %v5581_v30 }
 0x6f9   : > { %v4437_v45 = vpop.f32.mrf.mxu0  ;;  %v4550_v14 = vpop.f32.mrf.mxu1 }
 0x6fa   : > { %v4551_v5 = vadd.f32 %v4550_v14, %v4437_v45  ;;  %v4677_v6 = vpop.f32.mrf.mxu2  ;;  %v4790_v37 = vpop.f32.mrf.mxu3 }
 0x6fb   : > { %v4881_v8 = vmax.f32 %v4677_v6, 0.0  ;;  %v4882_v61 = vmax.f32 %v4790_v37, 0.0  ;;  %v5864_v6 = vld [vmem:[#allocation6 + $0x3d0] sm:$0xff] }
 0x6fc   : > { %v10854_v15 = vadd.f32 %v4551_v5, %v10654_v22  ;;  %v5848_v5 = vld [vmem:[#allocation6 + $0x350] sm:$0xff]  ;;  %5988 = vmatpush.msrb.mxu1 %v5864_v6 }
 0x6fd   : > { %4999 = vmatmul.f32.gmra.mxu0 %v4881_v8  ;;  %5112 = vmatmul.f32.gmra.mxu1 %v4882_v61 }
 0x6fe   : > { %12541 = vst [vmem:[#allocation62_spill] sm:$0xff] %v10854_v15  ;;  %4727 = vmatmul.f32.gmra.mxu2 %v10854_v15  ;;  %4840 = vmatmul.f32.gmra.mxu3 %v10854_v15 }
 0x6ff   : > { %5875 = vmatpush.msrb.mxu0 %v5848_v5 }
 0x701   : > { %v4440_v31 = vpop.f32.mrf.mxu0  ;;  %v4553_v32 = vpop.f32.mrf.mxu1 }
 0x702   : > { %v4554_v0 = vadd.f32 %v4553_v32, %v4440_v31  ;;  %v4680_v63 = vpop.f32.mrf.mxu2  ;;  %v4793_v49 = vpop.f32.mrf.mxu3 }
 0x703   : > { %v4883_v45 = vmax.f32 %v4680_v63, 0.0  ;;  %v4884_v14 = vmax.f32 %v4793_v49, 0.0  ;;  %v5596_v63 = vld [vmem:[#allocation3 + $0x388] sm:$0xff] }
 0x704   : > { %v10859_v22 = vadd.f32 %v4554_v0, %v10660_v58  ;;  %v5580_v0 = vld [vmem:[#allocation3 + $0x308] sm:$0xff]  ;;  %5738 = vmatpush.msrb.mxu3 %v5596_v63 }
 0x705   : > { %5002 = vmatmul.f32.gmra.mxu0 %v4883_v45  ;;  %5115 = vmatmul.f32.gmra.mxu1 %v4884_v14 }
 0x706   : > { %12542 = vst [vmem:[#allocation83_spill] sm:$0xff] %v10859_v22  ;;  %4730 = vmatmul.f32.gmra.mxu2 %v10859_v22  ;;  %4843 = vmatmul.f32.gmra.mxu3 %v10859_v22 }
 0x707   : > { %5625 = vmatpush.msrb.mxu2 %v5580_v0 }
 0x709   : > { %v4443_v37 = vpop.f32.mrf.mxu0  ;;  %v4556_v8 = vpop.f32.mrf.mxu1 }
 0x70a   : > { %v4557_v61 = vadd.f32 %v4556_v8, %v4443_v37  ;;  %v4683_v30 = vpop.f32.mrf.mxu2  ;;  %v4796_v41 = vpop.f32.mrf.mxu3 }
 0x70b   : > { %v4885_v31 = vmax.f32 %v4683_v30, 0.0  ;;  %v4886_v32 = vmax.f32 %v4796_v41, 0.0  ;;  %v5863_v30 = vld [vmem:[#allocation6 + $0x3c8] sm:$0xff] }
 0x70c   : > { %v10864_v58 = vadd.f32 %v4557_v61, %v10666_v12  ;;  %v5847_v61 = vld [vmem:[#allocation6 + $0x348] sm:$0xff]  ;;  %5989 = vmatpush.msrb.mxu1 %v5863_v30 }
 0x70d   : > { %5005 = vmatmul.f32.gmra.mxu0 %v4885_v31  ;;  %5118 = vmatmul.f32.gmra.mxu1 %v4886_v32 }
 0x70e   : > { %12543 = vst [vmem:[#allocation28_spill] sm:$0xff] %v10864_v58  ;;  %4733 = vmatmul.f32.gmra.mxu2 %v10864_v58  ;;  %4846 = vmatmul.f32.gmra.mxu3 %v10864_v58 }
 0x70f   : > { %5876 = vmatpush.msrb.mxu0 %v5847_v61 }
 0x711   : > { %v4446_v49 = vpop.f32.mrf.mxu0  ;;  %v4559_v45 = vpop.f32.mrf.mxu1 }
 0x712   : > { %v4560_v14 = vadd.f32 %v4559_v45, %v4446_v49  ;;  %v4686_v5 = vpop.f32.mrf.mxu2  ;;  %v4799_v6 = vpop.f32.mrf.mxu3 }
 0x713   : > { %v4887_v37 = vmax.f32 %v4686_v5, 0.0  ;;  %v4888_v8 = vmax.f32 %v4799_v6, 0.0  ;;  %v5595_v5 = vld [vmem:[#allocation3 + $0x380] sm:$0xff] }
 0x714   : > { %v10869_v12 = vadd.f32 %v4560_v14, %v10672_v39  ;;  %v5579_v14 = vld [vmem:[#allocation3 + $0x300] sm:$0xff]  ;;  %5739 = vmatpush.msrb.mxu3 %v5595_v5 }
 0x715   : > { %5008 = vmatmul.f32.gmra.mxu0 %v4887_v37  ;;  %5121 = vmatmul.f32.gmra.mxu1 %v4888_v8 }
 0x716   : > { %12544 = vst [vmem:[#allocation63_spill] sm:$0xff] %v10869_v12  ;;  %4736 = vmatmul.f32.gmra.mxu2 %v10869_v12  ;;  %4849 = vmatmul.f32.gmra.mxu3 %v10869_v12 }
 0x717   : > { %5626 = vmatpush.msrb.mxu2 %v5579_v14 }
 0x719   : > { %v4449_v41 = vpop.f32.mrf.mxu0  ;;  %v4562_v31 = vpop.f32.mrf.mxu1 }
 0x71a   : > { %v4563_v32 = vadd.f32 %v4562_v31, %v4449_v41  ;;  %v4689_v0 = vpop.f32.mrf.mxu2  ;;  %v4802_v63 = vpop.f32.mrf.mxu3 }
 0x71b   : > { %v4889_v49 = vmax.f32 %v4689_v0, 0.0  ;;  %v4890_v45 = vmax.f32 %v4802_v63, 0.0  ;;  %v5862_v0 = vld [vmem:[#allocation6 + $0x3c0] sm:$0xff] }
 0x71c   : > { %v10874_v39 = vadd.f32 %v4563_v32, %v10678_v27  ;;  %v5846_v32 = vld [vmem:[#allocation6 + $0x340] sm:$0xff]  ;;  %5990 = vmatpush.msrb.mxu1 %v5862_v0 }
 0x71d   : > { %5011 = vmatmul.f32.gmra.mxu0 %v4889_v49  ;;  %5124 = vmatmul.f32.gmra.mxu1 %v4890_v45 }
 0x71e   : > { %12545 = vst [vmem:[#allocation84_spill] sm:$0xff] %v10874_v39  ;;  %4739 = vmatmul.f32.gmra.mxu2 %v10874_v39  ;;  %4852 = vmatmul.f32.gmra.mxu3 %v10874_v39 }
 0x71f   : > { %5877 = vmatpush.msrb.mxu0 %v5846_v32 }
 0x721   : > { %v4452_v6 = vpop.f32.mrf.mxu0  ;;  %v4565_v37 = vpop.f32.mrf.mxu1 }
 0x722   : > { %v4566_v8 = vadd.f32 %v4565_v37, %v4452_v6  ;;  %v4692_v61 = vpop.f32.mrf.mxu2  ;;  %v4805_v30 = vpop.f32.mrf.mxu3 }
 0x723   : > { %v4891_v41 = vmax.f32 %v4692_v61, 0.0  ;;  %v4892_v31 = vmax.f32 %v4805_v30, 0.0 }
 0x724   : > { %v10879_v27 = vadd.f32 %v4566_v8, %v10684_v52 }
 0x725   : > { %5014 = vmatmul.f32.gmra.mxu0 %v4891_v41  ;;  %5127 = vmatmul.f32.gmra.mxu1 %v4892_v31 }
 0x726   : > { %12546 = vst [vmem:[#allocation29_spill] sm:$0xff] %v10879_v27  ;;  %4742 = vmatmul.f32.gmra.mxu2 %v10879_v27  ;;  %4855 = vmatmul.f32.gmra.mxu3 %v10879_v27 }
 0x729   : > { %v4455_v63 = vpop.f32.mrf.mxu0  ;;  %v4568_v49 = vpop.f32.mrf.mxu1 }
 0x72a   : > { %v4569_v45 = vadd.f32 %v4568_v49, %v4455_v63  ;;  %v4695_v14 = vpop.f32.mrf.mxu2  ;;  %v4808_v5 = vpop.f32.mrf.mxu3  ;;  %v5861_v49 = vld [vmem:[#allocation6 + $0x3b8] sm:$0xff] }
 0x72b   : > { %v4893_v6 = vmax.f32 %v4695_v14, 0.0  ;;  %v4894_v37 = vmax.f32 %v4808_v5, 0.0  ;;  %5991 = vmatpush.msrb.mxu1 %v5861_v49 }
 0x72c   : > { %v10884_v52 = vadd.f32 %v4569_v45, %v10692_v46  ;;  %v5845_v46 = vld [vmem:[#allocation6 + $0x338] sm:$0xff]  ;;  %v6196_v45 = vld [vmem:[#allocation8 + $0x6f0] sm:$0xff] }
 0x72d   : > { %5017 = vmatmul.f32.gmra.mxu0 %v4893_v6  ;;  %5130 = vmatmul.f32.gmra.mxu1 %v4894_v37  ;;  %v6197_v6 = vld [vmem:[#allocation8 + $0x6f8] sm:$0xff] }
 0x72e   : > { %12547 = vst [vmem:[#allocation64_spill] sm:$0xff] %v10884_v52  ;;  %4745 = vmatmul.f32.gmra.mxu2 %v10884_v52  ;;  %4858 = vmatmul.f32.gmra.mxu3 %v10884_v52 }
 0x72f   : > { %5878 = vmatpush.msrb.mxu0 %v5845_v46  ;;  %6198 = vmatpush.msra.mxu2 %v6196_v45 }
 0x730   : > { %6311 = vmatpush.msra.mxu3 %v6197_v6  ;;  %v5860_v6 = vld [vmem:[#allocation6 + $0x3b0] sm:$0xff] }
 0x731   : > { %v4458_v8 = vpop.f32.mrf.mxu0  ;;  %v4571_v61 = vpop.f32.mrf.mxu1  ;;  %5992 = vmatpush.msrb.mxu1 %v5860_v6 }
 0x732   : > { %v4572_v30 = vadd.f32 %v4571_v61, %v4458_v8  ;;  %v4698_v41 = vpop.f32.mrf.mxu2  ;;  %v4811_v31 = vpop.f32.mrf.mxu3 }
 0x733   : > { %v4895_v32 = vmax.f32 %v4698_v41, 0.0  ;;  %v4896_v0 = vmax.f32 %v4811_v31, 0.0 }
 0x734   : > { %v10889_v63 = vadd.f32 %v4572_v30, %v10697_v3 }
 0x735   : > { %5020 = vmatmul.f32.gmra.mxu0 %v4895_v32  ;;  %5133 = vmatmul.f32.gmra.mxu1 %v4896_v0 }
 0x736   : > { %12548 = vst [vmem:[#allocation85_spill] sm:$0xff] %v10889_v63  ;;  %4748 = vmatmul.f32.gmra.mxu2 %v10889_v63  ;;  %4861 = vmatmul.f32.gmra.mxu3 %v10889_v63 }
 0x739   : > { %v4461_v14 = vpop.f32.mrf.mxu0  ;;  %v4574_v5 = vpop.f32.mrf.mxu1 }
 0x73a   : > { %v4575_v37 = vadd.f32 %v4574_v5, %v4461_v14  ;;  %v4701_v8 = vpop.f32.mrf.mxu2  ;;  %v4814_v61 = vpop.f32.mrf.mxu3 }
 0x73b   : > { %v4897_v3 = vmax.f32 %v4701_v8, 0.0  ;;  %v4898_v30 = vmax.f32 %v4814_v61, 0.0  ;;  %v6195_v8 = vld [vmem:[#allocation8 + $0x6e8] sm:$0xff]  ;;  %v5292_v61 = vpop.permute.xlu2 %5291 }
 0x73c   : > { %v10894_v41 = vadd.f32 %v4575_v37, %v10702_v42  ;;  %v5844_v42 = vld [vmem:[#allocation6 + $0x330] sm:$0xff]  ;;  %v6194_v37 = vld [vmem:[#allocation8 + $0x6e0] sm:$0xff]  ;;  %6312 = vmatpush.msra.mxu3 %v6195_v8  ;;  %vm5386_vm0 = vcmp.eq.s32.totalorder %v5292_v61, %v8895_v25  ;;  %v5843_v8 = vld [vmem:[#allocation6 + $0x328] sm:$0xff] }
 0x73d   : > { %5023 = vmatmul.f32.gmra.mxu0 %v4897_v3  ;;  %5136 = vmatmul.f32.gmra.mxu1 %v4898_v30 }
 0x73e   : > { %12549 = vst [vmem:[#allocation30_spill] sm:$0xff] %v10894_v41  ;;  %4751 = vmatmul.f32.gmra.mxu2 %v10894_v41  ;;  %4864 = vmatmul.f32.gmra.mxu3 %v10894_v41 }
 0x73f   : > { %5879 = vmatpush.msrb.mxu0 %v5844_v42  ;;  %6199 = vmatpush.msra.mxu2 %v6194_v37 }
 0x741   : > { %v4464_v31 = vpop.f32.mrf.mxu0  ;;  %v4577_v32 = vpop.f32.mrf.mxu1  ;;  %5880 = vmatpush.msrb.mxu0 %v5843_v8 }
 0x742   : > { %v4578_v0 = vadd.f32 %v4577_v32, %v4464_v31  ;;  %v4704_v46 = vpop.f32.mrf.mxu2  ;;  %v4817_v49 = vpop.f32.mrf.mxu3 }
 0x743   : > { %v4899_v14 = vmax.f32 %v4704_v46, 0.0  ;;  %v4900_v5 = vmax.f32 %v4817_v49, 0.0  ;;  %v5295_v46 = vpop.permute.xlu0 %5294 }
 0x744   : > { %v10899_v45 = vadd.f32 %v4578_v0, %v10707_v24  ;;  %v12551_v24 = vld [vmem:[#allocation18_spill] sm:$0xff]  ;;  %v12552_v0 = vmov 1.0   ;;  %vm5388_vm2 = vcmp.eq.s32.totalorder %v5295_v46, %v8895_v25 }
 0x745   : > { %5026 = vmatmul.f32.gmra.mxu0 %v4899_v14  ;;  %5139 = vmatmul.f32.gmra.mxu1 %v4900_v5  ;;  %vm5387_vm1 = vcmp.eq.s32.totalorder %v5292_v61, %v12551_v24  ;;  %vm5389_vm3 = vcmp.eq.s32.totalorder %v5295_v46, %v12551_v24  ;;  %v5859_v61 = vld [vmem:[#allocation6 + $0x3a8] sm:$0xff] }
 0x746   : > { %12550 = vst [vmem:[#allocation65_spill] sm:$0xff] %v10899_v45  ;;  %4754 = vmatmul.f32.gmra.mxu2 %v10899_v45  ;;  %4867 = vmatmul.f32.gmra.mxu3 %v10899_v45 }
 0x747   : > { %5993 = vmatpush.msrb.mxu1 %v5859_v61 }
 0x74a   : > { %v4707_v3 = vpop.f32.mrf.mxu2  ;;  %v4820_v30 = vpop.f32.mrf.mxu3 }
 0x74b   : > { %v4901_v31 = vmax.f32 %v4707_v3, 0.0  ;;  %v4902_v32 = vmax.f32 %v4820_v30, 0.0  ;;  %v6192_v3 = vld [vmem:[#allocation8 + $0x6d0] sm:$0xff]  ;;  %v6193_v30 = vld [vmem:[#allocation8 + $0x6d8] sm:$0xff] }
 0x74c   : > { %6200 = vmatpush.msra.mxu2 %v6192_v3  ;;  %6313 = vmatpush.msra.mxu3 %v6193_v30 }
 0x74d   : > { %5029 = vmatmul.f32.gmra.mxu0 %v4901_v31  ;;  %5142 = vmatmul.f32.gmra.mxu1 %v4902_v32  ;;  %v5298_v31 = vpop.permute.xlu1 %5297 }
 0x74e   : > { %8143 = vmatmul.msk.f32.vlgmr.msrb.gmra.mxu2 %vm5386_vm0, %v12552_v0  ;;  %8175 = vmatmul.msk.f32.vlgmr.msrb.gmra.mxu3 %vm5387_vm1, %v12552_v0  ;;  %vm5390_vm4 = vcmp.eq.s32.totalorder %v5298_v31, %v8895_v25  ;;  %vm5391_vm5 = vcmp.eq.s32.totalorder %v5298_v31, %v12551_v24  ;;  %v5301_v31 = vpop.permute.xlu2 %5300 }
 0x74f   : > { %vm5392_vm6 = vcmp.eq.s32.totalorder %v5301_v31, %v8895_v25  ;;  %vm5393_vm7 = vcmp.eq.s32.totalorder %v5301_v31, %v12551_v24 }
 0x752   : > { %v4710_v49 = vpop.f32.mrf.mxu2  ;;  %v4823_v14 = vpop.f32.mrf.mxu3 }
 0x753   : > { %v4903_v5 = vmax.f32 %v4710_v49, 0.0  ;;  %v4904_v42 = vmax.f32 %v4823_v14, 0.0  ;;  %v10909_v6 = vpop.f32.mrf.mxu0  ;;  %v10911_v37 = vpop.f32.mrf.mxu1 }
 0x755   : > { %5032 = vmatmul.f32.gmra.mxu0 %v4903_v5  ;;  %5145 = vmatmul.f32.gmra.mxu1 %v4904_v42 }
 0x756   : > { %8144 = vmatmul.msk.f32.gmra.mxu2 %vm5388_vm2, %v12552_v0  ;;  %8176 = vmatmul.msk.f32.gmra.mxu3 %vm5389_vm3, %v12552_v0 }
 0x75a   : > { %v4713_v32 = vpop.f32.mrf.mxu2  ;;  %v4826_v46 = vpop.f32.mrf.mxu3 }
 0x75b   : > { %v4905_v49 = vmax.f32 %v4713_v32, 0.0  ;;  %v4906_v14 = vmax.f32 %v4826_v46, 0.0  ;;  %v10917_v5 = vpop.f32.mrf.mxu0  ;;  %v10919_v42 = vpop.f32.mrf.mxu1  ;;  %v5842_v32 = vld [vmem:[#allocation6 + $0x320] sm:$0xff] }
 0x75c   : > { %v5858_v46 = vld [vmem:[#allocation6 + $0x3a0] sm:$0xff]  ;;  %5881 = vmatpush.msrb.mxu0 %v5842_v32 }
 0x75d   : > { %5035 = vmatmul.f32.gmra.mxu0 %v4905_v49  ;;  %5148 = vmatmul.f32.gmra.mxu1 %v4906_v14  ;;  %v6190_v49 = vld [vmem:[#allocation8 + $0x6c0] sm:$0xff]  ;;  %v6191_v14 = vld [vmem:[#allocation8 + $0x6c8] sm:$0xff] }
 0x75e   : > { %8145 = vmatmul.msk.f32.gmra.mxu2 %vm5390_vm4, %v12552_v0  ;;  %8177 = vmatmul.msk.f32.gmra.mxu3 %vm5391_vm5, %v12552_v0 }
 0x75f   : > { %5994 = vmatpush.msrb.mxu1 %v5858_v46  ;;  %6201 = vmatpush.msra.mxu2 %v6190_v49 }
 0x760   : > { %6314 = vmatpush.msra.mxu3 %v6191_v14 }
 0x762   : > { %v4716_v8 = vpop.f32.mrf.mxu2  ;;  %v4829_v61 = vpop.f32.mrf.mxu3 }
 0x763   : > { %v4907_v3 = vmax.f32 %v4716_v8, 0.0  ;;  %v4908_v30 = vmax.f32 %v4829_v61, 0.0  ;;  %v10923_v45 = vpop.f32.mrf.mxu0  ;;  %v10925_v41 = vpop.f32.mrf.mxu1 }
 0x765   : > { %5038 = vmatmul.f32.gmra.mxu0 %v4907_v3  ;;  %5151 = vmatmul.f32.gmra.mxu1 %v4908_v30  ;;  %v5304_v30 = vpop.permute.xlu1 %5303 }
 0x766   : > { %8146 = vmatmul.msk.f32.gmra.mxu2 %vm5392_vm6, %v12552_v0  ;;  %8178 = vmatmul.msk.f32.gmra.mxu3 %vm5393_vm7, %v12552_v0  ;;  %vm5394_vm8 = vcmp.eq.s32.totalorder %v5304_v30, %v8895_v25  ;;  %vm5395_vm9 = vcmp.eq.s32.totalorder %v5304_v30, %v12551_v24  ;;  %v6188_v30 = vld [vmem:[#allocation8 + $0x6b0] sm:$0xff] }
 0x767   : > { %6202 = vmatpush.msra.mxu2 %v6188_v30 }
 0x76a   : > { %v4719_v8 = vpop.f32.mrf.mxu2  ;;  %v4832_v61 = vpop.f32.mrf.mxu3 }
 0x76b   : > { %v4909_v63 = vmax.f32 %v4719_v8, 0.0  ;;  %v4910_v52 = vmax.f32 %v4832_v61, 0.0  ;;  %v10931_v27 = vpop.f32.mrf.mxu0  ;;  %v10933_v3 = vpop.f32.mrf.mxu1 }
 0x76c   : > { %v5307_v61 = vpop.permute.xlu2 %5306 }
 0x76d   : > { %5041 = vmatmul.f32.gmra.mxu0 %v4909_v63  ;;  %5154 = vmatmul.f32.gmra.mxu1 %v4910_v52  ;;  %vm5396_vm10 = vcmp.eq.s32.totalorder %v5307_v61, %v8895_v25  ;;  %vm5397_vm11 = vcmp.eq.s32.totalorder %v5307_v61, %v12551_v24  ;;  %v5841_v52 = vld [vmem:[#allocation6 + $0x318] sm:$0xff] }
 0x76e   : > { %8147 = vmatmul.msk.f32.gmra.mxu2 %vm5394_vm8, %v12552_v0  ;;  %8179 = vmatmul.msk.f32.gmra.mxu3 %vm5395_vm9, %v12552_v0  ;;  %v5857_v63 = vld [vmem:[#allocation6 + $0x398] sm:$0xff] }
 0x76f   : > { %5882 = vmatpush.msrb.mxu0 %v5841_v52  ;;  %5995 = vmatpush.msrb.mxu1 %v5857_v63 }
 0x772   : > { %v4722_v31 = vpop.f32.mrf.mxu2  ;;  %v4835_v32 = vpop.f32.mrf.mxu3 }
 0x773   : > { %v4911_v46 = vmax.f32 %v4722_v31, 0.0  ;;  %v4912_v49 = vmax.f32 %v4835_v32, 0.0  ;;  %v10939_v14 = vpop.f32.mrf.mxu0  ;;  %v10941_v8 = vpop.f32.mrf.mxu1  ;;  %v6189_v31 = vld [vmem:[#allocation8 + $0x6b8] sm:$0xff] }
 0x774   : > { %6315 = vmatpush.msra.mxu3 %v6189_v31 }
 0x775   : > { %5044 = vmatmul.f32.gmra.mxu0 %v4911_v46  ;;  %5157 = vmatmul.f32.gmra.mxu1 %v4912_v49  ;;  %v5310_v49 = vpop.permute.xlu0 %5309 }
 0x776   : > { %8148 = vmatmul.msk.f32.gmra.mxu2 %vm5396_vm10, %v12552_v0  ;;  %8180 = vmatmul.msk.f32.gmra.mxu3 %vm5397_vm11, %v12552_v0  ;;  %vm5398_vm12 = vcmp.eq.s32.totalorder %v5310_v49, %v8895_v25  ;;  %vm5399_vm13 = vcmp.eq.s32.totalorder %v5310_v49, %v12551_v24  ;;  %v6186_v49 = vld [vmem:[#allocation8 + $0x6a0] sm:$0xff] }
 0x777   : > { %6203 = vmatpush.msra.mxu2 %v6186_v49 }
 0x77a   : > { %v4725_v32 = vpop.f32.mrf.mxu2  ;;  %v4838_v39 = vpop.f32.mrf.mxu3 }
 0x77b   : > { %v4913_v12 = vmax.f32 %v4725_v32, 0.0  ;;  %v4914_v58 = vmax.f32 %v4838_v39, 0.0  ;;  %v10947_v22 = vpop.f32.mrf.mxu0  ;;  %v10949_v46 = vpop.f32.mrf.mxu1 }
 0x77c   : > { %v5313_v32 = vpop.permute.xlu1 %5312 }
 0x77d   : > { %5047 = vmatmul.f32.gmra.mxu0 %v4913_v12  ;;  %5160 = vmatmul.f32.gmra.mxu1 %v4914_v58  ;;  %vm5400_vm14 = vcmp.eq.s32.totalorder %v5313_v32, %v8895_v25  ;;  %vm5401_vm15 = vcmp.eq.s32.totalorder %v5313_v32, %v12551_v24  ;;  %v5840_v58 = vld [vmem:[#allocation6 + $0x310] sm:$0xff] }
 0x77e   : > { %8149 = vmatmul.msk.f32.gmra.mxu2 %vm5398_vm12, %v12552_v0  ;;  %8181 = vmatmul.msk.f32.gmra.mxu3 %vm5399_vm13, %v12552_v0  ;;  %v5856_v12 = vld [vmem:[#allocation6 + $0x390] sm:$0xff] }
 0x77f   : > { %5883 = vmatpush.msrb.mxu0 %v5840_v58  ;;  %5996 = vmatpush.msrb.mxu1 %v5856_v12 }
 0x782   : > { %v4728_v61 = vpop.f32.mrf.mxu2  ;;  %v4841_v52 = vpop.f32.mrf.mxu3 }
 0x783   : > { %v4915_v63 = vmax.f32 %v4728_v61, 0.0  ;;  %v4916_v30 = vmax.f32 %v4841_v52, 0.0  ;;  %v10955_v39 = vpop.f32.mrf.mxu0  ;;  %v10957_v31 = vpop.f32.mrf.mxu1  ;;  %v6187_v61 = vld [vmem:[#allocation8 + $0x6a8] sm:$0xff] }
 0x784   : > { %6316 = vmatpush.msra.mxu3 %v6187_v61 }
 0x785   : > { %5050 = vmatmul.f32.gmra.mxu0 %v4915_v63  ;;  %5163 = vmatmul.f32.gmra.mxu1 %v4916_v30  ;;  %v5316_v30 = vpop.permute.xlu2 %5315 }
 0x786   : > { %8150 = vmatmul.msk.f32.gmra.mxu2 %vm5400_vm14, %v12552_v0  ;;  %8182 = vmatmul.msk.f32.gmra.mxu3 %vm5401_vm15, %v12552_v0  ;;  %vm5402_vm0 = vcmp.eq.s32.totalorder %v5316_v30, %v8895_v25  ;;  %vm5403_vm1 = vcmp.eq.s32.totalorder %v5316_v30, %v12551_v24  ;;  %v6184_v30 = vld [vmem:[#allocation8 + $0x690] sm:$0xff] }
 0x787   : > { %6204 = vmatpush.msra.mxu2 %v6184_v30 }
 0x78a   : > { %v4731_v52 = vpop.f32.mrf.mxu2  ;;  %v4844_v15 = vpop.f32.mrf.mxu3 }
 0x78b   : > { %v4917_v11 = vmax.f32 %v4731_v52, 0.0  ;;  %v4918_v57 = vmax.f32 %v4844_v15, 0.0  ;;  %v10963_v17 = vpop.f32.mrf.mxu0  ;;  %v10965_v63 = vpop.f32.mrf.mxu1 }
 0x78c   : > { %v5319_v52 = vpop.permute.xlu0 %5318 }
 0x78d   : > { %5053 = vmatmul.f32.gmra.mxu0 %v4917_v11  ;;  %5166 = vmatmul.f32.gmra.mxu1 %v4918_v57  ;;  %vm5404_vm2 = vcmp.eq.s32.totalorder %v5319_v52, %v8895_v25  ;;  %vm5405_vm3 = vcmp.eq.s32.totalorder %v5319_v52, %v12551_v24  ;;  %v5839_v57 = vld [vmem:[#allocation6 + $0x308] sm:$0xff] }
 0x78e   : > { %8151 = vmatmul.msk.f32.gmra.mxu2 %vm5402_vm0, %v12552_v0  ;;  %8183 = vmatmul.msk.f32.gmra.mxu3 %vm5403_vm1, %v12552_v0  ;;  %v5855_v11 = vld [vmem:[#allocation6 + $0x388] sm:$0xff] }
 0x78f   : > { %5884 = vmatpush.msrb.mxu0 %v5839_v57  ;;  %5997 = vmatpush.msrb.mxu1 %v5855_v11 }
 0x792   : > { %v4734_v32 = vpop.f32.mrf.mxu2  ;;  %v4847_v58 = vpop.f32.mrf.mxu3 }
 0x793   : > { %v4919_v12 = vmax.f32 %v4734_v32, 0.0  ;;  %v4920_v49 = vmax.f32 %v4847_v58, 0.0  ;;  %v10971_v15 = vpop.f32.mrf.mxu0  ;;  %v10973_v61 = vpop.f32.mrf.mxu1  ;;  %v6185_v32 = vld [vmem:[#allocation8 + $0x698] sm:$0xff] }
 0x794   : > { %6317 = vmatpush.msra.mxu3 %v6185_v32 }
 0x795   : > { %5056 = vmatmul.f32.gmra.mxu0 %v4919_v12  ;;  %5169 = vmatmul.f32.gmra.mxu1 %v4920_v49  ;;  %v5322_v49 = vpop.permute.xlu1 %5321 }
 0x796   : > { %8152 = vmatmul.msk.f32.gmra.mxu2 %vm5404_vm2, %v12552_v0  ;;  %8184 = vmatmul.msk.f32.gmra.mxu3 %vm5405_vm3, %v12552_v0  ;;  %vm5406_vm4 = vcmp.eq.s32.totalorder %v5322_v49, %v8895_v25  ;;  %vm5407_vm5 = vcmp.eq.s32.totalorder %v5322_v49, %v12551_v24  ;;  %v6182_v49 = vld [vmem:[#allocation8 + $0x680] sm:$0xff] }
 0x797   : > { %6205 = vmatpush.msra.mxu2 %v6182_v49 }
 0x79a   : > { %v4737_v58 = vpop.f32.mrf.mxu2  ;;  %v4850_v26 = vpop.f32.mrf.mxu3 }
 0x79b   : > { %v4921_v1 = vmax.f32 %v4737_v58, 0.0  ;;  %v4922_v23 = vmax.f32 %v4850_v26, 0.0  ;;  %v10979_v53 = vpop.f32.mrf.mxu0  ;;  %v10981_v12 = vpop.f32.mrf.mxu1 }
 0x79c   : > { %v5325_v58 = vpop.permute.xlu2 %5324 }
 0x79d   : > { %5059 = vmatmul.f32.gmra.mxu0 %v4921_v1  ;;  %5172 = vmatmul.f32.gmra.mxu1 %v4922_v23  ;;  %vm5408_vm6 = vcmp.eq.s32.totalorder %v5325_v58, %v8895_v25  ;;  %vm5409_vm7 = vcmp.eq.s32.totalorder %v5325_v58, %v12551_v24  ;;  %v5838_v23 = vld [vmem:[#allocation6 + $0x300] sm:$0xff] }
 0x79e   : > { %8153 = vmatmul.msk.f32.gmra.mxu2 %vm5406_vm4, %v12552_v0  ;;  %8185 = vmatmul.msk.f32.gmra.mxu3 %vm5407_vm5, %v12552_v0  ;;  %v5854_v1 = vld [vmem:[#allocation6 + $0x380] sm:$0xff] }
 0x79f   : > { %5885 = vmatpush.msrb.mxu0 %v5838_v23  ;;  %5998 = vmatpush.msrb.mxu1 %v5854_v1 }
 0x7a2   : > { %v4740_v52 = vpop.f32.mrf.mxu2  ;;  %v4853_v57 = vpop.f32.mrf.mxu3 }
 0x7a3   : > { %v4923_v11 = vmax.f32 %v4740_v52, 0.0  ;;  %v4924_v30 = vmax.f32 %v4853_v57, 0.0  ;;  %v10987_v26 = vpop.f32.mrf.mxu0  ;;  %v10989_v32 = vpop.f32.mrf.mxu1  ;;  %v6183_v52 = vld [vmem:[#allocation8 + $0x688] sm:$0xff] }
 0x7a4   : > { %6318 = vmatpush.msra.mxu3 %v6183_v52 }
 0x7a5   : > { %5062 = vmatmul.f32.gmra.mxu0 %v4923_v11  ;;  %5175 = vmatmul.f32.gmra.mxu1 %v4924_v30  ;;  %v5328_v30 = vpop.permute.xlu0 %5327 }
 0x7a6   : > { %8154 = vmatmul.msk.f32.gmra.mxu2 %vm5408_vm6, %v12552_v0  ;;  %8186 = vmatmul.msk.f32.gmra.mxu3 %vm5409_vm7, %v12552_v0  ;;  %vm5410_vm8 = vcmp.eq.s32.totalorder %v5328_v30, %v8895_v25  ;;  %vm5411_vm9 = vcmp.eq.s32.totalorder %v5328_v30, %v12551_v24 }
 0x7aa   : > { %v4743_v57 = vpop.f32.mrf.mxu2  ;;  %v4856_v51 = vpop.f32.mrf.mxu3 }
 0x7ab   : > { %v4925_v60 = vmax.f32 %v4743_v57, 0.0  ;;  %v4926_v21 = vmax.f32 %v4856_v51, 0.0  ;;  %v10995_v19 = vpop.f32.mrf.mxu0  ;;  %v10997_v11 = vpop.f32.mrf.mxu1 }
 0x7ac   : > { %v5331_v57 = vpop.permute.xlu1 %5330 }
 0x7ad   : > { %5065 = vmatmul.f32.gmra.mxu0 %v4925_v60  ;;  %5178 = vmatmul.f32.gmra.mxu1 %v4926_v21  ;;  %vm5412_vm10 = vcmp.eq.s32.totalorder %v5331_v57, %v8895_v25  ;;  %vm5413_vm11 = vcmp.eq.s32.totalorder %v5331_v57, %v12551_v24  ;;  %v6180_v60 = vld [vmem:[#allocation8 + $0x670] sm:$0xff]  ;;  %v6181_v21 = vld [vmem:[#allocation8 + $0x678] sm:$0xff] }
 0x7ae   : > { %8155 = vmatmul.msk.f32.gmra.mxu2 %vm5410_vm8, %v12552_v0  ;;  %8187 = vmatmul.msk.f32.gmra.mxu3 %vm5411_vm9, %v12552_v0 }
 0x7af   : > { %6206 = vmatpush.msra.mxu2 %v6180_v60  ;;  %6319 = vmatpush.msra.mxu3 %v6181_v21 }
 0x7b2   : > { %v4746_v58 = vpop.f32.mrf.mxu2  ;;  %v4859_v23 = vpop.f32.mrf.mxu3 }
 0x7b3   : > { %v4927_v1 = vmax.f32 %v4746_v58, 0.0  ;;  %v4928_v49 = vmax.f32 %v4859_v23, 0.0  ;;  %v11003_v51 = vpop.f32.mrf.mxu0  ;;  %v11005_v52 = vpop.f32.mrf.mxu1 }
 0x7b4   : > { %12553 = vst [vmem:[#allocation86_spill] sm:$0xff] %v11005_v52  ;;  %v5334_v52 = vpop.permute.xlu2 %5333 }
 0x7b5   : > { %5068 = vmatmul.f32.gmra.mxu0 %v4927_v1  ;;  %5181 = vmatmul.f32.gmra.mxu1 %v4928_v49  ;;  %vm5414_vm12 = vcmp.eq.s32.totalorder %v5334_v52, %v8895_v25  ;;  %vm5415_vm13 = vcmp.eq.s32.totalorder %v5334_v52, %v12551_v24  ;;  %v6504_v1 = vld [vmem:[#allocation9 + $0x678] sm:$0xff]  ;;  %v6179_v52 = vld [vmem:[#allocation8 + $0x668] sm:$0xff] }
 0x7b6   : > { %8156 = vmatmul.msk.f32.gmra.mxu2 %vm5412_vm10, %v12552_v0  ;;  %8188 = vmatmul.msk.f32.gmra.mxu3 %vm5413_vm11, %v12552_v0  ;;  %v6520_v49 = vld [vmem:[#allocation9 + $0x6f8] sm:$0xff] }
 0x7b7   : > { %6521 = vmatpush.msra.mxu0 %v6504_v1  ;;  %6634 = vmatpush.msra.mxu1 %v6520_v49  ;;  %v5099_v49 = vadd.f32 %v10911_v37, %v10909_v6  ;;  %v12560_v37 = vld [vmem:[#allocation97_spill] sm:$0xff] }
 0x7b8   : > { %6320 = vmatpush.msra.mxu3 %v6179_v52  ;;  %v5226_v52 = vadd.f32 %v10052_v20, %v12560_v37  ;;  %v6176_v20 = vld [vmem:[#allocation8 + $0x650] sm:$0xff] }
 0x7b9   : > { %v5194_v6 = vadd.f32 %v5099_v49, %v10712_v7  ;;  %v6177_v7 = vld [vmem:[#allocation8 + $0x658] sm:$0xff] }
 0x7ba   : > { %v4749_v30 = vpop.f32.mrf.mxu2  ;;  %v4862_v58 = vpop.f32.mrf.mxu3  ;;  %6321 = vmatpush.msra.mxu3 %v6177_v7 }
 0x7bb   : > { %v4929_v23 = vmax.f32 %v4749_v30, 0.0  ;;  %v4930_v36 = vmax.f32 %v4862_v58, 0.0  ;;  %v11011_v13 = vpop.f32.mrf.mxu0  ;;  %v11013_v55 = vpop.f32.mrf.mxu1 }
 0x7bc   : > { %12554 = vst [vmem:[#allocation32_spill] sm:$0xff] %v11011_v13  ;;  %v5337_v13 = vpop.permute.xlu0 %5336 }
 0x7bd   : > { %12555 = vst [vmem:[#allocation66_spill] sm:$0xff] %v11013_v55  ;;  %5071 = vmatmul.f32.gmra.mxu0 %v4929_v23  ;;  %5184 = vmatmul.f32.gmra.mxu1 %v4930_v36  ;;  %vm5416_vm14 = vcmp.eq.s32.totalorder %v5337_v13, %v8895_v25  ;;  %vm5417_vm15 = vcmp.eq.s32.totalorder %v5337_v13, %v12551_v24  ;;  %v6178_v36 = vld [vmem:[#allocation8 + $0x660] sm:$0xff] }
 0x7be   : > { %8157 = vmatmul.msk.f32.gmra.mxu2 %vm5414_vm12, %v12552_v0  ;;  %8189 = vmatmul.msk.f32.gmra.mxu3 %vm5415_vm13, %v12552_v0 }
 0x7bf   : > { %6207 = vmatpush.msra.mxu2 %v6178_v36  ;;  %v6519_v36 = vld [vmem:[#allocation9 + $0x6f0] sm:$0xff] }
 0x7c0   : > { %6635 = vmatpush.msra.mxu1 %v6519_v36 }
 0x7c1   : > { %6208 = vmatpush.msra.mxu2 %v6176_v20 }
 0x7c2   : > { %v4752_v57 = vpop.f32.mrf.mxu2  ;;  %v4865_v60 = vpop.f32.mrf.mxu3 }
 0x7c3   : > { %v4931_v21 = vmax.f32 %v4752_v57, 0.0  ;;  %v4932_v30 = vmax.f32 %v4865_v60, 0.0  ;;  %v11019_v58 = vpop.f32.mrf.mxu0  ;;  %v11021_v55 = vpop.f32.mrf.mxu1 }
 0x7c4   : > { %12556 = vst [vmem:[#allocation87_spill] sm:$0xff] %v11019_v58  ;;  %v5343_v58 = vpop.permute.xlu2 %5342 }
 0x7c5   : > { %12557 = vst [vmem:[#allocation34_spill] sm:$0xff] %v11021_v55  ;;  %5074 = vmatmul.f32.gmra.mxu0 %v4931_v21  ;;  %5187 = vmatmul.f32.gmra.mxu1 %v4932_v30  ;;  %v5340_v21 = vpop.permute.xlu1 %5339  ;;  %v6503_v30 = vld [vmem:[#allocation9 + $0x670] sm:$0xff]  ;;  %vm5420_vm2 = vcmp.eq.s32.totalorder %v5343_v58, %v8895_v25  ;;  %vm5421_vm3 = vcmp.eq.s32.totalorder %v5343_v58, %v12551_v24 }
 0x7c6   : > { %8158 = vmatmul.msk.f32.gmra.mxu2 %vm5416_vm14, %v12552_v0  ;;  %8190 = vmatmul.msk.f32.gmra.mxu3 %vm5417_vm15, %v12552_v0  ;;  %vm5418_vm0 = vcmp.eq.s32.totalorder %v5340_v21, %v8895_v25  ;;  %vm5419_vm1 = vcmp.eq.s32.totalorder %v5340_v21, %v12551_v24  ;;  %v5105_v58 = vadd.f32 %v10925_v41, %v10923_v45  ;;  %v12564_v45 = vld [vmem:[#allocation99_spill] sm:$0xff] }
 0x7c7   : > { %6522 = vmatpush.msra.mxu0 %v6503_v30 }
 0x7c8   : > { %v5196_v41 = vadd.f32 %v5105_v58, %v10722_v35  ;;  %v6175_v35 = vld [vmem:[#allocation8 + $0x648] sm:$0xff] }
 0x7c9   : > { %6322 = vmatpush.msra.mxu3 %v6175_v35 }
 0x7ca   : > { %v4755_v23 = vpop.f32.mrf.mxu2  ;;  %v4868_v1 = vpop.f32.mrf.mxu3 }
 0x7cb   : > { %v4933_v57 = vmax.f32 %v4755_v23, 0.0  ;;  %v4934_v60 = vmax.f32 %v4868_v1, 0.0  ;;  %v11029_v55 = vpop.f32.mrf.mxu0  ;;  %v11031_v13 = vpop.f32.mrf.mxu1 }
 0x7cc   : > { %12558 = vst [vmem:[#allocation67_spill] sm:$0xff] %v11029_v55 }
 0x7cd   : > { %12559 = vst [vmem:[#allocation88_spill] sm:$0xff] %v11031_v13  ;;  %5077 = vmatmul.f32.gmra.mxu0 %v4933_v57  ;;  %5190 = vmatmul.f32.gmra.mxu1 %v4934_v60  ;;  %v11040_v13 = vadd.f32 %v5226_v52, %v5194_v6  ;;  %v5102_v57 = vadd.f32 %v10919_v42, %v10917_v5  ;;  %v12562_v42 = vld [vmem:[#allocation98_spill] sm:$0xff] }
 0x7ce   : > { %8159 = vmatmul.msk.f32.gmra.mxu2 %vm5418_vm0, %v12552_v0  ;;  %8191 = vmatmul.msk.f32.gmra.mxu3 %vm5419_vm1, %v12552_v0  ;;  %v5227_v49 = vadd.f32 %v10069_v38, %v12562_v42  ;;  %v6502_v38 = vld [vmem:[#allocation9 + $0x668] sm:$0xff] }
 0x7cf   : > { %12561 = vst [vmem:[#allocation36_spill] sm:$0xff] %v11040_v13  ;;  %v5195_v5 = vadd.f32 %v5102_v57, %v10717_v9  ;;  %v6518_v9 = vld [vmem:[#allocation9 + $0x6e8] sm:$0xff]  ;;  %6523 = vmatpush.msra.mxu0 %v6502_v38  ;;  %v5228_v57 = vadd.f32 %v10088_v54, %v12564_v45  ;;  %v6174_v54 = vld [vmem:[#allocation8 + $0x640] sm:$0xff] }
 0x7d0   : > { %6636 = vmatpush.msra.mxu1 %v6518_v9  ;;  %6209 = vmatpush.msra.mxu2 %v6174_v54 }
 0x7d2   : > { %v5628_v23 = vpop.f32.mrf.mxu2  ;;  %v5741_v1 = vpop.f32.mrf.mxu3 }
 0x7d3   : > { %v11044_v60 = vpop.f32.mrf.mxu0  ;;  %v11046_v21 = vpop.f32.mrf.mxu1  ;;  %v11048_v55 = vadd.f32 %v5741_v1, %v5628_v23  ;;  %v11067_v23 = vadd.f32 %v5227_v49, %v5195_v5  ;;  %v5108_v5 = vadd.f32 %v10933_v3, %v10931_v27  ;;  %v12566_v3 = vld [vmem:[#allocation100_spill] sm:$0xff] }
 0x7d4   : > { %v5346_v1 = vpop.permute.xlu0 %5345  ;;  %v5229_v58 = vadd.f32 %v10107_v47, %v12566_v3  ;;  %v6501_v47 = vld [vmem:[#allocation9 + $0x660] sm:$0xff] }
 0x7d5   : > { %5886 = vmatmul.f32.vlgmr.msrb.gmra.mxu0 %v11048_v55  ;;  %5999 = vmatmul.f32.vlgmr.msrb.gmra.mxu1 %v11040_v13  ;;  %12563 = vst [vmem:[#allocation68_spill] sm:$0xff] %v11067_v23  ;;  %vm5422_vm4 = vcmp.eq.s32.totalorder %v5346_v1, %v8895_v25  ;;  %vm5423_vm5 = vcmp.eq.s32.totalorder %v5346_v1, %v12551_v24  ;;  %v5349_v1 = vpop.permute.xlu1 %5348 }
 0x7d6   : > { %8160 = vmatmul.msk.f32.gmra.mxu2 %vm5420_vm2, %v12552_v0  ;;  %8192 = vmatmul.msk.f32.gmra.mxu3 %vm5421_vm3, %v12552_v0  ;;  %vm5424_vm6 = vcmp.eq.s32.totalorder %v5349_v1, %v8895_v25  ;;  %vm5425_vm7 = vcmp.eq.s32.totalorder %v5349_v1, %v12551_v24  ;;  %v5197_v27 = vadd.f32 %v5108_v5, %v10727_v29  ;;  %v5352_v1 = vpop.permute.xlu2 %5351  ;;  %v6517_v29 = vld [vmem:[#allocation9 + $0x6e0] sm:$0xff] }
 0x7d7   : > { %vm5426_vm8 = vcmp.eq.s32.totalorder %v5352_v1, %v8895_v25  ;;  %vm5427_vm9 = vcmp.eq.s32.totalorder %v5352_v1, %v12551_v24  ;;  %6524 = vmatpush.msra.mxu0 %v6501_v47  ;;  %6637 = vmatpush.msra.mxu1 %v6517_v29 }
 0x7da   : > { %v5631_v30 = vpop.f32.mrf.mxu2  ;;  %v5744_v36 = vpop.f32.mrf.mxu3 }
 0x7db   : > { %v11061_v6 = vpop.f32.mrf.mxu0  ;;  %v11063_v37 = vpop.f32.mrf.mxu1  ;;  %v11065_v52 = vadd.f32 %v5744_v36, %v5631_v30  ;;  %v11086_v36 = vadd.f32 %v5228_v57, %v5196_v41  ;;  %v5111_v41 = vadd.f32 %v10941_v8, %v10939_v14  ;;  %v12568_v8 = vld [vmem:[#allocation101_spill] sm:$0xff] }
 0x7dc   : > { %v5230_v5 = vadd.f32 %v10126_v48, %v12568_v8  ;;  %v5355_v1 = vpop.permute.xlu0 %5354  ;;  %v6172_v48 = vld [vmem:[#allocation8 + $0x630] sm:$0xff] }
 0x7dd   : > { %5889 = vmatmul.f32.gmra.mxu0 %v11065_v52  ;;  %6002 = vmatmul.f32.gmra.mxu1 %v11067_v23  ;;  %12565 = vst [vmem:[#allocation89_spill] sm:$0xff] %v11086_v36  ;;  %v5198_v14 = vadd.f32 %v5111_v41, %v10732_v2  ;;  %vm5428_vm10 = vcmp.eq.s32.totalorder %v5355_v1, %v8895_v25  ;;  %v6173_v2 = vld [vmem:[#allocation8 + $0x638] sm:$0xff] }
 0x7de   : > { %8161 = vmatmul.msk.f32.gmra.mxu2 %vm5422_vm4, %v12552_v0  ;;  %8193 = vmatmul.msk.f32.gmra.mxu3 %vm5423_vm5, %v12552_v0  ;;  %vm5429_vm11 = vcmp.eq.s32.totalorder %v5355_v1, %v12551_v24  ;;  %v5358_v1 = vpop.permute.xlu1 %5357 }
 0x7df   : > { %6210 = vmatpush.msra.mxu2 %v6172_v48  ;;  %6323 = vmatpush.msra.mxu3 %v6173_v2  ;;  %vm5430_vm12 = vcmp.eq.s32.totalorder %v5358_v1, %v8895_v25  ;;  %vm5431_vm13 = vcmp.eq.s32.totalorder %v5358_v1, %v12551_v24  ;;  %v5361_v1 = vpop.permute.xlu2 %5360 }
 0x7e0   : > { %vm5432_vm14 = vcmp.eq.s32.totalorder %v5361_v1, %v8895_v25  ;;  %vm5433_vm15 = vcmp.eq.s32.totalorder %v5361_v1, %v12551_v24 }
 0x7e2   : > { %v5634_v20 = vpop.f32.mrf.mxu2  ;;  %v5747_v7 = vpop.f32.mrf.mxu3 }
 0x7e3   : > { %v11080_v42 = vpop.f32.mrf.mxu0  ;;  %v11082_v49 = vpop.f32.mrf.mxu1  ;;  %v11084_v30 = vadd.f32 %v5747_v7, %v5634_v20  ;;  %v11105_v7 = vadd.f32 %v5229_v58, %v5197_v27  ;;  %v5114_v27 = vadd.f32 %v10949_v46, %v10947_v22  ;;  %v12570_v46 = vld [vmem:[#allocation102_spill] sm:$0xff] }
 0x7e4   : > { %v5231_v41 = vadd.f32 %v10145_v62, %v12570_v46  ;;  %v6500_v62 = vld [vmem:[#allocation9 + $0x658] sm:$0xff]  ;;  %v5364_v1 = vpop.permute.xlu0 %5363 }
 0x7e5   : > { %5892 = vmatmul.f32.gmra.mxu0 %v11084_v30  ;;  %6005 = vmatmul.f32.gmra.mxu1 %v11086_v36  ;;  %12567 = vst [vmem:[#allocation38_spill] sm:$0xff] %v11105_v7  ;;  %v5199_v22 = vadd.f32 %v5114_v27, %v10737_v56  ;;  %v6516_v56 = vld [vmem:[#allocation9 + $0x6d8] sm:$0xff]  ;;  %vm5434_vm0 = vcmp.eq.s32.totalorder %v5364_v1, %v8895_v25 }
 0x7e6   : > { %8162 = vmatmul.msk.f32.gmra.mxu2 %vm5424_vm6, %v12552_v0  ;;  %8194 = vmatmul.msk.f32.gmra.mxu3 %vm5425_vm7, %v12552_v0  ;;  %vm5435_vm1 = vcmp.eq.s32.totalorder %v5364_v1, %v12551_v24  ;;  %v5367_v1 = vpop.permute.xlu1 %5366 }
 0x7e7   : > { %6525 = vmatpush.msra.mxu0 %v6500_v62  ;;  %6638 = vmatpush.msra.mxu1 %v6516_v56  ;;  %vm5436_vm2 = vcmp.eq.s32.totalorder %v5367_v1, %v8895_v25  ;;  %vm5437_vm3 = vcmp.eq.s32.totalorder %v5367_v1, %v12551_v24  ;;  %v5370_v1 = vpop.permute.xlu2 %5369 }
 0x7e8   : > { %vm5438_vm4 = vcmp.eq.s32.totalorder %v5370_v1, %v8895_v25  ;;  %vm5439_vm5 = vcmp.eq.s32.totalorder %v5370_v1, %v12551_v24 }
 0x7ea   : > { %v5637_v38 = vpop.f32.mrf.mxu2  ;;  %v5750_v9 = vpop.f32.mrf.mxu3 }
 0x7eb   : > { %v11099_v45 = vpop.f32.mrf.mxu0  ;;  %v11101_v57 = vpop.f32.mrf.mxu1  ;;  %v11103_v20 = vadd.f32 %v5750_v9, %v5637_v38  ;;  %v11124_v9 = vadd.f32 %v5230_v5, %v5198_v14  ;;  %v5117_v14 = vadd.f32 %v10957_v31, %v10955_v39  ;;  %v12572_v31 = vld [vmem:[#allocation44_spill] sm:$0xff] }
 0x7ec   : > { %v5232_v27 = vadd.f32 %v10164_v43, %v12572_v31  ;;  %v6170_v43 = vld [vmem:[#allocation8 + $0x620] sm:$0xff]  ;;  %v5373_v1 = vpop.permute.xlu0 %5372 }
 0x7ed   : > { %5895 = vmatmul.f32.gmra.mxu0 %v11103_v20  ;;  %6008 = vmatmul.f32.gmra.mxu1 %v11105_v7  ;;  %12569 = vst [vmem:[#allocation69_spill] sm:$0xff] %v11124_v9  ;;  %v5200_v39 = vadd.f32 %v5117_v14, %v10745_v44  ;;  %v6171_v44 = vld [vmem:[#allocation8 + $0x628] sm:$0xff]  ;;  %vm5440_vm6 = vcmp.eq.s32.totalorder %v5373_v1, %v8895_v25 }
 0x7ee   : > { %8163 = vmatmul.msk.f32.gmra.mxu2 %vm5426_vm8, %v12552_v0  ;;  %8195 = vmatmul.msk.f32.gmra.mxu3 %vm5427_vm9, %v12552_v0  ;;  %vm5441_vm7 = vcmp.eq.s32.totalorder %v5373_v1, %v12551_v24 }
 0x7ef   : > { %6211 = vmatpush.msra.mxu2 %v6170_v43  ;;  %6324 = vmatpush.msra.mxu3 %v6171_v44 }
 0x7f2   : > { %v5640_v54 = vpop.f32.mrf.mxu2  ;;  %v5753_v35 = vpop.f32.mrf.mxu3 }
 0x7f3   : > { %v11118_v3 = vpop.f32.mrf.mxu0  ;;  %v11120_v58 = vpop.f32.mrf.mxu1  ;;  %v11122_v38 = vadd.f32 %v5753_v35, %v5640_v54  ;;  %v11143_v35 = vadd.f32 %v5231_v41, %v5199_v22  ;;  %v5120_v22 = vadd.f32 %v10965_v63, %v10963_v17  ;;  %v12574_v63 = vld [vmem:[#allocation31_spill] sm:$0xff] }
 0x7f4   : > { %v5233_v14 = vadd.f32 %v10183_v50, %v12574_v63  ;;  %v6499_v50 = vld [vmem:[#allocation9 + $0x650] sm:$0xff] }
 0x7f5   : > { %5898 = vmatmul.f32.gmra.mxu0 %v11122_v38  ;;  %6011 = vmatmul.f32.gmra.mxu1 %v11124_v9  ;;  %12571 = vst [vmem:[#allocation18_spill] sm:$0xff] %v11143_v35  ;;  %v5201_v17 = vadd.f32 %v5120_v22, %v10753_v28  ;;  %v6515_v28 = vld [vmem:[#allocation9 + $0x6d0] sm:$0xff]  ;;  %v12600_v9 = vld [vmem:[#allocation67_spill] sm:$0xff] }
 0x7f6   : > { %8164 = vmatmul.msk.f32.gmra.mxu2 %vm5428_vm10, %v12552_v0  ;;  %8196 = vmatmul.msk.f32.gmra.mxu3 %vm5429_vm11, %v12552_v0 }
 0x7f7   : > { %6526 = vmatpush.msra.mxu0 %v6499_v50  ;;  %6639 = vmatpush.msra.mxu1 %v6515_v28 }
 0x7fa   : > { %v5643_v47 = vpop.f32.mrf.mxu2  ;;  %v5756_v29 = vpop.f32.mrf.mxu3 }
 0x7fb   : > { %v11137_v8 = vpop.f32.mrf.mxu0  ;;  %v11139_v5 = vpop.f32.mrf.mxu1  ;;  %v11141_v54 = vadd.f32 %v5756_v29, %v5643_v47  ;;  %v11162_v29 = vadd.f32 %v5232_v27, %v5200_v39  ;;  %v5123_v39 = vadd.f32 %v10973_v61, %v10971_v15  ;;  %v12576_v61 = vld [vmem:[#allocation45_spill] sm:$0xff] }
 0x7fc   : > { %v5234_v22 = vadd.f32 %v10202_v10, %v12576_v61  ;;  %v6168_v10 = vld [vmem:[#allocation8 + $0x610] sm:$0xff] }
 0x7fd   : > { %5901 = vmatmul.f32.gmra.mxu0 %v11141_v54  ;;  %6014 = vmatmul.f32.gmra.mxu1 %v11143_v35  ;;  %12573 = vst [vmem:[#allocation97_spill] sm:$0xff] %v11162_v29  ;;  %v5202_v15 = vadd.f32 %v5123_v39, %v10761_v40  ;;  %v6811_v35 = vld [vmem:[#allocation8 + $0x7f8] sm:$0xff] }
 0x7fe   : > { %8165 = vmatmul.msk.f32.gmra.mxu2 %vm5430_vm12, %v12552_v0  ;;  %8197 = vmatmul.msk.f32.gmra.mxu3 %vm5431_vm13, %v12552_v0 }
 0x7ff   : > { %6212 = vmatpush.msra.mxu2 %v6168_v10 }
 0x802   : > { %v5646_v48 = vpop.f32.mrf.mxu2  ;;  %v5759_v2 = vpop.f32.mrf.mxu3 }
 0x803   : > { %v11156_v46 = vpop.f32.mrf.mxu0  ;;  %v11158_v41 = vpop.f32.mrf.mxu1  ;;  %v11160_v47 = vadd.f32 %v5759_v2, %v5646_v48  ;;  %v11181_v2 = vadd.f32 %v5233_v14, %v5201_v17  ;;  %v5126_v17 = vadd.f32 %v10981_v12, %v10979_v53  ;;  %v6169_v53 = vld [vmem:[#allocation8 + $0x618] sm:$0xff] }
 0x804   : > { %6325 = vmatpush.msra.mxu3 %v6169_v53  ;;  %v12578_v12 = vld [vmem:[#allocation33_spill] sm:$0xff] }
 0x805   : > { %5904 = vmatmul.f32.gmra.mxu0 %v11160_v47  ;;  %6017 = vmatmul.f32.gmra.mxu1 %v11162_v29  ;;  %12575 = vst [vmem:[#allocation98_spill] sm:$0xff] %v11181_v2  ;;  %v5203_v40 = vadd.f32 %v5126_v17, %v10769_v4  ;;  %v5235_v39 = vadd.f32 %v10221_v16, %v12578_v12  ;;  %v6498_v16 = vld [vmem:[#allocation9 + $0x648] sm:$0xff] }
 0x806   : > { %8166 = vmatmul.msk.f32.gmra.mxu2 %vm5432_vm14, %v12552_v0  ;;  %8198 = vmatmul.msk.f32.gmra.mxu3 %vm5433_vm15, %v12552_v0  ;;  %v6514_v4 = vld [vmem:[#allocation9 + $0x6c8] sm:$0xff] }
 0x807   : > { %6527 = vmatpush.msra.mxu0 %v6498_v16  ;;  %6640 = vmatpush.msra.mxu1 %v6514_v4 }
 0x80a   : > { %v5649_v62 = vpop.f32.mrf.mxu2  ;;  %v5762_v56 = vpop.f32.mrf.mxu3 }
 0x80b   : > { %v11175_v31 = vpop.f32.mrf.mxu0  ;;  %v11177_v27 = vpop.f32.mrf.mxu1  ;;  %v11179_v48 = vadd.f32 %v5762_v56, %v5649_v62  ;;  %v11200_v56 = vadd.f32 %v5234_v22, %v5202_v15  ;;  %v5129_v15 = vadd.f32 %v10989_v32, %v10987_v26  ;;  %v12580_v32 = vld [vmem:[#allocation46_spill] sm:$0xff] }
 0x80c   : > { %v5236_v17 = vadd.f32 %v10240_v18, %v12580_v32  ;;  %v6166_v18 = vld [vmem:[#allocation8 + $0x600] sm:$0xff] }
 0x80d   : > { %5907 = vmatmul.f32.gmra.mxu0 %v11179_v48  ;;  %6020 = vmatmul.f32.gmra.mxu1 %v11181_v2  ;;  %12577 = vst [vmem:[#allocation99_spill] sm:$0xff] %v11200_v56  ;;  %v5204_v26 = vadd.f32 %v5129_v15, %v10777_v34 }
 0x80e   : > { %8167 = vmatmul.msk.f32.gmra.mxu2 %vm5434_vm0, %v12552_v0  ;;  %8199 = vmatmul.msk.f32.gmra.mxu3 %vm5435_vm1, %v12552_v0 }
 0x80f   : > { %6213 = vmatpush.msra.mxu2 %v6166_v18  ;;  %v5379_v18 = vpop.permute.xlu2 %5378 }
 0x810   : > { %vm5444_vm10 = vcmp.eq.s32.totalorder %v5379_v18, %v8895_v25  ;;  %vm5445_vm11 = vcmp.eq.s32.totalorder %v5379_v18, %v12551_v24 }
 0x812   : > { %v5652_v43 = vpop.f32.mrf.mxu2  ;;  %v5765_v44 = vpop.f32.mrf.mxu3 }
 0x813   : > { %v11194_v63 = vpop.f32.mrf.mxu0  ;;  %v11196_v14 = vpop.f32.mrf.mxu1  ;;  %v11198_v62 = vadd.f32 %v5765_v44, %v5652_v43  ;;  %v11219_v44 = vadd.f32 %v5235_v39, %v5203_v40  ;;  %v5132_v40 = vadd.f32 %v10997_v11, %v10995_v19  ;;  %v6167_v19 = vld [vmem:[#allocation8 + $0x608] sm:$0xff] }
 0x814   : > { %6326 = vmatpush.msra.mxu3 %v6167_v19  ;;  %v12582_v11 = vld [vmem:[#allocation35_spill] sm:$0xff]  ;;  %v12586_v19 = vld [vmem:[#allocation37_spill] sm:$0xff] }
 0x815   : > { %5910 = vmatmul.f32.gmra.mxu0 %v11198_v62  ;;  %6023 = vmatmul.f32.gmra.mxu1 %v11200_v56  ;;  %12579 = vst [vmem:[#allocation100_spill] sm:$0xff] %v11219_v44  ;;  %v5205_v34 = vadd.f32 %v5132_v40, %v10785_v33  ;;  %v5237_v15 = vadd.f32 %v10259_v59, %v12582_v11  ;;  %v6497_v59 = vld [vmem:[#allocation9 + $0x640] sm:$0xff] }
 0x816   : > { %8168 = vmatmul.msk.f32.gmra.mxu2 %vm5436_vm2, %v12552_v0  ;;  %8200 = vmatmul.msk.f32.gmra.mxu3 %vm5437_vm3, %v12552_v0  ;;  %v6513_v33 = vld [vmem:[#allocation9 + $0x6c0] sm:$0xff] }
 0x817   : > { %v11257_v1 = vadd.f32 %v5237_v15, %v5205_v34  ;;  %6528 = vmatpush.msra.mxu0 %v6497_v59  ;;  %6641 = vmatpush.msra.mxu1 %v6513_v33  ;;  %v12587_v34 = vld [vmem:[#allocation47_spill] sm:$0xff]  ;;  %v5382_v33 = vpop.permute.xlu0 %5381 }
 0x818   : > { %v5238_v11 = vadd.f32 %v12587_v34, %v12586_v19  ;;  %v12593_v19 = vld [vmem:[#allocation48_spill] sm:$0xff]  ;;  %vm5446_vm12 = vcmp.eq.s32.totalorder %v5382_v33, %v8895_v25  ;;  %vm5447_vm13 = vcmp.eq.s32.totalorder %v5382_v33, %v12551_v24  ;;  %6925 = vmatpush.msrb.mxu3 %v6811_v35 }
 0x819   : > { %12584 = vst [vmem:[#allocation102_spill] sm:$0xff] %v11257_v1 }
 0x81a   : > { %v5655_v50 = vpop.f32.mrf.mxu2  ;;  %v5768_v28 = vpop.f32.mrf.mxu3 }
 0x81b   : > { %v11213_v61 = vpop.f32.mrf.mxu0  ;;  %v11215_v22 = vpop.f32.mrf.mxu1  ;;  %v11217_v43 = vadd.f32 %v5768_v28, %v5655_v50  ;;  %v11238_v28 = vadd.f32 %v5236_v17, %v5204_v26  ;;  %v12583_v26 = vld [vmem:[#allocation86_spill] sm:$0xff] }
 0x81c   : > { %v5135_v32 = vadd.f32 %v12583_v26, %v11003_v51  ;;  %v12585_v51 = vld [vmem:[#allocation24_spill] sm:$0xff] }
 0x81d   : > { %5913 = vmatmul.f32.gmra.mxu0 %v11217_v43  ;;  %6026 = vmatmul.f32.gmra.mxu1 %v11219_v44  ;;  %12581 = vst [vmem:[#allocation101_spill] sm:$0xff] %v11238_v28 }
 0x81e   : > { %8169 = vmatmul.msk.f32.gmra.mxu2 %vm5438_vm4, %v12552_v0  ;;  %8201 = vmatmul.msk.f32.gmra.mxu3 %vm5439_vm5, %v12552_v0  ;;  %v5206_v40 = vadd.f32 %v5135_v32, %v12585_v51  ;;  %v12591_v32 = vld [vmem:[#allocation59_spill] sm:$0xff] }
 0x81f   : > { %v12592_v51 = vld [vmem:[#allocation39_spill] sm:$0xff] }
 0x820   : > { %v11276_v2 = vadd.f32 %v5238_v11, %v5206_v40  ;;  %v5239_v34 = vadd.f32 %v12593_v19, %v12592_v51  ;;  %v12597_v51 = vld [vmem:[#allocation80_spill] sm:$0xff] }
 0x822   : > { %v5658_v10 = vpop.f32.mrf.mxu2  ;;  %v5771_v53 = vpop.f32.mrf.mxu3  ;;  %12590 = vst [vmem:[#allocation44_spill] sm:$0xff] %v11276_v2 }
 0x823   : > { %v11232_v12 = vpop.f32.mrf.mxu0  ;;  %v11234_v39 = vpop.f32.mrf.mxu1  ;;  %v11236_v50 = vadd.f32 %v5771_v53, %v5658_v10 }
 0x825   : > { %5916 = vmatmul.f32.gmra.mxu0 %v11236_v50  ;;  %6029 = vmatmul.f32.gmra.mxu1 %v11238_v28  ;;  %v5376_v28 = vpop.permute.xlu1 %5375 }
 0x826   : > { %8170 = vmatmul.msk.f32.gmra.mxu2 %vm5440_vm6, %v12552_v0  ;;  %8202 = vmatmul.msk.f32.gmra.mxu3 %vm5441_vm7, %v12552_v0  ;;  %vm5442_vm8 = vcmp.eq.s32.totalorder %v5376_v28, %v8895_v25  ;;  %vm5443_vm9 = vcmp.eq.s32.totalorder %v5376_v28, %v12551_v24 }
 0x82a   : > { %v5661_v16 = vpop.f32.mrf.mxu2  ;;  %v5774_v4 = vpop.f32.mrf.mxu3 }
 0x82b   : > { %v11251_v17 = vpop.f32.mrf.mxu0  ;;  %v11253_v10 = vpop.f32.mrf.mxu1  ;;  %v11255_v53 = vadd.f32 %v5774_v4, %v5661_v16  ;;  %v12588_v16 = vld [vmem:[#allocation32_spill] sm:$0xff]  ;;  %v12589_v4 = vld [vmem:[#allocation66_spill] sm:$0xff] }
 0x82c   : > { %v5138_v26 = vadd.f32 %v12589_v4, %v12588_v16 }
 0x82d   : > { %5919 = vmatmul.f32.gmra.mxu0 %v11255_v53  ;;  %6032 = vmatmul.f32.gmra.mxu1 %v11257_v1 }
 0x82e   : > { %8171 = vmatmul.msk.f32.gmra.mxu2 %vm5442_vm8, %v12552_v0  ;;  %8203 = vmatmul.msk.f32.gmra.mxu3 %vm5443_vm9, %v12552_v0  ;;  %v5207_v59 = vadd.f32 %v5138_v26, %v12591_v32  ;;  %v6496_v26 = vld [vmem:[#allocation9 + $0x638] sm:$0xff] }
 0x82f   : > { %v6512_v32 = vld [vmem:[#allocation9 + $0x6b8] sm:$0xff]  ;;  %6529 = vmatpush.msra.mxu0 %v6496_v26  ;;  %v12603_v26 = vld [vmem:[#allocation70_spill] sm:$0xff] }
 0x830   : > { %v11295_v29 = vadd.f32 %v5239_v34, %v5207_v59  ;;  %6642 = vmatpush.msra.mxu1 %v6512_v32  ;;  %v5385_v59 = vpop.permute.xlu1 %5384  ;;  %v12598_v34 = vld [vmem:[#allocation90_spill] sm:$0xff]  ;;  %v12604_v32 = vld [vmem:[#allocation91_spill] sm:$0xff] }
 0x831   : > { %vm5448_vm14 = vcmp.eq.s32.totalorder %v5385_v59, %v8895_v25  ;;  %vm5449_vm15 = vcmp.eq.s32.totalorder %v5385_v59, %v12551_v24  ;;  %v5147_v25 = vadd.f32 %v11046_v21, %v11044_v60  ;;  %v12609_v60 = vld [vmem:[#allocation40_spill] sm:$0xff] }
 0x832   : > { %v5664_v15 = vpop.f32.mrf.mxu2  ;;  %v5777_v28 = vpop.f32.mrf.mxu3  ;;  %12596 = vst [vmem:[#allocation31_spill] sm:$0xff] %v11295_v29 }
 0x833   : > { %v11270_v1 = vpop.f32.mrf.mxu0  ;;  %v11272_v44 = vpop.f32.mrf.mxu1  ;;  %v11274_v56 = vadd.f32 %v5777_v28, %v5664_v15  ;;  %v12594_v15 = vld [vmem:[#allocation87_spill] sm:$0xff]  ;;  %v12595_v28 = vld [vmem:[#allocation34_spill] sm:$0xff] }
 0x834   : > { %v5141_v16 = vadd.f32 %v12595_v28, %v12594_v15  ;;  %v6810_v28 = vld [vmem:[#allocation8 + $0x7f0] sm:$0xff] }
 0x835   : > { %5922 = vmatmul.f32.gmra.mxu0 %v11274_v56  ;;  %6035 = vmatmul.f32.gmra.mxu1 %v11276_v2 }
 0x836   : > { %8172 = vmatmul.msk.f32.gmra.mxu2 %vm5444_vm10, %v12552_v0  ;;  %8204 = vmatmul.msk.f32.gmra.mxu3 %vm5445_vm11, %v12552_v0  ;;  %v5208_v19 = vadd.f32 %v5141_v16, %v12597_v51  ;;  %v5241_v51 = vadd.f32 %v12604_v32, %v12603_v26  ;;  %v6808_v26 = vld [vmem:[#allocation8 + $0x7e0] sm:$0xff]  ;;  %v6809_v32 = vld [vmem:[#allocation8 + $0x7e8] sm:$0xff] }
 0x837   : > { %6812 = vmatpush.msrb.mxu2 %v6810_v28  ;;  %6926 = vmatpush.msrb.mxu3 %v6809_v32 }
 0x839   : > { %6813 = vmatpush.msrb.mxu2 %v6808_v26 }
 0x83a   : > { %v5667_v40 = vpop.f32.mrf.mxu2  ;;  %v5780_v11 = vpop.f32.mrf.mxu3 }
 0x83b   : > { %v11289_v18 = vpop.f32.mrf.mxu0  ;;  %v11291_v4 = vpop.f32.mrf.mxu1  ;;  %v11293_v2 = vadd.f32 %v5780_v11, %v5667_v40  ;;  %v12599_v40 = vld [vmem:[#allocation49_spill] sm:$0xff] }
 0x83c   : > { %v5240_v11 = vadd.f32 %v12599_v40, %v12598_v34 }
 0x83d   : > { %5925 = vmatmul.f32.gmra.mxu0 %v11293_v2  ;;  %6038 = vmatmul.f32.gmra.mxu1 %v11295_v29  ;;  %v12601_v29 = vld [vmem:[#allocation88_spill] sm:$0xff] }
 0x83e   : > { %8173 = vmatmul.msk.f32.gmra.mxu2 %vm5446_vm12, %v12552_v0  ;;  %8205 = vmatmul.msk.f32.gmra.mxu3 %vm5447_vm13, %v12552_v0  ;;  %v5144_v7 = vadd.f32 %v12601_v29, %v12600_v9  ;;  %v11314_v16 = vadd.f32 %v5240_v11, %v5208_v19  ;;  %v12602_v9 = vld [vmem:[#allocation25_spill] sm:$0xff]  ;;  %v12607_v11 = vld [vmem:[#allocation60_spill] sm:$0xff] }
 0x840   : > { %v5209_v29 = vadd.f32 %v5144_v7, %v12602_v9  ;;  %v6511_v7 = vld [vmem:[#allocation9 + $0x6b0] sm:$0xff] }
 0x841   : > { %6643 = vmatpush.msra.mxu1 %v6511_v7 }
 0x842   : > { %v5670_v15 = vpop.f32.mrf.mxu2  ;;  %v5783_v33 = vpop.f32.mrf.mxu3  ;;  %v11333_v40 = vadd.f32 %v5241_v51, %v5209_v29  ;;  %v5150_v29 = vadd.f32 %v11063_v37, %v11061_v6  ;;  %v12612_v37 = vld [vmem:[#allocation81_spill] sm:$0xff] }
 0x843   : > { %v11308_v36 = vpop.f32.mrf.mxu0  ;;  %v11310_v23 = vpop.f32.mrf.mxu1  ;;  %v11312_v13 = vadd.f32 %v5783_v33, %v5670_v15  ;;  %v5210_v15 = vadd.f32 %v5147_v25, %v12607_v11  ;;  %v12608_v33 = vld [vmem:[#allocation50_spill] sm:$0xff] }
 0x844   : > { %12606 = vst [vmem:[#allocation33_spill] sm:$0xff] %v11333_v40  ;;  %v5242_v21 = vadd.f32 %v12609_v60, %v12608_v33  ;;  %v5211_v7 = vadd.f32 %v5150_v29, %v12612_v37  ;;  %v12614_v33 = vld [vmem:[#allocation92_spill] sm:$0xff]  ;;  %v6510_v37 = vld [vmem:[#allocation9 + $0x6a8] sm:$0xff] }
 0x845   : > { %5928 = vmatmul.f32.gmra.mxu0 %v11312_v13  ;;  %6041 = vmatmul.f32.gmra.mxu1 %v11314_v16 }
 0x846   : > { %8174 = vmatmul.msk.f32.gmra.mxu2 %vm5448_vm14, %v12552_v0  ;;  %8206 = vmatmul.msk.f32.gmra.mxu3 %vm5449_vm15, %v12552_v0  ;;  %v6495_v0 = vld [vmem:[#allocation9 + $0x630] sm:$0xff] }
 0x847   : > { %6530 = vmatpush.msra.mxu0 %v6495_v0  ;;  %v11349_v0 = vld [vmem:[%s12108_s3 + $0x3] ss:$0 sm:$0xff]  ;;  %6644 = vmatpush.msra.mxu1 %v6510_v37 }
 0x84a   : > { %v5673_v19 = vpop.f32.mrf.mxu2  ;;  %v5786_v34 = vpop.f32.mrf.mxu3 }
 0x84b   : > { %v11327_v35 = vpop.f32.mrf.mxu0  ;;  %v11329_v24 = vpop.f32.mrf.mxu1  ;;  %v11331_v59 = vadd.f32 %v5786_v34, %v5673_v19 }
 0x84d   : > { %12605 = vst [vmem:[#allocation45_spill] sm:$0xff] %v11331_v59  ;;  %5931 = vmatmul.f32.gmra.mxu0 %v11331_v59  ;;  %6044 = vmatmul.f32.gmra.mxu1 %v11333_v40  ;;  %v11344_v40 = vadd.f32 %v5242_v21, %v5210_v15  ;;  %v12613_v15 = vld [vmem:[#allocation93_spill] sm:$0xff] }
 0x84e   : > { %v5243_v60 = vadd.f32 %v12614_v33, %v12613_v15  ;;  %v12617_v15 = vld [vmem:[#allocation26_spill] sm:$0xff] }
 0x84f   : > { %12611 = vst [vmem:[#allocation35_spill] sm:$0xff] %v11344_v40 }
 0x850   : > { %v11366_v29 = vadd.f32 %v5243_v60, %v5211_v7 }
 0x852   : > { %v5676_v28 = vpop.f32.mrf.mxu2  ;;  %v5789_v9 = vpop.f32.mrf.mxu3  ;;  %12616 = vst [vmem:[#allocation24_spill] sm:$0xff] %v11366_v29 }
 0x853   : > { %v11342_v51 = vadd.f32 %v5789_v9, %v5676_v28  ;;  %v5887_v19 = vpop.f32.mrf.mxu0  ;;  %v6000_v34 = vpop.f32.mrf.mxu1  ;;  %v5153_v9 = vadd.f32 %v11082_v49, %v11080_v42  ;;  %v12618_v49 = vld [vmem:[#allocation41_spill] sm:$0xff] }
 0x854   : > { %v6001_v25 = vadd.f32 %v6000_v34, %v5887_v19 }
 0x855   : > { %12610 = vst [vmem:[#allocation46_spill] sm:$0xff] %v11342_v51  ;;  %5934 = vmatmul.f32.gmra.mxu0 %v11342_v51  ;;  %6047 = vmatmul.f32.gmra.mxu1 %v11344_v40  ;;  %v5212_v33 = vadd.f32 %v5153_v9, %v12617_v15 }
 0x856   : > { %v6096_v6 = vadd.f32 %v6001_v25, %v11048_v55 }
 0x858   : > { %v11356_v11 = vadd.f32 %v11349_v0, %v6096_v6  ;;  %v6494_v6 = vld [vmem:[#allocation9 + $0x628] sm:$0xff] }
 0x859   : > { %6531 = vmatpush.msra.mxu0 %v6494_v6 }
 0x85a   : > { %6214 = vmatmul.f32.vlgmr.msra.gmra.mxu2 %v11356_v11  ;;  %6327 = vmatmul.f32.vlgmr.msra.gmra.mxu3 %v11356_v11  ;;  %v5679_v21 = vpop.f32.mrf.mxu2  ;;  %v5792_v28 = vpop.f32.mrf.mxu3 }
 0x85b   : > { %v11364_v26 = vadd.f32 %v5792_v28, %v5679_v21  ;;  %v5890_v32 = vpop.f32.mrf.mxu0  ;;  %v6003_v19 = vpop.f32.mrf.mxu1  ;;  %v12619_v21 = vld [vmem:[#allocation71_spill] sm:$0xff] }
 0x85c   : > { %v6004_v34 = vadd.f32 %v6003_v19, %v5890_v32  ;;  %v5244_v7 = vadd.f32 %v12619_v21, %v12618_v49  ;;  %v6806_v32 = vld [vmem:[#allocation8 + $0x7d0] sm:$0xff]  ;;  %v6807_v19 = vld [vmem:[#allocation8 + $0x7d8] sm:$0xff] }
 0x85d   : > { %12615 = vst [vmem:[#allocation86_spill] sm:$0xff] %v11364_v26  ;;  %5937 = vmatmul.f32.gmra.mxu0 %v11364_v26  ;;  %6050 = vmatmul.f32.gmra.mxu1 %v11366_v29  ;;  %v12622_v21 = vld [vmem:[#allocation61_spill] sm:$0xff] }
 0x85e   : > { %v6097_v25 = vadd.f32 %v6004_v34, %v11065_v52  ;;  %v5156_v34 = vadd.f32 %v11101_v57, %v11099_v45  ;;  %6814 = vmatpush.msrb.mxu2 %v6806_v32  ;;  %6927 = vmatpush.msrb.mxu3 %v6807_v19  ;;  %v12623_v45 = vld [vmem:[#allocation94_spill] sm:$0xff]  ;;  %v12624_v57 = vld [vmem:[#allocation51_spill] sm:$0xff] }
 0x860   : > { %v11373_v42 = vadd.f32 %v11349_v0, %v6097_v25  ;;  %v11383_v25 = vadd.f32 %v5244_v7, %v5212_v33  ;;  %v5213_v29 = vadd.f32 %v5156_v34, %v12622_v21  ;;  %v6509_v21 = vld [vmem:[#allocation9 + $0x6a0] sm:$0xff] }
 0x861   : > { %6645 = vmatpush.msra.mxu1 %v6509_v21 }
 0x862   : > { %6217 = vmatmul.f32.gmra.mxu2 %v11373_v42  ;;  %6330 = vmatmul.f32.gmra.mxu3 %v11373_v42  ;;  %v5682_v60 = vpop.f32.mrf.mxu2  ;;  %v5795_v28 = vpop.f32.mrf.mxu3  ;;  %12621 = vst [vmem:[#allocation47_spill] sm:$0xff] %v11383_v25 }
 0x863   : > { %v11381_v9 = vadd.f32 %v5795_v28, %v5682_v60  ;;  %v5893_v6 = vpop.f32.mrf.mxu0  ;;  %v6006_v37 = vpop.f32.mrf.mxu1  ;;  %v5245_v60 = vadd.f32 %v12624_v57, %v12623_v45  ;;  %v5159_v28 = vadd.f32 %v11120_v58, %v11118_v3  ;;  %v12627_v45 = vld [vmem:[#allocation82_spill] sm:$0xff] }
 0x864   : > { %v6007_v15 = vadd.f32 %v6006_v37, %v5893_v6  ;;  %v12628_v58 = vld [vmem:[#allocation42_spill] sm:$0xff] }
 0x865   : > { %12620 = vst [vmem:[#allocation37_spill] sm:$0xff] %v11381_v9  ;;  %5940 = vmatmul.f32.gmra.mxu0 %v11381_v9  ;;  %6053 = vmatmul.f32.gmra.mxu1 %v11383_v25  ;;  %v11400_v34 = vadd.f32 %v5245_v60, %v5213_v29  ;;  %v5214_v57 = vadd.f32 %v5159_v28, %v12627_v45 }
 0x866   : > { %v6098_v49 = vadd.f32 %v6007_v15, %v11084_v30 }
 0x867   : > { %12626 = vst [vmem:[#allocation66_spill] sm:$0xff] %v11400_v34 }
 0x868   : > { %v11390_v40 = vadd.f32 %v11349_v0, %v6098_v49  ;;  %v6493_v49 = vld [vmem:[#allocation9 + $0x620] sm:$0xff] }
 0x869   : > { %6532 = vmatpush.msra.mxu0 %v6493_v49 }
 0x86a   : > { %6220 = vmatmul.f32.gmra.mxu2 %v11390_v40  ;;  %6333 = vmatmul.f32.gmra.mxu3 %v11390_v40  ;;  %v5685_v33 = vpop.f32.mrf.mxu2  ;;  %v5798_v7 = vpop.f32.mrf.mxu3 }
 0x86b   : > { %v11398_v32 = vadd.f32 %v5798_v7, %v5685_v33  ;;  %v5896_v19 = vpop.f32.mrf.mxu0  ;;  %v6009_v6 = vpop.f32.mrf.mxu1  ;;  %v12629_v33 = vld [vmem:[#allocation72_spill] sm:$0xff] }
 0x86c   : > { %v6010_v37 = vadd.f32 %v6009_v6, %v5896_v19  ;;  %v5246_v29 = vadd.f32 %v12629_v33, %v12628_v58  ;;  %v6804_v19 = vld [vmem:[#allocation8 + $0x7c0] sm:$0xff]  ;;  %v6805_v6 = vld [vmem:[#allocation8 + $0x7c8] sm:$0xff] }
 0x86d   : > { %12625 = vst [vmem:[#allocation32_spill] sm:$0xff] %v11398_v32  ;;  %5943 = vmatmul.f32.gmra.mxu0 %v11398_v32  ;;  %6056 = vmatmul.f32.gmra.mxu1 %v11400_v34  ;;  %v12632_v33 = vld [vmem:[#allocation27_spill] sm:$0xff] }
 0x86e   : > { %v6099_v15 = vadd.f32 %v6010_v37, %v11103_v20  ;;  %v5162_v37 = vadd.f32 %v11139_v5, %v11137_v8  ;;  %6815 = vmatpush.msrb.mxu2 %v6804_v19  ;;  %6928 = vmatpush.msrb.mxu3 %v6805_v6  ;;  %v12633_v8 = vld [vmem:[#allocation95_spill] sm:$0xff]  ;;  %v12634_v5 = vld [vmem:[#allocation52_spill] sm:$0xff] }
 0x870   : > { %v11407_v3 = vadd.f32 %v11349_v0, %v6099_v15  ;;  %v11417_v15 = vadd.f32 %v5246_v29, %v5214_v57  ;;  %v5215_v34 = vadd.f32 %v5162_v37, %v12632_v33  ;;  %v6508_v33 = vld [vmem:[#allocation9 + $0x698] sm:$0xff] }
 0x871   : > { %6646 = vmatpush.msra.mxu1 %v6508_v33 }
 0x872   : > { %6223 = vmatmul.f32.gmra.mxu2 %v11407_v3  ;;  %6336 = vmatmul.f32.gmra.mxu3 %v11407_v3  ;;  %v5688_v60 = vpop.f32.mrf.mxu2  ;;  %v5801_v7 = vpop.f32.mrf.mxu3  ;;  %12631 = vst [vmem:[#allocation39_spill] sm:$0xff] %v11417_v15 }
 0x873   : > { %v11415_v28 = vadd.f32 %v5801_v7, %v5688_v60  ;;  %v5899_v49 = vpop.f32.mrf.mxu0  ;;  %v6012_v21 = vpop.f32.mrf.mxu1  ;;  %v5247_v60 = vadd.f32 %v12634_v5, %v12633_v8  ;;  %v5165_v7 = vadd.f32 %v11158_v41, %v11156_v46  ;;  %v12637_v8 = vld [vmem:[#allocation62_spill] sm:$0xff]  ;;  %v12638_v41 = vld [vmem:[#allocation73_spill] sm:$0xff] }
 0x874   : > { %v6013_v45 = vadd.f32 %v6012_v21, %v5899_v49 }
 0x875   : > { %12630 = vst [vmem:[#allocation59_spill] sm:$0xff] %v11415_v28  ;;  %5946 = vmatmul.f32.gmra.mxu0 %v11415_v28  ;;  %6059 = vmatmul.f32.gmra.mxu1 %v11417_v15  ;;  %v11434_v37 = vadd.f32 %v5247_v60, %v5215_v34  ;;  %v5216_v5 = vadd.f32 %v5165_v7, %v12637_v8 }
 0x876   : > { %v6100_v58 = vadd.f32 %v6013_v45, %v11122_v38 }
 0x877   : > { %12636 = vst [vmem:[#allocation87_spill] sm:$0xff] %v11434_v37 }
 0x878   : > { %v11424_v25 = vadd.f32 %v11349_v0, %v6100_v58  ;;  %v6492_v58 = vld [vmem:[#allocation9 + $0x618] sm:$0xff] }
 0x879   : > { %6533 = vmatpush.msra.mxu0 %v6492_v58 }
 0x87a   : > { %6226 = vmatmul.f32.gmra.mxu2 %v11424_v25  ;;  %6339 = vmatmul.f32.gmra.mxu3 %v11424_v25  ;;  %v5691_v57 = vpop.f32.mrf.mxu2  ;;  %v5804_v29 = vpop.f32.mrf.mxu3 }
 0x87b   : > { %v11432_v19 = vadd.f32 %v5804_v29, %v5691_v57  ;;  %v5902_v6 = vpop.f32.mrf.mxu0  ;;  %v6015_v49 = vpop.f32.mrf.mxu1  ;;  %v12639_v57 = vld [vmem:[#allocation96_spill] sm:$0xff] }
 0x87c   : > { %v6016_v21 = vadd.f32 %v6015_v49, %v5902_v6  ;;  %v5248_v34 = vadd.f32 %v12639_v57, %v12638_v41  ;;  %v6802_v6 = vld [vmem:[#allocation8 + $0x7b0] sm:$0xff]  ;;  %v6803_v49 = vld [vmem:[#allocation8 + $0x7b8] sm:$0xff]  ;;  %v12642_v57 = vld [vmem:[#allocation83_spill] sm:$0xff] }
 0x87d   : > { %12635 = vst [vmem:[#allocation48_spill] sm:$0xff] %v11432_v19  ;;  %5949 = vmatmul.f32.gmra.mxu0 %v11432_v19  ;;  %6062 = vmatmul.f32.gmra.mxu1 %v11434_v37 }
 0x87e   : > { %v6101_v45 = vadd.f32 %v6016_v21, %v11141_v54  ;;  %v5168_v21 = vadd.f32 %v11177_v27, %v11175_v31  ;;  %6816 = vmatpush.msrb.mxu2 %v6802_v6  ;;  %6929 = vmatpush.msrb.mxu3 %v6803_v49  ;;  %v12643_v31 = vld [vmem:[#allocation53_spill] sm:$0xff]  ;;  %v12644_v27 = vld [vmem:[#allocation43_spill] sm:$0xff] }
 0x880   : > { %v11441_v46 = vadd.f32 %v11349_v0, %v6101_v45  ;;  %v11451_v45 = vadd.f32 %v5248_v34, %v5216_v5  ;;  %v5217_v37 = vadd.f32 %v5168_v21, %v12642_v57  ;;  %v6507_v57 = vld [vmem:[#allocation9 + $0x690] sm:$0xff] }
 0x881   : > { %6647 = vmatpush.msra.mxu1 %v6507_v57 }
 0x882   : > { %6229 = vmatmul.f32.gmra.mxu2 %v11441_v46  ;;  %6342 = vmatmul.f32.gmra.mxu3 %v11441_v46  ;;  %v5694_v60 = vpop.f32.mrf.mxu2  ;;  %v5807_v29 = vpop.f32.mrf.mxu3  ;;  %12641 = vst [vmem:[#allocation80_spill] sm:$0xff] %v11451_v45 }
 0x883   : > { %v11449_v7 = vadd.f32 %v5807_v29, %v5694_v60  ;;  %v5905_v58 = vpop.f32.mrf.mxu0  ;;  %v6018_v33 = vpop.f32.mrf.mxu1  ;;  %v5249_v60 = vadd.f32 %v12644_v27, %v12643_v31  ;;  %v5171_v29 = vadd.f32 %v11196_v14, %v11194_v63  ;;  %v12647_v31 = vld [vmem:[#allocation28_spill] sm:$0xff]  ;;  %v12648_v14 = vld [vmem:[#allocation19_spill] sm:$0xff] }
 0x884   : > { %v6019_v8 = vadd.f32 %v6018_v33, %v5905_v58 }
 0x885   : > { %12640 = vst [vmem:[#allocation34_spill] sm:$0xff] %v11449_v7  ;;  %5952 = vmatmul.f32.gmra.mxu0 %v11449_v7  ;;  %6065 = vmatmul.f32.gmra.mxu1 %v11451_v45  ;;  %v11468_v21 = vadd.f32 %v5249_v60, %v5217_v37  ;;  %v5218_v27 = vadd.f32 %v5171_v29, %v12647_v31 }
 0x886   : > { %v6102_v41 = vadd.f32 %v6019_v8, %v11160_v47 }
 0x887   : > { %12646 = vst [vmem:[#allocation49_spill] sm:$0xff] %v11468_v21 }
 0x888   : > { %v11458_v15 = vadd.f32 %v11349_v0, %v6102_v41  ;;  %v6491_v41 = vld [vmem:[#allocation9 + $0x610] sm:$0xff] }
 0x889   : > { %6534 = vmatpush.msra.mxu0 %v6491_v41 }
 0x88a   : > { %6232 = vmatmul.f32.gmra.mxu2 %v11458_v15  ;;  %6345 = vmatmul.f32.gmra.mxu3 %v11458_v15  ;;  %v5697_v5 = vpop.f32.mrf.mxu2  ;;  %v5810_v34 = vpop.f32.mrf.mxu3 }
 0x88b   : > { %v11466_v6 = vadd.f32 %v5810_v34, %v5697_v5  ;;  %v5908_v49 = vpop.f32.mrf.mxu0  ;;  %v6021_v58 = vpop.f32.mrf.mxu1  ;;  %v12649_v5 = vld [vmem:[#allocation74_spill] sm:$0xff] }
 0x88c   : > { %v6022_v33 = vadd.f32 %v6021_v58, %v5908_v49  ;;  %v5250_v37 = vadd.f32 %v12649_v5, %v12648_v14  ;;  %v6800_v49 = vld [vmem:[#allocation8 + $0x7a0] sm:$0xff]  ;;  %v6801_v58 = vld [vmem:[#allocation8 + $0x7a8] sm:$0xff] }
 0x88d   : > { %12645 = vst [vmem:[#allocation90_spill] sm:$0xff] %v11466_v6  ;;  %5955 = vmatmul.f32.gmra.mxu0 %v11466_v6  ;;  %6068 = vmatmul.f32.gmra.mxu1 %v11468_v21  ;;  %v12652_v5 = vld [vmem:[#allocation63_spill] sm:$0xff] }
 0x88e   : > { %v6103_v8 = vadd.f32 %v6022_v33, %v11179_v48  ;;  %v5174_v33 = vadd.f32 %v11215_v22, %v11213_v61  ;;  %6817 = vmatpush.msrb.mxu2 %v6800_v49  ;;  %6930 = vmatpush.msrb.mxu3 %v6801_v58  ;;  %v12653_v61 = vld [vmem:[#allocation75_spill] sm:$0xff]  ;;  %v12654_v22 = vld [vmem:[#allocation54_spill] sm:$0xff] }
 0x890   : > { %v11475_v63 = vadd.f32 %v11349_v0, %v6103_v8  ;;  %v11485_v8 = vadd.f32 %v5250_v37, %v5218_v27  ;;  %v5219_v21 = vadd.f32 %v5174_v33, %v12652_v5  ;;  %v6506_v5 = vld [vmem:[#allocation9 + $0x688] sm:$0xff] }
 0x891   : > { %6648 = vmatpush.msra.mxu1 %v6506_v5 }
 0x892   : > { %6235 = vmatmul.f32.gmra.mxu2 %v11475_v63  ;;  %6348 = vmatmul.f32.gmra.mxu3 %v11475_v63  ;;  %v5700_v60 = vpop.f32.mrf.mxu2  ;;  %v5813_v34 = vpop.f32.mrf.mxu3  ;;  %12651 = vst [vmem:[#allocation88_spill] sm:$0xff] %v11485_v8 }
 0x893   : > { %v11483_v29 = vadd.f32 %v5813_v34, %v5700_v60  ;;  %v5911_v41 = vpop.f32.mrf.mxu0  ;;  %v6024_v57 = vpop.f32.mrf.mxu1  ;;  %v5251_v60 = vadd.f32 %v12654_v22, %v12653_v61  ;;  %v5177_v34 = vadd.f32 %v11234_v39, %v11232_v12  ;;  %v12657_v61 = vld [vmem:[#allocation84_spill] sm:$0xff]  ;;  %v12658_v39 = vld [vmem:[#allocation55_spill] sm:$0xff] }
 0x894   : > { %v6025_v31 = vadd.f32 %v6024_v57, %v5911_v41 }
 0x895   : > { %12650 = vst [vmem:[#allocation67_spill] sm:$0xff] %v11483_v29  ;;  %5958 = vmatmul.f32.gmra.mxu0 %v11483_v29  ;;  %6071 = vmatmul.f32.gmra.mxu1 %v11485_v8  ;;  %v11502_v33 = vadd.f32 %v5251_v60, %v5219_v21  ;;  %v5220_v22 = vadd.f32 %v5177_v34, %v12657_v61 }
 0x896   : > { %v6104_v14 = vadd.f32 %v6025_v31, %v11198_v62 }
 0x897   : > { %12656 = vst [vmem:[#allocation70_spill] sm:$0xff] %v11502_v33 }
 0x898   : > { %v11492_v45 = vadd.f32 %v11349_v0, %v6104_v14  ;;  %v6490_v14 = vld [vmem:[#allocation9 + $0x608] sm:$0xff] }
 0x899   : > { %6535 = vmatpush.msra.mxu0 %v6490_v14 }
 0x89a   : > { %6238 = vmatmul.f32.gmra.mxu2 %v11492_v45  ;;  %6351 = vmatmul.f32.gmra.mxu3 %v11492_v45  ;;  %v5703_v27 = vpop.f32.mrf.mxu2  ;;  %v5816_v37 = vpop.f32.mrf.mxu3 }
 0x89b   : > { %v11500_v49 = vadd.f32 %v5816_v37, %v5703_v27  ;;  %v5914_v58 = vpop.f32.mrf.mxu0  ;;  %v6027_v41 = vpop.f32.mrf.mxu1  ;;  %v12659_v27 = vld [vmem:[#allocation20_spill] sm:$0xff] }
 0x89c   : > { %v6028_v57 = vadd.f32 %v6027_v41, %v5914_v58  ;;  %v5252_v21 = vadd.f32 %v12659_v27, %v12658_v39  ;;  %v6798_v58 = vld [vmem:[#allocation8 + $0x790] sm:$0xff]  ;;  %v6799_v41 = vld [vmem:[#allocation8 + $0x798] sm:$0xff] }
 0x89d   : > { %12655 = vst [vmem:[#allocation25_spill] sm:$0xff] %v11500_v49  ;;  %5961 = vmatmul.f32.gmra.mxu0 %v11500_v49  ;;  %6074 = vmatmul.f32.gmra.mxu1 %v11502_v33  ;;  %v12662_v27 = vld [vmem:[#allocation29_spill] sm:$0xff] }
 0x89e   : > { %v6105_v31 = vadd.f32 %v6028_v57, %v11217_v43  ;;  %v5180_v57 = vadd.f32 %v11253_v10, %v11251_v17  ;;  %6818 = vmatpush.msrb.mxu2 %v6798_v58  ;;  %6931 = vmatpush.msrb.mxu3 %v6799_v41  ;;  %v12663_v17 = vld [vmem:[#allocation21_spill] sm:$0xff]  ;;  %v12664_v10 = vld [vmem:[#allocation76_spill] sm:$0xff] }
 0x8a0   : > { %v11509_v12 = vadd.f32 %v11349_v0, %v6105_v31  ;;  %v11519_v31 = vadd.f32 %v5252_v21, %v5220_v22  ;;  %v5221_v33 = vadd.f32 %v5180_v57, %v12662_v27  ;;  %v6505_v27 = vld [vmem:[#allocation9 + $0x680] sm:$0xff] }
 0x8a1   : > { %6649 = vmatpush.msra.mxu1 %v6505_v27 }
 0x8a2   : > { %6241 = vmatmul.f32.gmra.mxu2 %v11509_v12  ;;  %6354 = vmatmul.f32.gmra.mxu3 %v11509_v12  ;;  %v5706_v60 = vpop.f32.mrf.mxu2  ;;  %v5819_v37 = vpop.f32.mrf.mxu3  ;;  %12661 = vst [vmem:[#allocation60_spill] sm:$0xff] %v11519_v31 }
 0x8a3   : > { %v11517_v34 = vadd.f32 %v5819_v37, %v5706_v60  ;;  %v5917_v14 = vpop.f32.mrf.mxu0  ;;  %v6030_v5 = vpop.f32.mrf.mxu1  ;;  %v5253_v60 = vadd.f32 %v12664_v10, %v12663_v17  ;;  %v5183_v37 = vadd.f32 %v11272_v44, %v11270_v1  ;;  %v12667_v17 = vld [vmem:[#allocation64_spill] sm:$0xff]  ;;  %v12668_v1 = vld [vmem:[#allocation77_spill] sm:$0xff] }
 0x8a4   : > { %v6031_v61 = vadd.f32 %v6030_v5, %v5917_v14 }
 0x8a5   : > { %12660 = vst [vmem:[#allocation91_spill] sm:$0xff] %v11517_v34  ;;  %5964 = vmatmul.f32.gmra.mxu0 %v11517_v34  ;;  %6077 = vmatmul.f32.gmra.mxu1 %v11519_v31  ;;  %v11536_v57 = vadd.f32 %v5253_v60, %v5221_v33  ;;  %v5222_v10 = vadd.f32 %v5183_v37, %v12667_v17 }
 0x8a6   : > { %v6106_v39 = vadd.f32 %v6031_v61, %v11236_v50 }
 0x8a7   : > { %12666 = vst [vmem:[#allocation40_spill] sm:$0xff] %v11536_v57 }
 0x8a8   : > { %v11526_v8 = vadd.f32 %v11349_v0, %v6106_v39  ;;  %v6489_v39 = vld [vmem:[#allocation9 + $0x600] sm:$0xff] }
 0x8a9   : > { %6536 = vmatpush.msra.mxu0 %v6489_v39 }
 0x8aa   : > { %6244 = vmatmul.f32.gmra.mxu2 %v11526_v8  ;;  %6357 = vmatmul.f32.gmra.mxu3 %v11526_v8  ;;  %v5709_v22 = vpop.f32.mrf.mxu2  ;;  %v5822_v21 = vpop.f32.mrf.mxu3 }
 0x8ab   : > { %v11534_v58 = vadd.f32 %v5822_v21, %v5709_v22  ;;  %v5920_v41 = vpop.f32.mrf.mxu0  ;;  %v6033_v14 = vpop.f32.mrf.mxu1  ;;  %v12669_v22 = vld [vmem:[#allocation56_spill] sm:$0xff] }
 0x8ac   : > { %v6034_v5 = vadd.f32 %v6033_v14, %v5920_v41  ;;  %v5254_v33 = vadd.f32 %v12669_v22, %v12668_v1  ;;  %v6796_v41 = vld [vmem:[#allocation8 + $0x780] sm:$0xff]  ;;  %v6797_v14 = vld [vmem:[#allocation8 + $0x788] sm:$0xff]  ;;  %v12672_v22 = vld [vmem:[#allocation85_spill] sm:$0xff] }
 0x8ad   : > { %12665 = vst [vmem:[#allocation50_spill] sm:$0xff] %v11534_v58  ;;  %5967 = vmatmul.f32.gmra.mxu0 %v11534_v58  ;;  %6080 = vmatmul.f32.gmra.mxu1 %v11536_v57 }
 0x8ae   : > { %v6107_v61 = vadd.f32 %v6034_v5, %v11255_v53  ;;  %v5186_v5 = vadd.f32 %v11291_v4, %v11289_v18  ;;  %6819 = vmatpush.msrb.mxu2 %v6796_v41  ;;  %6932 = vmatpush.msrb.mxu3 %v6797_v14  ;;  %v12673_v18 = vld [vmem:[#allocation57_spill] sm:$0xff]  ;;  %v12674_v4 = vld [vmem:[#allocation22_spill] sm:$0xff] }
 0x8b0   : > { %v11543_v44 = vadd.f32 %v11349_v0, %v6107_v61  ;;  %v11553_v61 = vadd.f32 %v5254_v33, %v5222_v10  ;;  %v5223_v57 = vadd.f32 %v5186_v5, %v12672_v22 }
 0x8b2   : > { %6247 = vmatmul.f32.gmra.mxu2 %v11543_v44  ;;  %6360 = vmatmul.f32.gmra.mxu3 %v11543_v44  ;;  %v5712_v60 = vpop.f32.mrf.mxu2  ;;  %v5825_v21 = vpop.f32.mrf.mxu3  ;;  %12671 = vst [vmem:[#allocation93_spill] sm:$0xff] %v11553_v61 }
 0x8b3   : > { %v11551_v37 = vadd.f32 %v5825_v21, %v5712_v60  ;;  %v5923_v39 = vpop.f32.mrf.mxu0  ;;  %v6036_v27 = vpop.f32.mrf.mxu1  ;;  %v5255_v60 = vadd.f32 %v12674_v4, %v12673_v18  ;;  %v5189_v21 = vadd.f32 %v11310_v23, %v11308_v36  ;;  %v12677_v4 = vld [vmem:[#allocation23_spill] sm:$0xff]  ;;  %v12678_v23 = vld [vmem:[#allocation78_spill] sm:$0xff] }
 0x8b4   : > { %v6037_v17 = vadd.f32 %v6036_v27, %v5923_v39  ;;  %v5256_v36 = vadd.f32 %v12678_v23, %v12677_v4  ;;  %v12681_v23 = vld [vmem:[#allocation65_spill] sm:$0xff] }
 0x8b5   : > { %12670 = vst [vmem:[#allocation81_spill] sm:$0xff] %v11551_v37  ;;  %5970 = vmatmul.f32.gmra.mxu0 %v11551_v37  ;;  %6083 = vmatmul.f32.gmra.mxu1 %v11553_v61  ;;  %v11570_v5 = vadd.f32 %v5255_v60, %v5223_v57 }
 0x8b6   : > { %v6108_v1 = vadd.f32 %v6037_v17, %v11274_v56 }
 0x8b7   : > { %12675 = vst [vmem:[#allocation92_spill] sm:$0xff] %v11570_v5 }
 0x8b8   : > { %v11560_v31 = vadd.f32 %v11349_v0, %v6108_v1  ;;  %v12676_v1 = vld [vmem:[#allocation30_spill] sm:$0xff] }
 0x8b9   : > { %v5224_v22 = vadd.f32 %v5189_v21, %v12676_v1 }
 0x8ba   : > { %6250 = vmatmul.f32.gmra.mxu2 %v11560_v31  ;;  %6363 = vmatmul.f32.gmra.mxu3 %v11560_v31  ;;  %v5715_v10 = vpop.f32.mrf.mxu2  ;;  %v5828_v33 = vpop.f32.mrf.mxu3 }
 0x8bb   : > { %v11568_v41 = vadd.f32 %v5828_v33, %v5715_v10  ;;  %v5926_v14 = vpop.f32.mrf.mxu0  ;;  %v6039_v39 = vpop.f32.mrf.mxu1  ;;  %v6794_v10 = vld [vmem:[#allocation8 + $0x770] sm:$0xff]  ;;  %v6795_v33 = vld [vmem:[#allocation8 + $0x778] sm:$0xff] }
 0x8bc   : > { %v6040_v27 = vadd.f32 %v6039_v39, %v5926_v14  ;;  %v5192_v14 = vadd.f32 %v11329_v24, %v11327_v35  ;;  %6820 = vmatpush.msrb.mxu2 %v6794_v10  ;;  %6933 = vmatpush.msrb.mxu3 %v6795_v33  ;;  %v7118_v35 = vld [vmem:[#allocation9 + $0x778] sm:$0xff] }
 0x8bd   : > { %5973 = vmatmul.f32.gmra.mxu0 %v11568_v41  ;;  %6086 = vmatmul.f32.gmra.mxu1 %v11570_v5  ;;  %v7134_v24 = vld [vmem:[#allocation9 + $0x7f8] sm:$0xff] }
 0x8be   : > { %v6109_v17 = vadd.f32 %v6040_v27, %v11293_v2  ;;  %v5225_v5 = vadd.f32 %v5192_v14, %v12681_v23  ;;  %7135 = vmatpush.msrb.mxu0 %v7118_v35  ;;  %7248 = vmatpush.msrb.mxu1 %v7134_v24  ;;  %v6792_v35 = vld [vmem:[#allocation8 + $0x760] sm:$0xff]  ;;  %v6793_v24 = vld [vmem:[#allocation8 + $0x768] sm:$0xff] }
 0x8bf   : > { %6821 = vmatpush.msrb.mxu2 %v6792_v35  ;;  %6934 = vmatpush.msrb.mxu3 %v6793_v24 }
 0x8c0   : > { %v11577_v18 = vadd.f32 %v11349_v0, %v6109_v17  ;;  %v11587_v17 = vadd.f32 %v5256_v36, %v5224_v22 }
 0x8c2   : > { %6253 = vmatmul.f32.gmra.mxu2 %v11577_v18  ;;  %6366 = vmatmul.f32.gmra.mxu3 %v11577_v18  ;;  %v5718_v57 = vpop.f32.mrf.mxu2  ;;  %v5831_v60 = vpop.f32.mrf.mxu3  ;;  %12680 = vst [vmem:[#allocation41_spill] sm:$0xff] %v11587_v17 }
 0x8c3   : > { %v11585_v39 = vadd.f32 %v5831_v60, %v5718_v57  ;;  %v5929_v21 = vpop.f32.mrf.mxu0  ;;  %v6042_v27 = vpop.f32.mrf.mxu1  ;;  %v12682_v57 = vld [vmem:[#allocation79_spill] sm:$0xff]  ;;  %v12683_v60 = vld [vmem:[#allocation58_spill] sm:$0xff] }
 0x8c4   : > { %v6043_v1 = vadd.f32 %v6042_v27, %v5929_v21  ;;  %v5257_v22 = vadd.f32 %v12683_v60, %v12682_v57 }
 0x8c5   : > { %12679 = vst [vmem:[#allocation26_spill] sm:$0xff] %v11585_v39  ;;  %5976 = vmatmul.f32.gmra.mxu0 %v11585_v39  ;;  %6089 = vmatmul.f32.gmra.mxu1 %v11587_v17 }
 0x8c6   : > { %v6110_v4 = vadd.f32 %v6043_v1, %v11312_v13  ;;  %v11602_v27 = vadd.f32 %v5257_v22, %v5225_v5 }
 0x8c8   : > { %v11594_v61 = vadd.f32 %v11349_v0, %v6110_v4  ;;  %12685 = vst [vmem:[#allocation61_spill] sm:$0xff] %v11602_v27 }
 0x8ca   : > { %6256 = vmatmul.f32.gmra.mxu2 %v11594_v61  ;;  %6369 = vmatmul.f32.gmra.mxu3 %v11594_v61  ;;  %v5721_v36 = vpop.f32.mrf.mxu2  ;;  %v5834_v10 = vpop.f32.mrf.mxu3 }
 0x8cb   : > { %v11600_v33 = vadd.f32 %v5834_v10, %v5721_v36  ;;  %v5932_v21 = vpop.f32.mrf.mxu0  ;;  %v6045_v14 = vpop.f32.mrf.mxu1  ;;  %v7117_v10 = vld [vmem:[#allocation9 + $0x770] sm:$0xff] }
 0x8cc   : > { %v6046_v1 = vadd.f32 %v6045_v14, %v5932_v21  ;;  %v7133_v21 = vld [vmem:[#allocation9 + $0x7f0] sm:$0xff]  ;;  %7136 = vmatpush.msrb.mxu0 %v7117_v10  ;;  %v6791_v10 = vld [vmem:[#allocation8 + $0x758] sm:$0xff] }
 0x8cd   : > { %12684 = vst [vmem:[#allocation71_spill] sm:$0xff] %v11600_v33  ;;  %5979 = vmatmul.f32.gmra.mxu0 %v11600_v33  ;;  %6092 = vmatmul.f32.gmra.mxu1 %v11602_v27 }
 0x8ce   : > { %v6111_v4 = vadd.f32 %v6046_v1, %v11331_v59  ;;  %7249 = vmatpush.msrb.mxu1 %v7133_v21  ;;  %6935 = vmatpush.msrb.mxu3 %v6791_v10 }
 0x8d0   : > { %v11608_v23 = vadd.f32 %v11349_v0, %v6111_v4 }
 0x8d2   : > { %6259 = vmatmul.f32.gmra.mxu2 %v11608_v23  ;;  %6372 = vmatmul.f32.gmra.mxu3 %v11608_v23 }
 0x8d3   : > { %v5935_v57 = vpop.f32.mrf.mxu0  ;;  %v6048_v60 = vpop.f32.mrf.mxu1 }
 0x8d4   : > { %v6049_v5 = vadd.f32 %v6048_v60, %v5935_v57 }
 0x8d6   : > { %v6112_v22 = vadd.f32 %v6049_v5, %v11342_v51 }
 0x8d8   : > { %v11614_v36 = vadd.f32 %v11349_v0, %v6112_v22  ;;  %v6790_v22 = vld [vmem:[#allocation8 + $0x750] sm:$0xff] }
 0x8d9   : > { %6822 = vmatpush.msrb.mxu2 %v6790_v22 }
 0x8da   : > { %6262 = vmatmul.f32.gmra.mxu2 %v11614_v36  ;;  %6375 = vmatmul.f32.gmra.mxu3 %v11614_v36 }
 0x8db   : > { %v5938_v14 = vpop.f32.mrf.mxu0  ;;  %v6051_v1 = vpop.f32.mrf.mxu1 }
 0x8dc   : > { %v6052_v4 = vadd.f32 %v6051_v1, %v5938_v14 }
 0x8dd   : > { %v6215_v27 = vpop.f32.mrf.mxu2  ;;  %v6328_v35 = vpop.f32.mrf.mxu3 }
 0x8de   : > { %v6113_v24 = vadd.f32 %v6052_v4, %v11364_v26  ;;  %v6424_v57 = vmax.f32 %v6215_v27, 0.0  ;;  %v6425_v60 = vmax.f32 %v6328_v35, 0.0  ;;  %v7132_v26 = vld [vmem:[#allocation9 + $0x7e8] sm:$0xff] }
 0x8df   : > { %7250 = vmatpush.msrb.mxu1 %v7132_v26  ;;  %v6788_v26 = vld [vmem:[#allocation8 + $0x740] sm:$0xff] }
 0x8e0   : > { %6537 = vmatmul.f32.vlgmr.msra.gmra.mxu0 %v6424_v57  ;;  %6650 = vmatmul.f32.vlgmr.msra.gmra.mxu1 %v6425_v60  ;;  %v11620_v5 = vadd.f32 %v11349_v0, %v6113_v24  ;;  %v7116_v60 = vld [vmem:[#allocation9 + $0x768] sm:$0xff] }
 0x8e1   : > { %7137 = vmatpush.msrb.mxu0 %v7116_v60  ;;  %6823 = vmatpush.msrb.mxu2 %v6788_v26 }
 0x8e2   : > { %6265 = vmatmul.f32.gmra.mxu2 %v11620_v5  ;;  %6378 = vmatmul.f32.gmra.mxu3 %v11620_v5 }
 0x8e3   : > { %v5941_v21 = vpop.f32.mrf.mxu0  ;;  %v6054_v17 = vpop.f32.mrf.mxu1 }
 0x8e4   : > { %v6055_v14 = vadd.f32 %v6054_v17, %v5941_v21 }
 0x8e5   : > { %v6218_v1 = vpop.f32.mrf.mxu2  ;;  %v6331_v4 = vpop.f32.mrf.mxu3 }
 0x8e6   : > { %v6114_v27 = vadd.f32 %v6055_v14, %v11381_v9  ;;  %v6426_v35 = vmax.f32 %v6218_v1, 0.0  ;;  %v6427_v57 = vmax.f32 %v6331_v4, 0.0 }
 0x8e8   : > { %6540 = vmatmul.f32.gmra.mxu0 %v6426_v35  ;;  %6653 = vmatmul.f32.gmra.mxu1 %v6427_v57  ;;  %v11626_v24 = vadd.f32 %v11349_v0, %v6114_v27  ;;  %v6789_v57 = vld [vmem:[#allocation8 + $0x748] sm:$0xff] }
 0x8e9   : > { %6936 = vmatpush.msrb.mxu3 %v6789_v57 }
 0x8ea   : > { %6268 = vmatmul.f32.gmra.mxu2 %v11626_v24  ;;  %6381 = vmatmul.f32.gmra.mxu3 %v11626_v24 }
 0x8eb   : > { %v5944_v17 = vpop.f32.mrf.mxu0  ;;  %v6057_v22 = vpop.f32.mrf.mxu1 }
 0x8ec   : > { %v6058_v10 = vadd.f32 %v6057_v22, %v5944_v17 }
 0x8ed   : > { %v6221_v21 = vpop.f32.mrf.mxu2  ;;  %v6334_v14 = vpop.f32.mrf.mxu3 }
 0x8ee   : > { %v6115_v1 = vadd.f32 %v6058_v10, %v11398_v32  ;;  %v6428_v4 = vmax.f32 %v6221_v21, 0.0  ;;  %v6429_v35 = vmax.f32 %v6334_v14, 0.0  ;;  %v7131_v32 = vld [vmem:[#allocation9 + $0x7e0] sm:$0xff] }
 0x8ef   : > { %7251 = vmatpush.msrb.mxu1 %v7131_v32  ;;  %v6786_v32 = vld [vmem:[#allocation8 + $0x730] sm:$0xff] }
 0x8f0   : > { %6543 = vmatmul.f32.gmra.mxu0 %v6428_v4  ;;  %6656 = vmatmul.f32.gmra.mxu1 %v6429_v35  ;;  %v11632_v27 = vadd.f32 %v11349_v0, %v6115_v1  ;;  %v7115_v35 = vld [vmem:[#allocation9 + $0x760] sm:$0xff] }
 0x8f1   : > { %7138 = vmatpush.msrb.mxu0 %v7115_v35  ;;  %6824 = vmatpush.msrb.mxu2 %v6786_v32 }
 0x8f2   : > { %6271 = vmatmul.f32.gmra.mxu2 %v11632_v27  ;;  %6384 = vmatmul.f32.gmra.mxu3 %v11632_v27 }
 0x8f3   : > { %v5947_v60 = vpop.f32.mrf.mxu0  ;;  %v6060_v9 = vpop.f32.mrf.mxu1 }
 0x8f4   : > { %v6061_v17 = vadd.f32 %v6060_v9, %v5947_v60 }
 0x8f5   : > { %v6224_v22 = vpop.f32.mrf.mxu2  ;;  %v6337_v10 = vpop.f32.mrf.mxu3 }
 0x8f6   : > { %v6116_v21 = vadd.f32 %v6061_v17, %v11415_v28  ;;  %v6430_v14 = vmax.f32 %v6224_v22, 0.0  ;;  %v6431_v4 = vmax.f32 %v6337_v10, 0.0 }
 0x8f8   : > { %6546 = vmatmul.f32.gmra.mxu0 %v6430_v14  ;;  %6659 = vmatmul.f32.gmra.mxu1 %v6431_v4  ;;  %v11638_v1 = vadd.f32 %v11349_v0, %v6116_v21  ;;  %v6787_v4 = vld [vmem:[#allocation8 + $0x738] sm:$0xff] }
 0x8f9   : > { %6937 = vmatpush.msrb.mxu3 %v6787_v4 }
 0x8fa   : > { %6274 = vmatmul.f32.gmra.mxu2 %v11638_v1  ;;  %6387 = vmatmul.f32.gmra.mxu3 %v11638_v1 }
 0x8fb   : > { %v5950_v9 = vpop.f32.mrf.mxu0  ;;  %v6063_v26 = vpop.f32.mrf.mxu1 }
 0x8fc   : > { %v6064_v57 = vadd.f32 %v6063_v26, %v5950_v9 }
 0x8fd   : > { %v6227_v60 = vpop.f32.mrf.mxu2  ;;  %v6340_v17 = vpop.f32.mrf.mxu3 }
 0x8fe   : > { %v6117_v22 = vadd.f32 %v6064_v57, %v11432_v19  ;;  %v6432_v10 = vmax.f32 %v6227_v60, 0.0  ;;  %v6433_v14 = vmax.f32 %v6340_v17, 0.0  ;;  %v7130_v19 = vld [vmem:[#allocation9 + $0x7d8] sm:$0xff] }
 0x8ff   : > { %7252 = vmatpush.msrb.mxu1 %v7130_v19  ;;  %v6784_v19 = vld [vmem:[#allocation8 + $0x720] sm:$0xff] }
 0x900   : > { %6549 = vmatmul.f32.gmra.mxu0 %v6432_v10  ;;  %6662 = vmatmul.f32.gmra.mxu1 %v6433_v14  ;;  %v11644_v21 = vadd.f32 %v11349_v0, %v6117_v22  ;;  %v7114_v14 = vld [vmem:[#allocation9 + $0x758] sm:$0xff] }
 0x901   : > { %7139 = vmatpush.msrb.mxu0 %v7114_v14  ;;  %6825 = vmatpush.msrb.mxu2 %v6784_v19 }
 0x902   : > { %6277 = vmatmul.f32.gmra.mxu2 %v11644_v21  ;;  %6390 = vmatmul.f32.gmra.mxu3 %v11644_v21 }
 0x903   : > { %v5953_v35 = vpop.f32.mrf.mxu0  ;;  %v6066_v28 = vpop.f32.mrf.mxu1 }
 0x904   : > { %v6067_v9 = vadd.f32 %v6066_v28, %v5953_v35 }
 0x905   : > { %v6230_v26 = vpop.f32.mrf.mxu2  ;;  %v6343_v57 = vpop.f32.mrf.mxu3 }
 0x906   : > { %v6118_v60 = vadd.f32 %v6067_v9, %v11449_v7  ;;  %v6434_v17 = vmax.f32 %v6230_v26, 0.0  ;;  %v6435_v10 = vmax.f32 %v6343_v57, 0.0 }
 0x908   : > { %6552 = vmatmul.f32.gmra.mxu0 %v6434_v17  ;;  %6665 = vmatmul.f32.gmra.mxu1 %v6435_v10  ;;  %v11650_v22 = vadd.f32 %v11349_v0, %v6118_v60  ;;  %v6785_v10 = vld [vmem:[#allocation8 + $0x728] sm:$0xff] }
 0x909   : > { %6938 = vmatpush.msrb.mxu3 %v6785_v10 }
 0x90a   : > { %6280 = vmatmul.f32.gmra.mxu2 %v11650_v22  ;;  %6393 = vmatmul.f32.gmra.mxu3 %v11650_v22 }
 0x90b   : > { %v5956_v28 = vpop.f32.mrf.mxu0  ;;  %v6069_v32 = vpop.f32.mrf.mxu1 }
 0x90c   : > { %v6070_v4 = vadd.f32 %v6069_v32, %v5956_v28 }
 0x90d   : > { %v6233_v35 = vpop.f32.mrf.mxu2  ;;  %v6346_v9 = vpop.f32.mrf.mxu3 }
 0x90e   : > { %v6119_v26 = vadd.f32 %v6070_v4, %v11466_v6  ;;  %v6436_v57 = vmax.f32 %v6233_v35, 0.0  ;;  %v6437_v17 = vmax.f32 %v6346_v9, 0.0  ;;  %v7129_v6 = vld [vmem:[#allocation9 + $0x7d0] sm:$0xff] }
 0x90f   : > { %7253 = vmatpush.msrb.mxu1 %v7129_v6  ;;  %v6782_v6 = vld [vmem:[#allocation8 + $0x710] sm:$0xff] }
 0x910   : > { %6555 = vmatmul.f32.gmra.mxu0 %v6436_v57  ;;  %6668 = vmatmul.f32.gmra.mxu1 %v6437_v17  ;;  %v11656_v60 = vadd.f32 %v11349_v0, %v6119_v26  ;;  %v7113_v17 = vld [vmem:[#allocation9 + $0x750] sm:$0xff] }
 0x911   : > { %7140 = vmatpush.msrb.mxu0 %v7113_v17  ;;  %6826 = vmatpush.msrb.mxu2 %v6782_v6 }
 0x912   : > { %6283 = vmatmul.f32.gmra.mxu2 %v11656_v60  ;;  %6396 = vmatmul.f32.gmra.mxu3 %v11656_v60 }
 0x913   : > { %v5959_v14 = vpop.f32.mrf.mxu0  ;;  %v6072_v7 = vpop.f32.mrf.mxu1 }
 0x914   : > { %v6073_v28 = vadd.f32 %v6072_v7, %v5959_v14 }
 0x915   : > { %v6236_v32 = vpop.f32.mrf.mxu2  ;;  %v6349_v4 = vpop.f32.mrf.mxu3 }
 0x916   : > { %v6120_v35 = vadd.f32 %v6073_v28, %v11483_v29  ;;  %v6438_v9 = vmax.f32 %v6236_v32, 0.0  ;;  %v6439_v57 = vmax.f32 %v6349_v4, 0.0 }
 0x918   : > { %6558 = vmatmul.f32.gmra.mxu0 %v6438_v9  ;;  %6671 = vmatmul.f32.gmra.mxu1 %v6439_v57  ;;  %v11662_v26 = vadd.f32 %v11349_v0, %v6120_v35  ;;  %v6783_v57 = vld [vmem:[#allocation8 + $0x718] sm:$0xff] }
 0x919   : > { %6939 = vmatpush.msrb.mxu3 %v6783_v57 }
 0x91a   : > { %6286 = vmatmul.f32.gmra.mxu2 %v11662_v26  ;;  %6399 = vmatmul.f32.gmra.mxu3 %v11662_v26 }
 0x91b   : > { %v5962_v7 = vpop.f32.mrf.mxu0  ;;  %v6075_v19 = vpop.f32.mrf.mxu1 }
 0x91c   : > { %v6076_v10 = vadd.f32 %v6075_v19, %v5962_v7 }
 0x91d   : > { %v6239_v14 = vpop.f32.mrf.mxu2  ;;  %v6352_v28 = vpop.f32.mrf.mxu3 }
 0x91e   : > { %v6121_v32 = vadd.f32 %v6076_v10, %v11500_v49  ;;  %v6440_v4 = vmax.f32 %v6239_v14, 0.0  ;;  %v6441_v9 = vmax.f32 %v6352_v28, 0.0  ;;  %v7128_v49 = vld [vmem:[#allocation9 + $0x7c8] sm:$0xff] }
 0x91f   : > { %7254 = vmatpush.msrb.mxu1 %v7128_v49  ;;  %v6780_v49 = vld [vmem:[#allocation8 + $0x700] sm:$0xff] }
 0x920   : > { %6561 = vmatmul.f32.gmra.mxu0 %v6440_v4  ;;  %6674 = vmatmul.f32.gmra.mxu1 %v6441_v9  ;;  %v11668_v35 = vadd.f32 %v11349_v0, %v6121_v32  ;;  %v7112_v9 = vld [vmem:[#allocation9 + $0x748] sm:$0xff] }
 0x921   : > { %7141 = vmatpush.msrb.mxu0 %v7112_v9  ;;  %6827 = vmatpush.msrb.mxu2 %v6780_v49 }
 0x922   : > { %6289 = vmatmul.f32.gmra.mxu2 %v11668_v35  ;;  %6402 = vmatmul.f32.gmra.mxu3 %v11668_v35 }
 0x923   : > { %v5965_v17 = vpop.f32.mrf.mxu0  ;;  %v6078_v29 = vpop.f32.mrf.mxu1 }
 0x924   : > { %v6079_v7 = vadd.f32 %v6078_v29, %v5965_v17 }
 0x925   : > { %v6242_v19 = vpop.f32.mrf.mxu2  ;;  %v6355_v10 = vpop.f32.mrf.mxu3 }
 0x926   : > { %v6122_v14 = vadd.f32 %v6079_v7, %v11517_v34  ;;  %v6442_v28 = vmax.f32 %v6242_v19, 0.0  ;;  %v6443_v4 = vmax.f32 %v6355_v10, 0.0 }
 0x928   : > { %6564 = vmatmul.f32.gmra.mxu0 %v6442_v28  ;;  %6677 = vmatmul.f32.gmra.mxu1 %v6443_v4  ;;  %v11674_v32 = vadd.f32 %v11349_v0, %v6122_v14  ;;  %v6781_v4 = vld [vmem:[#allocation8 + $0x708] sm:$0xff] }
 0x929   : > { %6940 = vmatpush.msrb.mxu3 %v6781_v4 }
 0x92a   : > { %6292 = vmatmul.f32.gmra.mxu2 %v11674_v32  ;;  %6405 = vmatmul.f32.gmra.mxu3 %v11674_v32 }
 0x92b   : > { %v5968_v29 = vpop.f32.mrf.mxu0  ;;  %v6081_v6 = vpop.f32.mrf.mxu1 }
 0x92c   : > { %v6082_v57 = vadd.f32 %v6081_v6, %v5968_v29 }
 0x92d   : > { %v6245_v17 = vpop.f32.mrf.mxu2  ;;  %v6358_v7 = vpop.f32.mrf.mxu3 }
 0x92e   : > { %v6123_v19 = vadd.f32 %v6082_v57, %v11534_v58  ;;  %v6444_v10 = vmax.f32 %v6245_v17, 0.0  ;;  %v6445_v28 = vmax.f32 %v6358_v7, 0.0  ;;  %v7127_v58 = vld [vmem:[#allocation9 + $0x7c0] sm:$0xff] }
 0x92f   : > { %7255 = vmatpush.msrb.mxu1 %v7127_v58 }
 0x930   : > { %6567 = vmatmul.f32.gmra.mxu0 %v6444_v10  ;;  %6680 = vmatmul.f32.gmra.mxu1 %v6445_v28  ;;  %v11680_v14 = vadd.f32 %v11349_v0, %v6123_v19  ;;  %v8436_v0 = vld [vmem:[%s12108_s3 + $0x3] ss:$0 sm:$0xff] }
 0x931   : > { %v7111_v28 = vld [vmem:[#allocation9 + $0x740] sm:$0xff] }
 0x932   : > { %6295 = vmatmul.f32.gmra.mxu2 %v11680_v14  ;;  %6408 = vmatmul.f32.gmra.mxu3 %v11680_v14 }
 0x933   : > { %v5971_v9 = vpop.f32.mrf.mxu0  ;;  %v6084_v34 = vpop.f32.mrf.mxu1  ;;  %7142 = vmatpush.msrb.mxu0 %v7111_v28 }
 0x934   : > { %v6085_v29 = vadd.f32 %v6084_v34, %v5971_v9 }
 0x935   : > { %v6248_v6 = vpop.f32.mrf.mxu2  ;;  %v6361_v57 = vpop.f32.mrf.mxu3 }
 0x936   : > { %v6124_v17 = vadd.f32 %v6085_v29, %v11551_v37  ;;  %v6446_v7 = vmax.f32 %v6248_v6, 0.0  ;;  %v6447_v10 = vmax.f32 %v6361_v57, 0.0 }
 0x938   : > { %6570 = vmatmul.f32.gmra.mxu0 %v6446_v7  ;;  %6683 = vmatmul.f32.gmra.mxu1 %v6447_v10  ;;  %v11688_v19 = vadd.f32 %v8436_v0, %v6124_v17 }
 0x93a   : > { %6298 = vmatmul.f32.gmra.mxu2 %v11688_v19  ;;  %6411 = vmatmul.f32.gmra.mxu3 %v11688_v19 }
 0x93b   : > { %v5974_v34 = vpop.f32.mrf.mxu0  ;;  %v6087_v49 = vpop.f32.mrf.mxu1 }
 0x93c   : > { %v6088_v4 = vadd.f32 %v6087_v49, %v5974_v34 }
 0x93d   : > { %v6251_v9 = vpop.f32.mrf.mxu2  ;;  %v6364_v29 = vpop.f32.mrf.mxu3 }
 0x93e   : > { %v6125_v6 = vadd.f32 %v6088_v4, %v11568_v41  ;;  %v6448_v57 = vmax.f32 %v6251_v9, 0.0  ;;  %v6449_v7 = vmax.f32 %v6364_v29, 0.0  ;;  %v7110_v9 = vld [vmem:[#allocation9 + $0x738] sm:$0xff] }
 0x93f   : > { %v7126_v29 = vld [vmem:[#allocation9 + $0x7b8] sm:$0xff]  ;;  %7143 = vmatpush.msrb.mxu0 %v7110_v9 }
 0x940   : > { %6573 = vmatmul.f32.gmra.mxu0 %v6448_v57  ;;  %6686 = vmatmul.f32.gmra.mxu1 %v6449_v7  ;;  %v11693_v17 = vadd.f32 %v8436_v0, %v6125_v6 }
 0x941   : > { %7256 = vmatpush.msrb.mxu1 %v7126_v29  ;;  %v7109_v29 = vld [vmem:[#allocation9 + $0x730] sm:$0xff] }
 0x942   : > { %6301 = vmatmul.f32.gmra.mxu2 %v11693_v17  ;;  %6414 = vmatmul.f32.gmra.mxu3 %v11693_v17 }
 0x943   : > { %v5977_v58 = vpop.f32.mrf.mxu0  ;;  %v6090_v10 = vpop.f32.mrf.mxu1  ;;  %7144 = vmatpush.msrb.mxu0 %v7109_v29 }
 0x944   : > { %v6091_v28 = vadd.f32 %v6090_v10, %v5977_v58 }
 0x945   : > { %v6254_v37 = vpop.f32.mrf.mxu2  ;;  %v6367_v51 = vpop.f32.mrf.mxu3 }
 0x946   : > { %v6126_v34 = vadd.f32 %v6091_v28, %v11585_v39  ;;  %v6450_v49 = vmax.f32 %v6254_v37, 0.0  ;;  %v6451_v59 = vmax.f32 %v6367_v51, 0.0 }
 0x948   : > { %6576 = vmatmul.f32.gmra.mxu0 %v6450_v49  ;;  %6689 = vmatmul.f32.gmra.mxu1 %v6451_v59  ;;  %v11698_v4 = vadd.f32 %v8436_v0, %v6126_v34 }
 0x94a   : > { %6304 = vmatmul.f32.gmra.mxu2 %v11698_v4  ;;  %6417 = vmatmul.f32.gmra.mxu3 %v11698_v4 }
 0x94b   : > { %v5980_v6 = vpop.f32.mrf.mxu0  ;;  %v6093_v57 = vpop.f32.mrf.mxu1 }
 0x94c   : > { %v6094_v7 = vadd.f32 %v6093_v57, %v5980_v6  ;;  %v7125_v6 = vld [vmem:[#allocation9 + $0x7b0] sm:$0xff] }
 0x94d   : > { %v6257_v58 = vpop.f32.mrf.mxu2  ;;  %v6370_v10 = vpop.f32.mrf.mxu3  ;;  %7257 = vmatpush.msrb.mxu1 %v7125_v6 }
 0x94e   : > { %v6127_v37 = vadd.f32 %v6094_v7, %v11600_v33  ;;  %v6452_v51 = vmax.f32 %v6257_v58, 0.0  ;;  %v6453_v28 = vmax.f32 %v6370_v10, 0.0 }
 0x950   : > { %6579 = vmatmul.f32.gmra.mxu0 %v6452_v51  ;;  %6692 = vmatmul.f32.gmra.mxu1 %v6453_v28  ;;  %v11703_v59 = vadd.f32 %v8436_v0, %v6127_v37 }
 0x952   : > { %6307 = vmatmul.f32.gmra.mxu2 %v11703_v59  ;;  %6420 = vmatmul.f32.gmra.mxu3 %v11703_v59 }
 0x955   : > { %v6260_v34 = vpop.f32.mrf.mxu2  ;;  %v6373_v49 = vpop.f32.mrf.mxu3 }
 0x956   : > { %v6454_v39 = vmax.f32 %v6260_v34, 0.0  ;;  %v6455_v9 = vmax.f32 %v6373_v49, 0.0 }
 0x958   : > { %6582 = vmatmul.f32.gmra.mxu0 %v6454_v39  ;;  %6695 = vmatmul.f32.gmra.mxu1 %v6455_v9 }
 0x95d   : > { %v6263_v57 = vpop.f32.mrf.mxu2  ;;  %v6376_v7 = vpop.f32.mrf.mxu3 }
 0x95e   : > { %v6456_v58 = vmax.f32 %v6263_v57, 0.0  ;;  %v6457_v10 = vmax.f32 %v6376_v7, 0.0  ;;  %v6538_v0 = vpop.f32.mrf.mxu0  ;;  %v6651_v37 = vpop.f32.mrf.mxu1 }
 0x95f   : > { %v6652_v51 = vadd.f32 %v6651_v37, %v6538_v0 }
 0x960   : > { %6585 = vmatmul.f32.gmra.mxu0 %v6456_v58  ;;  %6698 = vmatmul.f32.gmra.mxu1 %v6457_v10  ;;  %v7108_v58 = vld [vmem:[#allocation9 + $0x728] sm:$0xff] }
 0x961   : > { %v11708_v28 = vadd.f32 %v6652_v51, %v11356_v11  ;;  %v7124_v10 = vld [vmem:[#allocation9 + $0x7a8] sm:$0xff]  ;;  %7145 = vmatpush.msrb.mxu0 %v7108_v58 }
 0x962   : > { %7258 = vmatpush.msrb.mxu1 %v7124_v10 }
 0x963   : > { %6828 = vmatmul.f32.vlgmr.msrb.gmra.mxu2 %v11708_v28  ;;  %6941 = vmatmul.f32.vlgmr.msrb.gmra.mxu3 %v11708_v28 }
 0x965   : > { %v6266_v39 = vpop.f32.mrf.mxu2  ;;  %v6379_v34 = vpop.f32.mrf.mxu3 }
 0x966   : > { %v6458_v49 = vmax.f32 %v6266_v39, 0.0  ;;  %v6459_v9 = vmax.f32 %v6379_v34, 0.0  ;;  %v6541_v29 = vpop.f32.mrf.mxu0  ;;  %v6654_v6 = vpop.f32.mrf.mxu1 }
 0x967   : > { %v6655_v57 = vadd.f32 %v6654_v6, %v6541_v29 }
 0x968   : > { %6588 = vmatmul.f32.gmra.mxu0 %v6458_v49  ;;  %6701 = vmatmul.f32.gmra.mxu1 %v6459_v9 }
 0x969   : > { %v11713_v7 = vadd.f32 %v6655_v57, %v11373_v42 }
 0x96b   : > { %6831 = vmatmul.f32.gmra.mxu2 %v11713_v7  ;;  %6944 = vmatmul.f32.gmra.mxu3 %v11713_v7 }
 0x96d   : > { %v6269_v11 = vpop.f32.mrf.mxu2  ;;  %v6382_v0 = vpop.f32.mrf.mxu3 }
 0x96e   : > { %v6460_v37 = vmax.f32 %v6269_v11, 0.0  ;;  %v6461_v51 = vmax.f32 %v6382_v0, 0.0  ;;  %v6544_v39 = vpop.f32.mrf.mxu0  ;;  %v6657_v34 = vpop.f32.mrf.mxu1 }
 0x96f   : > { %v6658_v29 = vadd.f32 %v6657_v34, %v6544_v39 }
 0x970   : > { %6591 = vmatmul.f32.gmra.mxu0 %v6460_v37  ;;  %6704 = vmatmul.f32.gmra.mxu1 %v6461_v51  ;;  %v7107_v37 = vld [vmem:[#allocation9 + $0x720] sm:$0xff] }
 0x971   : > { %v11718_v42 = vadd.f32 %v6658_v29, %v11390_v40  ;;  %v7123_v51 = vld [vmem:[#allocation9 + $0x7a0] sm:$0xff]  ;;  %7146 = vmatpush.msrb.mxu0 %v7107_v37 }
 0x972   : > { %7259 = vmatpush.msrb.mxu1 %v7123_v51 }
 0x973   : > { %6834 = vmatmul.f32.gmra.mxu2 %v11718_v42  ;;  %6947 = vmatmul.f32.gmra.mxu3 %v11718_v42 }
 0x975   : > { %v6272_v49 = vpop.f32.mrf.mxu2  ;;  %v6385_v9 = vpop.f32.mrf.mxu3 }
 0x976   : > { %v6462_v6 = vmax.f32 %v6272_v49, 0.0  ;;  %v6463_v57 = vmax.f32 %v6385_v9, 0.0  ;;  %v6547_v58 = vpop.f32.mrf.mxu0  ;;  %v6660_v10 = vpop.f32.mrf.mxu1 }
 0x977   : > { %v6661_v11 = vadd.f32 %v6660_v10, %v6547_v58 }
 0x978   : > { %6594 = vmatmul.f32.gmra.mxu0 %v6462_v6  ;;  %6707 = vmatmul.f32.gmra.mxu1 %v6463_v57 }
 0x979   : > { %v11723_v0 = vadd.f32 %v6661_v11, %v11407_v3 }
 0x97b   : > { %6837 = vmatmul.f32.gmra.mxu2 %v11723_v0  ;;  %6950 = vmatmul.f32.gmra.mxu3 %v11723_v0 }
 0x97d   : > { %v6275_v40 = vpop.f32.mrf.mxu2  ;;  %v6388_v39 = vpop.f32.mrf.mxu3 }
 0x97e   : > { %v6464_v34 = vmax.f32 %v6275_v40, 0.0  ;;  %v6465_v29 = vmax.f32 %v6388_v39, 0.0  ;;  %v6550_v49 = vpop.f32.mrf.mxu0  ;;  %v6663_v9 = vpop.f32.mrf.mxu1 }
 0x97f   : > { %v6664_v58 = vadd.f32 %v6663_v9, %v6550_v49 }
 0x980   : > { %6597 = vmatmul.f32.gmra.mxu0 %v6464_v34  ;;  %6710 = vmatmul.f32.gmra.mxu1 %v6465_v29  ;;  %v7106_v34 = vld [vmem:[#allocation9 + $0x718] sm:$0xff] }
 0x981   : > { %v11728_v3 = vadd.f32 %v6664_v58, %v11424_v25  ;;  %v7122_v29 = vld [vmem:[#allocation9 + $0x798] sm:$0xff]  ;;  %7147 = vmatpush.msrb.mxu0 %v7106_v34 }
 0x982   : > { %7260 = vmatpush.msrb.mxu1 %v7122_v29 }
 0x983   : > { %6840 = vmatmul.f32.gmra.mxu2 %v11728_v3  ;;  %6953 = vmatmul.f32.gmra.mxu3 %v11728_v3 }
 0x985   : > { %v6278_v6 = vpop.f32.mrf.mxu2  ;;  %v6391_v57 = vpop.f32.mrf.mxu3 }
 0x986   : > { %v6466_v10 = vmax.f32 %v6278_v6, 0.0  ;;  %v6467_v11 = vmax.f32 %v6391_v57, 0.0  ;;  %v6553_v37 = vpop.f32.mrf.mxu0  ;;  %v6666_v51 = vpop.f32.mrf.mxu1 }
 0x987   : > { %v6667_v40 = vadd.f32 %v6666_v51, %v6553_v37 }
 0x988   : > { %6600 = vmatmul.f32.gmra.mxu0 %v6466_v10  ;;  %6713 = vmatmul.f32.gmra.mxu1 %v6467_v11 }
 0x989   : > { %v11733_v39 = vadd.f32 %v6667_v40, %v11441_v46 }
 0x98b   : > { %6843 = vmatmul.f32.gmra.mxu2 %v11733_v39  ;;  %6956 = vmatmul.f32.gmra.mxu3 %v11733_v39 }
 0x98d   : > { %v6281_v25 = vpop.f32.mrf.mxu2  ;;  %v6394_v49 = vpop.f32.mrf.mxu3 }
 0x98e   : > { %v6468_v9 = vmax.f32 %v6281_v25, 0.0  ;;  %v6469_v58 = vmax.f32 %v6394_v49, 0.0  ;;  %v6556_v6 = vpop.f32.mrf.mxu0  ;;  %v6669_v57 = vpop.f32.mrf.mxu1 }
 0x98f   : > { %v6670_v37 = vadd.f32 %v6669_v57, %v6556_v6 }
 0x990   : > { %6603 = vmatmul.f32.gmra.mxu0 %v6468_v9  ;;  %6716 = vmatmul.f32.gmra.mxu1 %v6469_v58  ;;  %v7105_v9 = vld [vmem:[#allocation9 + $0x710] sm:$0xff] }
 0x991   : > { %v11738_v46 = vadd.f32 %v6670_v37, %v11458_v15  ;;  %v7121_v58 = vld [vmem:[#allocation9 + $0x790] sm:$0xff]  ;;  %7148 = vmatpush.msrb.mxu0 %v7105_v9 }
 0x992   : > { %7261 = vmatpush.msrb.mxu1 %v7121_v58 }
 0x993   : > { %6846 = vmatmul.f32.gmra.mxu2 %v11738_v46  ;;  %6959 = vmatmul.f32.gmra.mxu3 %v11738_v46 }
 0x995   : > { %v6284_v10 = vpop.f32.mrf.mxu2  ;;  %v6397_v11 = vpop.f32.mrf.mxu3 }
 0x996   : > { %v6470_v51 = vmax.f32 %v6284_v10, 0.0  ;;  %v6471_v40 = vmax.f32 %v6397_v11, 0.0  ;;  %v6559_v34 = vpop.f32.mrf.mxu0  ;;  %v6672_v29 = vpop.f32.mrf.mxu1 }
 0x997   : > { %v6673_v25 = vadd.f32 %v6672_v29, %v6559_v34 }
 0x998   : > { %6606 = vmatmul.f32.gmra.mxu0 %v6470_v51  ;;  %6719 = vmatmul.f32.gmra.mxu1 %v6471_v40 }
 0x999   : > { %v11743_v49 = vadd.f32 %v6673_v25, %v11475_v63 }
 0x99b   : > { %6849 = vmatmul.f32.gmra.mxu2 %v11743_v49  ;;  %6962 = vmatmul.f32.gmra.mxu3 %v11743_v49 }
 0x99d   : > { %v6287_v15 = vpop.f32.mrf.mxu2  ;;  %v6400_v6 = vpop.f32.mrf.mxu3 }
 0x99e   : > { %v6472_v57 = vmax.f32 %v6287_v15, 0.0  ;;  %v6473_v37 = vmax.f32 %v6400_v6, 0.0  ;;  %v6562_v10 = vpop.f32.mrf.mxu0  ;;  %v6675_v11 = vpop.f32.mrf.mxu1 }
 0x99f   : > { %v6676_v34 = vadd.f32 %v6675_v11, %v6562_v10 }
 0x9a0   : > { %6609 = vmatmul.f32.gmra.mxu0 %v6472_v57  ;;  %6722 = vmatmul.f32.gmra.mxu1 %v6473_v37  ;;  %v7104_v57 = vld [vmem:[#allocation9 + $0x708] sm:$0xff] }
 0x9a1   : > { %v11748_v63 = vadd.f32 %v6676_v34, %v11492_v45  ;;  %v7120_v37 = vld [vmem:[#allocation9 + $0x788] sm:$0xff]  ;;  %7149 = vmatpush.msrb.mxu0 %v7104_v57 }
 0x9a2   : > { %7262 = vmatpush.msrb.mxu1 %v7120_v37 }
 0x9a3   : > { %6852 = vmatmul.f32.gmra.mxu2 %v11748_v63  ;;  %6965 = vmatmul.f32.gmra.mxu3 %v11748_v63 }
 0x9a5   : > { %v6290_v51 = vpop.f32.mrf.mxu2  ;;  %v6403_v40 = vpop.f32.mrf.mxu3 }
 0x9a6   : > { %v6474_v29 = vmax.f32 %v6290_v51, 0.0  ;;  %v6475_v25 = vmax.f32 %v6403_v40, 0.0  ;;  %v6565_v9 = vpop.f32.mrf.mxu0  ;;  %v6678_v58 = vpop.f32.mrf.mxu1 }
 0x9a7   : > { %v6679_v15 = vadd.f32 %v6678_v58, %v6565_v9 }
 0x9a8   : > { %6612 = vmatmul.f32.gmra.mxu0 %v6474_v29  ;;  %6725 = vmatmul.f32.gmra.mxu1 %v6475_v25 }
 0x9a9   : > { %v11753_v6 = vadd.f32 %v6679_v15, %v11509_v12 }
 0x9ab   : > { %6855 = vmatmul.f32.gmra.mxu2 %v11753_v6  ;;  %6968 = vmatmul.f32.gmra.mxu3 %v11753_v6 }
 0x9ad   : > { %v6293_v45 = vpop.f32.mrf.mxu2  ;;  %v6406_v10 = vpop.f32.mrf.mxu3 }
 0x9ae   : > { %v6476_v11 = vmax.f32 %v6293_v45, 0.0  ;;  %v6477_v34 = vmax.f32 %v6406_v10, 0.0  ;;  %v6568_v51 = vpop.f32.mrf.mxu0  ;;  %v6681_v40 = vpop.f32.mrf.mxu1 }
 0x9af   : > { %v6682_v9 = vadd.f32 %v6681_v40, %v6568_v51 }
 0x9b0   : > { %6615 = vmatmul.f32.gmra.mxu0 %v6476_v11  ;;  %6728 = vmatmul.f32.gmra.mxu1 %v6477_v34  ;;  %v7103_v11 = vld [vmem:[#allocation9 + $0x700] sm:$0xff] }
 0x9b1   : > { %v11758_v12 = vadd.f32 %v6682_v9, %v11526_v8  ;;  %v7119_v34 = vld [vmem:[#allocation9 + $0x780] sm:$0xff]  ;;  %7150 = vmatpush.msrb.mxu0 %v7103_v11 }
 0x9b2   : > { %7263 = vmatpush.msrb.mxu1 %v7119_v34 }
 0x9b3   : > { %6858 = vmatmul.f32.gmra.mxu2 %v11758_v12  ;;  %6971 = vmatmul.f32.gmra.mxu3 %v11758_v12 }
 0x9b5   : > { %v6296_v29 = vpop.f32.mrf.mxu2  ;;  %v6409_v25 = vpop.f32.mrf.mxu3 }
 0x9b6   : > { %v6478_v58 = vmax.f32 %v6296_v29, 0.0  ;;  %v6479_v15 = vmax.f32 %v6409_v25, 0.0  ;;  %v6571_v57 = vpop.f32.mrf.mxu0  ;;  %v6684_v37 = vpop.f32.mrf.mxu1 }
 0x9b7   : > { %v6685_v45 = vadd.f32 %v6684_v37, %v6571_v57 }
 0x9b8   : > { %6618 = vmatmul.f32.gmra.mxu0 %v6478_v58  ;;  %6731 = vmatmul.f32.gmra.mxu1 %v6479_v15 }
 0x9b9   : > { %v11763_v10 = vadd.f32 %v6685_v45, %v11543_v44 }
 0x9bb   : > { %6861 = vmatmul.f32.gmra.mxu2 %v11763_v10  ;;  %6974 = vmatmul.f32.gmra.mxu3 %v11763_v10 }
 0x9bd   : > { %v6299_v8 = vpop.f32.mrf.mxu2  ;;  %v6412_v51 = vpop.f32.mrf.mxu3 }
 0x9be   : > { %v6480_v40 = vmax.f32 %v6299_v8, 0.0  ;;  %v6481_v9 = vmax.f32 %v6412_v51, 0.0  ;;  %v6574_v29 = vpop.f32.mrf.mxu0  ;;  %v6687_v25 = vpop.f32.mrf.mxu1 }
 0x9bf   : > { %v6688_v57 = vadd.f32 %v6687_v25, %v6574_v29 }
 0x9c0   : > { %6621 = vmatmul.f32.gmra.mxu0 %v6480_v40  ;;  %6734 = vmatmul.f32.gmra.mxu1 %v6481_v9 }
 0x9c1   : > { %v11768_v44 = vadd.f32 %v6688_v57, %v11560_v31 }
 0x9c3   : > { %6864 = vmatmul.f32.gmra.mxu2 %v11768_v44  ;;  %6977 = vmatmul.f32.gmra.mxu3 %v11768_v44 }
 0x9c5   : > { %v6302_v58 = vpop.f32.mrf.mxu2  ;;  %v6415_v15 = vpop.f32.mrf.mxu3 }
 0x9c6   : > { %v6482_v37 = vmax.f32 %v6302_v58, 0.0  ;;  %v6483_v45 = vmax.f32 %v6415_v15, 0.0  ;;  %v6577_v11 = vpop.f32.mrf.mxu0  ;;  %v6690_v34 = vpop.f32.mrf.mxu1 }
 0x9c7   : > { %v6691_v8 = vadd.f32 %v6690_v34, %v6577_v11 }
 0x9c8   : > { %6624 = vmatmul.f32.gmra.mxu0 %v6482_v37  ;;  %6737 = vmatmul.f32.gmra.mxu1 %v6483_v45 }
 0x9c9   : > { %v11773_v51 = vadd.f32 %v6691_v8, %v11577_v18 }
 0x9cb   : > { %6867 = vmatmul.f32.gmra.mxu2 %v11773_v51  ;;  %6980 = vmatmul.f32.gmra.mxu3 %v11773_v51 }
 0x9cd   : > { %v6305_v31 = vpop.f32.mrf.mxu2  ;;  %v6418_v40 = vpop.f32.mrf.mxu3 }
 0x9ce   : > { %v6484_v9 = vmax.f32 %v6305_v31, 0.0  ;;  %v6485_v29 = vmax.f32 %v6418_v40, 0.0  ;;  %v6580_v25 = vpop.f32.mrf.mxu0  ;;  %v6693_v57 = vpop.f32.mrf.mxu1 }
 0x9cf   : > { %v6694_v58 = vadd.f32 %v6693_v57, %v6580_v25 }
 0x9d0   : > { %6627 = vmatmul.f32.gmra.mxu0 %v6484_v9  ;;  %6740 = vmatmul.f32.gmra.mxu1 %v6485_v29 }
 0x9d1   : > { %v11778_v15 = vadd.f32 %v6694_v58, %v11594_v61 }
 0x9d3   : > { %6870 = vmatmul.f32.gmra.mxu2 %v11778_v15  ;;  %6983 = vmatmul.f32.gmra.mxu3 %v11778_v15 }
 0x9d5   : > { %v6308_v18 = vpop.f32.mrf.mxu2  ;;  %v6421_v37 = vpop.f32.mrf.mxu3 }
 0x9d6   : > { %v6486_v45 = vmax.f32 %v6308_v18, 0.0  ;;  %v6487_v11 = vmax.f32 %v6421_v37, 0.0  ;;  %v6583_v34 = vpop.f32.mrf.mxu0  ;;  %v6696_v8 = vpop.f32.mrf.mxu1 }
 0x9d7   : > { %v6697_v31 = vadd.f32 %v6696_v8, %v6583_v34 }
 0x9d8   : > { %6630 = vmatmul.f32.gmra.mxu0 %v6486_v45  ;;  %6743 = vmatmul.f32.gmra.mxu1 %v6487_v11 }
 0x9d9   : > { %v11783_v40 = vadd.f32 %v6697_v31, %v11608_v23 }
 0x9db   : > { %6873 = vmatmul.f32.gmra.mxu2 %v11783_v40  ;;  %6986 = vmatmul.f32.gmra.mxu3 %v11783_v40 }
 0x9de   : > { %v6586_v61 = vpop.f32.mrf.mxu0  ;;  %v6699_v9 = vpop.f32.mrf.mxu1 }
 0x9df   : > { %v6700_v29 = vadd.f32 %v6699_v9, %v6586_v61 }
 0x9e1   : > { %v11788_v25 = vadd.f32 %v6700_v29, %v11614_v36 }
 0x9e3   : > { %6876 = vmatmul.f32.gmra.mxu2 %v11788_v25  ;;  %6989 = vmatmul.f32.gmra.mxu3 %v11788_v25 }
 0x9e6   : > { %v6589_v57 = vpop.f32.mrf.mxu0  ;;  %v6702_v58 = vpop.f32.mrf.mxu1 }
 0x9e7   : > { %v6703_v18 = vadd.f32 %v6702_v58, %v6589_v57  ;;  %v6829_v37 = vpop.f32.mrf.mxu2  ;;  %v6942_v23 = vpop.f32.mrf.mxu3 }
 0x9e8   : > { %v7038_v45 = vmax.f32 %v6829_v37, 0.0  ;;  %v7039_v11 = vmax.f32 %v6942_v23, 0.0 }
 0x9e9   : > { %v11793_v34 = vadd.f32 %v6703_v18, %v11620_v5 }
 0x9ea   : > { %7151 = vmatmul.f32.vlgmr.msrb.gmra.mxu0 %v7038_v45  ;;  %7264 = vmatmul.f32.vlgmr.msrb.gmra.mxu1 %v7039_v11 }
 0x9eb   : > { %6879 = vmatmul.f32.gmra.mxu2 %v11793_v34  ;;  %6992 = vmatmul.f32.gmra.mxu3 %v11793_v34 }
 0x9ee   : > { %v6592_v36 = vpop.f32.mrf.mxu0  ;;  %v6705_v8 = vpop.f32.mrf.mxu1 }
 0x9ef   : > { %v6706_v31 = vadd.f32 %v6705_v8, %v6592_v36  ;;  %v6832_v61 = vpop.f32.mrf.mxu2  ;;  %v6945_v9 = vpop.f32.mrf.mxu3 }
 0x9f0   : > { %v7040_v29 = vmax.f32 %v6832_v61, 0.0  ;;  %v7041_v57 = vmax.f32 %v6945_v9, 0.0 }
 0x9f1   : > { %v11798_v58 = vadd.f32 %v6706_v31, %v11626_v24 }
 0x9f2   : > { %7154 = vmatmul.f32.gmra.mxu0 %v7040_v29  ;;  %7267 = vmatmul.f32.gmra.mxu1 %v7041_v57 }
 0x9f3   : > { %6882 = vmatmul.f32.gmra.mxu2 %v11798_v58  ;;  %6995 = vmatmul.f32.gmra.mxu3 %v11798_v58 }
 0x9f6   : > { %v6595_v5 = vpop.f32.mrf.mxu0  ;;  %v6708_v18 = vpop.f32.mrf.mxu1 }
 0x9f7   : > { %v6709_v37 = vadd.f32 %v6708_v18, %v6595_v5  ;;  %v6835_v23 = vpop.f32.mrf.mxu2  ;;  %v6948_v45 = vpop.f32.mrf.mxu3 }
 0x9f8   : > { %v7042_v11 = vmax.f32 %v6835_v23, 0.0  ;;  %v7043_v36 = vmax.f32 %v6948_v45, 0.0 }
 0x9f9   : > { %v11803_v8 = vadd.f32 %v6709_v37, %v11632_v27 }
 0x9fa   : > { %7157 = vmatmul.f32.gmra.mxu0 %v7042_v11  ;;  %7270 = vmatmul.f32.gmra.mxu1 %v7043_v36 }
 0x9fb   : > { %6885 = vmatmul.f32.gmra.mxu2 %v11803_v8  ;;  %6998 = vmatmul.f32.gmra.mxu3 %v11803_v8 }
 0x9fe   : > { %v6598_v24 = vpop.f32.mrf.mxu0  ;;  %v6711_v31 = vpop.f32.mrf.mxu1 }
 0x9ff   : > { %v6712_v61 = vadd.f32 %v6711_v31, %v6598_v24  ;;  %v6838_v9 = vpop.f32.mrf.mxu2  ;;  %v6951_v29 = vpop.f32.mrf.mxu3 }
 0xa00   : > { %v7044_v57 = vmax.f32 %v6838_v9, 0.0  ;;  %v7045_v5 = vmax.f32 %v6951_v29, 0.0 }
 0xa01   : > { %v11808_v18 = vadd.f32 %v6712_v61, %v11638_v1 }
 0xa02   : > { %7160 = vmatmul.f32.gmra.mxu0 %v7044_v57  ;;  %7273 = vmatmul.f32.gmra.mxu1 %v7045_v5 }
 0xa03   : > { %6888 = vmatmul.f32.gmra.mxu2 %v11808_v18  ;;  %7001 = vmatmul.f32.gmra.mxu3 %v11808_v18 }
 0xa06   : > { %v6601_v27 = vpop.f32.mrf.mxu0  ;;  %v6714_v37 = vpop.f32.mrf.mxu1 }
 0xa07   : > { %v6715_v23 = vadd.f32 %v6714_v37, %v6601_v27  ;;  %v6841_v45 = vpop.f32.mrf.mxu2  ;;  %v6954_v11 = vpop.f32.mrf.mxu3 }
 0xa08   : > { %v7046_v36 = vmax.f32 %v6841_v45, 0.0  ;;  %v7047_v24 = vmax.f32 %v6954_v11, 0.0 }
 0xa09   : > { %v11813_v31 = vadd.f32 %v6715_v23, %v11644_v21 }
 0xa0a   : > { %7163 = vmatmul.f32.gmra.mxu0 %v7046_v36  ;;  %7276 = vmatmul.f32.gmra.mxu1 %v7047_v24 }
 0xa0b   : > { %6891 = vmatmul.f32.gmra.mxu2 %v11813_v31  ;;  %7004 = vmatmul.f32.gmra.mxu3 %v11813_v31 }
 0xa0e   : > { %v6604_v1 = vpop.f32.mrf.mxu0  ;;  %v6717_v61 = vpop.f32.mrf.mxu1 }
 0xa0f   : > { %v6718_v9 = vadd.f32 %v6717_v61, %v6604_v1  ;;  %v6844_v29 = vpop.f32.mrf.mxu2  ;;  %v6957_v57 = vpop.f32.mrf.mxu3 }
 0xa10   : > { %v7048_v5 = vmax.f32 %v6844_v29, 0.0  ;;  %v7049_v27 = vmax.f32 %v6957_v57, 0.0 }
 0xa11   : > { %v11818_v37 = vadd.f32 %v6718_v9, %v11650_v22 }
 0xa12   : > { %7166 = vmatmul.f32.gmra.mxu0 %v7048_v5  ;;  %7279 = vmatmul.f32.gmra.mxu1 %v7049_v27 }
 0xa13   : > { %6894 = vmatmul.f32.gmra.mxu2 %v11818_v37  ;;  %7007 = vmatmul.f32.gmra.mxu3 %v11818_v37 }
 0xa16   : > { %v6607_v21 = vpop.f32.mrf.mxu0  ;;  %v6720_v23 = vpop.f32.mrf.mxu1 }
 0xa17   : > { %v6721_v45 = vadd.f32 %v6720_v23, %v6607_v21  ;;  %v6847_v11 = vpop.f32.mrf.mxu2  ;;  %v6960_v36 = vpop.f32.mrf.mxu3 }
 0xa18   : > { %v7050_v24 = vmax.f32 %v6847_v11, 0.0  ;;  %v7051_v1 = vmax.f32 %v6960_v36, 0.0 }
 0xa19   : > { %v11823_v61 = vadd.f32 %v6721_v45, %v11656_v60 }
 0xa1a   : > { %7169 = vmatmul.f32.gmra.mxu0 %v7050_v24  ;;  %7282 = vmatmul.f32.gmra.mxu1 %v7051_v1 }
 0xa1b   : > { %6897 = vmatmul.f32.gmra.mxu2 %v11823_v61  ;;  %7010 = vmatmul.f32.gmra.mxu3 %v11823_v61 }
 0xa1e   : > { %v6610_v22 = vpop.f32.mrf.mxu0  ;;  %v6723_v9 = vpop.f32.mrf.mxu1 }
 0xa1f   : > { %v6724_v29 = vadd.f32 %v6723_v9, %v6610_v22  ;;  %v6850_v57 = vpop.f32.mrf.mxu2  ;;  %v6963_v5 = vpop.f32.mrf.mxu3 }
 0xa20   : > { %v7052_v27 = vmax.f32 %v6850_v57, 0.0  ;;  %v7053_v21 = vmax.f32 %v6963_v5, 0.0 }
 0xa21   : > { %v11828_v23 = vadd.f32 %v6724_v29, %v11662_v26 }
 0xa22   : > { %7172 = vmatmul.f32.gmra.mxu0 %v7052_v27  ;;  %7285 = vmatmul.f32.gmra.mxu1 %v7053_v21 }
 0xa23   : > { %6900 = vmatmul.f32.gmra.mxu2 %v11828_v23  ;;  %7013 = vmatmul.f32.gmra.mxu3 %v11828_v23 }
 0xa26   : > { %v6613_v60 = vpop.f32.mrf.mxu0  ;;  %v6726_v45 = vpop.f32.mrf.mxu1 }
 0xa27   : > { %v6727_v11 = vadd.f32 %v6726_v45, %v6613_v60  ;;  %v6853_v36 = vpop.f32.mrf.mxu2  ;;  %v6966_v24 = vpop.f32.mrf.mxu3 }
 0xa28   : > { %v7054_v1 = vmax.f32 %v6853_v36, 0.0  ;;  %v7055_v22 = vmax.f32 %v6966_v24, 0.0 }
 0xa29   : > { %v11833_v9 = vadd.f32 %v6727_v11, %v11668_v35 }
 0xa2a   : > { %7175 = vmatmul.f32.gmra.mxu0 %v7054_v1  ;;  %7288 = vmatmul.f32.gmra.mxu1 %v7055_v22 }
 0xa2b   : > { %6903 = vmatmul.f32.gmra.mxu2 %v11833_v9  ;;  %7016 = vmatmul.f32.gmra.mxu3 %v11833_v9 }
 0xa2e   : > { %v6616_v26 = vpop.f32.mrf.mxu0  ;;  %v6729_v29 = vpop.f32.mrf.mxu1 }
 0xa2f   : > { %v6730_v57 = vadd.f32 %v6729_v29, %v6616_v26  ;;  %v6856_v5 = vpop.f32.mrf.mxu2  ;;  %v6969_v27 = vpop.f32.mrf.mxu3 }
 0xa30   : > { %v7056_v21 = vmax.f32 %v6856_v5, 0.0  ;;  %v7057_v60 = vmax.f32 %v6969_v27, 0.0 }
 0xa31   : > { %v11838_v45 = vadd.f32 %v6730_v57, %v11674_v32 }
 0xa32   : > { %7178 = vmatmul.f32.gmra.mxu0 %v7056_v21  ;;  %7291 = vmatmul.f32.gmra.mxu1 %v7057_v60 }
 0xa33   : > { %6906 = vmatmul.f32.gmra.mxu2 %v11838_v45  ;;  %7019 = vmatmul.f32.gmra.mxu3 %v11838_v45 }
 0xa36   : > { %v6619_v35 = vpop.f32.mrf.mxu0  ;;  %v6732_v11 = vpop.f32.mrf.mxu1 }
 0xa37   : > { %v6733_v36 = vadd.f32 %v6732_v11, %v6619_v35  ;;  %v6859_v24 = vpop.f32.mrf.mxu2  ;;  %v6972_v1 = vpop.f32.mrf.mxu3 }
 0xa38   : > { %v7058_v22 = vmax.f32 %v6859_v24, 0.0  ;;  %v7059_v26 = vmax.f32 %v6972_v1, 0.0 }
 0xa39   : > { %v11843_v29 = vadd.f32 %v6733_v36, %v11680_v14 }
 0xa3a   : > { %7181 = vmatmul.f32.gmra.mxu0 %v7058_v22  ;;  %7294 = vmatmul.f32.gmra.mxu1 %v7059_v26 }
 0xa3b   : > { %6909 = vmatmul.f32.gmra.mxu2 %v11843_v29  ;;  %7022 = vmatmul.f32.gmra.mxu3 %v11843_v29 }
 0xa3e   : > { %v6622_v32 = vpop.f32.mrf.mxu0  ;;  %v6735_v57 = vpop.f32.mrf.mxu1 }
 0xa3f   : > { %v6736_v5 = vadd.f32 %v6735_v57, %v6622_v32  ;;  %v6862_v27 = vpop.f32.mrf.mxu2  ;;  %v6975_v21 = vpop.f32.mrf.mxu3 }
 0xa40   : > { %v7060_v60 = vmax.f32 %v6862_v27, 0.0  ;;  %v7061_v35 = vmax.f32 %v6975_v21, 0.0 }
 0xa41   : > { %v11848_v11 = vadd.f32 %v6736_v5, %v11688_v19 }
 0xa42   : > { %7184 = vmatmul.f32.gmra.mxu0 %v7060_v60  ;;  %7297 = vmatmul.f32.gmra.mxu1 %v7061_v35 }
 0xa43   : > { %6912 = vmatmul.f32.gmra.mxu2 %v11848_v11  ;;  %7025 = vmatmul.f32.gmra.mxu3 %v11848_v11 }
 0xa46   : > { %v6625_v14 = vpop.f32.mrf.mxu0  ;;  %v6738_v36 = vpop.f32.mrf.mxu1 }
 0xa47   : > { %v6739_v24 = vadd.f32 %v6738_v36, %v6625_v14  ;;  %v6865_v1 = vpop.f32.mrf.mxu2  ;;  %v6978_v22 = vpop.f32.mrf.mxu3 }
 0xa48   : > { %v7062_v26 = vmax.f32 %v6865_v1, 0.0  ;;  %v7063_v32 = vmax.f32 %v6978_v22, 0.0 }
 0xa49   : > { %v11853_v57 = vadd.f32 %v6739_v24, %v11693_v17 }
 0xa4a   : > { %7187 = vmatmul.f32.gmra.mxu0 %v7062_v26  ;;  %7300 = vmatmul.f32.gmra.mxu1 %v7063_v32 }
 0xa4b   : > { %6915 = vmatmul.f32.gmra.mxu2 %v11853_v57  ;;  %7028 = vmatmul.f32.gmra.mxu3 %v11853_v57 }
 0xa4e   : > { %v6628_v19 = vpop.f32.mrf.mxu0  ;;  %v6741_v5 = vpop.f32.mrf.mxu1 }
 0xa4f   : > { %v6742_v27 = vadd.f32 %v6741_v5, %v6628_v19  ;;  %v6868_v21 = vpop.f32.mrf.mxu2  ;;  %v6981_v60 = vpop.f32.mrf.mxu3 }
 0xa50   : > { %v7064_v35 = vmax.f32 %v6868_v21, 0.0  ;;  %v7065_v14 = vmax.f32 %v6981_v60, 0.0 }
 0xa51   : > { %v11858_v36 = vadd.f32 %v6742_v27, %v11698_v4 }
 0xa52   : > { %7190 = vmatmul.f32.gmra.mxu0 %v7064_v35  ;;  %7303 = vmatmul.f32.gmra.mxu1 %v7065_v14 }
 0xa53   : > { %6918 = vmatmul.f32.gmra.mxu2 %v11858_v36  ;;  %7031 = vmatmul.f32.gmra.mxu3 %v11858_v36 }
 0xa56   : > { %v6631_v17 = vpop.f32.mrf.mxu0  ;;  %v6744_v24 = vpop.f32.mrf.mxu1 }
 0xa57   : > { %v6745_v1 = vadd.f32 %v6744_v24, %v6631_v17  ;;  %v6871_v22 = vpop.f32.mrf.mxu2  ;;  %v6984_v26 = vpop.f32.mrf.mxu3 }
 0xa58   : > { %v7066_v32 = vmax.f32 %v6871_v22, 0.0  ;;  %v7067_v19 = vmax.f32 %v6984_v26, 0.0  ;;  %v12687_v26 = vld [vmem:[#allocation36_spill] sm:$0xff] }
 0xa59   : > { %v11863_v5 = vadd.f32 %v6745_v1, %v11703_v59 }
 0xa5a   : > { %7193 = vmatmul.f32.gmra.mxu0 %v7066_v32  ;;  %7306 = vmatmul.f32.gmra.mxu1 %v7067_v19  ;;  %v7393_v32 = vadd.f32 %v11048_v55, %v12687_v26 }
 0xa5b   : > { %12686 = vst [vmem:[#allocation94_spill] sm:$0xff] %v11863_v5  ;;  %6921 = vmatmul.f32.gmra.mxu2 %v11863_v5  ;;  %7034 = vmatmul.f32.gmra.mxu3 %v11863_v5 }
 0xa5f   : > { %v6874_v4 = vpop.f32.mrf.mxu2  ;;  %v6987_v27 = vpop.f32.mrf.mxu3 }
 0xa60   : > { %v7068_v21 = vmax.f32 %v6874_v4, 0.0  ;;  %v7069_v60 = vmax.f32 %v6987_v27, 0.0  ;;  %v11871_v4 = vstv %s7457_s21 }
 0xa62   : > { %7196 = vmatmul.f32.gmra.mxu0 %v7068_v21  ;;  %7309 = vmatmul.f32.gmra.mxu1 %v7069_v60  ;;  %v11878_v21 = vld [vmem:[%s12111_s6] ss:$0 sm:$0xff] }
 0xa67   : > { %v6877_v35 = vpop.f32.mrf.mxu2  ;;  %v6990_v14 = vpop.f32.mrf.mxu3 }
 0xa68   : > { %v7070_v17 = vmax.f32 %v6877_v35, 0.0  ;;  %v7071_v59 = vmax.f32 %v6990_v14, 0.0  ;;  %v7152_v24 = vpop.f32.mrf.mxu0  ;;  %v7265_v1 = vpop.f32.mrf.mxu1 }
 0xa69   : > { %v7266_v22 = vadd.f32 %v7265_v1, %v7152_v24 }
 0xa6a   : > { %7199 = vmatmul.f32.gmra.mxu0 %v7070_v17  ;;  %7312 = vmatmul.f32.gmra.mxu1 %v7071_v59 }
 0xa6b   : > { %v7361_v19 = vadd.f32 %v7266_v22, %v11708_v28  ;;  %v12688_v22 = vld [vmem:[#allocation68_spill] sm:$0xff] }
 0xa6c   : > { %v7394_v26 = vadd.f32 %v11065_v52, %v12688_v22  ;;  %v12689_v52 = vld [vmem:[#allocation89_spill] sm:$0xff] }
 0xa6d   : > { %v7425_v27 = vadd.f32 %v7393_v32, %v7361_v19  ;;  %v7395_v22 = vadd.f32 %v11084_v30, %v12689_v52 }
 0xa6f   : > { %v7459_v60 = vmul.f32 %v11871_v4, %v7425_v27  ;;  %v6880_v35 = vpop.f32.mrf.mxu2  ;;  %v6993_v14 = vpop.f32.mrf.mxu3 }
 0xa70   : > { %v7072_v17 = vmax.f32 %v6880_v35, 0.0  ;;  %v7073_v59 = vmax.f32 %v6993_v14, 0.0  ;;  %v7155_v24 = vpop.f32.mrf.mxu0  ;;  %v7268_v55 = vpop.f32.mrf.mxu1 }
 0xa71   : > { %v7495_v28 = vadd.f32 %v11878_v21, %v7459_v60  ;;  %v7269_v1 = vadd.f32 %v7268_v55, %v7155_v24 }
 0xa72   : > { %7202 = vmatmul.f32.gmra.mxu0 %v7072_v17  ;;  %7315 = vmatmul.f32.gmra.mxu1 %v7073_v59 }
 0xa73   : > { %7527 = vst [vmem:[%s11884_s9] sm:$0xff] %v7495_v28  ;;  %v7362_v32 = vadd.f32 %v7269_v1, %v11713_v7 }
 0xa75   : > { %v7426_v19 = vadd.f32 %v7394_v26, %v7362_v32 }
 0xa77   : > { %v7460_v27 = vmul.f32 %v11871_v4, %v7426_v19  ;;  %v6883_v35 = vpop.f32.mrf.mxu2  ;;  %v6996_v14 = vpop.f32.mrf.mxu3 }
 0xa78   : > { %v7074_v5 = vmax.f32 %v6883_v35, 0.0  ;;  %v7075_v60 = vmax.f32 %v6996_v14, 0.0  ;;  %v7158_v24 = vpop.f32.mrf.mxu0  ;;  %v7271_v17 = vpop.f32.mrf.mxu1 }
 0xa79   : > { %v7496_v59 = vadd.f32 %v11878_v21, %v7460_v27  ;;  %v7272_v55 = vadd.f32 %v7271_v17, %v7158_v24 }
 0xa7a   : > { %7205 = vmatmul.f32.gmra.mxu0 %v7074_v5  ;;  %7318 = vmatmul.f32.gmra.mxu1 %v7075_v60  ;;  %v12690_v60 = vld [vmem:[#allocation38_spill] sm:$0xff] }
 0xa7b   : > { %7528 = vst [vmem:[%s11884_s9 + $0x8] sm:$0xff] %v7496_v59  ;;  %v7363_v7 = vadd.f32 %v7272_v55, %v11718_v42  ;;  %v7396_v30 = vadd.f32 %v11103_v20, %v12690_v60 }
 0xa7d   : > { %v7427_v28 = vadd.f32 %v7395_v22, %v7363_v7 }
 0xa7f   : > { %v7461_v1 = vmul.f32 %v11871_v4, %v7427_v28  ;;  %v6886_v26 = vpop.f32.mrf.mxu2  ;;  %v6999_v32 = vpop.f32.mrf.mxu3 }
 0xa80   : > { %v7076_v19 = vmax.f32 %v6886_v26, 0.0  ;;  %v7077_v35 = vmax.f32 %v6999_v32, 0.0  ;;  %v7161_v14 = vpop.f32.mrf.mxu0  ;;  %v7274_v33 = vpop.f32.mrf.mxu1  ;;  %v12691_v26 = vld [vmem:[#allocation69_spill] sm:$0xff] }
 0xa81   : > { %v7497_v27 = vadd.f32 %v11878_v21, %v7461_v1  ;;  %v7275_v5 = vadd.f32 %v7274_v33, %v7161_v14  ;;  %v7397_v20 = vadd.f32 %v11122_v38, %v12691_v26 }
 0xa82   : > { %7208 = vmatmul.f32.gmra.mxu0 %v7076_v19  ;;  %7321 = vmatmul.f32.gmra.mxu1 %v7077_v35 }
 0xa83   : > { %7529 = vst [vmem:[%s11884_s9 + $0x10] sm:$0xff] %v7497_v27  ;;  %v7364_v42 = vadd.f32 %v7275_v5, %v11723_v0 }
 0xa85   : > { %v7428_v24 = vadd.f32 %v7396_v30, %v7364_v42 }
 0xa87   : > { %v7462_v17 = vmul.f32 %v11871_v4, %v7428_v24  ;;  %v6889_v59 = vpop.f32.mrf.mxu2  ;;  %v7002_v55 = vpop.f32.mrf.mxu3 }
 0xa88   : > { %v7078_v52 = vmax.f32 %v6889_v59, 0.0  ;;  %v7079_v22 = vmax.f32 %v7002_v55, 0.0  ;;  %v7164_v7 = vpop.f32.mrf.mxu0  ;;  %v7277_v28 = vpop.f32.mrf.mxu1 }
 0xa89   : > { %v7498_v33 = vadd.f32 %v11878_v21, %v7462_v17  ;;  %v7278_v1 = vadd.f32 %v7277_v28, %v7164_v7  ;;  %v12692_v17 = vld [vmem:[#allocation18_spill] sm:$0xff] }
 0xa8a   : > { %7211 = vmatmul.f32.gmra.mxu0 %v7078_v52  ;;  %7324 = vmatmul.f32.gmra.mxu1 %v7079_v22  ;;  %v7398_v38 = vadd.f32 %v11141_v54, %v12692_v17  ;;  %v12694_v17 = vld [vmem:[#allocation98_spill] sm:$0xff] }
 0xa8b   : > { %7530 = vst [vmem:[%s11884_s9 + $0x18] sm:$0xff] %v7498_v33  ;;  %v7365_v0 = vadd.f32 %v7278_v1, %v11728_v3 }
 0xa8d   : > { %v7429_v32 = vadd.f32 %v7397_v20, %v7365_v0  ;;  %v12693_v0 = vld [vmem:[#allocation97_spill] sm:$0xff] }
 0xa8e   : > { %v7399_v54 = vadd.f32 %v11160_v47, %v12693_v0  ;;  %v7400_v47 = vadd.f32 %v11179_v48, %v12694_v17 }
 0xa8f   : > { %v7463_v19 = vmul.f32 %v11871_v4, %v7429_v32  ;;  %v6892_v35 = vpop.f32.mrf.mxu2  ;;  %v7005_v14 = vpop.f32.mrf.mxu3 }
 0xa90   : > { %v7080_v27 = vmax.f32 %v6892_v35, 0.0  ;;  %v7081_v5 = vmax.f32 %v7005_v14, 0.0  ;;  %v7167_v60 = vpop.f32.mrf.mxu0  ;;  %v7280_v30 = vpop.f32.mrf.mxu1 }
 0xa91   : > { %v7499_v42 = vadd.f32 %v11878_v21, %v7463_v19  ;;  %v7281_v24 = vadd.f32 %v7280_v30, %v7167_v60 }
 0xa92   : > { %7214 = vmatmul.f32.gmra.mxu0 %v7080_v27  ;;  %7327 = vmatmul.f32.gmra.mxu1 %v7081_v5 }
 0xa93   : > { %7531 = vst [vmem:[%s11884_s9 + $0x20] sm:$0xff] %v7499_v42  ;;  %v7366_v3 = vadd.f32 %v7281_v24, %v11733_v39 }
 0xa95   : > { %v7430_v59 = vadd.f32 %v7398_v38, %v7366_v3 }
 0xa97   : > { %v7464_v55 = vmul.f32 %v11871_v4, %v7430_v59  ;;  %v6895_v52 = vpop.f32.mrf.mxu2  ;;  %v7008_v22 = vpop.f32.mrf.mxu3 }
 0xa98   : > { %v7082_v7 = vmax.f32 %v6895_v52, 0.0  ;;  %v7083_v28 = vmax.f32 %v7008_v22, 0.0  ;;  %v7170_v33 = vpop.f32.mrf.mxu0  ;;  %v7283_v1 = vpop.f32.mrf.mxu1 }
 0xa99   : > { %v7500_v26 = vadd.f32 %v11878_v21, %v7464_v55  ;;  %v7284_v20 = vadd.f32 %v7283_v1, %v7170_v33 }
 0xa9a   : > { %7217 = vmatmul.f32.gmra.mxu0 %v7082_v7  ;;  %7330 = vmatmul.f32.gmra.mxu1 %v7083_v28 }
 0xa9b   : > { %7532 = vst [vmem:[%s11884_s9 + $0x28] sm:$0xff] %v7500_v26  ;;  %v7367_v39 = vadd.f32 %v7284_v20, %v11738_v46  ;;  %v12695_v26 = vld [vmem:[#allocation99_spill] sm:$0xff] }
 0xa9c   : > { %v7401_v48 = vadd.f32 %v11198_v62, %v12695_v26 }
 0xa9d   : > { %v7431_v32 = vadd.f32 %v7399_v54, %v7367_v39 }
 0xa9f   : > { %v7465_v19 = vmul.f32 %v11871_v4, %v7431_v32  ;;  %v6898_v35 = vpop.f32.mrf.mxu2  ;;  %v7011_v14 = vpop.f32.mrf.mxu3 }
 0xaa0   : > { %v7084_v27 = vmax.f32 %v6898_v35, 0.0  ;;  %v7085_v5 = vmax.f32 %v7011_v14, 0.0  ;;  %v7173_v60 = vpop.f32.mrf.mxu0  ;;  %v7286_v30 = vpop.f32.mrf.mxu1 }
 0xaa1   : > { %v7501_v42 = vadd.f32 %v11878_v21, %v7465_v19  ;;  %v7287_v24 = vadd.f32 %v7286_v30, %v7173_v60  ;;  %v12696_v60 = vld [vmem:[#allocation100_spill] sm:$0xff] }
 0xaa2   : > { %7220 = vmatmul.f32.gmra.mxu0 %v7084_v27  ;;  %7333 = vmatmul.f32.gmra.mxu1 %v7085_v5  ;;  %v7402_v62 = vadd.f32 %v11217_v43, %v12696_v60 }
 0xaa3   : > { %7533 = vst [vmem:[%s11884_s9 + $0x30] sm:$0xff] %v7501_v42  ;;  %v7368_v46 = vadd.f32 %v7287_v24, %v11743_v49 }
 0xaa5   : > { %v7432_v38 = vadd.f32 %v7400_v47, %v7368_v46 }
 0xaa7   : > { %v7466_v3 = vmul.f32 %v11871_v4, %v7432_v38  ;;  %v6901_v59 = vpop.f32.mrf.mxu2  ;;  %v7014_v55 = vpop.f32.mrf.mxu3 }
 0xaa8   : > { %v7086_v52 = vmax.f32 %v6901_v59, 0.0  ;;  %v7087_v22 = vmax.f32 %v7014_v55, 0.0  ;;  %v7176_v7 = vpop.f32.mrf.mxu0  ;;  %v7289_v28 = vpop.f32.mrf.mxu1 }
 0xaa9   : > { %v7502_v33 = vadd.f32 %v11878_v21, %v7466_v3  ;;  %v7290_v1 = vadd.f32 %v7289_v28, %v7176_v7 }
 0xaaa   : > { %7223 = vmatmul.f32.gmra.mxu0 %v7086_v52  ;;  %7336 = vmatmul.f32.gmra.mxu1 %v7087_v22  ;;  %v12697_v52 = vld [vmem:[#allocation101_spill] sm:$0xff] }
 0xaab   : > { %7534 = vst [vmem:[%s11884_s9 + $0x38] sm:$0xff] %v7502_v33  ;;  %v7369_v49 = vadd.f32 %v7290_v1, %v11748_v63  ;;  %v7403_v43 = vadd.f32 %v11236_v50, %v12697_v52 }
 0xaad   : > { %v7433_v20 = vadd.f32 %v7401_v48, %v7369_v49 }
 0xaaf   : > { %v7467_v0 = vmul.f32 %v11871_v4, %v7433_v20  ;;  %v6904_v54 = vpop.f32.mrf.mxu2  ;;  %v7017_v39 = vpop.f32.mrf.mxu3 }
 0xab0   : > { %v7088_v32 = vmax.f32 %v6904_v54, 0.0  ;;  %v7089_v19 = vmax.f32 %v7017_v39, 0.0  ;;  %v7179_v35 = vpop.f32.mrf.mxu0  ;;  %v7292_v14 = vpop.f32.mrf.mxu1  ;;  %v12698_v54 = vld [vmem:[#allocation102_spill] sm:$0xff] }
 0xab1   : > { %v7503_v27 = vadd.f32 %v11878_v21, %v7467_v0  ;;  %v7293_v5 = vadd.f32 %v7292_v14, %v7179_v35  ;;  %v7404_v50 = vadd.f32 %v11255_v53, %v12698_v54 }
 0xab2   : > { %7226 = vmatmul.f32.gmra.mxu0 %v7088_v32  ;;  %7339 = vmatmul.f32.gmra.mxu1 %v7089_v19 }
 0xab3   : > { %7535 = vst [vmem:[%s11884_s9 + $0x40] sm:$0xff] %v7503_v27  ;;  %v7370_v63 = vadd.f32 %v7293_v5, %v11753_v6 }
 0xab5   : > { %v7434_v30 = vadd.f32 %v7402_v62, %v7370_v63 }
 0xab7   : > { %v7468_v42 = vmul.f32 %v11871_v4, %v7434_v30  ;;  %v6907_v24 = vpop.f32.mrf.mxu2  ;;  %v7020_v17 = vpop.f32.mrf.mxu3  ;;  %v12699_v30 = vld [vmem:[#allocation44_spill] sm:$0xff] }
 0xab8   : > { %v7090_v47 = vmax.f32 %v6907_v24, 0.0  ;;  %v7091_v46 = vmax.f32 %v7020_v17, 0.0  ;;  %v7182_v38 = vpop.f32.mrf.mxu0  ;;  %v7295_v3 = vpop.f32.mrf.mxu1  ;;  %v7405_v53 = vadd.f32 %v11274_v56, %v12699_v30 }
 0xab9   : > { %v7504_v59 = vadd.f32 %v11878_v21, %v7468_v42  ;;  %v7296_v55 = vadd.f32 %v7295_v3, %v7182_v38 }
 0xaba   : > { %7229 = vmatmul.f32.gmra.mxu0 %v7090_v47  ;;  %7342 = vmatmul.f32.gmra.mxu1 %v7091_v46 }
 0xabb   : > { %7536 = vst [vmem:[%s11884_s9 + $0x48] sm:$0xff] %v7504_v59  ;;  %v7371_v6 = vadd.f32 %v7296_v55, %v11758_v12 }
 0xabd   : > { %v7435_v22 = vadd.f32 %v7403_v43, %v7371_v6  ;;  %v12700_v43 = vld [vmem:[#allocation31_spill] sm:$0xff] }
 0xabe   : > { %v7406_v56 = vadd.f32 %v11293_v2, %v12700_v43  ;;  %v7407_v2 = vadd.f32 %v11312_v13, %v11314_v16  ;;  %v12701_v13 = vld [vmem:[#allocation33_spill] sm:$0xff]  ;;  %v12706_v43 = vld [vmem:[#allocation86_spill] sm:$0xff] }
 0xabf   : > { %v7469_v7 = vmul.f32 %v11871_v4, %v7435_v22  ;;  %v6910_v28 = vpop.f32.mrf.mxu2  ;;  %v7023_v33 = vpop.f32.mrf.mxu3  ;;  %v12702_v16 = vld [vmem:[#allocation45_spill] sm:$0xff] }
 0xac0   : > { %v7092_v1 = vmax.f32 %v6910_v28, 0.0  ;;  %v7093_v26 = vmax.f32 %v7023_v33, 0.0  ;;  %v7185_v48 = vpop.f32.mrf.mxu0  ;;  %v7298_v49 = vpop.f32.mrf.mxu1 }
 0xac1   : > { %v7505_v20 = vadd.f32 %v11878_v21, %v7469_v7  ;;  %v7299_v0 = vadd.f32 %v7298_v49, %v7185_v48 }
 0xac2   : > { %7232 = vmatmul.f32.gmra.mxu0 %v7092_v1  ;;  %7345 = vmatmul.f32.gmra.mxu1 %v7093_v26 }
 0xac3   : > { %7537 = vst [vmem:[%s11884_s9 + $0x50] sm:$0xff] %v7505_v20  ;;  %v7372_v12 = vadd.f32 %v7299_v0, %v11763_v10 }
 0xac5   : > { %v7436_v39 = vadd.f32 %v7404_v50, %v7372_v12 }
 0xac7   : > { %v7470_v32 = vmul.f32 %v11871_v4, %v7436_v39  ;;  %v6913_v19 = vpop.f32.mrf.mxu2  ;;  %v7026_v35 = vpop.f32.mrf.mxu3 }
 0xac8   : > { %v7094_v14 = vmax.f32 %v6913_v19, 0.0  ;;  %v7095_v27 = vmax.f32 %v7026_v35, 0.0  ;;  %v7188_v5 = vpop.f32.mrf.mxu0  ;;  %v7301_v60 = vpop.f32.mrf.mxu1 }
 0xac9   : > { %v7506_v62 = vadd.f32 %v11878_v21, %v7470_v32  ;;  %v7302_v63 = vadd.f32 %v7301_v60, %v7188_v5  ;;  %v7408_v5 = vadd.f32 %v12702_v16, %v12701_v13  ;;  %v12711_v16 = vld [vmem:[#allocation39_spill] sm:$0xff] }
 0xaca   : > { %7235 = vmatmul.f32.gmra.mxu0 %v7094_v14  ;;  %7348 = vmatmul.f32.gmra.mxu1 %v7095_v27 }
 0xacb   : > { %7538 = vst [vmem:[%s11884_s9 + $0x58] sm:$0xff] %v7506_v62  ;;  %v7373_v10 = vadd.f32 %v7302_v63, %v11768_v44 }
 0xacd   : > { %v7437_v42 = vadd.f32 %v7405_v53, %v7373_v10 }
 0xacf   : > { %v7471_v24 = vmul.f32 %v11871_v4, %v7437_v42  ;;  %v6916_v17 = vpop.f32.mrf.mxu2  ;;  %v7029_v47 = vpop.f32.mrf.mxu3  ;;  %v12703_v42 = vld [vmem:[#allocation35_spill] sm:$0xff] }
 0xad0   : > { %v7096_v46 = vmax.f32 %v6916_v17, 0.0  ;;  %v7097_v38 = vmax.f32 %v7029_v47, 0.0  ;;  %v7191_v3 = vpop.f32.mrf.mxu0  ;;  %v7304_v59 = vpop.f32.mrf.mxu1 }
 0xad1   : > { %v7507_v55 = vadd.f32 %v11878_v21, %v7471_v24  ;;  %v7305_v52 = vadd.f32 %v7304_v59, %v7191_v3  ;;  %v12704_v24 = vld [vmem:[#allocation46_spill] sm:$0xff] }
 0xad2   : > { %7238 = vmatmul.f32.gmra.mxu0 %v7096_v46  ;;  %7351 = vmatmul.f32.gmra.mxu1 %v7097_v38  ;;  %v7409_v17 = vadd.f32 %v12704_v24, %v12703_v42  ;;  %v12713_v42 = vld [vmem:[#allocation87_spill] sm:$0xff]  ;;  %v12714_v24 = vld [vmem:[#allocation48_spill] sm:$0xff] }
 0xad3   : > { %7539 = vst [vmem:[%s11884_s9 + $0x60] sm:$0xff] %v7507_v55  ;;  %v7374_v44 = vadd.f32 %v7305_v52, %v11773_v51  ;;  %v12705_v52 = vld [vmem:[#allocation24_spill] sm:$0xff] }
 0xad5   : > { %v7438_v6 = vadd.f32 %v7406_v56, %v7374_v44  ;;  %v7410_v56 = vadd.f32 %v12706_v43, %v12705_v52  ;;  %v12716_v52 = vld [vmem:[#allocation34_spill] sm:$0xff] }
 0xad7   : > { %v7472_v22 = vmul.f32 %v11871_v4, %v7438_v6  ;;  %v6919_v7 = vpop.f32.mrf.mxu2  ;;  %v7032_v28 = vpop.f32.mrf.mxu3 }
 0xad8   : > { %v7098_v33 = vmax.f32 %v6919_v7, 0.0  ;;  %v7099_v1 = vmax.f32 %v7032_v28, 0.0  ;;  %v7194_v26 = vpop.f32.mrf.mxu0  ;;  %v7307_v48 = vpop.f32.mrf.mxu1 }
 0xad9   : > { %v7508_v49 = vadd.f32 %v11878_v21, %v7472_v22  ;;  %v7308_v20 = vadd.f32 %v7307_v48, %v7194_v26  ;;  %v12708_v26 = vld [vmem:[#allocation37_spill] sm:$0xff] }
 0xada   : > { %7241 = vmatmul.f32.gmra.mxu0 %v7098_v33  ;;  %7354 = vmatmul.f32.gmra.mxu1 %v7099_v1  ;;  %v12707_v1 = vld [vmem:[#allocation47_spill] sm:$0xff] }
 0xadb   : > { %7540 = vst [vmem:[%s11884_s9 + $0x68] sm:$0xff] %v7508_v49  ;;  %v7375_v51 = vadd.f32 %v7308_v20, %v11778_v15  ;;  %v7411_v48 = vadd.f32 %v12708_v26, %v12707_v1 }
 0xadd   : > { %v7439_v0 = vadd.f32 %v7407_v2, %v7375_v51 }
 0xadf   : > { %v7473_v54 = vmul.f32 %v11871_v4, %v7439_v0  ;;  %v6922_v50 = vpop.f32.mrf.mxu2  ;;  %v7035_v12 = vpop.f32.mrf.mxu3 }
 0xae0   : > { %v7100_v39 = vmax.f32 %v6922_v50, 0.0  ;;  %v7101_v32 = vmax.f32 %v7035_v12, 0.0  ;;  %v7197_v19 = vpop.f32.mrf.mxu0  ;;  %v7310_v35 = vpop.f32.mrf.mxu1  ;;  %v12709_v50 = vld [vmem:[#allocation66_spill] sm:$0xff]  ;;  %v12710_v12 = vld [vmem:[#allocation32_spill] sm:$0xff] }
 0xae1   : > { %v7509_v14 = vadd.f32 %v11878_v21, %v7473_v54  ;;  %v7311_v27 = vadd.f32 %v7310_v35, %v7197_v19 }
 0xae2   : > { %7244 = vmatmul.f32.gmra.mxu0 %v7100_v39  ;;  %7357 = vmatmul.f32.gmra.mxu1 %v7101_v32  ;;  %v7412_v39 = vadd.f32 %v12710_v12, %v12709_v50 }
 0xae3   : > { %7541 = vst [vmem:[%s11884_s9 + $0x70] sm:$0xff] %v7509_v14  ;;  %v7376_v15 = vadd.f32 %v7311_v27, %v11783_v40 }
 0xae5   : > { %v7440_v60 = vadd.f32 %v7408_v5, %v7376_v15  ;;  %v12712_v5 = vld [vmem:[#allocation59_spill] sm:$0xff] }
 0xae6   : > { %v7413_v15 = vadd.f32 %v12712_v5, %v12711_v16 }
 0xae7   : > { %v7474_v62 = vmul.f32 %v11871_v4, %v7440_v60 }
 0xae8   : > { %v7200_v63 = vpop.f32.mrf.mxu0  ;;  %v7313_v30 = vpop.f32.mrf.mxu1 }
 0xae9   : > { %v7510_v53 = vadd.f32 %v11878_v21, %v7474_v62  ;;  %v7314_v10 = vadd.f32 %v7313_v30, %v7200_v63 }
 0xaeb   : > { %7542 = vst [vmem:[%s11884_s9 + $0x78] sm:$0xff] %v7510_v53  ;;  %v7377_v47 = vadd.f32 %v7314_v10, %v11788_v25 }
 0xaed   : > { %v7441_v46 = vadd.f32 %v7409_v17, %v7377_v47  ;;  %v7414_v17 = vadd.f32 %v12714_v24, %v12713_v42 }
 0xaef   : > { %v7475_v38 = vmul.f32 %v11871_v4, %v7441_v46 }
 0xaf0   : > { %v7203_v40 = vpop.f32.mrf.mxu0  ;;  %v7316_v3 = vpop.f32.mrf.mxu1 }
 0xaf1   : > { %v7511_v59 = vadd.f32 %v11878_v21, %v7475_v38  ;;  %v7317_v55 = vadd.f32 %v7316_v3, %v7203_v40 }
 0xaf3   : > { %7543 = vst [vmem:[%s11884_s9 + $0x80] sm:$0xff] %v7511_v59  ;;  %v7378_v44 = vadd.f32 %v7317_v55, %v11793_v34  ;;  %v12715_v55 = vld [vmem:[#allocation80_spill] sm:$0xff] }
 0xaf4   : > { %v7415_v43 = vadd.f32 %v12716_v52, %v12715_v55 }
 0xaf5   : > { %v7442_v6 = vadd.f32 %v7410_v56, %v7378_v44 }
 0xaf7   : > { %v7476_v22 = vmul.f32 %v11871_v4, %v7442_v6 }
 0xaf8   : > { %v7206_v25 = vpop.f32.mrf.mxu0  ;;  %v7319_v7 = vpop.f32.mrf.mxu1 }
 0xaf9   : > { %v7512_v28 = vadd.f32 %v11878_v21, %v7476_v22  ;;  %v7320_v33 = vadd.f32 %v7319_v7, %v7206_v25 }
 0xafb   : > { %7544 = vst [vmem:[%s11884_s9 + $0x88] sm:$0xff] %v7512_v28  ;;  %v7379_v49 = vadd.f32 %v7320_v33, %v11798_v58  ;;  %v12717_v28 = vld [vmem:[#allocation49_spill] sm:$0xff]  ;;  %v12718_v33 = vld [vmem:[#allocation90_spill] sm:$0xff] }
 0xafc   : > { %v7416_v1 = vadd.f32 %v12718_v33, %v12717_v28 }
 0xafd   : > { %v7443_v20 = vadd.f32 %v7411_v48, %v7379_v49 }
 0xaff   : > { %v7477_v2 = vmul.f32 %v11871_v4, %v7443_v20 }
 0xb00   : > { %v7209_v34 = vpop.f32.mrf.mxu0  ;;  %v7322_v51 = vpop.f32.mrf.mxu1 }
 0xb01   : > { %v7513_v0 = vadd.f32 %v11878_v21, %v7477_v2  ;;  %v7323_v54 = vadd.f32 %v7322_v51, %v7209_v34  ;;  %v12719_v51 = vld [vmem:[#allocation88_spill] sm:$0xff] }
 0xb03   : > { %7545 = vst [vmem:[%s11884_s9 + $0x90] sm:$0xff] %v7513_v0  ;;  %v7380_v32 = vadd.f32 %v7323_v54, %v11803_v8  ;;  %v12720_v0 = vld [vmem:[#allocation67_spill] sm:$0xff] }
 0xb04   : > { %v7417_v54 = vadd.f32 %v12720_v0, %v12719_v51  ;;  %v12730_v51 = vld [vmem:[#allocation41_spill] sm:$0xff]  ;;  %v12731_v0 = vld [vmem:[#allocation26_spill] sm:$0xff] }
 0xb05   : > { %v7444_v19 = vadd.f32 %v7412_v39, %v7380_v32 }
 0xb07   : > { %v7478_v35 = vmul.f32 %v11871_v4, %v7444_v19 }
 0xb08   : > { %v7212_v58 = vpop.f32.mrf.mxu0  ;;  %v7325_v14 = vpop.f32.mrf.mxu1 }
 0xb09   : > { %v7514_v27 = vadd.f32 %v11878_v21, %v7478_v35  ;;  %v7326_v13 = vadd.f32 %v7325_v14, %v7212_v58  ;;  %v12721_v58 = vld [vmem:[#allocation70_spill] sm:$0xff]  ;;  %v12722_v14 = vld [vmem:[#allocation25_spill] sm:$0xff] }
 0xb0b   : > { %7546 = vst [vmem:[%s11884_s9 + $0x98] sm:$0xff] %v7514_v27  ;;  %v7381_v60 = vadd.f32 %v7326_v13, %v11808_v18  ;;  %v7418_v27 = vadd.f32 %v12722_v14, %v12721_v58 }
 0xb0d   : > { %v7445_v62 = vadd.f32 %v7413_v15, %v7381_v60 }
 0xb0f   : > { %v7479_v63 = vmul.f32 %v11871_v4, %v7445_v62 }
 0xb10   : > { %v7215_v8 = vpop.f32.mrf.mxu0  ;;  %v7328_v30 = vpop.f32.mrf.mxu1 }
 0xb11   : > { %v7515_v53 = vadd.f32 %v11878_v21, %v7479_v63  ;;  %v7329_v10 = vadd.f32 %v7328_v30, %v7215_v8  ;;  %v12723_v63 = vld [vmem:[#allocation60_spill] sm:$0xff]  ;;  %v12724_v8 = vld [vmem:[#allocation91_spill] sm:$0xff] }
 0xb12   : > { %v7419_v30 = vadd.f32 %v12724_v8, %v12723_v63 }
 0xb13   : > { %7547 = vst [vmem:[%s11884_s9 + $0xa0] sm:$0xff] %v7515_v53  ;;  %v7382_v47 = vadd.f32 %v7329_v10, %v11813_v31 }
 0xb15   : > { %v7446_v46 = vadd.f32 %v7414_v17, %v7382_v47 }
 0xb17   : > { %v7480_v38 = vmul.f32 %v11871_v4, %v7446_v46  ;;  %v12725_v46 = vld [vmem:[#allocation40_spill] sm:$0xff] }
 0xb18   : > { %v7218_v18 = vpop.f32.mrf.mxu0  ;;  %v7331_v40 = vpop.f32.mrf.mxu1 }
 0xb19   : > { %v7516_v3 = vadd.f32 %v11878_v21, %v7480_v38  ;;  %v7332_v59 = vadd.f32 %v7331_v40, %v7218_v18  ;;  %v12726_v38 = vld [vmem:[#allocation50_spill] sm:$0xff] }
 0xb1a   : > { %v7420_v18 = vadd.f32 %v12726_v38, %v12725_v46 }
 0xb1b   : > { %7548 = vst [vmem:[%s11884_s9 + $0xa8] sm:$0xff] %v7516_v3  ;;  %v7383_v56 = vadd.f32 %v7332_v59, %v11818_v37 }
 0xb1d   : > { %v7447_v44 = vadd.f32 %v7415_v43, %v7383_v56  ;;  %v12727_v56 = vld [vmem:[#allocation93_spill] sm:$0xff] }
 0xb1f   : > { %v7481_v6 = vmul.f32 %v11871_v4, %v7447_v44  ;;  %v12728_v44 = vld [vmem:[#allocation81_spill] sm:$0xff] }
 0xb20   : > { %v7221_v31 = vpop.f32.mrf.mxu0  ;;  %v7334_v22 = vpop.f32.mrf.mxu1 }
 0xb21   : > { %v7517_v25 = vadd.f32 %v11878_v21, %v7481_v6  ;;  %v7335_v7 = vadd.f32 %v7334_v22, %v7221_v31  ;;  %v7421_v6 = vadd.f32 %v12728_v44, %v12727_v56 }
 0xb23   : > { %7549 = vst [vmem:[%s11884_s9 + $0xb0] sm:$0xff] %v7517_v25  ;;  %v7384_v26 = vadd.f32 %v7335_v7, %v11823_v61 }
 0xb25   : > { %v7448_v48 = vadd.f32 %v7416_v1, %v7384_v26  ;;  %v12729_v1 = vld [vmem:[#allocation92_spill] sm:$0xff] }
 0xb26   : > { %v7422_v26 = vadd.f32 %v11568_v41, %v12729_v1 }
 0xb27   : > { %v7482_v49 = vmul.f32 %v11871_v4, %v7448_v48 }
 0xb28   : > { %v7224_v37 = vpop.f32.mrf.mxu0  ;;  %v7337_v20 = vpop.f32.mrf.mxu1 }
 0xb29   : > { %v7518_v2 = vadd.f32 %v11878_v21, %v7482_v49  ;;  %v7338_v34 = vadd.f32 %v7337_v20, %v7224_v37 }
 0xb2b   : > { %7550 = vst [vmem:[%s11884_s9 + $0xb8] sm:$0xff] %v7518_v2  ;;  %v7385_v50 = vadd.f32 %v7338_v34, %v11828_v23 }
 0xb2d   : > { %v7449_v12 = vadd.f32 %v7417_v54, %v7385_v50  ;;  %v7423_v54 = vadd.f32 %v12731_v0, %v12730_v51 }
 0xb2f   : > { %v7483_v39 = vmul.f32 %v11871_v4, %v7449_v12 }
 0xb30   : > { %v7227_v61 = vpop.f32.mrf.mxu0  ;;  %v7340_v32 = vpop.f32.mrf.mxu1 }
 0xb31   : > { %v7519_v19 = vadd.f32 %v11878_v21, %v7483_v39  ;;  %v7341_v35 = vadd.f32 %v7340_v32, %v7227_v61 }
 0xb33   : > { %7551 = vst [vmem:[%s11884_s9 + $0xc0] sm:$0xff] %v7519_v19  ;;  %v7386_v13 = vadd.f32 %v7341_v35, %v11833_v9  ;;  %v12732_v19 = vld [vmem:[#allocation61_spill] sm:$0xff]  ;;  %v12733_v35 = vld [vmem:[#allocation71_spill] sm:$0xff] }
 0xb34   : > { %v7424_v58 = vadd.f32 %v12733_v35, %v12732_v19 }
 0xb35   : > { %v7450_v16 = vadd.f32 %v7418_v27, %v7386_v13 }
 0xb37   : > { %v7484_v5 = vmul.f32 %v11871_v4, %v7450_v16 }
 0xb38   : > { %v7230_v23 = vpop.f32.mrf.mxu0  ;;  %v7343_v15 = vpop.f32.mrf.mxu1 }
 0xb39   : > { %v7520_v60 = vadd.f32 %v11878_v21, %v7484_v5  ;;  %v7344_v62 = vadd.f32 %v7343_v15, %v7230_v23 }
 0xb3b   : > { %7552 = vst [vmem:[%s11884_s9 + $0xc8] sm:$0xff] %v7520_v60  ;;  %v7387_v53 = vadd.f32 %v7344_v62, %v11838_v45 }
 0xb3d   : > { %v7451_v10 = vadd.f32 %v7419_v30, %v7387_v53 }
 0xb3f   : > { %v7485_v42 = vmul.f32 %v11871_v4, %v7451_v10 }
 0xb40   : > { %v7233_v9 = vpop.f32.mrf.mxu0  ;;  %v7346_v24 = vpop.f32.mrf.mxu1 }
 0xb41   : > { %v7521_v17 = vadd.f32 %v11878_v21, %v7485_v42  ;;  %v7347_v47 = vadd.f32 %v7346_v24, %v7233_v9 }
 0xb43   : > { %7553 = vst [vmem:[%s11884_s9 + $0xd0] sm:$0xff] %v7521_v17  ;;  %v7388_v40 = vadd.f32 %v7347_v47, %v11843_v29 }
 0xb45   : > { %v7452_v3 = vadd.f32 %v7420_v18, %v7388_v40 }
 0xb47   : > { %v7486_v59 = vmul.f32 %v11871_v4, %v7452_v3 }
 0xb48   : > { %v7236_v45 = vpop.f32.mrf.mxu0  ;;  %v7349_v55 = vpop.f32.mrf.mxu1 }
 0xb49   : > { %v7522_v52 = vadd.f32 %v11878_v21, %v7486_v59  ;;  %v7350_v43 = vadd.f32 %v7349_v55, %v7236_v45 }
 0xb4b   : > { %7554 = vst [vmem:[%s11884_s9 + $0xd8] sm:$0xff] %v7522_v52  ;;  %v7389_v31 = vadd.f32 %v7350_v43, %v11848_v11 }
 0xb4d   : > { %v7453_v22 = vadd.f32 %v7421_v6, %v7389_v31 }
 0xb4f   : > { %v7487_v25 = vmul.f32 %v11871_v4, %v7453_v22 }
 0xb50   : > { %v7239_v29 = vpop.f32.mrf.mxu0  ;;  %v7352_v7 = vpop.f32.mrf.mxu1 }
 0xb51   : > { %v7523_v28 = vadd.f32 %v11878_v21, %v7487_v25  ;;  %v7353_v33 = vadd.f32 %v7352_v7, %v7239_v29 }
 0xb53   : > { %7555 = vst [vmem:[%s11884_s9 + $0xe0] sm:$0xff] %v7523_v28  ;;  %v7390_v48 = vadd.f32 %v7353_v33, %v11853_v57 }
 0xb55   : > { %v7454_v49 = vadd.f32 %v7422_v26, %v7390_v48 }
 0xb57   : > { %v7488_v37 = vmul.f32 %v11871_v4, %v7454_v49 }
 0xb58   : > { %v7242_v11 = vpop.f32.mrf.mxu0  ;;  %v7355_v20 = vpop.f32.mrf.mxu1 }
 0xb59   : > { %v7524_v2 = vadd.f32 %v11878_v21, %v7488_v37  ;;  %v7356_v34 = vadd.f32 %v7355_v20, %v7242_v11 }
 0xb5b   : > { %7556 = vst [vmem:[%s11884_s9 + $0xe8] sm:$0xff] %v7524_v2  ;;  %v7391_v50 = vadd.f32 %v7356_v34, %v11858_v36  ;;  %v12734_v36 = vld [vmem:[#allocation94_spill] sm:$0xff] }
 0xb5d   : > { %v7455_v41 = vadd.f32 %v7423_v54, %v7391_v50 }
 0xb5f   : > { %v7489_v12 = vmul.f32 %v11871_v4, %v7455_v41 }
 0xb60   : > { %v7245_v57 = vpop.f32.mrf.mxu0  ;;  %v7358_v39 = vpop.f32.mrf.mxu1 }
 0xb61   : > { %v7525_v61 = vadd.f32 %v11878_v21, %v7489_v12  ;;  %v7359_v32 = vadd.f32 %v7358_v39, %v7245_v57 }
 0xb63   : > { %7557 = vst [vmem:[%s11884_s9 + $0xf0] sm:$0xff] %v7525_v61  ;;  %v7392_v14 = vadd.f32 %v7359_v32, %v12734_v36 }
 0xb65   : > { %v7456_v27 = vadd.f32 %v7424_v58, %v7392_v14 }
 0xb67   : > { %v7490_v13 = vmul.f32 %v11871_v4, %v7456_v27 }
 0xb69   : > { %v7526_v16 = vadd.f32 %v11878_v21, %v7490_v13 }
 0xb6b   : > { %7558 = vst [vmem:[%s11884_s9 + $0xf8] sm:$0xff] %v7526_v16 }
 0xb6c   : > { %8584 = shalt.err (!%p8581_p8)
}
 0xb6d   : > { %s8646_s27 = smov 128   ;;  %s8647_s13 = smov 8  }
 0xb6e   : > { %8262 = dma.vmem_to_hbm [thread:$0]  (%p8734_p5), %s7573_s7, 4096, %s7575_s28, %s7560_s11, %s8646_s27, %s8646_s27, %s8647_s13  }
 0xb6f PF: > { %p8289_p9 = scmp.ge.s32.totalorder %s8631_s10, 2  ;;  %s7589_s1 = sand.u32 1, %s8619_s29  }
 0xb70   : > { %s7590_s2 = scalar_lea.sflag [#allocation5], %s7589_s1 }
 0xb71   : > { %p8278_p10 = pnand %p8289_p9, %p8738_p6 }
 0xb73   : > { %p8279_p11 = pneg %p8278_p10 }
 0xb75   : > { %8614 = dma.done.wait (%p8279_p11), %s7590_s2, 4096  }
 0xb76   : > { %8616 = vsyncadd (%p8279_p11), %s7590_s2, 4294963200  ;;  %s12735_s9 = sld [smem:[#allocation16_spill]]  ;;  %p22_p12 = scmp.ge.s32.totalorder %s8721_s12, 4  }
 0xb77   : > { %s12736_s15 = sld [smem:[#allocation17_spill]]  ;;  %s12737_s29 = smov %s8623_s30 }
 0xb78   : > { %s12740_s10 = smov %s8721_s12 }
 0xb79   :  { %24 = sbr.rel (!%p22_p12) target bundleno = 10 (0xa), region = 125 }
 0xb7c   : > { %s12738_s30 = smov %s12735_s9 }
 0xb7d   : > { %s12739_s9 = smov %s12736_s15 }
 0xb7e   :  { %7596 = vsyncpa [#allocation4], 1 }
 0xb7f   :  { %7598 = vsyncpa [#allocation4 + $0x1], 1 }
 0xb80   :  { %7599 = vsyncpa [#allocation7], 1 }
 0xb81   :  { %7600 = vsyncpa [#allocation10], 1 }
 0xb82   :  { %7601 = vsyncpa [#allocation5], 1 }
 0xb83   :  { %7603 = vsyncpa [#allocation5 + $0x1], 1 }

</bundles_post_ra>
